<compile_context>
chip_gen: v5e
topology: v5e:2x2
jax: 0.10.0
libtpu: 0.0.40
codegen_flags: <defaults>
</compile_context>

<pallas_src>
import math

import numpy as np
import jax
import jax.numpy as jnp
from jax.experimental import pallas as pl
from jax.experimental.pallas import tpu as pltpu

# ----------------- small Pixtral-style config -----------------
NUM_CHANNELS = 3
PATCH = 4
IMAGE_SIZE = 32                        # -> max_patches_per_side = 8
HIDDEN = 128                           # keeps every projection group 128-lane aligned
NUM_HEADS = 4
HEAD_DIM = HIDDEN // NUM_HEADS         # 32
INTER = 512                            # 4x hidden (Pixtral-style ratio)
NUM_LAYERS = 4
ROPE_THETA = 10000.0
MAX_SIDE = IMAGE_SIZE // PATCH         # 8
EPS = 1e-5
NEG_INF = -1e30
PATCH_DIM = NUM_CHANNELS * PATCH * PATCH   # 48


def _round_up(n, m):
    return (n + m - 1) // m * m


def _rmsnorm(x, w):
    var = jnp.mean(x * x, axis=-1, keepdims=True)
    return x * jax.lax.rsqrt(var + EPS) * w


def _split_heads(x):
    """[N, H*hd] -> [H, N, hd] head-batched slabs for batched MXU einsums."""
    # TODO(synk): at real sizes replace the static slices with a single relayout
    # (pltpu.einshape("nhd->hnd", ...)); slices kept here for lowering robustness.
    return jnp.stack(
        [x[:, h * HEAD_DIM:(h + 1) * HEAD_DIM] for h in range(NUM_HEADS)], axis=0)


# ----------------- fused encoder kernel -----------------
def _encoder_kernel(patch_ref, wconv_ref, lnpre_ref, cos_ref, sin_ref,
                    segr_ref, segc_ref,
                    anw_ref, wbig_ref, wo3_ref, fnw_ref, wgu_ref, wd_ref,
                    o_ref,
                    mask_ref, cosf_ref, sinf_ref):
    l = pl.program_id(0)

    # ---- layer-0 prologue: patch conv + ln_pre, plus layer-invariant tables ----
    @pl.when(l == 0)
    def _():
        x0 = jnp.dot(patch_ref[...], wconv_ref[...],
                     preferred_element_type=jnp.float32)
        o_ref[...] = _rmsnorm(x0, lnpre_ref[...])
        # block-diagonal (per-image) additive mask, built once (hoisted)
        mask_ref[...] = jnp.where(segr_ref[...] == segc_ref[...], 0.0, NEG_INF)
        # cos/sin expanded from [N, head_dim] to [N, hidden] once (hoisted)
        cosf_ref[...] = jnp.concatenate([cos_ref[...]] * NUM_HEADS, axis=1)
        sinf_ref[...] = jnp.concatenate([sin_ref[...]] * NUM_HEADS, axis=1)

    x = o_ref[...]                                       # [N, D] f32 residual

    # ---- attention ----
    h = _rmsnorm(x, anw_ref[...]).astype(jnp.bfloat16)
    # fused projection columns: [ q/sqrt(d) | k | v | (q@R)/sqrt(d) | k@R ]
    # each group is HIDDEN(=128) wide -> all slices below are 128-lane aligned.
    proj = jnp.dot(h, wbig_ref[...], preferred_element_type=jnp.float32)   # [N,5D]

    cos = cosf_ref[...]
    sin = sinf_ref[...]
    # RoPE: rotate_half already folded into the weights -> pure elementwise FMAs.
    q = proj[:, 0 * HIDDEN:1 * HIDDEN] * cos + proj[:, 3 * HIDDEN:4 * HIDDEN] * sin
    k = proj[:, 1 * HIDDEN:2 * HIDDEN] * cos + proj[:, 4 * HIDDEN:5 * HIDDEN] * sin
    v = proj[:, 2 * HIDDEN:3 * HIDDEN]

    q3 = _split_heads(q.astype(jnp.bfloat16))            # [H, N, hd]
    k3 = _split_heads(k.astype(jnp.bfloat16))
    v3 = _split_heads(v.astype(jnp.bfloat16))

    # TODO(synk): at real Pixtral N this dense [H,N,N] block must become a
    # flash-style online-softmax over KV tiles with a parallel token-tile axis.
    s = jnp.einsum('hnd,hmd->hnm', q3, k3,
                   preferred_element_type=jnp.float32)    # [H, N, N]
    s = s + mask_ref[...][None, :, :]

    s = s - jnp.max(s, axis=-1, keepdims=True)
    p = jnp.exp(s)
    denom = jnp.sum(p, axis=-1, keepdims=True)
    p = (p * pl.reciprocal(denom, approx=True)).astype(jnp.bfloat16)

    o3 = jnp.einsum('hnm,hmd->hnd', p, v3,
                    preferred_element_type=jnp.float32)   # [H, N, hd]

    # o-projection with the head concat folded in: wo is stored per-head as
    # [H, hd, D]; batched matmul + leading-axis reduce == concat(heads) @ wo.
    attn = jnp.einsum('hnd,hdo->hno', o3.astype(jnp.bfloat16), wo3_ref[...],
                      preferred_element_type=jnp.float32)
    attn = jnp.sum(attn, axis=0)                          # [N, D]
    h1 = x + attn

    # ---- MLP: gate/up -> silu(gate)*up -> down ----
    # hidden_act: silu (swap jax.nn.silu for jax.nn.gelu to match a "gelu" config)
    h2 = _rmsnorm(h1, fnw_ref[...]).astype(jnp.bfloat16)
    gu = jnp.dot(h2, wgu_ref[...], preferred_element_type=jnp.float32)    # [N, 2I]
    gate = gu[:, :INTER]
    up = gu[:, INTER:]
    act = (gate * jax.nn.sigmoid(gate) * up).astype(jnp.bfloat16)
    down = jnp.dot(act, wd_ref[...], preferred_element_type=jnp.float32)

    o_ref[...] = h1 + down


# ----------------- parameter setup / preprocessing -----------------
def init_params(key):
    std = 0.02
    ks = jax.random.split(key, 1 + 4 * NUM_LAYERS)
    params = {
        'patch_conv': jax.random.normal(
            ks[0], (HIDDEN, NUM_CHANNELS, PATCH, PATCH), jnp.float32) * std,
        'ln_pre': jnp.ones((1, HIDDEN), jnp.float32),
        'layers': [],
    }
    idx = 1
    for _ in range(NUM_LAYERS):
        params['layers'].append({
            'attn_norm': jnp.ones((1, HIDDEN), jnp.float32),
            'wqkv': jax.random.normal(ks[idx + 0], (HIDDEN, 3 * HIDDEN),
                                      jnp.float32) * std,
            'wo': jax.random.normal(ks[idx + 1], (HIDDEN, HIDDEN),
                                    jnp.float32) * std,
            'ffn_norm': jnp.ones((1, HIDDEN), jnp.float32),
            'wgu': jax.random.normal(ks[idx + 2], (HIDDEN, 2 * INTER),
                                     jnp.float32) * std,
            'wd': jax.random.normal(ks[idx + 3], (INTER, HIDDEN),
                                    jnp.float32) * std,
        })
        idx += 4
    return params


def _rotate_half_matrix():
    """R such that q @ R == rotate_half(q), applied per head (block-diagonal)."""
    h = HEAD_DIM // 2
    r = np.zeros((HEAD_DIM, HEAD_DIM), np.float32)
    r[np.arange(h) + h, np.arange(h)] = -1.0     # col j < h  gets -q[:, j+h]
    r[np.arange(h), np.arange(h) + h] = 1.0      # col j >= h gets  q[:, j-h]
    r_full = np.kron(np.eye(NUM_HEADS, dtype=np.float32), r)
    return jnp.asarray(r_full)                   # [HIDDEN, HIDDEN]


def prepare_kernel_params(params):
    """Stack per-layer weights to [L, ...], fold RoPE rotation + 1/sqrt(d) scale
    into the projection weights, reshape wo per-head, cast matmul weights bf16."""
    R = _rotate_half_matrix()
    scale = 1.0 / math.sqrt(HEAD_DIM)
    anw, wbig, wo3, fnw, wgu, wd = [], [], [], [], [], []
    for ly in params['layers']:
        wq = ly['wqkv'][:, :HIDDEN]
        wk = ly['wqkv'][:, HIDDEN:2 * HIDDEN]
        wv = ly['wqkv'][:, 2 * HIDDEN:]
        big = jnp.concatenate(
            [wq * scale, wk, wv, (wq @ R) * scale, wk @ R], axis=1)   # [D, 5D]
        anw.append(ly['attn_norm'])
        wbig.append(big.astype(jnp.bfloat16))
        wo3.append(ly['wo'].reshape(NUM_HEADS, HEAD_DIM, HIDDEN)
                            .astype(jnp.bfloat16))
        fnw.append(ly['ffn_norm'])
        wgu.append(ly['wgu'].astype(jnp.bfloat16))
        wd.append(ly['wd'].astype(jnp.bfloat16))
    return {
        'wconv': params['patch_conv'].reshape(HIDDEN, PATCH_DIM).T
                                      .astype(jnp.bfloat16),           # [48, D]
        'ln_pre': params['ln_pre'],
        'anw': jnp.stack(anw),        # [L, 1, D]      f32
        'wbig': jnp.stack(wbig),      # [L, D, 5D]     bf16
        'wo3': jnp.stack(wo3),        # [L, H, hd, D]  bf16
        'fnw': jnp.stack(fnw),        # [L, 1, D]      f32
        'wgu': jnp.stack(wgu),        # [L, D, 2I]     bf16
        'wd': jnp.stack(wd),          # [L, I, D]      bf16
    }


def pixtral_rope(position_ids):
    """2D rotary embedding exactly as PixtralRotaryEmbedding."""
    freqs = 1.0 / (ROPE_THETA ** (jnp.arange(0, HEAD_DIM, 2, dtype=jnp.float32)
                                  / HEAD_DIM))
    h = jnp.arange(MAX_SIDE, dtype=jnp.float32)
    w = jnp.arange(MAX_SIDE, dtype=jnp.float32)
    freqs_h = jnp.outer(h, freqs[::2])
    freqs_w = jnp.outer(w, freqs[1::2])
    inv_freq = jnp.concatenate(
        [jnp.repeat(freqs_h[:, None, :], MAX_SIDE, axis=1),
         jnp.repeat(freqs_w[None, :, :], MAX_SIDE, axis=0)],
        axis=-1).reshape(-1, HEAD_DIM // 2)
    f = inv_freq[position_ids]
    emb = jnp.concatenate([f, f], axis=-1)        # [N, HEAD_DIM]
    return jnp.cos(emb), jnp.sin(emb)


def _im2col(pixel_values):
    patches_list, pos_ids, seg_ids = [], [], []
    for i, img in enumerate(pixel_values):
        c, ih, iw = img.shape
        gh, gw = ih // PATCH, iw // PATCH
        p = img.reshape(c, gh, PATCH, gw, PATCH).transpose(1, 3, 0, 2, 4)
        patches_list.append(p.reshape(gh * gw, PATCH_DIM))
        ids = (jnp.arange(gh)[:, None] * MAX_SIDE
               + jnp.arange(gw)[None, :]).reshape(-1)
        pos_ids.append(ids)
        seg_ids.append(jnp.full((gh * gw,), i, jnp.int32))
    return (jnp.concatenate(patches_list, axis=0),
            jnp.concatenate(pos_ids),
            jnp.concatenate(seg_ids))


# ----------------- forward -----------------
def pixtral_vision_forward(kparams, pixel_values):
    patches, position_ids, segs = _im2col(pixel_values)
    n_tok = patches.shape[0]
    n_pad = _round_up(n_tok, 16)                  # bf16 packs 16 rows per sublane grp
    pad = n_pad - n_tok

    patches = jnp.pad(patches, ((0, pad), (0, 0))).astype(jnp.bfloat16)
    position_ids = jnp.pad(position_ids, (0, pad))
    # padded rows carry segment id -1: they attend only among themselves; their
    # inputs are zero and their outputs are dropped below.
    segs = jnp.pad(segs, (0, pad), constant_values=-1)

    cos, sin = pixtral_rope(position_ids)          # [n_pad, HEAD_DIM] f32
    seg_row = segs[:, None]                        # [n_pad, 1] int32
    seg_col = segs[None, :]                        # [1, n_pad] int32

    def fixed_spec(shape):                         # layer-invariant, VMEM-resident
        return pl.BlockSpec(shape, lambda l, _nd=len(shape): (0,) * _nd)

    def layer_spec(shape):                         # per-layer weight streaming
        return pl.BlockSpec((None,) + shape,
                            lambda l, _nd=len(shape): (l,) + (0,) * _nd)

    out = pl.pallas_call(
        _encoder_kernel,
        out_shape=jax.ShapeDtypeStruct((n_pad, HIDDEN), jnp.float32),
        grid_spec=pltpu.PrefetchScalarGridSpec(
            num_scalar_prefetch=0,
            grid=(NUM_LAYERS,),
            in_specs=[
                fixed_spec((n_pad, PATCH_DIM)),          # patches (im2col)
                fixed_spec((PATCH_DIM, HIDDEN)),         # patch-conv weight
                fixed_spec((1, HIDDEN)),                 # ln_pre
                fixed_spec((n_pad, HEAD_DIM)),           # cos (per-head, small)
                fixed_spec((n_pad, HEAD_DIM)),           # sin (per-head, small)
                fixed_spec((n_pad, 1)),                  # segment ids (rows)
                fixed_spec((1, n_pad)),                  # segment ids (cols)
                layer_spec((1, HIDDEN)),                 # attention_norm
                layer_spec((HIDDEN, 5 * HIDDEN)),        # fused qkv(+rot) proj
                layer_spec((NUM_HEADS, HEAD_DIM, HIDDEN)),  # o_proj per-head
                layer_spec((1, HIDDEN)),                 # ffn_norm
                layer_spec((HIDDEN, 2 * INTER)),         # gate_up_proj
                layer_spec((INTER, HIDDEN)),             # down_proj
            ],
            out_specs=pl.BlockSpec((n_pad, HIDDEN), lambda l: (0, 0)),
            scratch_shapes=[
                pltpu.VMEM((n_pad, n_pad), jnp.float32),   # block-diag mask
                pltpu.VMEM((n_pad, HIDDEN), jnp.float32),  # cos expanded to D
                pltpu.VMEM((n_pad, HIDDEN), jnp.float32),  # sin expanded to D
            ],
        ),
        # TODO(synk): at real sizes add a parallel token-tile axis
        # (("parallel", "arbitrary")) and set vmem_limit_bytes explicitly.
        compiler_params=pltpu.CompilerParams(
            dimension_semantics=("arbitrary",)),
    )(patches, kparams['wconv'], kparams['ln_pre'], cos, sin,
      seg_row, seg_col,
      kparams['anw'], kparams['wbig'], kparams['wo3'],
      kparams['fnw'], kparams['wgu'], kparams['wd'])

    # feature_sample_layers=None -> last hidden state only; drop padded rows
    return out[:n_tok]


# ----------------- pure-JAX reference (torch-module semantics) -----------------
def _rotate_half(x):
    x1, x2 = jnp.split(x, 2, axis=-1)
    return jnp.concatenate([-x2, x1], axis=-1)


def reference_forward(params, pixel_values):
    patches, position_ids, segs = _im2col(pixel_values)
    n = patches.shape[0]
    wconv = params['patch_conv'].reshape(HIDDEN, PATCH_DIM).T.astype(jnp.bfloat16)
    x = jnp.dot(patches.astype(jnp.bfloat16), wconv,
                preferred_element_type=jnp.float32)
    x = _rmsnorm(x, params['ln_pre'])
    cos, sin = pixtral_rope(position_ids)
    mask = jnp.where(segs[:, None] == segs[None, :], 0.0, NEG_INF)
    scale = 1.0 / math.sqrt(HEAD_DIM)
    for ly in params['layers']:
        h = _rmsnorm(x, ly['attn_norm']).astype(jnp.bfloat16)
        qkv = jnp.dot(h, ly['wqkv'].astype(jnp.bfloat16),
                      preferred_element_type=jnp.float32)
        q, k, v = jnp.split(qkv, 3, axis=-1)
        q = q.reshape(n, NUM_HEADS, HEAD_DIM)
        k = k.reshape(n, NUM_HEADS, HEAD_DIM)
        v = v.reshape(n, NUM_HEADS, HEAD_DIM)
        q = q * cos[:, None, :] + _rotate_half(q) * sin[:, None, :]
        k = k * cos[:, None, :] + _rotate_half(k) * sin[:, None, :]
        qh = jnp.transpose(q, (1, 0, 2)).astype(jnp.bfloat16)
        kh = jnp.transpose(k, (1, 0, 2)).astype(jnp.bfloat16)
        vh = jnp.transpose(v, (1, 0, 2)).astype(jnp.bfloat16)
        s = jnp.einsum('hnd,hmd->hnm', qh, kh,
                       preferred_element_type=jnp.float32) * scale
        s = s + mask[None]
        p = jax.nn.softmax(s, axis=-1).astype(jnp.bfloat16)
        o = jnp.einsum('hnm,hmd->hnd', p, vh, preferred_element_type=jnp.float32)
        o = jnp.transpose(o, (1, 0, 2)).reshape(n, HIDDEN)
        attn = jnp.dot(o.astype(jnp.bfloat16), ly['wo'].astype(jnp.bfloat16),
                       preferred_element_type=jnp.float32)
        h1 = x + attn
        h2 = _rmsnorm(h1, ly['ffn_norm']).astype(jnp.bfloat16)
        gu = jnp.dot(h2, ly['wgu'].astype(jnp.bfloat16),
                     preferred_element_type=jnp.float32)
        gate, up = gu[:, :INTER], gu[:, INTER:]
        act = (gate * jax.nn.sigmoid(gate) * up).astype(jnp.bfloat16)
        down = jnp.dot(act, ly['wd'].astype(jnp.bfloat16),
                       preferred_element_type=jnp.float32)
        x = h1 + down
    return x


if __name__ == "__main__":
    key = jax.random.PRNGKey(0)
    pkey, k1, k2 = jax.random.split(key, 3)
    params = init_params(pkey)
    kparams = prepare_kernel_params(params)

    # two images with different spatial sizes (exercises block-diagonal mask,
    # 2D RoPE position ids and the token-padding path): 64 + 56 = 120 tokens
    img1 = jax.random.normal(k1, (NUM_CHANNELS, 32, 32), jnp.float32)
    img2 = jax.random.normal(k2, (NUM_CHANNELS, 28, 32), jnp.float32)

    out = pixtral_vision_forward(kparams, [img1, img2])
    out = jax.block_until_ready(out)

    ref = reference_forward(params, [img1, img2])
    ref = jax.block_until_ready(ref)

    assert out.shape == (120, HIDDEN), out.shape
    assert bool(jnp.all(jnp.isfinite(out)))
    # tolerance-based check vs the pure-JAX reference (bf16 weights + approx
    # reciprocal mean the kernel is not bit-exact with an f32 reference)
    assert bool(jnp.allclose(out, ref, atol=2e-2, rtol=2e-2)), \
        float(jnp.max(jnp.abs(out - ref)))
    print("KERNEL_OK")
</pallas_src>

<mosaic_0001>
module attributes {stable_mosaic.version = 11 : i64} {
  func.func @_encoder_kernel(%arg0: i32, %arg1: memref<128x48xbf16, #tpu.memory_space<vmem>>, %arg2: memref<48x128xbf16, #tpu.memory_space<vmem>>, %arg3: memref<1x128xf32, #tpu.memory_space<vmem>>, %arg4: memref<128x32xf32, #tpu.memory_space<vmem>>, %arg5: memref<128x32xf32, #tpu.memory_space<vmem>>, %arg6: memref<128x1xi32, #tpu.memory_space<vmem>>, %arg7: memref<1x128xi32, #tpu.memory_space<vmem>>, %arg8: memref<1x1x128xf32, #tpu.memory_space<vmem>>, %arg9: memref<1x128x640xbf16, #tpu.memory_space<vmem>>, %arg10: memref<1x4x32x128xbf16, #tpu.memory_space<vmem>>, %arg11: memref<1x1x128xf32, #tpu.memory_space<vmem>>, %arg12: memref<1x128x1024xbf16, #tpu.memory_space<vmem>>, %arg13: memref<1x512x128xbf16, #tpu.memory_space<vmem>>, %arg14: memref<128x128xf32, #tpu.memory_space<vmem>>, %arg15: memref<128x128xf32, #tpu.memory_space<vmem>>, %arg16: memref<128x128xf32, #tpu.memory_space<vmem>>, %arg17: memref<128x128xf32, #tpu.memory_space<vmem>>) attributes {dimension_semantics = [#tpu.dimension_semantics<arbitrary>], iteration_bounds = array<i64: 4>, scalar_prefetch = 0 : i64, scratch_operands = 3 : i64, tpu.core_type = #tpu.core_type<tc>, window_params = [{pipeline_mode = #tpu.pipeline_mode<synchronous>, transform_indices = @transform_0, window_bounds = array<i64: 128, 48>}, {pipeline_mode = #tpu.pipeline_mode<synchronous>, transform_indices = @transform_1, window_bounds = array<i64: 48, 128>}, {pipeline_mode = #tpu.pipeline_mode<synchronous>, transform_indices = @transform_2, window_bounds = array<i64: 1, 128>}, {pipeline_mode = #tpu.pipeline_mode<synchronous>, transform_indices = @transform_3, window_bounds = array<i64: 128, 32>}, {pipeline_mode = #tpu.pipeline_mode<synchronous>, transform_indices = @transform_4, window_bounds = array<i64: 128, 32>}, {pipeline_mode = #tpu.pipeline_mode<synchronous>, transform_indices = @transform_5, window_bounds = array<i64: 128, 1>}, {pipeline_mode = #tpu.pipeline_mode<synchronous>, transform_indices = @transform_6, window_bounds = array<i64: 1, 128>}, {transform_indices = @transform_7, window_bounds = array<i64: 1, 1, 128>}, {transform_indices = @transform_8, window_bounds = array<i64: 1, 128, 640>}, {transform_indices = @transform_9, window_bounds = array<i64: 1, 4, 32, 128>}, {transform_indices = @transform_10, window_bounds = array<i64: 1, 1, 128>}, {transform_indices = @transform_11, window_bounds = array<i64: 1, 128, 1024>}, {transform_indices = @transform_12, window_bounds = array<i64: 1, 512, 128>}, {pipeline_mode = #tpu.pipeline_mode<synchronous>, transform_indices = @transform_13, window_bounds = array<i64: 128, 128>}]} {
    %c0_i32 = arith.constant 0 : i32
    %0 = arith.cmpi eq, %arg0, %c0_i32 : i32
    %1 = arith.extui %0 : i1 to i32
    %c0_i32_0 = arith.constant 0 : i32
    %2 = arith.cmpi ne, %1, %c0_i32_0 : i32
    scf.if %2 {
      %c0_44 = arith.constant 0 : index
      %c0_45 = arith.constant 0 : index
      %121 = vector.load %arg1[%c0_44, %c0_45] : memref<128x48xbf16, #tpu.memory_space<vmem>>, vector<128x48xbf16>
      %c0_46 = arith.constant 0 : index
      %c0_47 = arith.constant 0 : index
      %122 = vector.load %arg2[%c0_46, %c0_47] : memref<48x128xbf16, #tpu.memory_space<vmem>>, vector<48x128xbf16>
      %cst_48 = arith.constant dense<0.000000e+00> : vector<128x128xf32>
      %123 = tpu.matmul %121, %122, %cst_48 {dimension_numbers = #tpu.dot_dimension_numbers<[1], [0], [0], [1], [0, 0, 1, 1], [], []>} : vector<128x48xbf16>, vector<48x128xbf16>, vector<128x128xf32> -> vector<128x128xf32>
      %c0_49 = arith.constant 0 : index
      %c0_50 = arith.constant 0 : index
      %124 = vector.load %arg3[%c0_49, %c0_50] : memref<1x128xf32, #tpu.memory_space<vmem>>, vector<1x128xf32>
      %125 = arith.mulf %123, %123 : vector<128x128xf32>
      %cst_51 = arith.constant dense<0.000000e+00> : vector<128xf32>
      %126 = vector.multi_reduction <add>, %125, %cst_51 [1] : vector<128x128xf32> to vector<128xf32>
      %127 = vector.shape_cast %126 : vector<128xf32> to vector<128x1xf32>
      %cst_52 = arith.constant 1.280000e+02 : f32
      %128 = vector.broadcast %cst_52 : f32 to vector<128x1xf32>
      %129 = arith.divf %127, %128 : vector<128x1xf32>
      %cst_53 = arith.constant 9.99999974E-6 : f32
      %130 = vector.broadcast %cst_53 : f32 to vector<128x1xf32>
      %131 = arith.addf %129, %130 : vector<128x1xf32>
      %132 = math.rsqrt %131 : vector<128x1xf32>
      %133 = vector.broadcast %132 : vector<128x1xf32> to vector<128x128xf32>
      %134 = arith.mulf %123, %133 : vector<128x128xf32>
      %135 = vector.broadcast %124 : vector<1x128xf32> to vector<128x128xf32>
      %136 = arith.mulf %134, %135 : vector<128x128xf32>
      %c0_54 = arith.constant 0 : index
      %c0_55 = arith.constant 0 : index
      %137 = vector.load %arg14[%c0_54, %c0_55] : memref<128x128xf32, #tpu.memory_space<vmem>>, vector<128x128xf32>
      tpu.vector_store %arg14[%c0_54, %c0_55], %136 {strides = array<i32>} : memref<128x128xf32, #tpu.memory_space<vmem>>, vector<128x128xf32>,
      %c0_56 = arith.constant 0 : index
      %c0_57 = arith.constant 0 : index
      %138 = vector.load %arg6[%c0_56, %c0_57] : memref<128x1xi32, #tpu.memory_space<vmem>>, vector<128x1xi32>
      %c0_58 = arith.constant 0 : index
      %c0_59 = arith.constant 0 : index
      %139 = vector.load %arg7[%c0_58, %c0_59] : memref<1x128xi32, #tpu.memory_space<vmem>>, vector<1x128xi32>
      %140 = vector.broadcast %138 : vector<128x1xi32> to vector<128x128xi32>
      %141 = vector.broadcast %139 : vector<1x128xi32> to vector<128x128xi32>
      %142 = arith.cmpi eq, %140, %141 : vector<128x128xi32>
      %cst_60 = arith.constant 0.000000e+00 : f32
      %cst_61 = arith.constant -1.000000e+30 : f32
      %143 = vector.broadcast %cst_60 : f32 to vector<128x128xf32>
      %144 = vector.broadcast %cst_61 : f32 to vector<128x128xf32>
      %145 = arith.select %142, %143, %144 : vector<128x128xi1>, vector<128x128xf32>
      %c0_62 = arith.constant 0 : index
      %c0_63 = arith.constant 0 : index
      %146 = vector.load %arg15[%c0_62, %c0_63] : memref<128x128xf32, #tpu.memory_space<vmem>>, vector<128x128xf32>
      tpu.vector_store %arg15[%c0_62, %c0_63], %145 {strides = array<i32>} : memref<128x128xf32, #tpu.memory_space<vmem>>, vector<128x128xf32>,
      %c0_64 = arith.constant 0 : index
      %c0_65 = arith.constant 0 : index
      %147 = vector.load %arg4[%c0_64, %c0_65] : memref<128x32xf32, #tpu.memory_space<vmem>>, vector<128x32xf32>
      %148 = tpu.concatenate %147, %147, %147, %147 in 1 : vector<128x32xf32>, vector<128x32xf32>, vector<128x32xf32>, vector<128x32xf32> -> vector<128x128xf32>
      %c0_66 = arith.constant 0 : index
      %c0_67 = arith.constant 0 : index
      %149 = vector.load %arg16[%c0_66, %c0_67] : memref<128x128xf32, #tpu.memory_space<vmem>>, vector<128x128xf32>
      tpu.vector_store %arg16[%c0_66, %c0_67], %148 {strides = array<i32>} : memref<128x128xf32, #tpu.memory_space<vmem>>, vector<128x128xf32>,
      %c0_68 = arith.constant 0 : index
      %c0_69 = arith.constant 0 : index
      %150 = vector.load %arg5[%c0_68, %c0_69] : memref<128x32xf32, #tpu.memory_space<vmem>>, vector<128x32xf32>
      %151 = tpu.concatenate %150, %150, %150, %150 in 1 : vector<128x32xf32>, vector<128x32xf32>, vector<128x32xf32>, vector<128x32xf32> -> vector<128x128xf32>
      %c0_70 = arith.constant 0 : index
      %c0_71 = arith.constant 0 : index
      %152 = vector.load %arg17[%c0_70, %c0_71] : memref<128x128xf32, #tpu.memory_space<vmem>>, vector<128x128xf32>
      tpu.vector_store %arg17[%c0_70, %c0_71], %151 {strides = array<i32>} : memref<128x128xf32, #tpu.memory_space<vmem>>, vector<128x128xf32>,
    } else {
    }
    %c0 = arith.constant 0 : index
    %c0_1 = arith.constant 0 : index
    %3 = vector.load %arg14[%c0, %c0_1] : memref<128x128xf32, #tpu.memory_space<vmem>>, vector<128x128xf32>
    %c0_2 = arith.constant 0 : index
    %c0_3 = arith.constant 0 : index
    %c0_4 = arith.constant 0 : index
    %4 = vector.load %arg8[%c0_2, %c0_3, %c0_4] : memref<1x1x128xf32, #tpu.memory_space<vmem>>, vector<1x1x128xf32>
    %5 = vector.shape_cast %4 : vector<1x1x128xf32> to vector<1x128xf32>
    %6 = arith.mulf %3, %3 : vector<128x128xf32>
    %cst = arith.constant dense<0.000000e+00> : vector<128xf32>
    %7 = vector.multi_reduction <add>, %6, %cst [1] : vector<128x128xf32> to vector<128xf32>
    %8 = vector.shape_cast %7 : vector<128xf32> to vector<128x1xf32>
    %cst_5 = arith.constant 1.280000e+02 : f32
    %9 = vector.broadcast %cst_5 : f32 to vector<128x1xf32>
    %10 = arith.divf %8, %9 : vector<128x1xf32>
    %cst_6 = arith.constant 9.99999974E-6 : f32
    %11 = vector.broadcast %cst_6 : f32 to vector<128x1xf32>
    %12 = arith.addf %10, %11 : vector<128x1xf32>
    %13 = math.rsqrt %12 : vector<128x1xf32>
    %14 = vector.broadcast %13 : vector<128x1xf32> to vector<128x128xf32>
    %15 = arith.mulf %3, %14 : vector<128x128xf32>
    %16 = vector.broadcast %5 : vector<1x128xf32> to vector<128x128xf32>
    %17 = arith.mulf %15, %16 : vector<128x128xf32>
    %18 = arith.truncf %17 : vector<128x128xf32> to vector<128x128xbf16>
    %c0_7 = arith.constant 0 : index
    %c0_8 = arith.constant 0 : index
    %c0_9 = arith.constant 0 : index
    %19 = vector.load %arg9[%c0_7, %c0_8, %c0_9] : memref<1x128x640xbf16, #tpu.memory_space<vmem>>, vector<1x128x640xbf16>
    %20 = vector.shape_cast %19 : vector<1x128x640xbf16> to vector<128x640xbf16>
    %cst_10 = arith.constant dense<0.000000e+00> : vector<128x640xf32>
    %21 = tpu.matmul %18, %20, %cst_10 {dimension_numbers = #tpu.dot_dimension_numbers<[1], [0], [0], [1], [0, 0, 1, 1], [], []>} : vector<128x128xbf16>, vector<128x640xbf16>, vector<128x640xf32> -> vector<128x640xf32>
    %c0_11 = arith.constant 0 : index
    %c0_12 = arith.constant 0 : index
    %22 = vector.load %arg16[%c0_11, %c0_12] : memref<128x128xf32, #tpu.memory_space<vmem>>, vector<128x128xf32>
    %c0_13 = arith.constant 0 : index
    %c0_14 = arith.constant 0 : index
    %23 = vector.load %arg17[%c0_13, %c0_14] : memref<128x128xf32, #tpu.memory_space<vmem>>, vector<128x128xf32>
    %24 = vector.extract_strided_slice %21 {offsets = [0, 0], sizes = [128, 128], strides = [1, 1]} : vector<128x640xf32> to vector<128x128xf32>
    %25 = arith.mulf %24, %22 : vector<128x128xf32>
    %26 = vector.extract_strided_slice %21 {offsets = [0, 384], sizes = [128, 128], strides = [1, 1]} : vector<128x640xf32> to vector<128x128xf32>
    %27 = arith.mulf %26, %23 : vector<128x128xf32>
    %28 = arith.addf %25, %27 : vector<128x128xf32>
    %29 = vector.extract_strided_slice %21 {offsets = [0, 128], sizes = [128, 128], strides = [1, 1]} : vector<128x640xf32> to vector<128x128xf32>
    %30 = arith.mulf %29, %22 : vector<128x128xf32>
    %31 = vector.extract_strided_slice %21 {offsets = [0, 512], sizes = [128, 128], strides = [1, 1]} : vector<128x640xf32> to vector<128x128xf32>
    %32 = arith.mulf %31, %23 : vector<128x128xf32>
    %33 = arith.addf %30, %32 : vector<128x128xf32>
    %34 = vector.extract_strided_slice %21 {offsets = [0, 256], sizes = [128, 128], strides = [1, 1]} : vector<128x640xf32> to vector<128x128xf32>
    %35 = arith.truncf %28 : vector<128x128xf32> to vector<128x128xbf16>
    %36 = vector.extract_strided_slice %35 {offsets = [0, 0], sizes = [128, 32], strides = [1, 1]} : vector<128x128xbf16> to vector<128x32xbf16>
    %37 = vector.extract_strided_slice %35 {offsets = [0, 32], sizes = [128, 32], strides = [1, 1]} : vector<128x128xbf16> to vector<128x32xbf16>
    %38 = vector.extract_strided_slice %35 {offsets = [0, 64], sizes = [128, 32], strides = [1, 1]} : vector<128x128xbf16> to vector<128x32xbf16>
    %39 = vector.extract_strided_slice %35 {offsets = [0, 96], sizes = [128, 32], strides = [1, 1]} : vector<128x128xbf16> to vector<128x32xbf16>
    %40 = vector.shape_cast %36 : vector<128x32xbf16> to vector<1x128x32xbf16>
    %41 = vector.shape_cast %37 : vector<128x32xbf16> to vector<1x128x32xbf16>
    %42 = vector.shape_cast %38 : vector<128x32xbf16> to vector<1x128x32xbf16>
    %43 = vector.shape_cast %39 : vector<128x32xbf16> to vector<1x128x32xbf16>
    %44 = tpu.concatenate %40, %41, %42, %43 in 0 : vector<1x128x32xbf16>, vector<1x128x32xbf16>, vector<1x128x32xbf16>, vector<1x128x32xbf16> -> vector<4x128x32xbf16>
    %45 = arith.truncf %33 : vector<128x128xf32> to vector<128x128xbf16>
    %46 = vector.extract_strided_slice %45 {offsets = [0, 0], sizes = [128, 32], strides = [1, 1]} : vector<128x128xbf16> to vector<128x32xbf16>
    %47 = vector.extract_strided_slice %45 {offsets = [0, 32], sizes = [128, 32], strides = [1, 1]} : vector<128x128xbf16> to vector<128x32xbf16>
    %48 = vector.extract_strided_slice %45 {offsets = [0, 64], sizes = [128, 32], strides = [1, 1]} : vector<128x128xbf16> to vector<128x32xbf16>
    %49 = vector.extract_strided_slice %45 {offsets = [0, 96], sizes = [128, 32], strides = [1, 1]} : vector<128x128xbf16> to vector<128x32xbf16>
    %50 = vector.shape_cast %46 : vector<128x32xbf16> to vector<1x128x32xbf16>
    %51 = vector.shape_cast %47 : vector<128x32xbf16> to vector<1x128x32xbf16>
    %52 = vector.shape_cast %48 : vector<128x32xbf16> to vector<1x128x32xbf16>
    %53 = vector.shape_cast %49 : vector<128x32xbf16> to vector<1x128x32xbf16>
    %54 = tpu.concatenate %50, %51, %52, %53 in 0 : vector<1x128x32xbf16>, vector<1x128x32xbf16>, vector<1x128x32xbf16>, vector<1x128x32xbf16> -> vector<4x128x32xbf16>
    %55 = arith.truncf %34 : vector<128x128xf32> to vector<128x128xbf16>
    %56 = vector.extract_strided_slice %55 {offsets = [0, 0], sizes = [128, 32], strides = [1, 1]} : vector<128x128xbf16> to vector<128x32xbf16>
    %57 = vector.extract_strided_slice %55 {offsets = [0, 32], sizes = [128, 32], strides = [1, 1]} : vector<128x128xbf16> to vector<128x32xbf16>
    %58 = vector.extract_strided_slice %55 {offsets = [0, 64], sizes = [128, 32], strides = [1, 1]} : vector<128x128xbf16> to vector<128x32xbf16>
    %59 = vector.extract_strided_slice %55 {offsets = [0, 96], sizes = [128, 32], strides = [1, 1]} : vector<128x128xbf16> to vector<128x32xbf16>
    %60 = vector.shape_cast %56 : vector<128x32xbf16> to vector<1x128x32xbf16>
    %61 = vector.shape_cast %57 : vector<128x32xbf16> to vector<1x128x32xbf16>
    %62 = vector.shape_cast %58 : vector<128x32xbf16> to vector<1x128x32xbf16>
    %63 = vector.shape_cast %59 : vector<128x32xbf16> to vector<1x128x32xbf16>
    %64 = tpu.concatenate %60, %61, %62, %63 in 0 : vector<1x128x32xbf16>, vector<1x128x32xbf16>, vector<1x128x32xbf16>, vector<1x128x32xbf16> -> vector<4x128x32xbf16>
    "tpu.trace_start"() <{level = 10 : i32, message = "hnd,hmd->hnm"}> : () -> ()
    %cst_15 = arith.constant dense<0.000000e+00> : vector<4x128x128xf32>
    %65 = tpu.matmul %44, %54, %cst_15 {dimension_numbers = #tpu.dot_dimension_numbers<[2], [2], [1], [1], [0, 0, 0, 1, 1, 1], [0], [0]>} : vector<4x128x32xbf16>, vector<4x128x32xbf16>, vector<4x128x128xf32> -> vector<4x128x128xf32>
    "tpu.trace_stop"() : () -> ()
    %c0_16 = arith.constant 0 : index
    %c0_17 = arith.constant 0 : index
    %66 = vector.load %arg15[%c0_16, %c0_17] : memref<128x128xf32, #tpu.memory_space<vmem>>, vector<128x128xf32>
    %67 = vector.shape_cast %66 : vector<128x128xf32> to vector<1x128x128xf32>
    %68 = vector.broadcast %67 : vector<1x128x128xf32> to vector<4x128x128xf32>
    %69 = arith.addf %65, %68 : vector<4x128x128xf32>
    %cst_18 = arith.constant dense<0xFF800000> : vector<4x128xf32>
    %70 = vector.multi_reduction <maximumf>, %69, %cst_18 [2] : vector<4x128x128xf32> to vector<4x128xf32>
    %71 = vector.shape_cast %70 : vector<4x128xf32> to vector<4x128x1xf32>
    %72 = vector.broadcast %71 : vector<4x128x1xf32> to vector<4x128x128xf32>
    %73 = arith.subf %69, %72 : vector<4x128x128xf32>
    %74 = math.exp %73 : vector<4x128x128xf32>
    %cst_19 = arith.constant dense<0.000000e+00> : vector<4x128xf32>
    %75 = vector.multi_reduction <add>, %74, %cst_19 [2] : vector<4x128x128xf32> to vector<4x128xf32>
    %76 = vector.shape_cast %75 : vector<4x128xf32> to vector<4x128x1xf32>
    %77 = tpu.reciprocal %76 {approx = true} : vector<4x128x1xf32> -> vector<4x128x1xf32>
    %78 = vector.broadcast %77 : vector<4x128x1xf32> to vector<4x128x128xf32>
    %79 = arith.mulf %74, %78 : vector<4x128x128xf32>
    %80 = arith.truncf %79 : vector<4x128x128xf32> to vector<4x128x128xbf16>
    "tpu.trace_start"() <{level = 10 : i32, message = "hnm,hmd->hnd"}> : () -> ()
    %cst_20 = arith.constant dense<0.000000e+00> : vector<4x128x32xf32>
    %81 = tpu.matmul %80, %64, %cst_20 {dimension_numbers = #tpu.dot_dimension_numbers<[2], [1], [1], [2], [0, 0, 0, 1, 1, 2], [0], [0]>} : vector<4x128x128xbf16>, vector<4x128x32xbf16>, vector<4x128x32xf32> -> vector<4x128x32xf32>
    "tpu.trace_stop"() : () -> ()
    %82 = arith.truncf %81 : vector<4x128x32xf32> to vector<4x128x32xbf16>
    %c0_21 = arith.constant 0 : index
    %c0_22 = arith.constant 0 : index
    %c0_23 = arith.constant 0 : index
    %c0_24 = arith.constant 0 : index
    %83 = vector.load %arg10[%c0_21, %c0_22, %c0_23, %c0_24] : memref<1x4x32x128xbf16, #tpu.memory_space<vmem>>, vector<1x4x32x128xbf16>
    %84 = vector.shape_cast %83 : vector<1x4x32x128xbf16> to vector<4x32x128xbf16>
    "tpu.trace_start"() <{level = 10 : i32, message = "hnd,hdo->hno"}> : () -> ()
    %cst_25 = arith.constant dense<0.000000e+00> : vector<4x128x128xf32>
    %85 = tpu.matmul %82, %84, %cst_25 {dimension_numbers = #tpu.dot_dimension_numbers<[2], [1], [1], [2], [0, 0, 0, 1, 1, 2], [0], [0]>} : vector<4x128x32xbf16>, vector<4x32x128xbf16>, vector<4x128x128xf32> -> vector<4x128x128xf32>
    "tpu.trace_stop"() : () -> ()
    %cst_26 = arith.constant dense<0.000000e+00> : vector<128x128xf32>
    %86 = vector.multi_reduction <add>, %85, %cst_26 [0] : vector<4x128x128xf32> to vector<128x128xf32>
    %87 = arith.addf %3, %86 : vector<128x128xf32>
    %c0_27 = arith.constant 0 : index
    %c0_28 = arith.constant 0 : index
    %c0_29 = arith.constant 0 : index
    %88 = vector.load %arg11[%c0_27, %c0_28, %c0_29] : memref<1x1x128xf32, #tpu.memory_space<vmem>>, vector<1x1x128xf32>
    %89 = vector.shape_cast %88 : vector<1x1x128xf32> to vector<1x128xf32>
    %90 = arith.mulf %87, %87 : vector<128x128xf32>
    %cst_30 = arith.constant dense<0.000000e+00> : vector<128xf32>
    %91 = vector.multi_reduction <add>, %90, %cst_30 [1] : vector<128x128xf32> to vector<128xf32>
    %92 = vector.shape_cast %91 : vector<128xf32> to vector<128x1xf32>
    %cst_31 = arith.constant 1.280000e+02 : f32
    %93 = vector.broadcast %cst_31 : f32 to vector<128x1xf32>
    %94 = arith.divf %92, %93 : vector<128x1xf32>
    %cst_32 = arith.constant 9.99999974E-6 : f32
    %95 = vector.broadcast %cst_32 : f32 to vector<128x1xf32>
    %96 = arith.addf %94, %95 : vector<128x1xf32>
    %97 = math.rsqrt %96 : vector<128x1xf32>
    %98 = vector.broadcast %97 : vector<128x1xf32> to vector<128x128xf32>
    %99 = arith.mulf %87, %98 : vector<128x128xf32>
    %100 = vector.broadcast %89 : vector<1x128xf32> to vector<128x128xf32>
    %101 = arith.mulf %99, %100 : vector<128x128xf32>
    %102 = arith.truncf %101 : vector<128x128xf32> to vector<128x128xbf16>
    %c0_33 = arith.constant 0 : index
    %c0_34 = arith.constant 0 : index
    %c0_35 = arith.constant 0 : index
    %103 = vector.load %arg12[%c0_33, %c0_34, %c0_35] : memref<1x128x1024xbf16, #tpu.memory_space<vmem>>, vector<1x128x1024xbf16>
    %104 = vector.shape_cast %103 : vector<1x128x1024xbf16> to vector<128x1024xbf16>
    %cst_36 = arith.constant dense<0.000000e+00> : vector<128x1024xf32>
    %105 = tpu.matmul %102, %104, %cst_36 {dimension_numbers = #tpu.dot_dimension_numbers<[1], [0], [0], [1], [0, 0, 1, 1], [], []>} : vector<128x128xbf16>, vector<128x1024xbf16>, vector<128x1024xf32> -> vector<128x1024xf32>
    %106 = vector.extract_strided_slice %105 {offsets = [0, 0], sizes = [128, 512], strides = [1, 1]} : vector<128x1024xf32> to vector<128x512xf32>
    %107 = vector.extract_strided_slice %105 {offsets = [0, 512], sizes = [128, 512], strides = [1, 1]} : vector<128x1024xf32> to vector<128x512xf32>
    %108 = arith.negf %106 : vector<128x512xf32>
    %109 = math.exp %108 : vector<128x512xf32>
    %cst_37 = arith.constant 1.000000e+00 : f32
    %110 = vector.broadcast %cst_37 : f32 to vector<128x512xf32>
    %111 = arith.addf %110, %109 : vector<128x512xf32>
    %112 = arith.divf %110, %111 : vector<128x512xf32>
    %113 = arith.mulf %106, %112 : vector<128x512xf32>
    %114 = arith.mulf %113, %107 : vector<128x512xf32>
    %115 = arith.truncf %114 : vector<128x512xf32> to vector<128x512xbf16>
    %c0_38 = arith.constant 0 : index
    %c0_39 = arith.constant 0 : index
    %c0_40 = arith.constant 0 : index
    %116 = vector.load %arg13[%c0_38, %c0_39, %c0_40] : memref<1x512x128xbf16, #tpu.memory_space<vmem>>, vector<1x512x128xbf16>
    %117 = vector.shape_cast %116 : vector<1x512x128xbf16> to vector<512x128xbf16>
    %cst_41 = arith.constant dense<0.000000e+00> : vector<128x128xf32>
    %118 = tpu.matmul %115, %117, %cst_41 {dimension_numbers = #tpu.dot_dimension_numbers<[1], [0], [0], [1], [0, 0, 1, 1], [], []>} : vector<128x512xbf16>, vector<512x128xbf16>, vector<128x128xf32> -> vector<128x128xf32>
    %119 = arith.addf %87, %118 : vector<128x128xf32>
    %c0_42 = arith.constant 0 : index
    %c0_43 = arith.constant 0 : index
    %120 = vector.load %arg14[%c0_42, %c0_43] : memref<128x128xf32, #tpu.memory_space<vmem>>, vector<128x128xf32>
    tpu.vector_store %arg14[%c0_42, %c0_43], %119 {strides = array<i32>} : memref<128x128xf32, #tpu.memory_space<vmem>>, vector<128x128xf32>,
    return
  }
  func.func @transform_0(%arg0: i32) -> (i32, i32) {
    %c0_i32 = arith.constant 0 : i32
    %c0_i32_0 = arith.constant 0 : i32
    %c0_i32_1 = arith.constant 0 : i32
    return %c0_i32, %c0_i32_0 : i32, i32
  }
  func.func @transform_1(%arg0: i32) -> (i32, i32) {
    %c0_i32 = arith.constant 0 : i32
    %c0_i32_0 = arith.constant 0 : i32
    %c0_i32_1 = arith.constant 0 : i32
    return %c0_i32, %c0_i32_0 : i32, i32
  }
  func.func @transform_2(%arg0: i32) -> (i32, i32) {
    %c0_i32 = arith.constant 0 : i32
    %c0_i32_0 = arith.constant 0 : i32
    %c0_i32_1 = arith.constant 0 : i32
    return %c0_i32, %c0_i32_0 : i32, i32
  }
  func.func @transform_3(%arg0: i32) -> (i32, i32) {
    %c0_i32 = arith.constant 0 : i32
    %c0_i32_0 = arith.constant 0 : i32
    %c0_i32_1 = arith.constant 0 : i32
    return %c0_i32, %c0_i32_0 : i32, i32
  }
  func.func @transform_4(%arg0: i32) -> (i32, i32) {
    %c0_i32 = arith.constant 0 : i32
    %c0_i32_0 = arith.constant 0 : i32
    %c0_i32_1 = arith.constant 0 : i32
    return %c0_i32, %c0_i32_0 : i32, i32
  }
  func.func @transform_5(%arg0: i32) -> (i32, i32) {
    %c0_i32 = arith.constant 0 : i32
    %c0_i32_0 = arith.constant 0 : i32
    %c0_i32_1 = arith.constant 0 : i32
    return %c0_i32, %c0_i32_0 : i32, i32
  }
  func.func @transform_6(%arg0: i32) -> (i32, i32) {
    %c0_i32 = arith.constant 0 : i32
    %c0_i32_0 = arith.constant 0 : i32
    %c0_i32_1 = arith.constant 0 : i32
    return %c0_i32, %c0_i32_0 : i32, i32
  }
  func.func @transform_7(%arg0: i32) -> (i32, i32, i32) {
    %c0_i32 = arith.constant 0 : i32
    %c0_i32_0 = arith.constant 0 : i32
    %c0_i32_1 = arith.constant 0 : i32
    return %arg0, %c0_i32, %c0_i32_0 : i32, i32, i32
  }
  func.func @transform_8(%arg0: i32) -> (i32, i32, i32) {
    %c0_i32 = arith.constant 0 : i32
    %c0_i32_0 = arith.constant 0 : i32
    %c0_i32_1 = arith.constant 0 : i32
    return %arg0, %c0_i32, %c0_i32_0 : i32, i32, i32
  }
  func.func @transform_9(%arg0: i32) -> (i32, i32, i32, i32) {
    %c0_i32 = arith.constant 0 : i32
    %c0_i32_0 = arith.constant 0 : i32
    %c0_i32_1 = arith.constant 0 : i32
    %c0_i32_2 = arith.constant 0 : i32
    return %arg0, %c0_i32, %c0_i32_0, %c0_i32_1 : i32, i32, i32, i32
  }
  func.func @transform_10(%arg0: i32) -> (i32, i32, i32) {
    %c0_i32 = arith.constant 0 : i32
    %c0_i32_0 = arith.constant 0 : i32
    %c0_i32_1 = arith.constant 0 : i32
    return %arg0, %c0_i32, %c0_i32_0 : i32, i32, i32
  }
  func.func @transform_11(%arg0: i32) -> (i32, i32, i32) {
    %c0_i32 = arith.constant 0 : i32
    %c0_i32_0 = arith.constant 0 : i32
    %c0_i32_1 = arith.constant 0 : i32
    return %arg0, %c0_i32, %c0_i32_0 : i32, i32, i32
  }
  func.func @transform_12(%arg0: i32) -> (i32, i32, i32) {
    %c0_i32 = arith.constant 0 : i32
    %c0_i32_0 = arith.constant 0 : i32
    %c0_i32_1 = arith.constant 0 : i32
    return %arg0, %c0_i32, %c0_i32_0 : i32, i32, i32
  }
  func.func @transform_13(%arg0: i32) -> (i32, i32) {
    %c0_i32 = arith.constant 0 : i32
    %c0_i32_0 = arith.constant 0 : i32
    %c0_i32_1 = arith.constant 0 : i32
    return %c0_i32, %c0_i32_0 : i32, i32
  }
}

</mosaic_0001>

<bundles_post_ra>
// kernel: tpu_custom_call.1
= control target key start
LH: loop header
LB: loop body
LE: loop exit
PB: predicated region body
PF: predicated region fallthrough
CT: control target
= control target key end

     0   :  { %s16544_s0 = inlined_call_operand.vmem [shape: bf16[128,48], index: 0, kind: input, shape index: {}]   ;;  %s16545_s1 = inlined_call_operand.vmem [shape: bf16[48,128], index: 1, kind: input, shape index: {}]   ;;  %s16546_s2 = inlined_call_operand.vmem [shape: f32[1,128], index: 2, kind: input, shape index: {}]   ;;  %s16547_s3 = inlined_call_operand.vmem [shape: f32[128,32], index: 3, kind: input, shape index: {}]   ;;  %s16548_s4 = inlined_call_operand.vmem [shape: f32[128,32], index: 4, kind: input, shape index: {}]   ;;  %s16549_s5 = inlined_call_operand.vmem [shape: s32[128,1], index: 5, kind: input, shape index: {}]   ;;  %s16550_s6 = inlined_call_operand.vmem [shape: s32[1,128], index: 6, kind: input, shape index: {}]   ;;  %s16551_s7 = inlined_call_operand.vmem [shape: f32[4,1,128], index: 7, kind: input, shape index: {}]   ;;  %s16552_s8 = inlined_call_operand.hbm [shape: bf16[4,128,640], index: 8, kind: input, shape index: {}]   ;;  %s16553_s9 = inlined_call_operand.vmem [shape: bf16[4,4,32,128], index: 9, kind: input, shape index: {}]   ;;  %s16554_s10 = inlined_call_operand.vmem [shape: f32[4,1,128], index: 10, kind: input, shape index: {}]   ;;  %s16555_s11 = inlined_call_operand.hbm [shape: bf16[4,128,1024], index: 11, kind: input, shape index: {}]   ;;  %s16556_s12 = inlined_call_operand.hbm [shape: bf16[4,512,128], index: 12, kind: input, shape index: {}]   ;;  %s16557_s13 = inlined_call_operand.hbm [shape: f32[128,128], index: 13, kind: output, shape index: {}]  }
   0x1   :  { %16644 = sst [smem:[#allocation98_spill]] %s16546_s2 }
   0x2   :  { %16645 = sst [smem:[#allocation99_spill]] %s16547_s3 }
   0x3   :  { %16646 = sst [smem:[#allocation100_spill]] %s16548_s4 }
   0x4   :  { %16647 = sst [smem:[#allocation101_spill]] %s16550_s6 }
   0x5   :  { %16648 = sst [smem:[#allocation102_spill]] %s16555_s11 }
   0x6   :  { %16649 = sst [smem:[#allocation103_spill]] %s16557_s13 }
   0x7   :  { %18 = vsyncpa [#allocation6], 0 }
   0x8   :  { %20 = vsyncpa [#allocation6 + $0x1], 0 }
   0x9   :  { %21 = vsyncpa [#allocation9], 0 }
   0xa   :  { %23 = vsyncpa [#allocation9 + $0x1], 0 }
   0xb   :  { %24 = vsyncpa [#allocation7], 0  ;;  %s10341_s25 = smov 0   ;;  %s10343_s26 = smov 0  }
   0xc   :  { %s10345_s27 = smov 0   ;;  %s10347_s28 = smov 0  }
   0xd LB: > { %16650 = sst [smem:[#allocation15_spill]] %s10246_s27  ;;  %s10360_s29 = sadd.s32 4294967295, %s10250_s28   ;;  %s10250_s28 = sphi %s10347_s28, %s17283_s28   ;;  %s10246_s27 = sphi %s10345_s27, %s17285_s27   ;;  %s10242_s26 = sphi %s10343_s26, %s17287_s26   ;;  %s10238_s25 = sphi %s10341_s25, %s17286_s25  }
   0xe   : > { %s10363_s30 = sadd.s32 1, %s10250_s28   ;;  %s210_s15 = sadd.s32 1, %s10246_s27 }
   0xf   : > { %16651 = sst [smem:[#allocation16_spill]] %s10363_s30  ;;  %s207_s14 = ssub.s32 %s10250_s28, %s10363_s30 }
  0x10   : > { %p208_p0 = scmp.eq.s32.totalorder %s207_s14, 0  ;;  %p217_p1 = scmp.ne.s32.totalorder %s10246_s27, %s10242_s26 }
  0x11   : > { %p218_p2 = scmp.eq.s32.totalorder %s10250_s28, 0  ;;  %p223_p3 = scmp.ne.s32.totalorder %s10242_s26, %s10238_s25 }
  0x12   : > { %s10373_s16 = scalar_select %p208_p0, %s10246_s27, %s210_s15  }
  0x13   : > { %p219_p4 = por %p218_p2, %p217_p1  ;;  %p224_p5 = scmp.eq.s32.totalorder %s10360_s29, 0 }
  0x14   : > { %16652 = sst [smem:[#allocation17_spill]] %s10373_s16  ;;  %p9394_p6 = scmp.lt.s32.totalorder %s10250_s28, 4 }
  0x15   : > { %p10377_p7 = por %p224_p5, %p223_p3  ;;  %s10382_s18 = sand.u32 1, %s10246_s27  }
  0x16   : > { %p10384_p8 = pnand %p9394_p6, %p219_p4  ;;  %s435_s20 = sand.u32 1, %s10250_s28  }
  0x17   : > { %s8408_s21 = sshll.u32 %s10382_s18, 9  ;;  %s9180_s22 = sshll.u32 %s10250_s28, 9 }
  0x18   : > { %s439_s23 = scalar_lea.vmem [#allocation8], %s8408_s21  ;;  %s16655_s11 = sld [smem:[#allocation102_spill]] }
  0x19   : > { %s447_s24 = sshll.u32 %s439_s23, 4  ;;  %s10394_s27 = scalar_lea.sflag [#allocation9], %s435_s20  ;;  %s448_s24 = int_to_ptr.vmem [resolvable:$true] %s447_s24 }
  0x1a   : > { %p10094_p10 = pneg %p10384_p8 }
  0x1e   : > { %s444_s15 = scalar_lea.hbm %s16655_s11, %s9180_s22  ;;  %s10097_s25 = scalar_lea.hbm %s16655_s11, 2048 }
  0x1f   : > { %s445_s16 = sshll.u32 %s444_s15, 4  ;;  %s446_s16 = int_to_ptr.hbm [resolvable:$true] %s445_s16 }
  0x20   : > { %s10090_s30 = sshra.s32 %s446_s16, 4  ;;  %s10091_s30 = int_to_ptr.hbm [resolvable:$true] %s10090_s30 }
  0x21   : > { %s10092_s13 = scalar_lea.hbm %s10091_s30, 512  ;;  %p10098_p13 = scmp.lt.s32.totalorder %s10091_s30, %s16655_s11 }
  0x22   : > { %p10093_p9 = scmp.ne.s32.totalorder %s10091_s30, %s10092_s13  ;;  %p10099_p0 = scmp.lt.s32.totalorder %s10097_s25, %s10092_s13 }
  0x24   : > { %p10095_p11 = pnand %p10094_p10, %p10093_p9  ;;  %p10100_p1 = por %p10099_p0, %p10098_p13 }
  0x26   : > { %p10096_p12 = pneg %p10095_p11 }
  0x28   : > { %p10101_p2 = pnand %p10100_p1, %p10096_p12 }
  0x2a   : > { %10104 = shalt.err (!%p10101_p2)
}
  0x2b   : > { %s10252_s20 = smov 512   ;;  %s10253_s15 = smov 32  }
  0x2c   : > { %9390 = dma.hbm_to_vmem [thread:$0]  (!%p10384_p8), %s446_s16, 8192, %s448_s24, %s10394_s27, %s10252_s20, %s10252_s20, %s10253_s15  }
  0x2d   : > { %p8414_p3 = scmp.ge.s32.totalorder %s10250_s28, 1  ;;  %p477_p4 = scmp.lt.s32.totalorder %s10250_s28, 5 }
  0x2e   : > { %s9371_s21 = smul.u32 320, %s10382_s18  ;;  %s400_s4 = scalar_lea.sflag [#allocation6], %s10382_s18 }
  0x2f   : > { %p10413_p5 = pnand %p8414_p3, %p477_p4  ;;  %s9372_s30 = smul.u32 320, %s10250_s28 }
  0x30   : > { %s403_s14 = scalar_lea.vmem [#allocation5], %s9371_s21  ;;  %s10127_s6 = scalar_lea.hbm %s16552_s8, 1280 }
  0x31   : > { %s408_s22 = scalar_lea.hbm %s16552_s8, %s9372_s30  ;;  %s411_s11 = sshll.u32 %s403_s14, 4  ;;  %s412_s11 = int_to_ptr.vmem [resolvable:$true] %s411_s11 }
  0x32   : > { %s409_s2 = sshll.u32 %s408_s22, 4  ;;  %s410_s2 = int_to_ptr.hbm [resolvable:$true] %s409_s2 }
  0x33   : > { %s10120_s16 = sshra.s32 %s410_s2, 4  ;;  %s10121_s16 = int_to_ptr.hbm [resolvable:$true] %s10120_s16 }
  0x34   : > { %s10122_s24 = scalar_lea.hbm %s10121_s16, 320  ;;  %p10128_p12 = scmp.lt.s32.totalorder %s10121_s16, %s16552_s8 }
  0x35   : > { %p10123_p6 = scmp.ne.s32.totalorder %s10121_s16, %s10122_s24  ;;  %p10129_p13 = scmp.lt.s32.totalorder %s10127_s6, %s10122_s24 }
  0x37   : > { %p10125_p9 = pnand %p10123_p6, %p10094_p10  ;;  %p10130_p0 = por %p10129_p13, %p10128_p12 }
  0x39   : > { %p10126_p11 = pneg %p10125_p9 }
  0x3b   : > { %p10131_p1 = pnand %p10130_p0, %p10126_p11 }
  0x3d   : > { %10134 = shalt.err (!%p10131_p1)
}
  0x3e   : > { %s10254_s21 = smov 320   ;;  %s10255_s25 = smov 20  }
  0x3f   : > { %9387 = dma.hbm_to_vmem [thread:$0]  (!%p10384_p8), %s410_s2, 5120, %s412_s11, %s400_s4, %s10254_s21, %s10254_s21, %s10255_s25  }
  0x40   : > { %s8411_s22 = sshll.u32 %s10382_s18, 8  ;;  %s9181_s14 = sshll.u32 %s10250_s28, 8 }
  0x41   : > { %s466_s3 = scalar_lea.hbm %s16556_s12, %s9181_s14  ;;  %s461_s16 = scalar_lea.vmem [#allocation10], %s8411_s22 }
  0x42   : > { %s467_s23 = sshll.u32 %s466_s3, 4  ;;  %s469_s6 = sshll.u32 %s461_s16, 4  ;;  %s468_s23 = int_to_ptr.hbm [resolvable:$true] %s467_s23  ;;  %s470_s6 = int_to_ptr.vmem [resolvable:$true] %s469_s6 }
  0x43   : > { %s10150_s24 = sshra.s32 %s468_s23, 4  ;;  %s10157_s11 = scalar_lea.hbm %s16556_s12, 1024  ;;  %s10151_s24 = int_to_ptr.hbm [resolvable:$true] %s10150_s24 }
  0x44   : > { %s10152_s30 = scalar_lea.hbm %s10151_s24, 256  ;;  %p10158_p6 = scmp.lt.s32.totalorder %s10151_s24, %s16556_s12 }
  0x45   : > { %p10153_p2 = scmp.ne.s32.totalorder %s10151_s24, %s10152_s30  ;;  %p10159_p9 = scmp.lt.s32.totalorder %s10157_s11, %s10152_s30 }
  0x47   : > { %p10155_p3 = pnand %p10153_p2, %p10094_p10  ;;  %p10160_p11 = por %p10159_p9, %p10158_p6 }
  0x49   : > { %p10156_p4 = pneg %p10155_p3 }
  0x4b   : > { %p10161_p12 = pnand %p10160_p11, %p10156_p4 }
  0x4d   : > { %10164 = shalt.err (!%p10161_p12)
}
  0x4e   : > { %s10256_s3 = smov 64   ;;  %s10257_s21 = smov 4  }
  0x4f   : > { %9393 = dma.hbm_to_vmem [thread:$0]  (!%p10384_p8), %s468_s23, 4096, %s470_s6, %s10394_s27, %s10256_s3, %s10256_s3, %s10257_s21  }
  0x50   : > { %481 = sbr.rel (%p10413_p5) target bundleno = 3105 (0xc21), region = 72 }
  0x55   : > { %s483_s25 = sand.u32 1, %s10242_s26  }
  0x56   : > { %s9373_s22 = smul.u32 320, %s483_s25  ;;  %s484_s14 = scalar_lea.sflag [#allocation6], %s483_s25 }
  0x58   : > { %s10453_s20 = scalar_lea.vmem [#allocation5], %s9373_s22 }
  0x59   : > { %10225 = dma.done.wait (%p10377_p7), %s484_s14, 5120  }
  0x5a   : > { %10227 = vsyncadd (%p10377_p7), %s484_s14, 4294962176  ;;  %s493_s15 = sand.u32 1, %s10360_s29   ;;  %s8415_s19 = sshll.u32 %s483_s25, 9 }
  0x5b   : > { %s494_s27 = scalar_lea.sflag [#allocation9], %s493_s15  ;;  %s10460_s23 = scalar_lea.vmem [#allocation8], %s8415_s19 }
  0x5c   : > { %10229 = dma.done.wait (%p10377_p7), %s494_s27, 12288  }
  0x5d   : > { %10231 = vsyncadd (%p10377_p7), %s494_s27, 4294955008  ;;  %s8416_s13 = sshll.u32 %s483_s25, 8  ;;  %p567_p8 = scmp.lt.s32.totalorder %s10360_s29, 3 }
  0x5e   : > { %s10484_s21 = scalar_lea.vmem [#allocation10], %s8416_s13  ;;  %p8419_p7 = scmp.ne.s32.totalorder %s10360_s29, 0 }
  0x5f   : > { %s10468_s16 = scalar_select %p567_p8, %s10360_s29, 3 }
  0x60   : > { %582 = sbr.rel (%p8419_p7) target bundleno = 659 (0x293), region = 88 }
  0x61   : > { %s569_s30 = scalar_lea.vmem %s16551_s7, %s10468_s16  ;;  %s9182_s2 = sshll.u32 %s10468_s16, 6 }
  0x62   : > { %s10478_s28 = scalar_lea.vmem %s16553_s9, %s9182_s2  ;;  %s577_s3 = scalar_lea.vmem %s16554_s10, %s10468_s16 }
  0x65   : > { %v1038_v0 = vld [vmem:[%s16549_s5 + $0x10] sm:$0xff]  ;;  %v1037_v1 = vld [vmem:[%s16549_s5 + $0x8] sm:$0xff]  ;;  %v1036_v2 = vld [vmem:[%s16549_s5] sm:$0xff]  ;;  %v10258_v3 = vmov 0   ;;  %vm663_vm0 = vcmask 392192   ;;  %s16657_s19 = sld [smem:[#allocation99_spill]] }
  0x66   : > { %9450 = vset.pattern.permute.xlu0 %v10258_v3  ;;  %9449 = vset.pattern.permute.xlu2 %v10258_v3  ;;  %v9193_v4 = vld [vmem:[%s16545_s1 + $0x10] sm:$0xff]  ;;  %v9192_v5 = vld [vmem:[%s16545_s1 + $0x8] sm:$0xff]  ;;  %v1039_v7 = vld [vmem:[%s16549_s5 + $0x18] sm:$0xff]  ;;  %s10259_s2 = smov 32   ;;  %s10260_s14 = smov 64  }
  0x67   : > { %9448 = vset.pattern.permute.xlu1 %v10258_v3  ;;  %1060 = vperm.xlu0 %9450, %v1038_v0   ;;  %v1045_v6 = vld [vmem:[%s16549_s5 + $0x48] sm:$0xff]  ;;  %v1040_v8 = vld [vmem:[%s16549_s5 + $0x20] sm:$0xff]  ;;  %v9189_v11 = vld [vmem:[%s16544_s0 + $0x30] sm:$0xff]  ;;  %s16658_s18 = sld [smem:[#allocation101_spill]]  ;;  %v10261_v46 = vmov -1e+30  }
  0x68   : > { %1057 = vperm.xlu2 %9449, %v1037_v1   ;;  %1054 = vperm.xlu1 %9448, %v1036_v2   ;;  %v9191_v9 = vld [vmem:[%s16545_s1] sm:$0xff]  ;;  %v9185_v13 = vld [vmem:[%s16544_s0 + $0x10] sm:$0xff]  ;;  %v1041_v15 = vld [vmem:[%s16549_s5 + $0x28] sm:$0xff]  ;;  %s10263_s25 = smov 96   ;;  %s16663_s27 = sld [smem:[#allocation100_spill]] }
  0x69   : > { %693 = vmatpush.bf16.msra.mxu0 %v9193_v4  ;;  %9340 = vmatpush.bf16.msra.mxu3 %v9193_v4  ;;  %v9183_v10 = vld [vmem:[%s16544_s0] sm:$0xff]  ;;  %v1042_v16 = vld [vmem:[%s16549_s5 + $0x30] sm:$0xff]  ;;  %v1051_v17 = vld [vmem:[%s16549_s5 + $0x78] sm:$0xff]  ;;  %s16665_s4 = sld [smem:[#allocation98_spill]] }
  0x6a   : > { %9339 = vmatpush.bf16.msra.mxu2 %v9193_v4  ;;  %9338 = vmatpush.bf16.msra.mxu1 %v9193_v4  ;;  %v9187_v12 = vld [vmem:[%s16544_s0 + $0x20] sm:$0xff]  ;;  %v1043_v18 = vld [vmem:[%s16549_s5 + $0x38] sm:$0xff]  ;;  %v9184_v20 = vld [vmem:[%s16544_s0 + $0x8] sm:$0xff] }
  0x6b   : > { %v1048_v14 = vld [vmem:[%s16549_s5 + $0x60] sm:$0xff]  ;;  %v9186_v21 = vld [vmem:[%s16544_s0 + $0x18] sm:$0xff]  ;;  %v9188_v22 = vld [vmem:[%s16544_s0 + $0x28] sm:$0xff] }
  0x6c   : > { %v1044_v19 = vld [vmem:[%s16549_s5 + $0x40] sm:$0xff]  ;;  %v10561_v23 = vld [vmem:[%s16657_s19 + $0x10] sm:$0xff]  ;;  %v1047_v25 = vld [vmem:[%s16549_s5 + $0x58] sm:$0xff] }
  0x6d   : > { %694 = vmatpush.bf16.msra.mxu0 %v9192_v5  ;;  %9343 = vmatpush.bf16.msra.mxu3 %v9192_v5  ;;  %v1046_v24 = vld [vmem:[%s16549_s5 + $0x50] sm:$0xff]  ;;  %v10576_v26 = vld [vmem:[%s16657_s19 + $0x28] sm:$0xff]  ;;  %v10589_v29 = vld [vmem:[%s16657_s19 + $0x40] sm:$0xff] }
  0x6e   : > { %9342 = vmatpush.bf16.msra.mxu2 %v9192_v5  ;;  %9341 = vmatpush.bf16.msra.mxu1 %v9192_v5  ;;  %v1049_v27 = vld [vmem:[%s16549_s5 + $0x68] sm:$0xff]  ;;  %v1050_v28 = vld [vmem:[%s16549_s5 + $0x70] sm:$0xff]  ;;  %v10594_v30 = vld [vmem:[%s16657_s19] sm:$0xff]  ;;  %s16664_s13 = smov %s16663_s27 }
  0x6f   : > { %1081 = vperm.xlu0 %9450, %v1045_v6   ;;  %v10599_v31 = vld [vmem:[%s16657_s19 + $0x8] sm:$0xff]  ;;  %v9190_v32 = vld [vmem:[%s16544_s0 + $0x38] sm:$0xff]  ;;  %v10624_v35 = vld [vmem:[%s16657_s19 + $0x20] sm:$0xff] }
  0x70   : > { %1063 = vperm.xlu2 %9449, %v1039_v7   ;;  %1066 = vperm.xlu1 %9448, %v1040_v8   ;;  %v10614_v33 = vld [vmem:[%s16657_s19 + $0x58] sm:$0xff]  ;;  %v10635_v36 = vld [vmem:[%s16657_s19 + $0x70] sm:$0xff]  ;;  %v10656_v39 = vld [vmem:[%s16657_s19 + $0x48] sm:$0xff] }
  0x71   : > { %695 = vmatpush.bf16.msra.mxu0 %v9191_v9  ;;  %9346 = vmatpush.bf16.msra.mxu3 %v9191_v9  ;;  %v10619_v34 = vld [vmem:[%s16657_s19 + $0x18] sm:$0xff]  ;;  %v10640_v37 = vld [vmem:[%s16657_s19 + $0x30] sm:$0xff]  ;;  %v10672_v41 = vld [vmem:[%s16657_s19 + $0x60] sm:$0xff] }
  0x72   : > { %9345 = vmatpush.bf16.msra.mxu2 %v9191_v9  ;;  %9344 = vmatpush.bf16.msra.mxu1 %v9191_v9  ;;  %v10645_v38 = vld [vmem:[%s16657_s19 + $0x38] sm:$0xff]  ;;  %v10661_v40 = vld [vmem:[%s16657_s19 + $0x50] sm:$0xff]  ;;  %v10677_v42 = vld [vmem:[%s16657_s19 + $0x68] sm:$0xff] }
  0x73   : > { %v10688_v43 = vld [vmem:[%s16657_s19 + $0x78] sm:$0xff]  ;;  %v10693_v44 = vld [vmem:[%s16658_s18] ss:$0 sm:$0xff] }
  0x74   : > { %8464 = vmatmul.msk.bf16.vlgmr.msra.gmra.mxu0 %vm663_vm0, %v9183_v10  ;;  %8470 = vmatmul.msk.bf16.vlgmr.msra.gmra.mxu3 %vm663_vm0, %v9189_v11 }
  0x75   : > { %8468 = vmatmul.msk.bf16.vlgmr.msra.gmra.mxu2 %vm663_vm0, %v9187_v12  ;;  %8466 = vmatmul.msk.bf16.vlgmr.msra.gmra.mxu1 %vm663_vm0, %v9185_v13 }
  0x77   : > { %1090 = vperm.xlu0 %9450, %v1048_v14  }
  0x78   : > { %1069 = vperm.xlu2 %9449, %v1041_v15   ;;  %1072 = vperm.xlu1 %9448, %v1042_v16  }
  0x7f   : > { %1099 = vperm.xlu0 %9450, %v1051_v17  }
  0x80   : > { %1075 = vperm.xlu2 %9449, %v1043_v18   ;;  %1078 = vperm.xlu1 %9448, %v1044_v19  }
  0x84   : > { %8465 = vmatmul.msk.bf16.gmra.mxu0 %vm663_vm0, %v9184_v20  ;;  %8471 = vmatmul.msk.bf16.gmra.mxu3 %vm663_vm0, %v9190_v32 }
  0x85   : > { %8467 = vmatmul.msk.bf16.gmra.mxu1 %vm663_vm0, %v9186_v21  ;;  %8469 = vmatmul.msk.bf16.gmra.mxu2 %vm663_vm0, %v9188_v22 }
  0x87   : > { %1186 = vrot.lane.b32.xlu0 %v10561_v23, %s10259_s2 }
  0x88   : > { %1084 = vperm.xlu2 %9449, %v1046_v24   ;;  %1087 = vperm.xlu1 %9448, %v1047_v25  }
  0x8f   : > { %1192 = vrot.lane.b32.xlu0 %v10576_v26, %s10259_s2 }
  0x90   : > { %1093 = vperm.xlu2 %9449, %v1049_v27   ;;  %1096 = vperm.xlu1 %9448, %v1050_v28  }
  0x97   : > { %1198 = vrot.lane.b32.xlu0 %v10589_v29, %s10259_s2 }
  0x98   : > { %1182 = vrot.lane.b32.xlu2 %v10594_v30, %s10259_s2  ;;  %1184 = vrot.lane.b32.xlu1 %v10599_v31, %s10259_s2 }
  0x9f   : > { %1204 = vrot.lane.b32.xlu0 %v10614_v33, %s10259_s2 }
  0xa0   : > { %1188 = vrot.lane.b32.xlu2 %v10619_v34, %s10259_s2  ;;  %1190 = vrot.lane.b32.xlu1 %v10624_v35, %s10259_s2 }
  0xa7   : > { %1210 = vrot.lane.b32.xlu0 %v10635_v36, %s10259_s2 }
  0xa8   : > { %1194 = vrot.lane.b32.xlu2 %v10640_v37, %s10259_s2  ;;  %1196 = vrot.lane.b32.xlu1 %v10645_v38, %s10259_s2 }
  0xaf   : > { %1232 = vrot.lane.b32.xlu0 %v10599_v31, %s10260_s14 }
  0xb0   : > { %1200 = vrot.lane.b32.xlu2 %v10656_v39, %s10259_s2  ;;  %1202 = vrot.lane.b32.xlu1 %v10661_v40, %s10259_s2 }
  0xb7   : > { %1238 = vrot.lane.b32.xlu0 %v10624_v35, %s10260_s14 }
  0xb8   : > { %1206 = vrot.lane.b32.xlu2 %v10672_v41, %s10259_s2  ;;  %1208 = vrot.lane.b32.xlu1 %v10677_v42, %s10259_s2 }
  0xc0   : > { %1212 = vrot.lane.b32.xlu2 %v10688_v43, %s10259_s2  ;;  %1230 = vrot.lane.b32.xlu1 %v10594_v30, %s10260_s14 }
  0xc2   : > { %v1058_v45 = vpop.permute.xlu2 %1057 }
  0xc3   : > { %vm1103_vm1 = vcmp.eq.s32.totalorder %v1058_v45, %v10693_v44 }
  0xc4   : > { %v1119_v47 = vsel %vm1103_vm1, 0.0, %v10261_v46  ;;  %vm1326_vm1 = vcmask 261120  }
  0xc5   : > { %1135 = vst [vmem:[#allocation2] sm:$0xff] %v1119_v47 }
  0xc8   : > { %1234 = vrot.lane.b32.xlu2 %v10561_v23, %s10260_s14  ;;  %1236 = vrot.lane.b32.xlu1 %v10619_v34, %s10260_s14 }
  0xca   : > { %v1064_v48 = vpop.permute.xlu2 %1063 }
  0xcb   : > { %vm1105_vm2 = vcmp.eq.s32.totalorder %v1064_v48, %v10693_v44 }
  0xcc   : > { %v1121_v49 = vsel %vm1105_vm2, 0.0, %v10261_v46  ;;  %vm1343_vm2 = vcmask 523264  }
  0xcd   : > { %1137 = vst [vmem:[#allocation2 + $0x18] sm:$0xff] %v1121_v49 }
  0xd0   : > { %1240 = vrot.lane.b32.xlu2 %v10576_v26, %s10260_s14  ;;  %1242 = vrot.lane.b32.xlu1 %v10640_v37, %s10260_s14 }
  0xd2   : > { %v1070_v50 = vpop.permute.xlu2 %1069 }
  0xd3   : > { %vm1107_vm3 = vcmp.eq.s32.totalorder %v1070_v50, %v10693_v44 }
  0xd4   : > { %v1123_v51 = vsel %vm1107_vm3, 0.0, %v10261_v46 }
  0xd5   : > { %1139 = vst [vmem:[#allocation2 + $0x68] sm:$0xff] %v1123_v51 }
  0xd9   : > { %v1061_v52 = vpop.permute.xlu0 %1060 }
  0xda   : > { %vm1104_vm4 = vcmp.eq.s32.totalorder %v1061_v52, %v10693_v44  ;;  %v1076_v53 = vpop.permute.xlu2 %1075  ;;  %v1055_v54 = vpop.permute.xlu1 %1054 }
  0xdb   : > { %v1120_v55 = vsel %vm1104_vm4, 0.0, %v10261_v46  ;;  %vm1109_vm5 = vcmp.eq.s32.totalorder %v1076_v53, %v10693_v44  ;;  %vm1102_vm6 = vcmp.eq.s32.totalorder %v1055_v54, %v10693_v44 }
  0xdc   : > { %1136 = vst [vmem:[#allocation2 + $0x58] sm:$0xff] %v1120_v55  ;;  %v1125_v56 = vsel %vm1109_vm5, 0.0, %v10261_v46  ;;  %v1118_v57 = vsel %vm1102_vm6, 0.0, %v10261_v46 }
  0xdd   : > { %1141 = vst [vmem:[#allocation2 + $0x48] sm:$0xff] %v1125_v56 }
  0xde   : > { %1134 = vst [vmem:[#allocation2 + $0x30] sm:$0xff] %v1118_v57 }
  0xe1   : > { %v1082_v58 = vpop.permute.xlu0 %1081 }
  0xe2   : > { %vm1111_vm7 = vcmp.eq.s32.totalorder %v1082_v58, %v10693_v44  ;;  %v1085_v59 = vpop.permute.xlu2 %1084  ;;  %v1067_v60 = vpop.permute.xlu1 %1066 }
  0xe3   : > { %v1127_v61 = vsel %vm1111_vm7, 0.0, %v10261_v46  ;;  %vm1112_vm8 = vcmp.eq.s32.totalorder %v1085_v59, %v10693_v44  ;;  %vm1106_vm9 = vcmp.eq.s32.totalorder %v1067_v60, %v10693_v44 }
  0xe4   : > { %1143 = vst [vmem:[#allocation2 + $0x20] sm:$0xff] %v1127_v61  ;;  %v1128_v62 = vsel %vm1112_vm8, 0.0, %v10261_v46  ;;  %v1122_v63 = vsel %vm1106_vm9, 0.0, %v10261_v46 }
  0xe5   : > { %1144 = vst [vmem:[#allocation2 + $0x10] sm:$0xff] %v1128_v62 }
  0xe6   : > { %1138 = vst [vmem:[#allocation2 + $0x50] sm:$0xff] %v1122_v63 }
  0xe9   : > { %v1091_v0 = vpop.permute.xlu0 %1090 }
  0xea   : > { %vm1114_vm10 = vcmp.eq.s32.totalorder %v1091_v0, %v10693_v44  ;;  %v1094_v1 = vpop.permute.xlu2 %1093  ;;  %v1073_v2 = vpop.permute.xlu1 %1072 }
  0xeb   : > { %v1130_v3 = vsel %vm1114_vm10, 0.0, %v10261_v46  ;;  %vm1115_vm11 = vcmp.eq.s32.totalorder %v1094_v1, %v10693_v44  ;;  %vm1108_vm12 = vcmp.eq.s32.totalorder %v1073_v2, %v10693_v44 }
  0xec   : > { %1146 = vst [vmem:[#allocation2 + $0x60] sm:$0xff] %v1130_v3  ;;  %v1131_v4 = vsel %vm1115_vm11, 0.0, %v10261_v46  ;;  %v1124_v5 = vsel %vm1108_vm12, 0.0, %v10261_v46 }
  0xed   : > { %1147 = vst [vmem:[#allocation2 + $0x70] sm:$0xff] %v1131_v4 }
  0xee   : > { %1140 = vst [vmem:[#allocation2 + $0x8] sm:$0xff] %v1124_v5 }
  0xf1   : > { %v10731_v6 = vpop.f32.mrf.mxu0  ;;  %v1100_v7 = vpop.permute.xlu0 %1099 }
  0xf2   : > { %vm1117_vm13 = vcmp.eq.s32.totalorder %v1100_v7, %v10693_v44  ;;  %v10734_v8 = vpop.permute.xlu2 %1182  ;;  %v1079_v9 = vpop.permute.xlu1 %1078  ;;  %v738_v10 = vmul.f32 %v10731_v6, %v10731_v6 }
  0xf3   : > { %v1133_v11 = vsel %vm1117_vm13, 0.0, %v10261_v46  ;;  %vm1110_vm14 = vcmp.eq.s32.totalorder %v1079_v9, %v10693_v44  ;;  %v10740_v12 = vpop.f32.mrf.mxu1 }
  0xf4   : > { %1149 = vst [vmem:[#allocation2 + $0x28] sm:$0xff] %v1133_v11  ;;  %v1126_v13 = vsel %vm1110_vm14, 0.0, %v10261_v46  ;;  %754 = vadd.xlane.f32.xlu0 %v738_v10  ;;  %v742_v14 = vmul.f32 %v10740_v12, %v10740_v12 }
  0xf5   : > { %1142 = vst [vmem:[#allocation2 + $0x40] sm:$0xff] %v1126_v13 }
  0xf7   : > { %v10745_v15 = vpop.f32.mrf.mxu3 }
  0xf8   : > { %v750_v16 = vmul.f32 %v10745_v15, %v10745_v15  ;;  %v10749_v17 = vpop.f32.mrf.mxu2 }
  0xf9   : > { %762 = vadd.xlane.f32.xlu2 %v742_v14  ;;  %v1187_v18 = vpop.permute.xlu0 %1186  ;;  %v10753_v21 = vpop.f32.mrf.mxu0  ;;  %v746_v24 = vmul.f32 %v10749_v17, %v10749_v17 }
  0xfa   : > { %v10751_v19 = vpop.permute.xlu2 %1188  ;;  %v1088_v20 = vpop.permute.xlu1 %1087  ;;  %v739_v47 = vmul.f32 %v10753_v21, %v10753_v21  ;;  %v1329_v10 = vsel %vm1326_vm1, %v10561_v23, %v1187_v18 }
  0xfb   : > { %vm1113_vm15 = vcmp.eq.s32.totalorder %v1088_v20, %v10693_v44  ;;  %v10772_v50 = vpop.f32.mrf.mxu1 }
  0xfc   : > { %v1129_v22 = vsel %vm1113_vm15, 0.0, %v10261_v46  ;;  %778 = vadd.xlane.f32.xlu0 %v750_v16  ;;  %v743_v53 = vmul.f32 %v10772_v50, %v10772_v50 }
  0xfd   : > { %1145 = vst [vmem:[#allocation2 + $0x38] sm:$0xff] %v1129_v22 }
  0xff   : > { %v10759_v25 = vpop.f32.mrf.mxu3 }
 0x100   : > { %v751_v27 = vmul.f32 %v10759_v25, %v10759_v25  ;;  %v10767_v48 = vpop.f32.mrf.mxu2 }
 0x101   : > { %770 = vadd.xlane.f32.xlu2 %v746_v24  ;;  %v10763_v28 = vpop.permute.xlu0 %1192  ;;  %v10770_v49 = vpop.f32.mrf.mxu0  ;;  %v747_v56 = vmul.f32 %v10767_v48, %v10767_v48 }
 0x102   : > { %v1195_v32 = vpop.permute.xlu2 %1194  ;;  %v1097_v45 = vpop.permute.xlu1 %1096  ;;  %780 = vadd.xlane.f32.xlu1 %v751_v27  ;;  %v740_v52 = vmul.f32 %v10770_v49, %v10770_v49  ;;  %v1327_v27 = vsel %vm1326_vm1, %v10594_v30, %v10734_v8 }
 0x103   : > { %vm1116_vm0 = vcmp.eq.s32.totalorder %v1097_v45, %v10693_v44  ;;  %v10789_v58 = vpop.f32.mrf.mxu1 }
 0x104   : > { %v1132_v51 = vsel %vm1116_vm0, 0.0, %v10261_v46  ;;  %756 = vadd.xlane.f32.xlu0 %v739_v47  ;;  %v744_v59 = vmul.f32 %v10789_v58, %v10789_v58 }
 0x105   : > { %1148 = vst [vmem:[#allocation2 + $0x78] sm:$0xff] %v1132_v51  ;;  %v1330_v51 = vsel %vm1326_vm1, %v10619_v34, %v10751_v19 }
 0x107   : > { %v10850_v8 = vpop.f32.mrf.mxu3 }
 0x108   : > { %v10785_v57 = vpop.f32.mrf.mxu2  ;;  %v752_v19 = vmul.f32 %v10850_v8, %v10850_v8 }
 0x109   : > { %764 = vadd.xlane.f32.xlu2 %v743_v53  ;;  %v10779_v54 = vpop.permute.xlu0 %1198  ;;  %v748_v46 = vmul.f32 %v10785_v57, %v10785_v57  ;;  %v10797_v63 = vpop.f32.mrf.mxu0 }
 0x10a   : > { %v10781_v55 = vpop.permute.xlu2 %1200  ;;  %v1185_v44 = vpop.permute.xlu1 %1184  ;;  %758 = vadd.xlane.f32.xlu1 %v740_v52  ;;  %v741_v0 = vmul.f32 %v10797_v63, %v10797_v63 }
 0x10b   : > { %v10807_v4 = vpop.f32.mrf.mxu1  ;;  %v1328_v5 = vsel %vm1326_vm1, %v10599_v31, %v1185_v44  ;;  %v1333_v44 = vsel %vm1326_vm1, %v10640_v37, %v1195_v32 }
 0x10c   : > { %772 = vadd.xlane.f32.xlu0 %v747_v56  ;;  %v745_v7 = vmul.f32 %v10807_v4, %v10807_v4 }
 0x10f   : > { %v10863_v32 = vpop.f32.mrf.mxu3 }
 0x111   : > { %v10793_v60 = vpop.permute.xlu0 %1204 }
 0x112   : > { %v10795_v61 = vpop.permute.xlu2 %1206  ;;  %v1191_v62 = vpop.permute.xlu1 %1190  ;;  %774 = vadd.xlane.f32.xlu1 %v748_v46 }
 0x113   : > { %v1331_v20 = vsel %vm1326_vm1, %v10624_v35, %v1191_v62  ;;  %v10861_v62 = vpop.f32.mrf.mxu2 }
 0x114   : > { %766 = vadd.xlane.f32.xlu0 %v744_v59  ;;  %v10262_v59 = vmov 128.0  }
 0x115   : > { %9453 = vrcp.f32 %v10262_v59 }
 0x119   : > { %v10801_v1 = vpop.permute.xlu0 %1210 }
 0x11a   : > { %v10803_v2 = vpop.permute.xlu2 %1212  ;;  %v10805_v3 = vpop.permute.xlu1 %1196  ;;  %760 = vadd.xlane.f32.xlu1 %v741_v0  ;;  %v749_v0 = vmul.f32 %v10861_v62, %v10861_v62 }
 0x121   : > { %1246 = vrot.lane.b32.xlu2 %v10589_v29, %s10260_s14  ;;  %v1233_v9 = vpop.permute.xlu0 %1232 }
 0x122   : > { %v1235_v11 = vpop.permute.xlu2 %1234  ;;  %v10817_v13 = vpop.permute.xlu1 %1202  ;;  %768 = vadd.xlane.f32.xlu1 %v745_v7  ;;  %v10820_v14 = vsel %vm1343_vm2, %v1328_v5, %v1233_v9  ;;  %v753_v5 = vmul.f32 %v10863_v32, %v10863_v32 }
 0x123   : > { %16659 = vst [vmem:[#allocation18_spill] sm:$0xff] %v10817_v13  ;;  %v10823_v16 = vsel %vm1343_vm2, %v1329_v10, %v1235_v11  ;;  %v9454_v7 = vpop.eup %9453 }
 0x124   : > { %v787_v9 = vmul.f32 128.0, %v9454_v7  ;;  %vm791_vm3 = vweird.f32 %v9454_v7 }
 0x126   : > { %v788_v10 = vsub.f32 1.0, %v787_v9 }
 0x128   : > { %1244 = vrot.lane.b32.xlu0 %v10645_v38, %s10260_s14  ;;  %v789_v11 = vmul.f32 %v9454_v7, %v788_v10 }
 0x129   : > { %v1239_v22 = vpop.permute.xlu0 %1238 }
 0x12a   : > { %v10829_v24 = vpop.permute.xlu1 %1208  ;;  %v10832_v18 = vsel %vm1343_vm2, %v1331_v20, %v1239_v22  ;;  %v790_v20 = vadd.f32 %v9454_v7, %v789_v11  ;;  %v10875_v22 = vpop.permute.xlu2 %1240 }
 0x12b   : > { %16660 = vst [vmem:[#allocation19_spill] sm:$0xff] %v10829_v24 }
 0x132   : > { %v1231_v45 = vpop.permute.xlu1 %1230 }
 0x133   : > { %v10838_v47 = vsel %vm1343_vm2, %v1327_v27, %v1231_v45  ;;  %v10877_v27 = vsel %vm791_vm3, %v9454_v7, %v790_v20 }
 0x13a   : > { %v1237_v52 = vpop.permute.xlu1 %1236 }
 0x13b   : > { %v10844_v53 = vsel %vm1343_vm2, %v1330_v51, %v1237_v52  ;;  %1248 = vrot.lane.b32.xlu1 %v10656_v39, %s10260_s14 }
 0x13c   : > { %16661 = vst [vmem:[#allocation20_spill] sm:$0xff] %v10844_v53 }
 0x142   : > { %v1243_v56 = vpop.permute.xlu1 %1242 }
 0x143   : > { %v10853_v46 = vsel %vm1343_vm2, %v1333_v44, %v1243_v56  ;;  %1254 = vrot.lane.b32.xlu1 %v10672_v41, %s10260_s14 }
 0x144   : > { %16662 = vst [vmem:[#allocation21_spill] sm:$0xff] %v10853_v46 }
 0x14a   : > { %782 = vadd.xlane.f32.xlu2 %v752_v19 }
 0x14b   : > { %1260 = vrot.lane.b32.xlu1 %v10688_v43, %s10260_s14 }
 0x152   : > { %776 = vadd.xlane.f32.xlu2 %v749_v0  ;;  %784 = vadd.xlane.f32.xlu0 %v753_v5 }
 0x153   : > { %1282 = vrot.lane.b32.xlu1 %v10561_v23, %s10263_s25 }
 0x15b   : > { %1288 = vrot.lane.b32.xlu1 %v10576_v26, %s10263_s25 }
 0x163   : > { %1294 = vrot.lane.b32.xlu1 %v10589_v29, %s10263_s25 }
 0x166   : > { %1250 = vrot.lane.b32.xlu0 %v10661_v40, %s10260_s14 }
 0x167   : > { %v755_v45 = vpop.xlane.xlu0 %754 }
 0x168   : > { %v793_v23 = vmul.f32 %v10877_v27, %v755_v45 }
 0x16a   : > { %v809_v51 = vadd.f32 1e-05, %v793_v23  ;;  %1252 = vrot.lane.b32.xlu2 %v10614_v33, %s10260_s14 }
 0x16b   : > { %1300 = vrot.lane.b32.xlu1 %v10614_v33, %s10263_s25 }
 0x16c   : > { %9455 = vrsqrt.f32 %v809_v51  ;;  %v763_v26 = vpop.xlane.xlu2 %762  ;;  %vm831_vm5 = vweird.f32 %v809_v51 }
 0x16d   : > { %v797_v29 = vmul.f32 %v10877_v27, %v763_v26 }
 0x16e   : > { %1256 = vrot.lane.b32.xlu0 %v10677_v42, %s10260_s14 }
 0x16f   : > { %v813_v52 = vadd.f32 1e-05, %v797_v29  ;;  %v779_v44 = vpop.xlane.xlu0 %778 }
 0x170   : > { %v805_v56 = vmul.f32 %v10877_v27, %v779_v44  ;;  %v10909_v44 = vld [vmem:[%s16663_s27 + $0x8] sm:$0xff] }
 0x171   : > { %9457 = vrsqrt.f32 %v813_v52  ;;  %vm871_vm7 = vweird.f32 %v813_v52 }
 0x172   : > { %v9456_v19 = vpop.eup %9455  ;;  %v10890_v59 = vadd.f32 1e-05, %v805_v56  ;;  %1258 = vrot.lane.b32.xlu2 %v10635_v36, %s10260_s14 }
 0x173   : > { %v826_v0 = vmul.f32 %v9456_v19, %v809_v51  ;;  %1306 = vrot.lane.b32.xlu1 %v10635_v36, %s10263_s25  ;;  %vm832_vm4 = vweird.f32 %v9456_v19 }
 0x174   : > { %9459 = vrsqrt.f32 %v10890_v59  ;;  %v771_v33 = vpop.xlane.xlu2 %770  ;;  %vm833_vm6 = vmor %vm831_vm5, %vm832_vm4  ;;  %vm951_vm11 = vweird.f32 %v10890_v59 }
 0x175   : > { %v827_v5 = vmul.f32 %v9456_v19, %v826_v0  ;;  %v801_v7 = vmul.f32 %v10877_v27, %v771_v33  ;;  %v781_v9 = vpop.xlane.xlu1 %780 }
 0x176   : > { %v806_v10 = vmul.f32 %v10877_v27, %v781_v9  ;;  %1278 = vrot.lane.b32.xlu0 %v10594_v30, %s10263_s25  ;;  %v10923_v9 = vld [vmem:[%s16665_s4] ss:$0 sm:$0xff] }
 0x177   : > { %v9458_v11 = vpop.eup %9457  ;;  %v828_v20 = vmul.f32 0.5, %v827_v5  ;;  %v10901_v45 = vadd.f32 1e-05, %v801_v7  ;;  %v757_v23 = vpop.xlane.xlu0 %756 }
 0x178   : > { %v866_v26 = vmul.f32 %v9458_v11, %v813_v52  ;;  %v10903_v29 = vadd.f32 1e-05, %v806_v10  ;;  %v794_v36 = vmul.f32 %v10877_v27, %v757_v23  ;;  %vm872_vm8 = vweird.f32 %v9458_v11 }
 0x179   : > { %v829_v56 = vsub.f32 1.5, %v828_v20  ;;  %9461 = vrsqrt.f32 %v10901_v45  ;;  %vm873_vm9 = vmor %vm871_vm7, %vm872_vm8  ;;  %vm911_vm13 = vweird.f32 %v10901_v45 }
 0x17a   : > { %v9460_v30 = vpop.eup %9459  ;;  %v867_v0 = vmul.f32 %v9458_v11, %v866_v26  ;;  %9463 = vrsqrt.f32 %v10903_v29  ;;  %v10913_v33 = vadd.f32 1e-05, %v794_v36  ;;  %1280 = vrot.lane.b32.xlu2 %v10599_v31, %s10263_s25  ;;  %vm961_vm14 = vweird.f32 %v10903_v29 }
 0x17b   : > { %v830_v5 = vmul.f32 %v9456_v19, %v829_v56  ;;  %v946_v7 = vmul.f32 %v9460_v30, %v10890_v59  ;;  %1427 = vrot.lane.b32.xlu1 %v10909_v44, %s10259_s2  ;;  %vm952_vm10 = vweird.f32 %v9460_v30 }
 0x17c   : > { %v868_v10 = vmul.f32 0.5, %v867_v0  ;;  %9465 = vrsqrt.f32 %v10913_v33  ;;  %v765_v20 = vpop.xlane.xlu2 %764  ;;  %vm953_vm12 = vmor %vm951_vm11, %vm952_vm10  ;;  %vm841_vm3 = vweird.f32 %v10913_v33 }
 0x17d   : > { %v834_v23 = vsel %vm833_vm6, %v9456_v19, %v830_v5  ;;  %v947_v31 = vmul.f32 %v9460_v30, %v946_v7  ;;  %v798_v51 = vmul.f32 %v10877_v27, %v765_v20  ;;  %v759_v26 = vpop.xlane.xlu1 %758 }
 0x17e   : > { %v985_v36 = vmul.f32 %v834_v23, %v10731_v6  ;;  %v869_v56 = vsub.f32 1.5, %v868_v10  ;;  %v795_v24 = vmul.f32 %v10877_v27, %v759_v26  ;;  %1284 = vrot.lane.b32.xlu0 %v10619_v34, %s10263_s25  ;;  %v10943_v10 = vld [vmem:[%s16664_s13 + $0x20] sm:$0xff] }
 0x17f   : > { %v10931_v46 = vpop.eup %9461  ;;  %v948_v0 = vmul.f32 0.5, %v947_v31  ;;  %v10933_v13 = vadd.f32 1e-05, %v798_v51  ;;  %v773_v19 = vpop.xlane.xlu0 %772 }
 0x180   : > { %v10935_v5 = vpop.eup %9463  ;;  %v1004_v7 = vmul.f32 %v10923_v9, %v985_v36  ;;  %v870_v20 = vmul.f32 %v9458_v11, %v869_v56  ;;  %v906_v6 = vmul.f32 %v10931_v46, %v10901_v45  ;;  %v10953_v36 = vadd.f32 1e-05, %v795_v24 }
 0x181   : > { %v949_v34 = vsub.f32 1.5, %v948_v0  ;;  %v956_v23 = vmul.f32 %v10935_v5, %v10903_v29  ;;  %9467 = vrsqrt.f32 %v10933_v13  ;;  %vm912_vm15 = vweird.f32 %v10931_v46 }
 0x182   : > { %v10949_v31 = vpop.eup %9465  ;;  %1020 = vst [vmem:[#allocation11] sm:$0xff] %v1004_v7  ;;  %v874_v51 = vsel %vm873_vm9, %v9458_v11, %v870_v20  ;;  %v907_v26 = vmul.f32 %v10931_v46, %v906_v6  ;;  %1286 = vrot.lane.b32.xlu2 %v10624_v35, %s10263_s25  ;;  %9469 = vrsqrt.f32 %v10953_v36  ;;  %vm962_vm0 = vweird.f32 %v10935_v5  ;;  %vm913_vm4 = vmor %vm911_vm13, %vm912_vm15 }
 0x183   : > { %v989_v52 = vmul.f32 %v874_v51, %v10740_v12  ;;  %v950_v56 = vmul.f32 %v9460_v30, %v949_v34  ;;  %v957_v0 = vmul.f32 %v10935_v5, %v956_v23  ;;  %v836_v53 = vmul.f32 %v10949_v31, %v10913_v33  ;;  %1433 = vrot.lane.b32.xlu1 %v10943_v10, %s10259_s2  ;;  %vm963_vm6 = vmor %vm961_vm14, %vm962_vm0 }
 0x184   : > { %v908_v59 = vmul.f32 0.5, %v907_v26  ;;  %v802_v34 = vmul.f32 %v10877_v27, %v773_v19  ;;  %vm842_vm5 = vweird.f32 %v10949_v31  ;;  %vm851_vm8 = vweird.f32 %v10953_v36 }
 0x185   : > { %v1008_v35 = vmul.f32 %v10923_v9, %v989_v52  ;;  %v954_v12 = vsel %vm953_vm12, %v9460_v30, %v950_v56  ;;  %v958_v24 = vmul.f32 0.5, %v957_v0  ;;  %v837_v11 = vmul.f32 %v10949_v31, %v836_v53  ;;  %v775_v7 = vpop.xlane.xlu1 %774  ;;  %vm843_vm7 = vmor %vm841_vm3, %vm842_vm5 }
 0x186   : > { %v997_v20 = vmul.f32 %v954_v12, %v10745_v15  ;;  %v909_v6 = vsub.f32 1.5, %v908_v59  ;;  %1290 = vrot.lane.b32.xlu0 %v10640_v37, %s10263_s25  ;;  %v803_v53 = vmul.f32 %v10877_v27, %v775_v7  ;;  %v10986_v37 = vld [vmem:[%s16664_s13 + $0x38] sm:$0xff]  ;;  %v10994_v59 = vadd.f32 1e-05, %v802_v34 }
 0x187   : > { %v10974_v23 = vpop.eup %9467  ;;  %1024 = vst [vmem:[#allocation11 + $0x20] sm:$0xff] %v1008_v35  ;;  %v959_v51 = vsub.f32 1.5, %v958_v24  ;;  %v838_v30 = vmul.f32 0.5, %v837_v11  ;;  %v767_v26 = vpop.xlane.xlu0 %766  ;;  %vm881_vm11 = vweird.f32 %v10933_v13 }
 0x188   : > { %v1016_v15 = vmul.f32 %v10923_v9, %v997_v20  ;;  %v910_v52 = vmul.f32 %v10931_v46, %v909_v6  ;;  %v876_v19 = vmul.f32 %v10974_v23, %v10933_v13  ;;  %v9470_v35 = vpop.eup %9469  ;;  %v11002_v45 = vadd.f32 1e-05, %v803_v53 }
 0x189   : > { %v960_v56 = vmul.f32 %v10935_v5, %v959_v51  ;;  %v839_v0 = vsub.f32 1.5, %v838_v30  ;;  %v799_v11 = vmul.f32 %v10877_v27, %v767_v26  ;;  %v846_v6 = vmul.f32 %v9470_v35, %v10953_v36 }
 0x18a   : > { %1032 = vst [vmem:[#allocation11 + $0x60] sm:$0xff] %v1016_v15  ;;  %v914_v12 = vsel %vm913_vm4, %v10931_v46, %v910_v52  ;;  %v877_v24 = vmul.f32 %v10974_v23, %v876_v19  ;;  %1292 = vrot.lane.b32.xlu2 %v10645_v38, %s10263_s25  ;;  %9471 = vrsqrt.f32 %v10994_v59  ;;  %vm882_vm9 = vweird.f32 %v10974_v23 }
 0x18b   : > { %v993_v7 = vmul.f32 %v914_v12, %v10749_v17  ;;  %v964_v20 = vsel %vm963_vm6, %v10935_v5, %v960_v56  ;;  %v840_v46 = vmul.f32 %v10949_v31, %v839_v0  ;;  %1439 = vrot.lane.b32.xlu1 %v10986_v37, %s10259_s2  ;;  %v847_v5 = vmul.f32 %v9470_v35, %v846_v6  ;;  %vm883_vm12 = vmor %vm881_vm11, %vm882_vm9 }
 0x18c   : > { %v998_v29 = vmul.f32 %v964_v20, %v10759_v25  ;;  %v878_v34 = vmul.f32 0.5, %v877_v24  ;;  %9473 = vrsqrt.f32 %v11002_v45  ;;  %vm852_vm10 = vweird.f32 %v9470_v35 }
 0x18d   : > { %v1012_v38 = vmul.f32 %v10923_v9, %v993_v7  ;;  %v844_v17 = vsel %vm843_vm7, %v10949_v31, %v840_v46  ;;  %v761_v51 = vpop.xlane.xlu1 %760  ;;  %v848_v33 = vmul.f32 0.5, %v847_v5  ;;  %v11028_v26 = vadd.f32 1e-05, %v799_v11  ;;  %vm853_vm13 = vmor %vm851_vm8, %vm852_vm10 }
 0x18e   : > { %v1017_v25 = vmul.f32 %v10923_v9, %v998_v29  ;;  %v986_v30 = vmul.f32 %v844_v17, %v10753_v21  ;;  %v879_v53 = vsub.f32 1.5, %v878_v34  ;;  %1296 = vrot.lane.b32.xlu0 %v10656_v39, %s10263_s25  ;;  %v796_v31 = vmul.f32 %v10877_v27, %v761_v51  ;;  %v11037_v21 = vld [vmem:[%s16664_s13 + $0x50] sm:$0xff] }
 0x18f   : > { %1028 = vst [vmem:[#allocation11 + $0x40] sm:$0xff] %v1012_v38  ;;  %v849_v19 = vsub.f32 1.5, %v848_v33  ;;  %9475 = vrsqrt.f32 %v11028_v26  ;;  %vm931_vm15 = vweird.f32 %v11002_v45  ;;  %vm921_vm3 = vweird.f32 %v10994_v59 }
 0x190   : > { %1033 = vst [vmem:[#allocation11 + $0x68] sm:$0xff] %v1017_v25  ;;  %v1005_v15 = vmul.f32 %v10923_v9, %v986_v30  ;;  %v880_v52 = vmul.f32 %v10974_v23, %v879_v53  ;;  %v11042_v56 = vadd.f32 1e-05, %v796_v31  ;;  %v9472_v0 = vpop.eup %9471  ;;  %vm891_vm9 = vweird.f32 %v11028_v26 }
 0x191   : > { %v850_v24 = vmul.f32 %v9470_v35, %v849_v19  ;;  %v916_v11 = vmul.f32 %v9472_v0, %v10994_v59  ;;  %vm922_vm14 = vweird.f32 %v9472_v0 }
 0x192   : > { %1021 = vst [vmem:[#allocation11 + $0x8] sm:$0xff] %v1005_v15  ;;  %v884_v12 = vsel %vm883_vm12, %v10974_v23, %v880_v52  ;;  %1298 = vrot.lane.b32.xlu2 %v10661_v40, %s10263_s25  ;;  %v9474_v7 = vpop.eup %9473  ;;  %9477 = vrsqrt.f32 %v11042_v56  ;;  %vm923_vm4 = vmor %vm921_vm3, %vm922_vm14  ;;  %vm861_vm7 = vweird.f32 %v11042_v56 }
 0x193   : > { %v990_v13 = vmul.f32 %v884_v12, %v10772_v50  ;;  %1445 = vrot.lane.b32.xlu1 %v11037_v21, %s10259_s2  ;;  %v854_v20 = vsel %vm853_vm13, %v9470_v35, %v850_v24  ;;  %v917_v46 = vmul.f32 %v9472_v0, %v916_v11  ;;  %v926_v36 = vmul.f32 %v9474_v7, %v11002_v45 }
 0x194   : > { %v987_v40 = vmul.f32 %v854_v20, %v10770_v49  ;;  %v11068_v49 = vld [vmem:[%s16664_s13 + $0x68] sm:$0xff]  ;;  %vm932_vm0 = vweird.f32 %v9474_v7 }
 0x195   : > { %v1009_v23 = vmul.f32 %v10923_v9, %v990_v13  ;;  %v769_v6 = vpop.xlane.xlu1 %768  ;;  %v9476_v29 = vpop.eup %9475  ;;  %v918_v34 = vmul.f32 0.5, %v917_v46  ;;  %v927_v38 = vmul.f32 %v9474_v7, %v926_v36  ;;  %vm933_vm5 = vmor %vm931_vm15, %vm932_vm0  ;;  %vm1360_vm15 = vcmask 785408  }
 0x196   : > { %v800_v50 = vmul.f32 %v10877_v27, %v769_v6  ;;  %1302 = vrot.lane.b32.xlu0 %v10672_v41, %s10263_s25  ;;  %v1006_v17 = vmul.f32 %v10923_v9, %v987_v40  ;;  %v886_v35 = vmul.f32 %v9476_v29, %v11028_v26  ;;  %vm892_vm6 = vweird.f32 %v9476_v29  ;;  %v11101_v40 = vld [vmem:[%s16664_s13 + $0x10] sm:$0xff] }
 0x197   : > { %1025 = vst [vmem:[#allocation11 + $0x28] sm:$0xff] %v1009_v23  ;;  %v919_v51 = vsub.f32 1.5, %v918_v34  ;;  %v928_v25 = vmul.f32 0.5, %v927_v38  ;;  %vm893_vm10 = vmor %vm891_vm9, %vm892_vm6 }
 0x198   : > { %v11063_v5 = vadd.f32 1e-05, %v800_v50  ;;  %v9478_v30 = vpop.eup %9477  ;;  %1022 = vst [vmem:[#allocation11 + $0x10] sm:$0xff] %v1006_v17  ;;  %v887_v53 = vmul.f32 %v9476_v29, %v886_v35  ;;  %v11111_v35 = vld [vmem:[%s16664_s13 + $0x18] sm:$0xff] }
 0x199   : > { %v920_v33 = vmul.f32 %v9472_v0, %v919_v51  ;;  %v929_v31 = vsub.f32 1.5, %v928_v25  ;;  %v856_v15 = vmul.f32 %v9478_v30, %v11042_v56  ;;  %vm862_vm8 = vweird.f32 %v9478_v30  ;;  %v11121_v25 = vld [vmem:[%s16664_s13 + $0x28] sm:$0xff] }
 0x19a   : > { %9479 = vrsqrt.f32 %v11063_v5  ;;  %1304 = vrot.lane.b32.xlu2 %v10677_v42, %s10263_s25  ;;  %v888_v45 = vmul.f32 0.5, %v887_v53  ;;  %vm863_vm11 = vmor %vm861_vm7, %vm862_vm8  ;;  %vm901_vm13 = vweird.f32 %v11063_v5 }
 0x19b   : > { %1451 = vrot.lane.b32.xlu1 %v11068_v49, %s10259_s2  ;;  %v924_v52 = vsel %vm923_vm4, %v9472_v0, %v920_v33  ;;  %v930_v19 = vmul.f32 %v9474_v7, %v929_v31  ;;  %v857_v59 = vmul.f32 %v9478_v30, %v856_v15  ;;  %v11136_v15 = vld [vmem:[%s16664_s13 + $0x30] sm:$0xff] }
 0x19c   : > { %v994_v12 = vmul.f32 %v924_v52, %v10767_v48  ;;  %v889_v13 = vsub.f32 1.5, %v888_v45  ;;  %v11089_v48 = vld [vmem:[%s16664_s13] sm:$0xff] }
 0x19d   : > { %v934_v42 = vsel %vm933_vm5, %v9474_v7, %v930_v19  ;;  %v858_v24 = vmul.f32 0.5, %v857_v59  ;;  %v11160_v19 = vld [vmem:[%s16664_s13 + $0x48] sm:$0xff]  ;;  %v1342_v59 = vsel %vm1326_vm1, %v10688_v43, %v10803_v2 }
 0x19e   : > { %1308 = vrot.lane.b32.xlu0 %v10688_v43, %s10263_s25  ;;  %v1013_v23 = vmul.f32 %v10923_v9, %v994_v12  ;;  %v995_v20 = vmul.f32 %v934_v42, %v10785_v57  ;;  %v890_v0 = vmul.f32 %v9476_v29, %v889_v13  ;;  %v11194_v43 = vld [vmem:[%s16664_s13 + $0x70] sm:$0xff] }
 0x19f   : > { %v859_v46 = vsub.f32 1.5, %v858_v24 }
 0x1a0   : > { %v9480_v11 = vpop.eup %9479  ;;  %1029 = vst [vmem:[#allocation11 + $0x48] sm:$0xff] %v1013_v23  ;;  %v1014_v56 = vmul.f32 %v10923_v9, %v995_v20  ;;  %v894_v36 = vsel %vm893_vm10, %v9476_v29, %v890_v0  ;;  %v11185_v23 = vld [vmem:[%s16664_s13 + $0x60] sm:$0xff] }
 0x1a1   : > { %v896_v7 = vmul.f32 %v9480_v11, %v11063_v5  ;;  %v991_v57 = vmul.f32 %v894_v36, %v10789_v58  ;;  %v860_v26 = vmul.f32 %v9478_v30, %v859_v46  ;;  %vm902_vm12 = vweird.f32 %v9480_v11 }
 0x1a2   : > { %1425 = vrot.lane.b32.xlu2 %v11089_v48, %s10259_s2  ;;  %1030 = vst [vmem:[#allocation11 + $0x50] sm:$0xff] %v1014_v56  ;;  %vm903_vm14 = vmor %vm901_vm13, %vm902_vm12  ;;  %v1336_v5 = vsel %vm1326_vm1, %v10656_v39, %v10781_v55  ;;  %v11145_v39 = vld [vmem:[%s16664_s13 + $0x40] sm:$0xff]  ;;  %v1339_v55 = vsel %vm1326_vm1, %v10672_v41, %v10795_v61  ;;  %v11169_v41 = vld [vmem:[%s16664_s13 + $0x58] sm:$0xff]  ;;  %v11171_v61 = vpop.permute.xlu0 %1244 }
 0x1a3   : > { %v897_v6 = vmul.f32 %v9480_v11, %v896_v7  ;;  %1473 = vrot.lane.b32.xlu1 %v11089_v48, %s10260_s14  ;;  %v1010_v50 = vmul.f32 %v10923_v9, %v991_v57  ;;  %v864_v29 = vsel %vm863_vm11, %v9478_v30, %v860_v26 }
 0x1a4   : > { %v988_v38 = vmul.f32 %v864_v29, %v10797_v63 }
 0x1a5   : > { %v898_v34 = vmul.f32 0.5, %v897_v6  ;;  %1026 = vst [vmem:[#allocation11 + $0x30] sm:$0xff] %v1010_v50  ;;  %v11205_v6 = vld [vmem:[%s16664_s13 + $0x78] sm:$0xff] }
 0x1a6   : > { %1429 = vrot.lane.b32.xlu0 %v11101_v40, %s10259_s2  ;;  %v1007_v17 = vmul.f32 %v10923_v9, %v988_v38 }
 0x1a7   : > { %v899_v58 = vsub.f32 1.5, %v898_v34 }
 0x1a8   : > { %1023 = vst [vmem:[#allocation11 + $0x18] sm:$0xff] %v1007_v17 }
 0x1a9   : > { %v900_v51 = vmul.f32 %v9480_v11, %v899_v58 }
 0x1aa   : > { %1431 = vrot.lane.b32.xlu2 %v11111_v35, %s10259_s2 }
 0x1ab   : > { %v904_v63 = vsel %vm903_vm14, %v9480_v11, %v900_v51  ;;  %1479 = vrot.lane.b32.xlu1 %v11111_v35, %s10260_s14 }
 0x1ac   : > { %v992_v30 = vmul.f32 %v904_v63, %v10807_v4  ;;  %v11150_v4 = vpop.permute.xlu2 %1246 }
 0x1ad   : > { %v1249_v53 = vpop.permute.xlu1 %1248 }
 0x1ae   : > { %v1011_v33 = vmul.f32 %v10923_v9, %v992_v30  ;;  %v11129_v31 = vsel %vm1343_vm2, %v1336_v5, %v1249_v53  ;;  %1435 = vrot.lane.b32.xlu0 %v11121_v25, %s10259_s2 }
 0x1b0   : > { %1027 = vst [vmem:[#allocation11 + $0x38] sm:$0xff] %v1011_v33 }
 0x1b2   : > { %1437 = vrot.lane.b32.xlu2 %v11136_v15, %s10259_s2 }
 0x1b3   : > { %1485 = vrot.lane.b32.xlu1 %v11136_v15, %s10260_s14 }
 0x1b5   : > { %v1255_v45 = vpop.permute.xlu1 %1254 }
 0x1b6   : > { %v11153_v52 = vsel %vm1343_vm2, %v1339_v55, %v1255_v45  ;;  %1441 = vrot.lane.b32.xlu0 %v11145_v39, %s10259_s2 }
 0x1ba   : > { %1443 = vrot.lane.b32.xlu2 %v11160_v19, %s10259_s2 }
 0x1bb   : > { %1491 = vrot.lane.b32.xlu1 %v11160_v19, %s10260_s14 }
 0x1bd   : > { %v783_v12 = vpop.xlane.xlu2 %782  ;;  %v1261_v13 = vpop.permute.xlu1 %1260 }
 0x1be   : > { %v807_v42 = vmul.f32 %v10877_v27, %v783_v12  ;;  %v11178_v24 = vsel %vm1343_vm2, %v1342_v59, %v1261_v13  ;;  %1447 = vrot.lane.b32.xlu0 %v11169_v41, %s10259_s2  ;;  %v9488_v12 = vld [vmem:[%s16657_s19 + $0x40] sm:$0xff] }
 0x1bf   : > { %v1335_v13 = vsel %vm1326_vm1, %v9488_v12, %v10779_v54 }
 0x1c0   : > { %v823_v11 = vadd.f32 1e-05, %v807_v42 }
 0x1c2   : > { %9481 = vrsqrt.f32 %v823_v11  ;;  %1449 = vrot.lane.b32.xlu2 %v11185_v23, %s10259_s2  ;;  %vm971_vm3 = vweird.f32 %v823_v11 }
 0x1c3   : > { %1497 = vrot.lane.b32.xlu1 %v11185_v23, %s10260_s14 }
 0x1c5   : > { %v777_v2 = vpop.xlane.xlu2 %776  ;;  %v785_v20 = vpop.xlane.xlu0 %784 }
 0x1c6   : > { %v804_v0 = vmul.f32 %v10877_v27, %v777_v2  ;;  %v808_v46 = vmul.f32 %v10877_v27, %v785_v20  ;;  %v1283_v7 = vpop.permute.xlu1 %1282  ;;  %1453 = vrot.lane.b32.xlu0 %v11194_v43, %s10259_s2  ;;  %v1352_v2 = vsel %vm1343_vm2, %v1335_v13, %v11150_v4  ;;  %v16666_v13 = vld [vmem:[#allocation20_spill] sm:$0xff] }
 0x1c7   : > { %v1363_v56 = vsel %vm1360_vm15, %v10823_v16, %v1283_v7  ;;  %v9487_v16 = vld [vmem:[%s16657_s19 + $0x28] sm:$0xff] }
 0x1c8   : > { %v9482_v36 = vpop.eup %9481  ;;  %v820_v57 = vadd.f32 1e-05, %v804_v0  ;;  %v824_v26 = vadd.f32 1e-05, %v808_v46  ;;  %1379 = vst [vmem:[#allocation3 + $0x10] sm:$0xff] %v1363_v56  ;;  %v1332_v29 = vsel %vm1326_vm1, %v9487_v16, %v10763_v28 }
 0x1c9   : > { %v966_v50 = vmul.f32 %v9482_v36, %v823_v11  ;;  %v1349_v58 = vsel %vm1343_vm2, %v1332_v29, %v10875_v22  ;;  %vm972_vm0 = vweird.f32 %v9482_v36  ;;  %v9489_v29 = vld [vmem:[%s16657_s19 + $0x58] sm:$0xff] }
 0x1ca   : > { %9483 = vrsqrt.f32 %v820_v57  ;;  %1455 = vrot.lane.b32.xlu2 %v11205_v6, %s10259_s2  ;;  %vm973_vm4 = vmor %vm971_vm3, %vm972_vm0  ;;  %vm941_vm7 = vweird.f32 %v820_v57  ;;  %vm981_vm9 = vweird.f32 %v824_v26 }
 0x1cb   : > { %v967_v27 = vmul.f32 %v9482_v36, %v966_v50  ;;  %9485 = vrsqrt.f32 %v824_v26  ;;  %1503 = vrot.lane.b32.xlu1 %v11205_v6, %s10260_s14 }
 0x1cd   : > { %v968_v34 = vmul.f32 0.5, %v967_v27  ;;  %v1253_v38 = vpop.permute.xlu2 %1252 }
 0x1ce   : > { %v1289_v17 = vpop.permute.xlu1 %1288  ;;  %1475 = vrot.lane.b32.xlu0 %v10909_v44, %s10260_s14 }
 0x1cf   : > { %v969_v51 = vsub.f32 1.5, %v968_v34  ;;  %v1366_v63 = vsel %vm1360_vm15, %v1349_v58, %v1289_v17 }
 0x1d0   : > { %v9484_v30 = vpop.eup %9483  ;;  %1382 = vst [vmem:[#allocation3 + $0x30] sm:$0xff] %v1366_v63 }
 0x1d1   : > { %v9486_v5 = vpop.eup %9485  ;;  %v970_v53 = vmul.f32 %v9482_v36, %v969_v51  ;;  %v936_v33 = vmul.f32 %v9484_v30, %v820_v57  ;;  %vm942_vm5 = vweird.f32 %v9484_v30  ;;  %v1338_v57 = vsel %vm1326_vm1, %v9489_v29, %v10793_v60 }
 0x1d2   : > { %v976_v28 = vmul.f32 %v9486_v5, %v824_v26  ;;  %1477 = vrot.lane.b32.xlu2 %v11101_v40, %s10260_s14  ;;  %vm982_vm6 = vweird.f32 %v9486_v5  ;;  %vm943_vm8 = vmor %vm941_vm7, %vm942_vm5  ;;  %v1355_v17 = vsel %vm1343_vm2, %v1338_v57, %v1253_v38 }
 0x1d3   : > { %v974_v22 = vsel %vm973_vm4, %v9482_v36, %v970_v53  ;;  %v937_v55 = vmul.f32 %v9484_v30, %v936_v33  ;;  %1525 = vrot.lane.b32.xlu1 %v11101_v40, %s10263_s25  ;;  %vm983_vm10 = vmor %vm981_vm9, %vm982_vm6 }
 0x1d4   : > { %v999_v45 = vmul.f32 %v974_v22, %v10850_v8  ;;  %v977_v59 = vmul.f32 %v9486_v5, %v976_v28 }
 0x1d5   : > { %v938_v42 = vmul.f32 0.5, %v937_v55  ;;  %v1259_v11 = vpop.permute.xlu2 %1258 }
 0x1d6   : > { %v1018_v20 = vmul.f32 %v10923_v9, %v999_v45  ;;  %v978_v0 = vmul.f32 0.5, %v977_v59  ;;  %v1295_v46 = vpop.permute.xlu1 %1294  ;;  %1481 = vrot.lane.b32.xlu0 %v10943_v10, %s10260_s14 }
 0x1d7   : > { %v939_v8 = vsub.f32 1.5, %v938_v42  ;;  %v1369_v7 = vsel %vm1360_vm15, %v1352_v2, %v1295_v46 }
 0x1d8   : > { %1034 = vst [vmem:[#allocation11 + $0x70] sm:$0xff] %v1018_v20  ;;  %v979_v56 = vsub.f32 1.5, %v978_v0  ;;  %v1251_v54 = vpop.permute.xlu0 %1250 }
 0x1d9   : > { %v940_v36 = vmul.f32 %v9484_v30, %v939_v8  ;;  %1385 = vst [vmem:[#allocation3 + $0x20] sm:$0xff] %v1369_v7  ;;  %v16668_v7 = vld [vmem:[#allocation21_spill] sm:$0xff] }
 0x1da   : > { %v980_v4 = vmul.f32 %v9486_v5, %v979_v56  ;;  %1483 = vrot.lane.b32.xlu2 %v11121_v25, %s10260_s14 }
 0x1db   : > { %v944_v50 = vsel %vm943_vm8, %v9484_v30, %v940_v36  ;;  %1531 = vrot.lane.b32.xlu1 %v11121_v25, %s10263_s25  ;;  %v16669_v36 = vld [vmem:[#allocation19_spill] sm:$0xff] }
 0x1dc   : > { %v996_v27 = vmul.f32 %v944_v50, %v10861_v62  ;;  %v984_v16 = vsel %vm983_vm10, %v9486_v5, %v980_v4 }
 0x1dd   : > { %v1000_v26 = vmul.f32 %v984_v16, %v10863_v32  ;;  %v1281_v34 = vpop.permute.xlu2 %1280 }
 0x1de   : > { %v1015_v58 = vmul.f32 %v10923_v9, %v996_v27  ;;  %v1362_v51 = vsel %vm1360_vm15, %v10820_v14, %v1281_v34  ;;  %v1301_v63 = vpop.permute.xlu1 %1300  ;;  %1487 = vrot.lane.b32.xlu0 %v10986_v37, %s10260_s14  ;;  %v9490_v14 = vld [vmem:[%s16657_s19 + $0x70] sm:$0xff] }
 0x1df   : > { %v1019_v62 = vmul.f32 %v10923_v9, %v1000_v26  ;;  %1378 = vst [vmem:[#allocation3 + $0x68] sm:$0xff] %v1362_v51  ;;  %v1372_v30 = vsel %vm1360_vm15, %v1355_v17, %v1301_v63  ;;  %v1341_v32 = vsel %vm1326_vm1, %v9490_v14, %v10801_v1  ;;  %v9491_v1 = vld [vmem:[%s16657_s19 + $0x38] sm:$0xff] }
 0x1e0   : > { %1031 = vst [vmem:[#allocation11 + $0x58] sm:$0xff] %v1015_v58  ;;  %v1257_v60 = vpop.permute.xlu0 %1256  ;;  %v1358_v38 = vsel %vm1343_vm2, %v1341_v32, %v1259_v11 }
 0x1e1   : > { %1035 = vst [vmem:[#allocation11 + $0x78] sm:$0xff] %v1019_v62 }
 0x1e2   : > { %1388 = vst [vmem:[#allocation3 + $0x58] sm:$0xff] %v1372_v30  ;;  %1489 = vrot.lane.b32.xlu2 %v11145_v39, %s10260_s14 }
 0x1e3   : > { %1537 = vrot.lane.b32.xlu1 %v11145_v39, %s10263_s25 }
 0x1e5   : > { %v1287_v9 = vpop.permute.xlu2 %1286 }
 0x1e6   : > { %v1365_v5 = vsel %vm1360_vm15, %v10832_v18, %v1287_v9  ;;  %v1307_v53 = vpop.permute.xlu1 %1306  ;;  %1493 = vrot.lane.b32.xlu0 %v11037_v21, %s10260_s14  ;;  %v1334_v18 = vsel %vm1326_vm1, %v9491_v1, %v10805_v3  ;;  %v9492_v3 = vld [vmem:[%s16657_s19 + $0x50] sm:$0xff] }
 0x1e7   : > { %1381 = vst [vmem:[#allocation3 + $0x48] sm:$0xff] %v1365_v5  ;;  %v1375_v33 = vsel %vm1360_vm15, %v1358_v38, %v1307_v53  ;;  %v1351_v55 = vsel %vm1343_vm2, %v1334_v18, %v11171_v61  ;;  %v16667_v61 = vld [vmem:[#allocation18_spill] sm:$0xff] }
 0x1e8   : > { %1391 = vst [vmem:[#allocation3 + $0x60] sm:$0xff] %v1375_v33  ;;  %v1279_v28 = vpop.permute.xlu0 %1278  ;;  %v1337_v11 = vsel %vm1326_vm1, %v9492_v3, %v16667_v61 }
 0x1e9   : > { %v1361_v22 = vsel %vm1360_vm15, %v10838_v47, %v1279_v28  ;;  %v1354_v2 = vsel %vm1343_vm2, %v1337_v11, %v1251_v54  ;;  %v9493_v54 = vld [vmem:[%s16657_s19 + $0x68] sm:$0xff] }
 0x1ea   : > { %1377 = vst [vmem:[#allocation3 + $0x28] sm:$0xff] %v1361_v22  ;;  %1495 = vrot.lane.b32.xlu2 %v11169_v41, %s10260_s14  ;;  %v1340_v4 = vsel %vm1326_vm1, %v9493_v54, %v16669_v36 }
 0x1eb   : > { %1543 = vrot.lane.b32.xlu1 %v11169_v41, %s10263_s25  ;;  %v1357_v50 = vsel %vm1343_vm2, %v1340_v4, %v1257_v60 }
 0x1ed   : > { %v1293_v45 = vpop.permute.xlu2 %1292 }
 0x1ee   : > { %v1368_v47 = vsel %vm1360_vm15, %v1351_v55, %v1293_v45  ;;  %v11285_v59 = vpop.permute.xlu1 %1427  ;;  %1499 = vrot.lane.b32.xlu0 %v11068_v49, %s10260_s14 }
 0x1ef   : > { %1384 = vst [vmem:[#allocation3 + $0x38] sm:$0xff] %v1368_v47 }
 0x1f0   : > { %v1285_v12 = vpop.permute.xlu0 %1284 }
 0x1f1   : > { %v1364_v42 = vsel %vm1360_vm15, %v16666_v13, %v1285_v12 }
 0x1f2   : > { %1380 = vst [vmem:[#allocation3 + $0x40] sm:$0xff] %v1364_v42  ;;  %1501 = vrot.lane.b32.xlu2 %v11194_v43, %s10260_s14 }
 0x1f3   : > { %1549 = vrot.lane.b32.xlu1 %v11194_v43, %s10263_s25 }
 0x1f5   : > { %v1299_v20 = vpop.permute.xlu2 %1298 }
 0x1f6   : > { %v1371_v0 = vsel %vm1360_vm15, %v1354_v2, %v1299_v20  ;;  %v11302_v46 = vpop.permute.xlu1 %1433  ;;  %1521 = vrot.lane.b32.xlu0 %v11089_v48, %s10263_s25 }
 0x1f7   : > { %1387 = vst [vmem:[#allocation3 + $0x18] sm:$0xff] %v1371_v0 }
 0x1f8   : > { %v1291_v8 = vpop.permute.xlu0 %1290 }
 0x1f9   : > { %v1367_v56 = vsel %vm1360_vm15, %v16668_v7, %v1291_v8 }
 0x1fa   : > { %1383 = vst [vmem:[#allocation3 + $0x70] sm:$0xff] %v1367_v56  ;;  %1523 = vrot.lane.b32.xlu2 %v10909_v44, %s10263_s25 }
 0x1fd   : > { %v1305_v27 = vpop.permute.xlu2 %1304 }
 0x1fe   : > { %v1374_v16 = vsel %vm1360_vm15, %v1357_v50, %v1305_v27  ;;  %v11317_v29 = vpop.permute.xlu1 %1439  ;;  %1527 = vrot.lane.b32.xlu0 %v11111_v35, %s10263_s25 }
 0x1ff   : > { %1390 = vst [vmem:[#allocation3 + $0x8] sm:$0xff] %v1374_v16 }
 0x200   : > { %v1297_v57 = vpop.permute.xlu0 %1296 }
 0x201   : > { %v1370_v26 = vsel %vm1360_vm15, %v11129_v31, %v1297_v57 }
 0x202   : > { %1386 = vst [vmem:[#allocation3 + $0x78] sm:$0xff] %v1370_v26  ;;  %1529 = vrot.lane.b32.xlu2 %v10943_v10, %s10263_s25 }
 0x205   : > { %v1426_v34 = vpop.permute.xlu2 %1425 }
 0x206   : > { %v11325_v58 = vpop.permute.xlu1 %1445  ;;  %1533 = vrot.lane.b32.xlu0 %v11136_v15, %s10263_s25 }
 0x208   : > { %v1303_v17 = vpop.permute.xlu0 %1302 }
 0x209   : > { %v1373_v51 = vsel %vm1360_vm15, %v11153_v52, %v1303_v17  ;;  %v1569_v52 = vsel %vm1326_vm1, %v11089_v48, %v1426_v34 }
 0x20a   : > { %1389 = vst [vmem:[#allocation3] sm:$0xff] %v1373_v51  ;;  %1535 = vrot.lane.b32.xlu2 %v10986_v37, %s10263_s25 }
 0x20d   : > { %v1432_v63 = vpop.permute.xlu2 %1431 }
 0x20e   : > { %v11333_v31 = vpop.permute.xlu1 %1451  ;;  %1539 = vrot.lane.b32.xlu0 %v11160_v19, %s10263_s25 }
 0x210   : > { %v1309_v62 = vpop.permute.xlu0 %1308 }
 0x211   : > { %v1376_v30 = vsel %vm1360_vm15, %v11178_v24, %v1309_v62  ;;  %v1572_v24 = vsel %vm1326_vm1, %v11111_v35, %v1432_v63 }
 0x212   : > { %1392 = vst [vmem:[#allocation3 + $0x50] sm:$0xff] %v1376_v30  ;;  %1541 = vrot.lane.b32.xlu2 %v11037_v21, %s10263_s25 }
 0x215   : > { %v1438_v60 = vpop.permute.xlu2 %1437 }
 0x216   : > { %v1474_v14 = vpop.permute.xlu1 %1473  ;;  %1545 = vrot.lane.b32.xlu0 %v11185_v23, %s10263_s25  ;;  %v1575_v33 = vsel %vm1326_vm1, %v11136_v15, %v1438_v60 }
 0x217   : > { %v11346_v32 = vsel %vm1343_vm2, %v1569_v52, %v1474_v14 }
 0x218   : > { %v1430_v9 = vpop.permute.xlu0 %1429 }
 0x219   : > { %v1571_v8 = vsel %vm1326_vm1, %v11101_v40, %v1430_v9 }
 0x21a   : > { %1547 = vrot.lane.b32.xlu2 %v11068_v49, %s10263_s25 }
 0x21d   : > { %v1444_v38 = vpop.permute.xlu2 %1443 }
 0x21e   : > { %v1480_v5 = vpop.permute.xlu1 %1479  ;;  %1551 = vrot.lane.b32.xlu0 %v11205_v6, %s10263_s25  ;;  %v1578_v35 = vsel %vm1326_vm1, %v11160_v19, %v1444_v38 }
 0x21f   : > { %v11355_v48 = vsel %vm1343_vm2, %v1572_v24, %v1480_v5 }
 0x220   : > { %v1436_v53 = vpop.permute.xlu0 %1435 }
 0x225   : > { %v1450_v28 = vpop.permute.xlu2 %1449 }
 0x226   : > { %v1486_v22 = vpop.permute.xlu1 %1485  ;;  %v1581_v13 = vsel %vm1326_vm1, %v11185_v23, %v1450_v28 }
 0x227   : > { %v11360_v1 = vsel %vm1343_vm2, %v1575_v33, %v1486_v22 }
 0x228   : > { %v1442_v18 = vpop.permute.xlu0 %1441 }
 0x229   : > { %v1577_v40 = vsel %vm1326_vm1, %v11145_v39, %v1442_v18 }
 0x22d   : > { %v1456_v55 = vpop.permute.xlu2 %1455 }
 0x22e   : > { %v1492_v45 = vpop.permute.xlu1 %1491  ;;  %v1584_v11 = vsel %vm1326_vm1, %v11205_v6, %v1456_v55  ;;  %v1574_v6 = vsel %vm1326_vm1, %v11121_v25, %v1436_v53  ;;  %v1570_v25 = vsel %vm1326_vm1, %v10909_v44, %v11285_v59  ;;  %v1573_v44 = vsel %vm1326_vm1, %v10943_v10, %v11302_v46 }
 0x22f   : > { %v11365_v47 = vsel %vm1343_vm2, %v1578_v35, %v1492_v45  ;;  %v1576_v10 = vsel %vm1326_vm1, %v10986_v37, %v11317_v29 }
 0x230   : > { %v1448_v12 = vpop.permute.xlu0 %1447 }
 0x231   : > { %v1580_v62 = vsel %vm1326_vm1, %v11169_v41, %v1448_v12 }
 0x235   : > { %v1478_v42 = vpop.permute.xlu2 %1477 }
 0x236   : > { %v1498_v15 = vpop.permute.xlu1 %1497  ;;  %v1587_v23 = vsel %vm1343_vm2, %v1571_v8, %v1478_v42 }
 0x237   : > { %v11370_v3 = vsel %vm1343_vm2, %v1581_v13, %v1498_v15 }
 0x238   : > { %v1454_v61 = vpop.permute.xlu0 %1453 }
 0x239   : > { %v1583_v41 = vsel %vm1326_vm1, %v11194_v43, %v1454_v61 }
 0x23d   : > { %v1484_v2 = vpop.permute.xlu2 %1483 }
 0x23e   : > { %v1504_v19 = vpop.permute.xlu1 %1503  ;;  %v1590_v50 = vsel %vm1343_vm2, %v1574_v6, %v1484_v2 }
 0x23f   : > { %v11375_v20 = vsel %vm1343_vm2, %v1584_v11, %v1504_v19 }
 0x240   : > { %v1476_v0 = vpop.permute.xlu0 %1475 }
 0x241   : > { %v1586_v30 = vsel %vm1343_vm2, %v1570_v25, %v1476_v0 }
 0x245   : > { %v1490_v7 = vpop.permute.xlu2 %1489 }
 0x246   : > { %v1526_v56 = vpop.permute.xlu1 %1525  ;;  %v1593_v34 = vsel %vm1343_vm2, %v1577_v40, %v1490_v7 }
 0x247   : > { %v1603_v54 = vsel %vm1360_vm15, %v1587_v23, %v1526_v56 }
 0x248   : > { %1619 = vst [vmem:[#allocation4 + $0x48] sm:$0xff] %v1603_v54  ;;  %v1482_v36 = vpop.permute.xlu0 %1481 }
 0x249   : > { %v1589_v59 = vsel %vm1343_vm2, %v1573_v44, %v1482_v36 }
 0x24d   : > { %v1496_v4 = vpop.permute.xlu2 %1495 }
 0x24e   : > { %v1532_v27 = vpop.permute.xlu1 %1531  ;;  %v1596_v39 = vsel %vm1343_vm2, %v1580_v62, %v1496_v4 }
 0x24f   : > { %v1606_v16 = vsel %vm1360_vm15, %v1590_v50, %v1532_v27 }
 0x250   : > { %1622 = vst [vmem:[#allocation4 + $0x18] sm:$0xff] %v1606_v16  ;;  %v1488_v57 = vpop.permute.xlu0 %1487 }
 0x251   : > { %v1592_v43 = vsel %vm1343_vm2, %v1576_v10, %v1488_v57 }
 0x255   : > { %v1502_v26 = vpop.permute.xlu2 %1501 }
 0x256   : > { %v1538_v17 = vpop.permute.xlu1 %1537  ;;  %v1599_v5 = vsel %vm1343_vm2, %v1583_v41, %v1502_v26 }
 0x257   : > { %v1609_v51 = vsel %vm1360_vm15, %v1593_v34, %v1538_v17 }
 0x258   : > { %1625 = vst [vmem:[#allocation4 + $0x40] sm:$0xff] %v1609_v51  ;;  %v1494_v63 = vpop.permute.xlu0 %1493 }
 0x25d   : > { %v1524_v52 = vpop.permute.xlu2 %1523 }
 0x25e   : > { %v1602_v60 = vsel %vm1360_vm15, %v1586_v30, %v1524_v52  ;;  %v1544_v14 = vpop.permute.xlu1 %1543 }
 0x25f   : > { %1618 = vst [vmem:[#allocation4] sm:$0xff] %v1602_v60  ;;  %v1612_v9 = vsel %vm1360_vm15, %v1596_v39, %v1544_v14 }
 0x260   : > { %1628 = vst [vmem:[#allocation4 + $0x20] sm:$0xff] %v1612_v9  ;;  %v1500_v24 = vpop.permute.xlu0 %1499 }
 0x265   : > { %v1530_v38 = vpop.permute.xlu2 %1529 }
 0x266   : > { %v1605_v53 = vsel %vm1360_vm15, %v1589_v59, %v1530_v38  ;;  %v1550_v33 = vpop.permute.xlu1 %1549 }
 0x267   : > { %1621 = vst [vmem:[#allocation4 + $0x68] sm:$0xff] %v1605_v53  ;;  %v1615_v28 = vsel %vm1360_vm15, %v1599_v5, %v1550_v33 }
 0x268   : > { %1631 = vst [vmem:[#allocation4 + $0x50] sm:$0xff] %v1615_v28  ;;  %v1522_v22 = vpop.permute.xlu0 %1521 }
 0x269   : > { %v1601_v18 = vsel %vm1360_vm15, %v11346_v32, %v1522_v22  ;;  %v1579_v32 = vsel %vm1326_vm1, %v11037_v21, %v11325_v58 }
 0x26a   : > { %1617 = vst [vmem:[#allocation4 + $0x8] sm:$0xff] %v1601_v18  ;;  %v1595_v12 = vsel %vm1343_vm2, %v1579_v32, %v1494_v63 }
 0x26d   : > { %v1536_v46 = vpop.permute.xlu2 %1535 }
 0x26e   : > { %v1608_v35 = vsel %vm1360_vm15, %v1592_v43, %v1536_v46 }
 0x26f   : > { %1624 = vst [vmem:[#allocation4 + $0x38] sm:$0xff] %v1608_v35 }
 0x270   : > { %v1528_v55 = vpop.permute.xlu0 %1527 }
 0x271   : > { %v1604_v45 = vsel %vm1360_vm15, %v11355_v48, %v1528_v55  ;;  %v1582_v48 = vsel %vm1326_vm1, %v11068_v49, %v11333_v31 }
 0x272   : > { %1620 = vst [vmem:[#allocation4 + $0x60] sm:$0xff] %v1604_v45  ;;  %v1598_v15 = vsel %vm1343_vm2, %v1582_v48, %v1500_v24 }
 0x275   : > { %v1542_v13 = vpop.permute.xlu2 %1541 }
 0x276   : > { %v1611_v37 = vsel %vm1360_vm15, %v1595_v12, %v1542_v13 }
 0x277   : > { %1627 = vst [vmem:[#allocation4 + $0x70] sm:$0xff] %v1611_v37 }
 0x278   : > { %v1534_v29 = vpop.permute.xlu0 %1533 }
 0x279   : > { %v1607_v42 = vsel %vm1360_vm15, %v11360_v1, %v1534_v29 }
 0x27a   : > { %1623 = vst [vmem:[#allocation4 + $0x10] sm:$0xff] %v1607_v42 }
 0x27d   : > { %v1548_v61 = vpop.permute.xlu2 %1547 }
 0x27e   : > { %v1614_v21 = vsel %vm1360_vm15, %v1598_v15, %v1548_v61 }
 0x27f   : > { %1630 = vst [vmem:[#allocation4 + $0x30] sm:$0xff] %v1614_v21 }
 0x280   : > { %v1540_v58 = vpop.permute.xlu0 %1539 }
 0x281   : > { %v1610_v11 = vsel %vm1360_vm15, %v11365_v47, %v1540_v58 }
 0x282   : > { %1626 = vst [vmem:[#allocation4 + $0x28] sm:$0xff] %v1610_v11 }
 0x288   : > { %v1546_v2 = vpop.permute.xlu0 %1545 }
 0x289   : > { %v1613_v1 = vsel %vm1360_vm15, %v11370_v3, %v1546_v2 }
 0x28a   : > { %1629 = vst [vmem:[#allocation4 + $0x58] sm:$0xff] %v1613_v1 }
 0x290   : > { %v1552_v19 = vpop.permute.xlu0 %1551 }
 0x291   : > { %v1616_v49 = vsel %vm1360_vm15, %v11375_v20, %v1552_v19 }
 0x292   : > { %1632 = vst [vmem:[#allocation4 + $0x78] sm:$0xff] %v1616_v49 }
 0x293 PF: > { %v11434_v31 = vld [vmem:[#allocation11 + $0x20] sm:$0xff]  ;;  %v11436_v0 = vld [vmem:[#allocation11 + $0x10] sm:$0xff]  ;;  %v11446_v20 = vld [vmem:[#allocation11 + $0x28] sm:$0xff]  ;;  %v10264_v38 = vmov 128.0   ;;  %s10267_s6 = smov 32   ;;  %s17281_s4 = sld [smem:[#allocation103_spill]] }
 0x294   : > { %v11438_v8 = vld [vmem:[#allocation11] sm:$0xff]  ;;  %v1654_v47 = vmul.f32 %v11434_v31, %v11434_v31  ;;  %v1652_v7 = vmul.f32 %v11436_v0, %v11436_v0  ;;  %v11448_v23 = vld [vmem:[#allocation11 + $0x18] sm:$0xff]  ;;  %v11450_v56 = vld [vmem:[#allocation11 + $0x8] sm:$0xff]  ;;  %v1655_v54 = vmul.f32 %v11446_v20, %v11446_v20  ;;  %9496 = vrcp.f32 %v10264_v38  ;;  %p9395_p10 = scmp.eq.s32.totalorder %s10360_s29, 3  ;;  %s10269_s17 = smov 128  }
 0x295   : > { %v1650_v3 = vmul.f32 %v11438_v8, %v11438_v8  ;;  %v1653_v36 = vmul.f32 %v11448_v23, %v11448_v23  ;;  %v1651_v6 = vmul.f32 %v11450_v56, %v11450_v56  ;;  %v11458_v4 = vld [vmem:[#allocation11 + $0x40] sm:$0xff]  ;;  %v11460_v50 = vld [vmem:[#allocation11 + $0x38] sm:$0xff]  ;;  %v11462_v27 = vld [vmem:[#allocation11 + $0x30] sm:$0xff]  ;;  %s10270_s18 = smov 8  }
 0x296   : > { %1674 = vadd.xlane.f32.xlu2 %v1654_v47  ;;  %1670 = vadd.xlane.f32.xlu1 %v1652_v7  ;;  %v1658_v16 = vmul.f32 %v11458_v4, %v11458_v4  ;;  %v1657_v57 = vmul.f32 %v11460_v50, %v11460_v50  ;;  %v1656_v40 = vmul.f32 %v11462_v27, %v11462_v27  ;;  %v11470_v26 = vld [vmem:[#allocation11 + $0x58] sm:$0xff]  ;;  %v11472_v34 = vld [vmem:[#allocation11 + $0x50] sm:$0xff]  ;;  %v11474_v17 = vld [vmem:[#allocation11 + $0x48] sm:$0xff] }
 0x297   : > { %1666 = vadd.xlane.f32.xlu0 %v1650_v3  ;;  %v1661_v51 = vmul.f32 %v11470_v26, %v11470_v26  ;;  %v1660_v63 = vmul.f32 %v11472_v34, %v11472_v34  ;;  %v1659_v25 = vmul.f32 %v11474_v17, %v11474_v17  ;;  %v11482_v62 = vld [vmem:[#allocation11 + $0x68] sm:$0xff]  ;;  %v11484_v30 = vld [vmem:[#allocation11 + $0x70] sm:$0xff]  ;;  %v11486_v52 = vld [vmem:[#allocation11 + $0x60] sm:$0xff] }
 0x298   : > { %v1663_v39 = vmul.f32 %v11482_v62, %v11482_v62  ;;  %v1664_v60 = vmul.f32 %v11484_v30, %v11484_v30  ;;  %v1662_v14 = vmul.f32 %v11486_v52, %v11486_v52  ;;  %v11494_v9 = vld [vmem:[#allocation11 + $0x78] sm:$0xff]  ;;  %v9231_v41 = vld [vmem:[%s10453_s20 + $0x128] sm:$0xf0]  ;;  %v8616_v53 = vld [vmem:[%s10453_s20 + $0x12c] sm:$0xf0] }
 0x299   : > { %v1665_v24 = vmul.f32 %v11494_v9, %v11494_v9  ;;  %v8614_v44 = vld [vmem:[%s10453_s20 + $0x118] sm:$0xf]  ;;  %v9229_v59 = vld [vmem:[%s10453_s20 + $0x11c] sm:$0xf]  ;;  %v8594_v28 = vld [vmem:[%s10453_s20 + $0xf0] sm:$0xf] }
 0x29a   : > { %v8615_v5 = vor.u32 %v9231_v41, %v8614_v44  ;;  %v8619_v33 = vor.u32 %v9229_v59, %v8616_v53  ;;  %v9226_v22 = vld [vmem:[%s10453_s20 + $0x100] sm:$0xf0]  ;;  %v9224_v18 = vld [vmem:[%s10453_s20 + $0xf4] sm:$0xf]  ;;  %v8596_v43 = vld [vmem:[%s10453_s20 + $0x104] sm:$0xf0]  ;;  %v9497_v46 = vpop.eup %9496 }
 0x29b   : > { %v8595_v10 = vor.u32 %v9226_v22, %v8594_v28  ;;  %v8599_v35 = vor.u32 %v9224_v18, %v8596_v43  ;;  %v8574_v55 = vld [vmem:[%s10453_s20 + $0xc8] sm:$0xf]  ;;  %v9221_v45 = vld [vmem:[%s10453_s20 + $0xd8] sm:$0xf0]  ;;  %v9219_v32 = vld [vmem:[%s10453_s20 + $0xcc] sm:$0xf]  ;;  %vm1703_vm1 = vweird.f32 %v9497_v46 }
 0x29c   : > { %2196 = vmatpush.bf16.msra.mxu0 %v8615_v5  ;;  %9347 = vmatpush.bf16.msra.mxu2 %v8615_v5  ;;  %v1699_v12 = vmul.f32 128.0, %v9497_v46  ;;  %v8575_v13 = vor.u32 %v9221_v45, %v8574_v55  ;;  %v8576_v37 = vld [vmem:[%s10453_s20 + $0xdc] sm:$0xf0]  ;;  %v9216_v61 = vld [vmem:[%s10453_s20 + $0xb0] sm:$0xf0]  ;;  %s8277_s11 = sshll.u32 %s17281_s4, 4  ;;  %s8278_s11 = int_to_ptr.hbm [resolvable:$true] %s8277_s11 }
 0x29d   : > { %2245 = vmatpush.bf16.msra.mxu1 %v8619_v33  ;;  %9355 = vmatpush.bf16.msra.mxu3 %v8619_v33  ;;  %v8579_v29 = vor.u32 %v9219_v32, %v8576_v37  ;;  %v8554_v15 = vld [vmem:[%s10453_s20 + $0xa0] sm:$0xf]  ;;  %v9214_v21 = vld [vmem:[%s10453_s20 + $0xa4] sm:$0xf]  ;;  %v8556_v11 = vld [vmem:[%s10453_s20 + $0xb4] sm:$0xf0] }
 0x29e   : > { %1676 = vadd.xlane.f32.xlu2 %v1655_v54  ;;  %1672 = vadd.xlane.f32.xlu1 %v1653_v36  ;;  %v1700_v42 = vsub.f32 1.0, %v1699_v12  ;;  %v8555_v58 = vor.u32 %v9216_v61, %v8554_v15  ;;  %v8559_v2 = vor.u32 %v9214_v21, %v8556_v11  ;;  %v8534_v19 = vld [vmem:[%s10453_s20 + $0x78] sm:$0xf]  ;;  %v9211_v49 = vld [vmem:[%s10453_s20 + $0x88] sm:$0xf0] }
 0x29f   : > { %1668 = vadd.xlane.f32.xlu0 %v1651_v6  ;;  %v9209_v47 = vld [vmem:[%s10453_s20 + $0x7c] sm:$0xf]  ;;  %v8535_v7 = vor.u32 %v9211_v49, %v8534_v19  ;;  %v8536_v3 = vld [vmem:[%s10453_s20 + $0x8c] sm:$0xf0]  ;;  %v8494_v44 = vld [vmem:[%s10453_s20 + $0x28] sm:$0xf] }
 0x2a0   : > { %2197 = vmatpush.bf16.msra.mxu0 %v8595_v10  ;;  %9348 = vmatpush.bf16.msra.mxu2 %v8595_v10  ;;  %v1701_v48 = vmul.f32 %v9497_v46, %v1700_v42  ;;  %v8539_v54 = vor.u32 %v9209_v47, %v8536_v3  ;;  %v9201_v41 = vld [vmem:[%s10453_s20 + $0x38] sm:$0xf0]  ;;  %v9199_v38 = vld [vmem:[%s10453_s20 + $0x2c] sm:$0xf]  ;;  %v8496_v5 = vld [vmem:[%s10453_s20 + $0x3c] sm:$0xf0] }
 0x2a1   : > { %2246 = vmatpush.bf16.msra.mxu1 %v8599_v35  ;;  %9356 = vmatpush.bf16.msra.mxu3 %v8599_v35  ;;  %v8495_v59 = vor.u32 %v9201_v41, %v8494_v44  ;;  %v8499_v53 = vor.u32 %v9199_v38, %v8496_v5  ;;  %v8474_v22 = vld [vmem:[%s10453_s20] sm:$0xf]  ;;  %v9196_v18 = vld [vmem:[%s10453_s20 + $0x10] sm:$0xf0]  ;;  %v9194_v10 = vld [vmem:[%s10453_s20 + $0x4] sm:$0xf] }
 0x2a2   : > { %v1702_v1 = vadd.f32 %v9497_v46, %v1701_v48  ;;  %v8475_v55 = vor.u32 %v9196_v18, %v8474_v22  ;;  %v8476_v45 = vld [vmem:[%s10453_s20 + $0x14] sm:$0xf0] }
 0x2a3   : > { %v8479_v12 = vor.u32 %v9194_v10, %v8476_v45 }
 0x2a4   : > { %2198 = vmatpush.bf16.msra.mxu0 %v8575_v13  ;;  %9349 = vmatpush.bf16.msra.mxu2 %v8575_v13  ;;  %v11518_v36 = vsel %vm1703_vm1, %v9497_v46, %v1702_v1 }
 0x2a5   : > { %2247 = vmatpush.bf16.msra.mxu1 %v8579_v29  ;;  %9357 = vmatpush.bf16.msra.mxu3 %v8579_v29  ;;  %16670 = vst [vmem:[#allocation22_spill] sm:$0xff] %v11518_v36 }
 0x2a6   : > { %1682 = vadd.xlane.f32.xlu2 %v1658_v16  ;;  %1680 = vadd.xlane.f32.xlu1 %v1657_v57  ;;  %v8514_v57 = vld [vmem:[%s10453_s20 + $0x50] sm:$0xf] }
 0x2a7   : > { %1678 = vadd.xlane.f32.xlu0 %v1656_v40  ;;  %v9206_v40 = vld [vmem:[%s10453_s20 + $0x60] sm:$0xf0] }
 0x2a8   : > { %2199 = vmatpush.bf16.msra.mxu0 %v8555_v58  ;;  %9350 = vmatpush.bf16.msra.mxu2 %v8555_v58 }
 0x2a9   : > { %2248 = vmatpush.bf16.msra.mxu1 %v8559_v2  ;;  %9358 = vmatpush.bf16.msra.mxu3 %v8559_v2 }
 0x2ac   : > { %2200 = vmatpush.bf16.msra.mxu0 %v8535_v7  ;;  %9351 = vmatpush.bf16.msra.mxu2 %v8535_v7 }
 0x2ad   : > { %2249 = vmatpush.bf16.msra.mxu1 %v8539_v54  ;;  %9359 = vmatpush.bf16.msra.mxu3 %v8539_v54 }
 0x2ae   : > { %1688 = vadd.xlane.f32.xlu2 %v1661_v51  ;;  %1686 = vadd.xlane.f32.xlu1 %v1660_v63  ;;  %v9204_v51 = vld [vmem:[%s10453_s20 + $0x54] sm:$0xf] }
 0x2af   : > { %1684 = vadd.xlane.f32.xlu0 %v1659_v25  ;;  %v8515_v25 = vor.u32 %v9206_v40, %v8514_v57 }
 0x2b1   : > { %2201 = vmatpush.bf16.msra.mxu0 %v8515_v25  ;;  %9352 = vmatpush.bf16.msra.mxu2 %v8515_v25 }
 0x2b5   : > { %2202 = vmatpush.bf16.msra.mxu0 %v8495_v59  ;;  %9353 = vmatpush.bf16.msra.mxu2 %v8495_v59 }
 0x2b6   : > { %1692 = vadd.xlane.f32.xlu1 %v1663_v39  ;;  %1694 = vadd.xlane.f32.xlu2 %v1664_v60  ;;  %v8516_v39 = vld [vmem:[%s10453_s20 + $0x64] sm:$0xf0] }
 0x2b7   : > { %1690 = vadd.xlane.f32.xlu0 %v1662_v14  ;;  %v8519_v14 = vor.u32 %v9204_v51, %v8516_v39 }
 0x2b9   : > { %2250 = vmatpush.bf16.msra.mxu1 %v8519_v14  ;;  %9360 = vmatpush.bf16.msra.mxu3 %v8519_v14 }
 0x2ba   : > { %2203 = vmatpush.bf16.msra.mxu0 %v8475_v55  ;;  %9354 = vmatpush.bf16.msra.mxu2 %v8475_v55 }
 0x2bd   : > { %2251 = vmatpush.bf16.msra.mxu1 %v8499_v53  ;;  %9361 = vmatpush.bf16.msra.mxu3 %v8499_v53 }
 0x2bf   : > { %1696 = vadd.xlane.f32.xlu0 %v1665_v24 }
 0x2c1   : > { %2252 = vmatpush.bf16.msra.mxu1 %v8479_v12  ;;  %9362 = vmatpush.bf16.msra.mxu3 %v8479_v12 }
 0x309   : > { %v1675_v6 = vpop.xlane.xlu2 %1674  ;;  %v1671_v16 = vpop.xlane.xlu1 %1670 }
 0x30a   : > { %v1667_v63 = vpop.xlane.xlu0 %1666  ;;  %v1707_v43 = vmul.f32 %v11518_v36, %v1671_v16  ;;  %v1709_v48 = vmul.f32 %v11518_v36, %v1675_v6 }
 0x30b   : > { %v1705_v60 = vmul.f32 %v11518_v36, %v1667_v63 }
 0x30c   : > { %v11541_v42 = vadd.f32 1e-05, %v1707_v43  ;;  %v11549_v2 = vadd.f32 1e-05, %v1709_v48 }
 0x30d   : > { %v11525_v24 = vadd.f32 1e-05, %v1705_v60 }
 0x30e   : > { %vm1763_vm5 = vweird.f32 %v11541_v42  ;;  %vm1783_vm8 = vweird.f32 %v11549_v2 }
 0x30f   : > { %9498 = vrsqrt.f32 %v11525_v24  ;;  %vm1743_vm12 = vweird.f32 %v11525_v24 }
 0x311   : > { %v1677_v33 = vpop.xlane.xlu2 %1676  ;;  %v1673_v28 = vpop.xlane.xlu1 %1672 }
 0x312   : > { %v1708_v46 = vmul.f32 %v11518_v36, %v1673_v28  ;;  %v1669_v35 = vpop.xlane.xlu0 %1668  ;;  %v1710_v19 = vmul.f32 %v11518_v36, %v1677_v33 }
 0x313   : > { %v1706_v32 = vmul.f32 %v11518_v36, %v1669_v35 }
 0x314   : > { %v11539_v13 = vadd.f32 1e-05, %v1708_v46  ;;  %v11557_v6 = vadd.f32 1e-05, %v1710_v19 }
 0x315   : > { %v1722_v37 = vadd.f32 1e-05, %v1706_v32  ;;  %v9499_v29 = vpop.eup %9498 }
 0x316   : > { %v1738_v15 = vmul.f32 %v9499_v29, %v11525_v24  ;;  %9500 = vrsqrt.f32 %v11539_v13  ;;  %vm1744_vm2 = vweird.f32 %v9499_v29  ;;  %v11586_v24 = vld [vmem:[%s569_s30] ss:$0 sm:$0xff]  ;;  %vm1773_vm4 = vweird.f32 %v11539_v13  ;;  %s10266_s30 = smov 96  }
 0x317   : > { %9502 = vrsqrt.f32 %v1722_v37  ;;  %vm1745_vm13 = vmor %vm1743_vm12, %vm1744_vm2  ;;  %vm1753_vm14 = vweird.f32 %v1722_v37  ;;  %vm1793_vm1 = vweird.f32 %v11557_v6 }
 0x318   : > { %v1739_v61 = vmul.f32 %v9499_v29, %v1738_v15  ;;  %9504 = vrsqrt.f32 %v11541_v42 }
 0x319   : > { %v11546_v21 = vpop.xlane.xlu2 %1682  ;;  %v1681_v58 = vpop.xlane.xlu1 %1680  ;;  %9506 = vrsqrt.f32 %v11549_v2 }
 0x31a   : > { %v1679_v11 = vpop.xlane.xlu0 %1678  ;;  %v1740_v1 = vmul.f32 0.5, %v1739_v61  ;;  %9508 = vrsqrt.f32 %v11557_v6  ;;  %v1712_v10 = vmul.f32 %v11518_v36, %v1681_v58 }
 0x31c   : > { %v11552_v49 = vpop.eup %9500  ;;  %v1741_v54 = vsub.f32 1.5, %v1740_v1  ;;  %v11594_v48 = vadd.f32 1e-05, %v1712_v10 }
 0x31d   : > { %v9503_v47 = vpop.eup %9502  ;;  %v1768_v16 = vmul.f32 %v11552_v49, %v11539_v13  ;;  %vm1774_vm0 = vweird.f32 %v11552_v49  ;;  %v9225_v13 = vld [vmem:[%s10453_s20 + $0xfc] sm:$0xf] }
 0x31e   : > { %v1748_v7 = vmul.f32 %v9503_v47, %v1722_v37  ;;  %v11555_v3 = vpop.eup %9504  ;;  %v1742_v60 = vmul.f32 %v9499_v29, %v1741_v54  ;;  %vm1754_vm11 = vweird.f32 %v9503_v47  ;;  %9510 = vrsqrt.f32 %v11594_v48  ;;  %vm11623_vm6 = vmor %vm1773_vm4, %vm1774_vm0 }
 0x31f   : > { %v1758_v25 = vmul.f32 %v11555_v3, %v11541_v42  ;;  %v11570_v14 = vpop.eup %9506  ;;  %v1769_v44 = vmul.f32 %v11552_v49, %v1768_v16  ;;  %vm1755_vm15 = vmor %vm1753_vm14, %vm1754_vm11  ;;  %vm1764_vm3 = vweird.f32 %v11555_v3 }
 0x320   : > { %v1749_v57 = vmul.f32 %v9503_v47, %v1748_v7  ;;  %v1778_v5 = vmul.f32 %v11570_v14, %v11549_v2  ;;  %v1746_v53 = vsel %vm1745_vm13, %v9499_v29, %v1742_v60  ;;  %v11577_v22 = vpop.eup %9508  ;;  %v1711_v29 = vmul.f32 %v11518_v36, %v1679_v11  ;;  %vm11628_vm7 = vmor %vm1763_vm5, %vm1764_vm3 }
 0x321   : > { %v11561_v40 = vpop.xlane.xlu2 %1688  ;;  %v11563_v51 = vpop.xlane.xlu1 %1686  ;;  %v1759_v59 = vmul.f32 %v11555_v3, %v1758_v25  ;;  %v1770_v33 = vmul.f32 0.5, %v1769_v44  ;;  %v1897_v35 = vmul.f32 %v1746_v53, %v11438_v8  ;;  %v1788_v12 = vmul.f32 %v11577_v22, %v11557_v6  ;;  %v9230_v53 = vld [vmem:[%s10453_s20 + $0x124] sm:$0xf] }
 0x322   : > { %v11565_v63 = vpop.xlane.xlu0 %1684  ;;  %v1750_v39 = vmul.f32 0.5, %v1749_v57  ;;  %v1779_v32 = vmul.f32 %v11570_v14, %v1778_v5  ;;  %v11607_v16 = vadd.f32 1e-05, %v1711_v29  ;;  %v9232_v5 = vld [vmem:[%s10453_s20 + $0x130] sm:$0xf0]  ;;  %vm1784_vm9 = vweird.f32 %v11570_v14 }
 0x323   : > { %v1760_v46 = vmul.f32 0.5, %v1759_v59  ;;  %v1916_v1 = vmul.f32 %v11586_v24, %v1897_v35  ;;  %v1789_v11 = vmul.f32 %v11577_v22, %v1788_v12  ;;  %vm11670_vm10 = vmor %vm1783_vm8, %vm1784_vm9  ;;  %vm1794_vm2 = vweird.f32 %v11577_v22 }
 0x324   : > { %v1751_v41 = vsub.f32 1.5, %v1750_v39  ;;  %v1780_v19 = vmul.f32 0.5, %v1779_v32  ;;  %vm11699_vm11 = vmor %vm1793_vm1, %vm1794_vm2  ;;  %v1714_v6 = vmul.f32 %v11518_v36, %v11565_v63 }
 0x325   : > { %v1761_v58 = vsub.f32 1.5, %v1760_v46  ;;  %v9227_v46 = vld [vmem:[%s10453_s20 + $0x108] sm:$0xf0] }
 0x326   : > { %v1752_v38 = vmul.f32 %v9503_v47, %v1751_v41  ;;  %v1781_v44 = vsub.f32 1.5, %v1780_v19  ;;  %v1790_v41 = vmul.f32 0.5, %v1789_v11 }
 0x327   : > { %v1762_v39 = vmul.f32 %v11555_v3, %v1761_v58 }
 0x328   : > { %v1756_v28 = vsel %vm1755_vm15, %v9503_v47, %v1752_v38  ;;  %v8622_v38 = vld [vmem:[%s10453_s20 + $0x120] sm:$0xf]  ;;  %v11659_v12 = vmul.f32 %v11570_v14, %v1781_v44 }
 0x329   : > { %v1898_v18 = vmul.f32 %v1756_v28, %v11450_v56  ;;  %v1693_v43 = vpop.xlane.xlu1 %1692  ;;  %v1695_v45 = vpop.xlane.xlu2 %1694  ;;  %v1771_v56 = vsub.f32 1.5, %v1770_v33  ;;  %v8624_v33 = vld [vmem:[%s10453_s20 + $0x134] sm:$0xf0]  ;;  %v1766_v28 = vsel %vm11628_vm7, %v11555_v3, %v1762_v39 }
 0x32a   : > { %v1691_v55 = vpop.xlane.xlu0 %1690  ;;  %v1718_v15 = vmul.f32 %v11518_v36, %v1693_v43  ;;  %v1719_v8 = vmul.f32 %v11518_v36, %v1695_v45  ;;  %v8602_v43 = vld [vmem:[%s10453_s20 + $0xf8] sm:$0xf]  ;;  %v8623_v45 = vor.u32 %v9232_v5, %v8622_v38  ;;  %v8627_v32 = vor.u32 %v9230_v53, %v8624_v33  ;;  %v8582_v5 = vld [vmem:[%s10453_s20 + $0xd0] sm:$0xf]  ;;  %v9222_v53 = vld [vmem:[%s10453_s20 + $0xe0] sm:$0xf0] }
 0x32b   : > { %v1917_v37 = vmul.f32 %v11586_v24, %v1898_v18  ;;  %v1717_v61 = vmul.f32 %v11518_v36, %v1691_v55  ;;  %v1772_v54 = vmul.f32 %v11552_v49, %v1771_v56  ;;  %v11644_v18 = vpop.eup %9510  ;;  %v1713_v55 = vmul.f32 %v11518_v36, %v11546_v21 }
 0x32c   : > { %v11601_v47 = vadd.f32 1e-05, %v1718_v15  ;;  %v11613_v25 = vadd.f32 1e-05, %v1719_v8  ;;  %v1899_v56 = vmul.f32 %v1766_v28, %v11436_v0  ;;  %2294 = vmatpush.bf16.msrb.mxu2 %v8623_v45  ;;  %2343 = vmatpush.bf16.msrb.mxu3 %v8627_v32  ;;  %v8603_v0 = vor.u32 %v9227_v46, %v8602_v43  ;;  %v8562_v45 = vld [vmem:[%s10453_s20 + $0xa8] sm:$0xf] }
 0x32d   : > { %v11603_v7 = vadd.f32 1e-05, %v1717_v61  ;;  %v11609_v57 = vpack.c.bf16 %v1917_v37, %v1916_v1  ;;  %v1776_v42 = vsel %vm11623_vm6, %v11552_v49, %v1772_v54  ;;  %v1791_v37 = vsub.f32 1.5, %v1790_v41  ;;  %v8604_v41 = vld [vmem:[%s10453_s20 + $0x10c] sm:$0xf0] }
 0x32e   : > { %9512 = vrsqrt.f32 %v11601_v47  ;;  %v1900_v49 = vmul.f32 %v1776_v42, %v11448_v23  ;;  %v11684_v1 = vadd.f32 1e-05, %v1713_v55  ;;  %v1786_v54 = vsel %vm11670_vm10, %v11570_v14, %v11659_v12  ;;  %v9217_v32 = vld [vmem:[%s10453_s20 + $0xb8] sm:$0xf0] }
 0x32f   : > { %2204 = vmatmul.bf16.vlgmr.msra.gmra.mxu0 %v11609_v57  ;;  %2253 = vmatmul.bf16.vlgmr.msra.gmra.mxu1 %v11609_v57  ;;  %9514 = vrsqrt.f32 %v11603_v7  ;;  %v1918_v39 = vmul.f32 %v11586_v24, %v1899_v56  ;;  %v1792_v60 = vmul.f32 %v11577_v22, %v1791_v37  ;;  %v8607_v55 = vor.u32 %v9225_v13, %v8604_v41  ;;  %v9212_v13 = vld [vmem:[%s10453_s20 + $0x90] sm:$0xf0] }
 0x330   : > { %9516 = vrsqrt.f32 %v11607_v16  ;;  %v1919_v2 = vmul.f32 %v11586_v24, %v1900_v49  ;;  %2295 = vmatpush.bf16.msrb.mxu2 %v8603_v0  ;;  %v9220_v49 = vld [vmem:[%s10453_s20 + $0xd4] sm:$0xf]  ;;  %vm1873_vm14 = vweird.f32 %v11601_v47  ;;  %v8583_v56 = vor.u32 %v9222_v53, %v8582_v5  ;;  %v9210_v53 = vld [vmem:[%s10453_s20 + $0x84] sm:$0xf] }
 0x331   : > { %9518 = vrsqrt.f32 %v11613_v25  ;;  %v1796_v12 = vsel %vm11699_vm11, %v11577_v22, %v1792_v60  ;;  %vm1863_vm0 = vweird.f32 %v11603_v7  ;;  %2344 = vmatpush.bf16.msrb.mxu3 %v8607_v55  ;;  %v8564_v60 = vld [vmem:[%s10453_s20 + $0xbc] sm:$0xf0]  ;;  %vm1883_vm4 = vweird.f32 %v11613_v25 }
 0x332   : > { %v1697_v59 = vpop.xlane.xlu0 %1696  ;;  %v11713_v28 = vpack.c.bf16 %v1919_v2, %v1918_v39  ;;  %v11739_v2 = vadd.f32 1e-05, %v1714_v6  ;;  %v1902_v41 = vmul.f32 %v1796_v12, %v11446_v20  ;;  %v8544_v6 = vld [vmem:[%s10453_s20 + $0x94] sm:$0xf0]  ;;  %vm1814_vm9 = vweird.f32 %v11644_v18 }
 0x333   : > { %v1720_v10 = vmul.f32 %v11518_v36, %v1697_v59  ;;  %v1808_v59 = vmul.f32 %v11644_v18, %v11594_v48  ;;  %vm1813_vm10 = vweird.f32 %v11594_v48 }
 0x334   : > { %v11652_v35 = vpop.eup %9512  ;;  %2296 = vmatpush.bf16.msrb.mxu2 %v8583_v56  ;;  %vm11804_vm2 = vmor %vm1813_vm10, %vm1814_vm9 }
 0x335   : > { %v11656_v3 = vpop.eup %9514  ;;  %v1868_v23 = vmul.f32 %v11652_v35, %v11601_v47  ;;  %v11682_v58 = vadd.f32 1e-05, %v1720_v10  ;;  %vm1874_vm12 = vweird.f32 %v11652_v35  ;;  %v8584_v10 = vld [vmem:[%s10453_s20 + $0xe4] sm:$0xf0]  ;;  %v1809_v37 = vmul.f32 %v11644_v18, %v1808_v59 }
 0x336   : > { %v11664_v29 = vpop.eup %9516  ;;  %v1858_v15 = vmul.f32 %v11656_v3, %v11603_v7  ;;  %vm1864_vm13 = vweird.f32 %v11656_v3  ;;  %vm1875_vm15 = vmor %vm1873_vm14, %vm1874_vm12  ;;  %v8587_v47 = vor.u32 %v9220_v49, %v8584_v10  ;;  %v9207_v49 = vld [vmem:[%s10453_s20 + $0x68] sm:$0xf0]  ;;  %v1921_v10 = vmul.f32 %v11586_v24, %v1902_v41  ;;  %v8482_v41 = vld [vmem:[%s10453_s20 + $0x8] sm:$0xf] }
 0x337   : > { %v11677_v61 = vpop.eup %9518  ;;  %v1869_v8 = vmul.f32 %v11652_v35, %v1868_v23  ;;  %v1798_v14 = vmul.f32 %v11664_v29, %v11607_v16  ;;  %9520 = vrsqrt.f32 %v11682_v58  ;;  %vm1865_vm3 = vmor %vm1863_vm0, %vm1864_vm13  ;;  %v1810_v42 = vmul.f32 0.5, %v1809_v37  ;;  %v9205_v37 = vld [vmem:[%s10453_s20 + $0x5c] sm:$0xf] }
 0x338   : > { %v1859_v19 = vmul.f32 %v11656_v3, %v1858_v15  ;;  %v1878_v11 = vmul.f32 %v11677_v61, %v11613_v25  ;;  %v8563_v15 = vor.u32 %v9217_v32, %v8562_v45  ;;  %9522 = vrsqrt.f32 %v11684_v1  ;;  %2345 = vmatpush.bf16.msrb.mxu3 %v8587_v47  ;;  %v8502_v47 = vld [vmem:[%s10453_s20 + $0x30] sm:$0xf] }
 0x339   : > { %v1870_v44 = vmul.f32 0.5, %v1869_v8  ;;  %v1799_v23 = vmul.f32 %v11664_v29, %v1798_v14  ;;  %9524 = vrsqrt.f32 %v11739_v2  ;;  %vm1884_vm5 = vweird.f32 %v11677_v61 }
 0x33a   : > { %v1860_v38 = vmul.f32 0.5, %v1859_v19  ;;  %v1879_v46 = vmul.f32 %v11677_v61, %v1878_v11  ;;  %v9215_v11 = vld [vmem:[%s10453_s20 + $0xac] sm:$0xf]  ;;  %2297 = vmatpush.bf16.msrb.mxu2 %v8563_v15  ;;  %vm1893_vm6 = vweird.f32 %v11682_v58  ;;  %vm11777_vm8 = vmor %vm1883_vm4, %vm1884_vm5  ;;  %v9202_v15 = vld [vmem:[%s10453_s20 + $0x40] sm:$0xf0]  ;;  %v1716_v25 = vmul.f32 %v11518_v36, %v11561_v40 }
 0x33b   : > { %v1871_v33 = vsub.f32 1.5, %v1870_v44  ;;  %v8542_v44 = vld [vmem:[%s10453_s20 + $0x80] sm:$0xf]  ;;  %v1800_v59 = vmul.f32 0.5, %v1799_v23  ;;  %v8567_v20 = vor.u32 %v9215_v11, %v8564_v60  ;;  %vm1804_vm11 = vweird.f32 %v11664_v29 }
 0x33c   : > { %v1861_v43 = vsub.f32 1.5, %v1860_v38  ;;  %v1880_v19 = vmul.f32 0.5, %v1879_v46  ;;  %v8543_v5 = vor.u32 %v9212_v13, %v8542_v44  ;;  %v8504_v13 = vld [vmem:[%s10453_s20 + $0x44] sm:$0xf0]  ;;  %vm1803_vm12 = vweird.f32 %v11607_v16 }
 0x33d   : > { %v1872_v63 = vmul.f32 %v11652_v35, %v1871_v33  ;;  %v11737_v0 = vpop.eup %9520  ;;  %v8522_v33 = vld [vmem:[%s10453_s20 + $0x58] sm:$0xf]  ;;  %v1801_v46 = vsub.f32 1.5, %v1800_v59  ;;  %2346 = vmatpush.bf16.msrb.mxu3 %v8567_v20  ;;  %v8610_v59 = vld [vmem:[%s10453_s20 + $0x100] sm:$0xf]  ;;  %vm11832_vm13 = vmor %vm1803_vm12, %vm1804_vm11  ;;  %vm1823_vm14 = vweird.f32 %v11684_v1  ;;  %vm1833_vm4 = vweird.f32 %v11739_v2 }
 0x33e   : > { %v1862_v21 = vmul.f32 %v11656_v3, %v1861_v43  ;;  %v1888_v39 = vmul.f32 %v11737_v0, %v11682_v58  ;;  %v1881_v38 = vsub.f32 1.5, %v1880_v19  ;;  %v1811_v43 = vsub.f32 1.5, %v1810_v42  ;;  %v11770_v45 = vpop.eup %9522  ;;  %2298 = vmatpush.bf16.msrb.mxu2 %v8543_v5  ;;  %v9197_v42 = vld [vmem:[%s10453_s20 + $0x18] sm:$0xf0]  ;;  %v9228_v20 = vld [vmem:[%s10453_s20 + $0x110] sm:$0xf0] }
 0x33f   : > { %2209 = vmatmul.bf16.gmra.mxu0 %v11713_v28  ;;  %2258 = vmatmul.bf16.gmra.mxu1 %v11713_v28  ;;  %v1876_v22 = vsel %vm1875_vm15, %v11652_v35, %v1872_v63  ;;  %vm1894_vm7 = vweird.f32 %v11737_v0  ;;  %v8547_v63 = vor.u32 %v9210_v53, %v8544_v6  ;;  %v8523_v56 = vor.u32 %v9207_v49, %v8522_v33  ;;  %v9195_v49 = vld [vmem:[%s10453_s20 + $0xc] sm:$0xf] }
 0x340   : > { %v1910_v7 = vmul.f32 %v1876_v22, %v11482_v62  ;;  %v1866_v8 = vsel %vm1865_vm3, %v11656_v3, %v1862_v21  ;;  %v1901_v3 = vmul.f32 %v1786_v54, %v11434_v31  ;;  %v1889_v14 = vmul.f32 %v11737_v0, %v1888_v39  ;;  %v8524_v22 = vld [vmem:[%s10453_s20 + $0x6c] sm:$0xf0]  ;;  %vm1895_vm1 = vmor %vm1893_vm6, %vm1894_vm7 }
 0x341   : > { %v1909_v35 = vmul.f32 %v1866_v8, %v11486_v52  ;;  %v1882_v32 = vmul.f32 %v11677_v61, %v1881_v38  ;;  %v1715_v8 = vmul.f32 %v11518_v36, %v11563_v51  ;;  %v1812_v19 = vmul.f32 %v11644_v18, %v1811_v43  ;;  %2347 = vmatpush.bf16.msrb.mxu3 %v8547_v63  ;;  %v12103_v36 = vld [vmem:[#allocation3 + $0x38] sm:$0xff] }
 0x342   : > { %v1929_v62 = vmul.f32 %v11586_v24, %v1910_v7  ;;  %v1890_v31 = vmul.f32 0.5, %v1889_v14  ;;  %v1920_v23 = vmul.f32 %v11586_v24, %v1901_v3  ;;  %v11788_v7 = vpop.eup %9524  ;;  %v1802_v11 = vmul.f32 %v11664_v29, %v1801_v46  ;;  %2299 = vmatpush.bf16.msrb.mxu2 %v8523_v56  ;;  %v9233_v3 = vld [vmem:[%s10453_s20 + $0x138] sm:$0xf0] }
 0x343   : > { %v1928_v52 = vmul.f32 %v11586_v24, %v1909_v35  ;;  %v1886_v51 = vsel %vm11777_vm8, %v11677_v61, %v1882_v32  ;;  %v8527_v58 = vor.u32 %v9205_v37, %v8524_v22  ;;  %v8503_v39 = vor.u32 %v9202_v15, %v8502_v47  ;;  %v8630_v61 = vld [vmem:[%s10453_s20 + $0x128] sm:$0xf]  ;;  %v9223_v37 = vld [vmem:[%s10453_s20 + $0xe8] sm:$0xf0]  ;;  %v8570_v22 = vld [vmem:[%s10453_s20 + $0xb0] sm:$0xf] }
 0x344   : > { %v1891_v55 = vsub.f32 1.5, %v1890_v31  ;;  %v11802_v35 = vpack.c.bf16 %v1921_v10, %v1920_v23  ;;  %v1828_v60 = vmul.f32 %v11788_v7, %v11739_v2  ;;  %v11836_v16 = vadd.f32 1e-05, %v1716_v25  ;;  %v8484_v10 = vld [vmem:[%s10453_s20 + $0x1c] sm:$0xf0] }
 0x345   : > { %v11761_v54 = vpack.c.bf16 %v1929_v62, %v1928_v52  ;;  %v1818_v62 = vmul.f32 %v11770_v45, %v11684_v1  ;;  %v1911_v14 = vmul.f32 %v1886_v51, %v11484_v30  ;;  %v8631_v38 = vor.u32 %v9233_v3, %v8630_v61  ;;  %2348 = vmatpush.bf16.msrb.mxu3 %v8527_v58  ;;  %v9218_v47 = vld [vmem:[%s10453_s20 + $0xc0] sm:$0xf0]  ;;  %v8550_v1 = vld [vmem:[%s10453_s20 + $0x88] sm:$0xf]  ;;  %v9208_v61 = vld [vmem:[%s10453_s20 + $0x70] sm:$0xf0] }
 0x346   : > { %v1892_v21 = vmul.f32 %v11737_v0, %v1891_v55  ;;  %v1806_v5 = vsel %vm11832_vm13, %v11664_v29, %v1802_v11  ;;  %v11843_v53 = vadd.f32 1e-05, %v1715_v8  ;;  %2300 = vmatpush.bf16.msrb.mxu2 %v8503_v39  ;;  %v8483_v6 = vor.u32 %v9197_v42, %v8482_v41  ;;  %v9213_v39 = vld [vmem:[%s10453_s20 + $0x98] sm:$0xf0] }
 0x347   : > { %2234 = vmatmul.bf16.vlgmr.msra.gmra.mxu2 %v11761_v54  ;;  %2283 = vmatmul.bf16.vlgmr.msra.gmra.mxu3 %v11761_v54  ;;  %v1829_v31 = vmul.f32 %v11788_v7, %v1828_v60  ;;  %v8611_v30 = vor.u32 %v9228_v20, %v8610_v59  ;;  %v1819_v43 = vmul.f32 %v11770_v45, %v1818_v62  ;;  %9526 = vrsqrt.f32 %v11836_v16  ;;  %v8530_v62 = vld [vmem:[%s10453_s20 + $0x60] sm:$0xf] }
 0x348   : > { %v1896_v48 = vsel %vm1895_vm1, %v11737_v0, %v1892_v21  ;;  %v9200_v0 = vld [vmem:[%s10453_s20 + $0x34] sm:$0xf]  ;;  %2392 = vmatpush.bf16.msrb.mxu0 %v8631_v38  ;;  %9363 = vmatpush.bf16.msrb.mxu1 %v8631_v38  ;;  %v1930_v29 = vmul.f32 %v11586_v24, %v1911_v14  ;;  %v1903_v55 = vmul.f32 %v1806_v5, %v11462_v27  ;;  %9528 = vrsqrt.f32 %v11843_v53  ;;  %v9203_v38 = vld [vmem:[%s10453_s20 + $0x48] sm:$0xf0] }
 0x349   : > { %v1912_v44 = vmul.f32 %v1896_v48, %v11494_v9  ;;  %v1816_v9 = vsel %vm11804_vm2, %v11644_v18, %v1812_v19  ;;  %v8507_v18 = vor.u32 %v9200_v0, %v8504_v13  ;;  %v8487_v32 = vor.u32 %v9195_v49, %v8484_v10 }
 0x34a   : > { %v1904_v46 = vmul.f32 %v1816_v9, %v11460_v50  ;;  %2301 = vmatpush.bf16.msrb.mxu2 %v8483_v6  ;;  %v1830_v12 = vmul.f32 0.5, %v1829_v31  ;;  %v1820_v56 = vmul.f32 0.5, %v1819_v43  ;;  %v8590_v50 = vld [vmem:[%s10453_s20 + $0xd8] sm:$0xf]  ;;  %v1922_v23 = vmul.f32 %v11586_v24, %v1903_v55  ;;  %v9198_v6 = vld [vmem:[%s10453_s20 + $0x20] sm:$0xf0] }
 0x34b   : > { %v1931_v33 = vmul.f32 %v11586_v24, %v1912_v44  ;;  %2349 = vmatpush.bf16.msrb.mxu3 %v8507_v18  ;;  %v8591_v21 = vor.u32 %v9223_v37, %v8590_v50  ;;  %v8571_v11 = vor.u32 %v9218_v47, %v8570_v22  ;;  %vm1824_vm15 = vweird.f32 %v11770_v45 }
 0x34c   : > { %2393 = vmatpush.bf16.msrb.mxu0 %v8611_v30  ;;  %9364 = vmatpush.bf16.msrb.mxu1 %v8611_v30  ;;  %v1923_v27 = vmul.f32 %v11586_v24, %v1904_v46  ;;  %v1831_v25 = vsub.f32 1.5, %v1830_v12  ;;  %v1821_v19 = vsub.f32 1.5, %v1820_v56  ;;  %vm1834_vm0 = vweird.f32 %v11788_v7  ;;  %vm11884_vm3 = vmor %vm1823_vm14, %vm1824_vm15  ;;  %v11933_v56 = vld [vmem:[#allocation3 + $0x10] sm:$0xff] }
 0x34d   : > { %v11855_v63 = vpack.c.bf16 %v1931_v33, %v1930_v29  ;;  %v11865_v15 = vpop.eup %9526  ;;  %v8551_v44 = vor.u32 %v9213_v39, %v8550_v1  ;;  %vm1835_vm5 = vmor %vm1833_vm4, %vm1834_vm0  ;;  %v8531_v59 = vor.u32 %v9208_v61, %v8530_v62  ;;  %vm1853_vm6 = vweird.f32 %v11836_v16  ;;  %v11994_v61 = vld [vmem:[#allocation4 + $0x8] sm:$0xff] }
 0x34e   : > { %v11867_v8 = vpop.eup %9528  ;;  %v11871_v48 = vpack.c.bf16 %v1923_v27, %v1922_v23  ;;  %v1848_v40 = vmul.f32 %v11865_v15, %v11836_v16  ;;  %v1832_v58 = vmul.f32 %v11788_v7, %v1831_v25  ;;  %v1822_v0 = vmul.f32 %v11770_v45, %v1821_v19  ;;  %v11948_v23 = vld [vmem:[#allocation3] sm:$0xff] }
 0x34f   : > { %2214 = vmatmul.bf16.gmra.mxu0 %v11802_v35  ;;  %2263 = vmatmul.bf16.gmra.mxu1 %v11802_v35  ;;  %v1838_v51 = vmul.f32 %v11867_v8, %v11843_v53  ;;  %vm1854_vm7 = vweird.f32 %v11865_v15  ;;  %vm1844_vm8 = vweird.f32 %v11867_v8  ;;  %vm1843_vm10 = vweird.f32 %v11843_v53 }
 0x350   : > { %2350 = vmatpush.bf16.msrb.mxu3 %v8487_v32  ;;  %2394 = vmatpush.bf16.msrb.mxu0 %v8591_v21  ;;  %v1849_v13 = vmul.f32 %v11865_v15, %v1848_v40  ;;  %v1836_v42 = vsel %vm1835_vm5, %v11788_v7, %v1832_v58  ;;  %v1826_v3 = vsel %vm11884_vm3, %v11770_v45, %v1822_v0  ;;  %v8510_v7 = vld [vmem:[%s10453_s20 + $0x38] sm:$0xf]  ;;  %vm1855_vm9 = vmor %vm1853_vm6, %vm1854_vm7  ;;  %v11974_v58 = vld [vmem:[#allocation3 + $0x70] sm:$0xff]  ;;  %vm3017_vm2 = vcmask 261120  }
 0x351   : > { %9365 = vmatpush.bf16.msrb.mxu1 %v8591_v21  ;;  %v1839_v41 = vmul.f32 %v11867_v8, %v1838_v51  ;;  %v1906_v2 = vmul.f32 %v1836_v42, %v11474_v17  ;;  %v1905_v14 = vmul.f32 %v1826_v3, %v11458_v4  ;;  %v8511_v45 = vor.u32 %v9203_v38, %v8510_v7  ;;  %v8490_v17 = vld [vmem:[%s10453_s20 + $0x10] sm:$0xf]  ;;  %vm1845_vm1 = vmor %vm1843_vm10, %vm1844_vm8  ;;  %v11950_v21 = vld [vmem:[#allocation3 + $0x48] sm:$0xff]  ;;  %s10265_s20 = smov 64  }
 0x352   : > { %v1850_v9 = vmul.f32 0.5, %v1849_v13  ;;  %v8491_v33 = vor.u32 %v9198_v6, %v8490_v17  ;;  %v11972_v51 = vld [vmem:[#allocation3 + $0x60] sm:$0xff] }
 0x353   : > { %v1840_v52 = vmul.f32 0.5, %v1839_v41  ;;  %v1925_v20 = vmul.f32 %v11586_v24, %v1906_v2  ;;  %v1924_v31 = vmul.f32 %v11586_v24, %v1905_v14 }
 0x354   : > { %2395 = vmatpush.bf16.msrb.mxu0 %v8571_v11  ;;  %v1851_v5 = vsub.f32 1.5, %v1850_v9 }
 0x355   : > { %9366 = vmatpush.bf16.msrb.mxu1 %v8571_v11  ;;  %v1841_v18 = vsub.f32 1.5, %v1840_v52  ;;  %v1936_v4 = vpack.c.bf16 %v1925_v20, %v1924_v31  ;;  %v12003_v20 = vld [vmem:[#allocation3 + $0x68] sm:$0xff] }
 0x356   : > { %v1852_v49 = vmul.f32 %v11865_v15, %v1851_v5 }
 0x357   : > { %2239 = vmatmul.bf16.gmra.mxu2 %v11855_v63  ;;  %2288 = vmatmul.bf16.gmra.mxu3 %v11855_v63  ;;  %v1842_v10 = vmul.f32 %v11867_v8, %v1841_v18 }
 0x358   : > { %2396 = vmatpush.bf16.msrb.mxu0 %v8551_v44  ;;  %v1856_v16 = vsel %vm1855_vm9, %v11865_v15, %v1852_v49 }
 0x359   : > { %9367 = vmatpush.bf16.msrb.mxu1 %v8551_v44  ;;  %v1846_v30 = vsel %vm1845_vm1, %v11867_v8, %v1842_v10  ;;  %v1908_v43 = vmul.f32 %v1856_v16, %v11470_v26  ;;  %v2441_v26 = vld [vmem:[#allocation3 + $0x28] sm:$0xff] }
 0x35a   : > { %v1907_v29 = vmul.f32 %v1846_v30, %v11472_v34  ;;  %v12017_v10 = vld [vmem:[#allocation4 + $0x48] sm:$0xff] }
 0x35b   : > { %v1927_v46 = vmul.f32 %v11586_v24, %v1908_v43 }
 0x35c   : > { %2397 = vmatpush.bf16.msrb.mxu0 %v8531_v59  ;;  %v1926_v55 = vmul.f32 %v11586_v24, %v1907_v29 }
 0x35d   : > { %9368 = vmatpush.bf16.msrb.mxu1 %v8531_v59 }
 0x35e   : > { %v1937_v53 = vpack.c.bf16 %v1927_v46, %v1926_v55 }
 0x35f   : > { %2219 = vmatmul.bf16.gmra.mxu0 %v11871_v48  ;;  %2268 = vmatmul.bf16.gmra.mxu1 %v11871_v48 }
 0x360   : > { %2398 = vmatpush.bf16.msrb.mxu0 %v8511_v45 }
 0x361   : > { %9369 = vmatpush.bf16.msrb.mxu1 %v8511_v45  ;;  %v12005_v45 = vld [vmem:[#allocation4] sm:$0xff] }
 0x364   : > { %2399 = vmatpush.bf16.msrb.mxu0 %v8491_v33 }
 0x365   : > { %9370 = vmatpush.bf16.msrb.mxu1 %v8491_v33 }
 0x367   : > { %2302 = vmatmul.bf16.vlgmr.msrb.gmra.mxu2 %v11609_v57  ;;  %2351 = vmatmul.bf16.vlgmr.msrb.gmra.mxu3 %v11609_v57 }
 0x36f   : > { %2224 = vmatmul.bf16.gmra.mxu0 %v1936_v4  ;;  %2273 = vmatmul.bf16.gmra.mxu1 %v1936_v4 }
 0x377   : > { %2307 = vmatmul.bf16.gmra.mxu2 %v11713_v28  ;;  %2356 = vmatmul.bf16.gmra.mxu3 %v11713_v28 }
 0x37f   : > { %2229 = vmatmul.bf16.gmra.mxu0 %v1937_v53  ;;  %2278 = vmatmul.bf16.gmra.mxu1 %v1937_v53 }
 0x387   : > { %2312 = vmatmul.bf16.gmra.mxu2 %v11802_v35  ;;  %2361 = vmatmul.bf16.gmra.mxu3 %v11802_v35 }
 0x38f   : > { %2400 = vmatmul.bf16.vlgmr.msrb.gmra.mxu0 %v11609_v57  ;;  %2420 = vmatmul.bf16.vlgmr.msrb.gmra.mxu1 %v1936_v4 }
 0x397   : > { %2317 = vmatmul.bf16.gmra.mxu2 %v11871_v48  ;;  %2366 = vmatmul.bf16.gmra.mxu3 %v11871_v48 }
 0x39f   : > { %2405 = vmatmul.bf16.gmra.mxu0 %v11713_v28  ;;  %2425 = vmatmul.bf16.gmra.mxu1 %v1937_v53 }
 0x3a7   : > { %2322 = vmatmul.bf16.gmra.mxu2 %v1936_v4  ;;  %2371 = vmatmul.bf16.gmra.mxu3 %v1936_v4 }
 0x3ac   : > { %v2205_v34 = vpop.f32.mrf.mxu0  ;;  %v2254_v24 = vpop.f32.mrf.mxu1 }
 0x3ad   : > { %v11927_v32 = vmul.f32 %v2441_v26, %v2254_v24  ;;  %v2473_v59 = vmul.f32 %v2441_v26, %v2205_v34 }
 0x3af   : > { %2410 = vmatmul.bf16.gmra.mxu0 %v11802_v35  ;;  %2430 = vmatmul.bf16.gmra.mxu1 %v11761_v54 }
 0x3b4   : > { %v2207_v57 = vpop.f32.mrf.mxu0  ;;  %v11931_v12 = vpop.f32.mrf.mxu1 }
 0x3b5   : > { %v2474_v17 = vmul.f32 %v12003_v20, %v2207_v57 }
 0x3b7   : > { %2327 = vmatmul.bf16.gmra.mxu2 %v1937_v53  ;;  %2376 = vmatmul.bf16.gmra.mxu3 %v1937_v53 }
 0x3bc   : > { %v11935_v28 = vpop.f32.mrf.mxu0  ;;  %v2259_v50 = vpop.f32.mrf.mxu1 }
 0x3bd   : > { %v11938_v37 = vmul.f32 %v11933_v56, %v2259_v50  ;;  %v2475_v46 = vmul.f32 %v11933_v56, %v11935_v28  ;;  %v12032_v50 = vld [vmem:[#allocation3 + $0x40] sm:$0xff] }
 0x3bf   : > { %2415 = vmatmul.bf16.gmra.mxu0 %v11871_v48  ;;  %2435 = vmatmul.bf16.gmra.mxu1 %v11855_v63 }
 0x3c4   : > { %v11942_v35 = vpop.f32.mrf.mxu0  ;;  %v11944_v27 = vpop.f32.mrf.mxu1 }
 0x3c7   : > { %2332 = vmatmul.bf16.gmra.mxu2 %v11761_v54  ;;  %2381 = vmatmul.bf16.gmra.mxu3 %v11761_v54 }
 0x3ca   : > { %v2235_v22 = vpop.f32.mrf.mxu2  ;;  %v11952_v47 = vpop.f32.mrf.mxu3 }
 0x3cb   : > { %v11955_v15 = vmul.f32 %v11948_v23, %v2235_v22  ;;  %v12034_v22 = vld [vmem:[#allocation4 + $0x60] sm:$0xff] }
 0x3cc   : > { %v11957_v25 = vpop.f32.mrf.mxu0  ;;  %v2264_v8 = vpop.f32.mrf.mxu1 }
 0x3cd   : > { %v11960_v19 = vmul.f32 %v11950_v21, %v2264_v8  ;;  %v2476_v8 = vmul.f32 %v12032_v50, %v11942_v35 }
 0x3d2   : > { %v11962_v11 = vpop.f32.mrf.mxu2  ;;  %v11964_v48 = vpop.f32.mrf.mxu3 }
 0x3d4   : > { %v11966_v54 = vpop.f32.mrf.mxu0  ;;  %v11968_v40 = vpop.f32.mrf.mxu1 }
 0x3d7   : > { %2337 = vmatmul.bf16.gmra.mxu2 %v11855_v63  ;;  %2386 = vmatmul.bf16.gmra.mxu3 %v11855_v63 }
 0x3da   : > { %v2240_v1 = vpop.f32.mrf.mxu2  ;;  %v11976_v39 = vpop.f32.mrf.mxu3 }
 0x3db   : > { %v11979_v0 = vmul.f32 %v11972_v51, %v2240_v1 }
 0x3dc   : > { %v11981_v60 = vpop.f32.mrf.mxu0  ;;  %v2269_v44 = vpop.f32.mrf.mxu1 }
 0x3dd   : > { %v11984_v13 = vmul.f32 %v11974_v58, %v2269_v44 }
 0x3e2   : > { %v11986_v41 = vpop.f32.mrf.mxu2  ;;  %v11988_v42 = vpop.f32.mrf.mxu3 }
 0x3e4   : > { %v11990_v63 = vpop.f32.mrf.mxu0  ;;  %v11992_v62 = vpop.f32.mrf.mxu1 }
 0x3ea   : > { %v11996_v3 = vpop.f32.mrf.mxu2  ;;  %v2352_v2 = vpop.f32.mrf.mxu3 }
 0x3eb   : > { %16687 = vst [vmem:[#allocation23_spill] sm:$0xff] %v11996_v3  ;;  %v2489_v9 = vmul.f32 %v11994_v61, %v2352_v2  ;;  %v2469_v3 = vld [vmem:[#allocation4 + $0x58] sm:$0xff] }
 0x3ec   : > { %v11999_v52 = vpop.f32.mrf.mxu0  ;;  %v12001_v14 = vpop.f32.mrf.mxu1 }
 0x3ed   : > { %v2505_v7 = vadd.f32 %v2489_v9, %v2473_v59 }
 0x3ef   : > { %v2569_v38 = vpack.c.bf16 %v2505_v7, %v2505_v7  ;;  %v12048_v7 = vld [vmem:[#allocation4 + $0x68] sm:$0xff] }
 0x3f1   : > { %2633 = vrot.lane.b32.xlu1 %v2569_v38, %s10265_s20  ;;  %2601 = vrot.lane.b32.xlu0 %v2569_v38, %s10266_s30  ;;  %v2969_v16 = vunpack.c.l.b16 %v2569_v38 }
 0x3f2   : > { %v12009_v5 = vpop.f32.mrf.mxu2  ;;  %v2354_v18 = vpop.f32.mrf.mxu3 }
 0x3f3   : > { %16688 = vst [vmem:[#allocation24_spill] sm:$0xff] %v12009_v5  ;;  %v2490_v6 = vmul.f32 %v12005_v45, %v2354_v18 }
 0x3f4   : > { %v12013_v31 = vpop.f32.mrf.mxu0  ;;  %v12015_v4 = vpop.f32.mrf.mxu1 }
 0x3f5   : > { %v2506_v33 = vadd.f32 %v2490_v6, %v2474_v17  ;;  %v2477_v6 = vmul.f32 %v11950_v21, %v11957_v25 }
 0x3f7   : > { %v2570_v49 = vpack.c.bf16 %v2506_v33, %v2506_v33 }
 0x3f9   : > { %v2970_v30 = vunpack.c.l.b16 %v2570_v49  ;;  %2665 = vrot.lane.b32.xlu0 %v2569_v38, %s10267_s6  ;;  %2603 = vrot.lane.b32.xlu2 %v2570_v49, %s10266_s30 }
 0x3fa   : > { %v12021_v43 = vpop.f32.mrf.mxu2  ;;  %v2357_v29 = vpop.f32.mrf.mxu3 }
 0x3fb   : > { %16689 = vst [vmem:[#allocation25_spill] sm:$0xff] %v12021_v43  ;;  %v2491_v55 = vmul.f32 %v12017_v10, %v2357_v29  ;;  %v12030_v34 = vpack.c.b16 %v2970_v30, %v2969_v16 }
 0x3fc   : > { %v12026_v53 = vpop.f32.mrf.mxu0  ;;  %v12028_v26 = vpop.f32.mrf.mxu1 }
 0x3fd   : > { %v2507_v24 = vadd.f32 %v2491_v55, %v2475_v46 }
 0x3ff   : > { %v2571_v57 = vpack.c.bf16 %v2507_v24, %v2507_v24 }
 0x401   : > { %2635 = vrot.lane.b32.xlu0 %v2570_v49, %s10265_s20  ;;  %2667 = vrot.lane.b32.xlu2 %v2570_v49, %s10267_s6  ;;  %v2971_v38 = vunpack.c.l.b16 %v2571_v57 }
 0x402   : > { %2605 = vrot.lane.b32.xlu1 %v2571_v57, %s10266_s30  ;;  %v12039_v56 = vpop.f32.mrf.mxu2  ;;  %v2359_v28 = vpop.f32.mrf.mxu3 }
 0x403   : > { %16690 = vst [vmem:[#allocation26_spill] sm:$0xff] %v12039_v56  ;;  %v2492_v1 = vmul.f32 %v12034_v22, %v2359_v28  ;;  %v12066_v28 = vld [vmem:[#allocation4 + $0x18] sm:$0xff]  ;;  %v12200_v56 = vld [vmem:[#allocation4 + $0x20] sm:$0xff] }
 0x404   : > { %v12044_v44 = vpop.f32.mrf.mxu0  ;;  %v12046_v2 = vpop.f32.mrf.mxu1 }
 0x405   : > { %v2508_v59 = vadd.f32 %v2492_v1, %v2476_v8 }
 0x407   : > { %v2572_v9 = vpack.c.bf16 %v2508_v59, %v2508_v59  ;;  %v2522_v59 = vmul.f32 %v12003_v20, %v11931_v12 }
 0x409   : > { %2669 = vrot.lane.b32.xlu0 %v2571_v57, %s10267_s6  ;;  %2637 = vrot.lane.b32.xlu2 %v2571_v57, %s10265_s20  ;;  %v2972_v18 = vunpack.c.l.b16 %v2572_v9  ;;  %v12064_v57 = vld [vmem:[#allocation3 + $0x30] sm:$0xff] }
 0x40a   : > { %2639 = vrot.lane.b32.xlu1 %v2572_v9, %s10265_s20  ;;  %v12053_v17 = vpop.f32.mrf.mxu2  ;;  %v2362_v35 = vpop.f32.mrf.mxu3 }
 0x40b   : > { %v2493_v33 = vmul.f32 %v12048_v7, %v2362_v35  ;;  %v12060_v30 = vpack.c.b16 %v2972_v18, %v2971_v38 }
 0x40c   : > { %v2401_v49 = vpop.f32.mrf.mxu0  ;;  %v12058_v16 = vpop.f32.mrf.mxu1 }
 0x40d   : > { %16691 = vst [vmem:[#allocation27_spill] sm:$0xff] %v12060_v30  ;;  %v2537_v29 = vmul.f32 %v11994_v61, %v2401_v49  ;;  %v2509_v46 = vadd.f32 %v2493_v33, %v2477_v6  ;;  %v2478_v61 = vmul.f32 %v12064_v57, %v11966_v54  ;;  %v12085_v49 = vld [vmem:[#allocation4 + $0x10] sm:$0xff]  ;;  %v12105_v30 = vld [vmem:[#allocation4 + $0x38] sm:$0xff] }
 0x40f   : > { %v2553_v55 = vadd.f32 %v2537_v29, %v11927_v32  ;;  %v2573_v24 = vpack.c.bf16 %v2509_v46, %v2509_v46 }
 0x411   : > { %2671 = vrot.lane.b32.xlu2 %v2572_v9, %s10267_s6  ;;  %2607 = vrot.lane.b32.xlu0 %v2572_v9, %s10266_s30  ;;  %v12081_v9 = vpack.c.bf16 %v2553_v55, %v2553_v55  ;;  %v2973_v54 = vunpack.c.l.b16 %v2573_v24  ;;  %v2479_v55 = vmul.f32 %v11974_v58, %v11981_v60  ;;  %v2480_v60 = vmul.f32 %v12103_v36, %v11990_v63 }
 0x412   : > { %2609 = vrot.lane.b32.xlu1 %v2573_v24, %s10266_s30  ;;  %v12071_v21 = vpop.f32.mrf.mxu2  ;;  %v2364_v25 = vpop.f32.mrf.mxu3 }
 0x413   : > { %v2494_v8 = vmul.f32 %v12066_v28, %v2364_v25 }
 0x414   : > { %v2403_v32 = vpop.f32.mrf.mxu0  ;;  %v12076_v1 = vpop.f32.mrf.mxu1 }
 0x415   : > { %v2538_v38 = vmul.f32 %v12005_v45, %v2403_v32  ;;  %v2510_v18 = vadd.f32 %v2494_v8, %v2478_v61  ;;  %v2993_v45 = vunpack.c.l.b16 %v12081_v9 }
 0x417   : > { %v2554_v35 = vadd.f32 %v2538_v38, %v2522_v59  ;;  %v2574_v6 = vpack.c.bf16 %v2510_v18, %v2510_v18 }
 0x419   : > { %v12083_v33 = vpack.c.bf16 %v2554_v35, %v2554_v35  ;;  %2673 = vrot.lane.b32.xlu0 %v2573_v24, %s10267_s6  ;;  %2641 = vrot.lane.b32.xlu2 %v2573_v24, %s10265_s20  ;;  %v2974_v29 = vunpack.c.l.b16 %v2574_v6 }
 0x41a   : > { %2643 = vrot.lane.b32.xlu1 %v2574_v6, %s10265_s20  ;;  %v2318_v12 = vpop.f32.mrf.mxu2  ;;  %v2367_v20 = vpop.f32.mrf.mxu3 }
 0x41b   : > { %v2994_v46 = vunpack.c.l.b16 %v12083_v33  ;;  %v2495_v25 = vmul.f32 %v12085_v49, %v2367_v20  ;;  %v12097_v32 = vpack.c.b16 %v2974_v29, %v2973_v54 }
 0x41c   : > { %v2406_v61 = vpop.f32.mrf.mxu0  ;;  %v12095_v8 = vpop.f32.mrf.mxu1 }
 0x41d   : > { %16692 = vst [vmem:[#allocation28_spill] sm:$0xff] %v12097_v32  ;;  %v2539_v24 = vmul.f32 %v12017_v10, %v2406_v61  ;;  %v12100_v59 = vpack.c.b16 %v2994_v46, %v2993_v45  ;;  %v2511_v38 = vadd.f32 %v2495_v25, %v2479_v55  ;;  %v12120_v25 = vpack.c.bf16 %v2318_v12, %v2318_v12  ;;  %v12178_v32 = vld [vmem:[#allocation3 + $0x50] sm:$0xff] }
 0x41f   : > { %v2555_v18 = vadd.f32 %v2539_v24, %v11938_v37  ;;  %v2575_v35 = vpack.c.bf16 %v2511_v38, %v2511_v38  ;;  %v2524_v37 = vmul.f32 %v12032_v50, %v11944_v27  ;;  %16693 = vst [vmem:[#allocation29_spill] sm:$0xff] %v12120_v25 }
 0x421   : > { %2675 = vrot.lane.b32.xlu2 %v2574_v6, %s10267_s6  ;;  %2611 = vrot.lane.b32.xlu0 %v2574_v6, %s10266_s30  ;;  %v12118_v55 = vpack.c.bf16 %v2555_v18, %v2555_v18  ;;  %v2975_v27 = vunpack.c.l.b16 %v2575_v35 }
 0x422   : > { %2613 = vrot.lane.b32.xlu1 %v2575_v35, %s10266_s30  ;;  %v2369_v58 = vpop.f32.mrf.mxu3  ;;  %v2320_v45 = vpop.f32.mrf.mxu2 }
 0x423   : > { %v2496_v10 = vmul.f32 %v12105_v30, %v2369_v58  ;;  %v12122_v24 = vpack.c.bf16 %v2320_v45, %v2320_v45  ;;  %v2995_v12 = vunpack.c.l.b16 %v12118_v55  ;;  %v2449_v45 = vld [vmem:[#allocation3 + $0x20] sm:$0xff] }
 0x424   : > { %v2408_v54 = vpop.f32.mrf.mxu0  ;;  %v12113_v29 = vpop.f32.mrf.mxu1 }
 0x425   : > { %v2540_v20 = vmul.f32 %v12034_v22, %v2408_v54  ;;  %v2512_v46 = vadd.f32 %v2496_v10, %v2480_v60 }
 0x427   : > { %v2556_v6 = vadd.f32 %v2540_v20, %v2524_v37  ;;  %v2576_v61 = vpack.c.bf16 %v2512_v46, %v2512_v46  ;;  %v2465_v37 = vld [vmem:[#allocation4 + $0x40] sm:$0xff] }
 0x428   : > { %v2545_v46 = vmul.f32 %v2465_v37, %v12058_v16 }
 0x429   : > { %v12124_v63 = vpack.c.bf16 %v2556_v6, %v2556_v6  ;;  %2901 = vrot.lane.b32.xlu2 %v12120_v25, %s10265_s20  ;;  %2869 = vrot.lane.b32.xlu0 %v12120_v25, %s10266_s30  ;;  %v2976_v50 = vunpack.c.l.b16 %v2576_v61  ;;  %v2529_v6 = vmul.f32 %v2449_v45, %v12001_v14  ;;  %v12204_v25 = vld [vmem:[#allocation3 + $0x58] sm:$0xff] }
 0x42a   : > { %2903 = vrot.lane.b32.xlu1 %v12122_v24, %s10265_s20  ;;  %v2372_v22 = vpop.f32.mrf.mxu3 }
 0x42b   : > { %v2996_v38 = vunpack.c.l.b16 %v12124_v63  ;;  %v12134_v60 = vpack.c.b16 %v2976_v50, %v2975_v27 }
 0x42c   : > { %v2411_v18 = vpop.f32.mrf.mxu0  ;;  %v2431_v58 = vpop.f32.mrf.mxu1 }
 0x42d   : > { %16694 = vst [vmem:[#allocation30_spill] sm:$0xff] %v12134_v60  ;;  %v2541_v10 = vmul.f32 %v12048_v7, %v2411_v18  ;;  %v12137_v54 = vpack.c.b16 %v2996_v38, %v2995_v12  ;;  %v2526_v12 = vmul.f32 %v12064_v57, %v11968_v40  ;;  %v2323_v18 = vpop.f32.mrf.mxu2  ;;  %v12163_v57 = vld [vmem:[#allocation4 + $0x50] sm:$0xff]  ;;  %v2497_v60 = vmul.f32 %v2465_v37, %v2372_v22 }
 0x42e   : > { %v2536_v37 = vmul.f32 %v12178_v32, %v11988_v42 }
 0x42f   : > { %v12140_v20 = vadd.f32 %v2541_v10, %v11960_v19  ;;  %v2561_v19 = vadd.f32 %v2545_v46, %v2529_v6 }
 0x431   : > { %2645 = vrot.lane.b32.xlu2 %v2575_v35, %s10265_s20  ;;  %2677 = vrot.lane.b32.xlu0 %v2575_v35, %s10267_s6  ;;  %v12154_v10 = vpack.c.bf16 %v2561_v19, %v2561_v19  ;;  %v12174_v19 = vld [vmem:[#allocation3 + $0x8] sm:$0xff] }
 0x432   : > { %2647 = vrot.lane.b32.xlu1 %v2576_v61, %s10265_s20  ;;  %v12147_v27 = vpop.f32.mrf.mxu3 }
 0x434   : > { %v2413_v7 = vpop.f32.mrf.mxu0  ;;  %v2433_v50 = vpop.f32.mrf.mxu1 }
 0x435   : > { %v2542_v38 = vmul.f32 %v12066_v28, %v2413_v7  ;;  %v12170_v7 = vpop.f32.mrf.mxu2 }
 0x437   : > { %v12152_v16 = vadd.f32 %v2542_v38, %v2526_v12  ;;  %v12172_v12 = vld [vmem:[#allocation4 + $0x30] sm:$0xff]  ;;  %v2535_v38 = vmul.f32 %v11972_v51, %v11976_v39  ;;  %v2534_v39 = vmul.f32 %v12174_v19, %v11964_v48  ;;  %v12202_v48 = vpack.c.bf16 %v2323_v18, %v2323_v18 }
 0x439   : > { %2679 = vrot.lane.b32.xlu2 %v2576_v61, %s10267_s6  ;;  %2871 = vrot.lane.b32.xlu0 %v12122_v24, %s10266_s30 }
 0x43a   : > { %2777 = vrot.lane.b32.xlu1 %v12154_v10, %s10265_s20  ;;  %v12161_v14 = vpop.f32.mrf.mxu3 }
 0x43c   : > { %v2416_v35 = vpop.f32.mrf.mxu0  ;;  %v2436_v40 = vpop.f32.mrf.mxu1 }
 0x43d   : > { %v2543_v28 = vmul.f32 %v12085_v49, %v2416_v35  ;;  %v2551_v6 = vmul.f32 %v12163_v57, %v2436_v40  ;;  %v2481_v49 = vmul.f32 %v2449_v45, %v11999_v52  ;;  %v2550_v35 = vmul.f32 %v12172_v12, %v2433_v50  ;;  %v2466_v52 = vld [vmem:[#allocation4 + $0x28] sm:$0xff]  ;;  %v2450_v50 = vld [vmem:[#allocation3 + $0x78] sm:$0xff] }
 0x43e   : > { %v2533_v45 = vmul.f32 %v11948_v23, %v11952_v47  ;;  %v2546_v42 = vmul.f32 %v2466_v52, %v12076_v1  ;;  %v2530_v23 = vmul.f32 %v2450_v50, %v12015_v4  ;;  %v12212_v47 = vld [vmem:[#allocation4 + $0x70] sm:$0xff] }
 0x43f   : > { %v12167_v46 = vadd.f32 %v2543_v28, %v11984_v13  ;;  %v12183_v13 = vld [vmem:[#allocation4 + $0x78] sm:$0xff]  ;;  %v2567_v40 = vadd.f32 %v2551_v6, %v2535_v38  ;;  %v2549_v28 = vmul.f32 %v2469_v3, %v2431_v58  ;;  %v2566_v6 = vadd.f32 %v2550_v35, %v2534_v39  ;;  %v12214_v35 = vpop.f32.mrf.mxu2 }
 0x440   : > { %v2532_v39 = vmul.f32 %v12204_v25, %v12046_v2 }
 0x441   : > { %2809 = vrot.lane.b32.xlu2 %v12154_v10, %s10267_s6  ;;  %2615 = vrot.lane.b32.xlu0 %v2576_v61, %s10266_s30  ;;  %v2513_v61 = vadd.f32 %v2497_v60, %v2481_v49  ;;  %v12198_v38 = vpack.c.bf16 %v2567_v40, %v2567_v40  ;;  %v2565_v60 = vadd.f32 %v2549_v28, %v2533_v45  ;;  %v12228_v40 = vld [vmem:[#allocation3 + $0x18] sm:$0xff] }
 0x442   : > { %2761 = vrot.lane.b32.xlu1 %v12081_v9, %s10265_s20  ;;  %v12189_v51 = vpop.f32.mrf.mxu3  ;;  %v12222_v1 = vpack.c.bf16 %v2566_v6, %v2566_v6  ;;  %v2531_v6 = vmul.f32 %v12228_v40, %v12028_v26 }
 0x443   : > { %16695 = vst [vmem:[#allocation31_spill] sm:$0xff] %v12198_v38  ;;  %v12207_v58 = vpack.c.bf16 %v2513_v61, %v2513_v61  ;;  %v3007_v4 = vunpack.c.l.b16 %v12198_v38  ;;  %v12234_v61 = vpack.c.bf16 %v2565_v60, %v2565_v60 }
 0x444   : > { %v2438_v22 = vpop.f32.mrf.mxu1  ;;  %v3006_v2 = vunpack.c.l.b16 %v12222_v1 }
 0x445   : > { %v2552_v5 = vmul.f32 %v12183_v13, %v2438_v22  ;;  %v3005_v60 = vunpack.c.l.b16 %v12234_v61 }
 0x447   : > { %v2568_v43 = vadd.f32 %v2552_v5, %v2536_v37  ;;  %v2548_v5 = vmul.f32 %v12200_v56, %v12113_v29  ;;  %v2562_v37 = vadd.f32 %v2546_v42, %v2530_v23  ;;  %v2547_v29 = vmul.f32 %v12212_v47, %v12095_v8 }
 0x448   : > { %v2498_v8 = vmul.f32 %v2466_v52, %v12147_v27  ;;  %v3015_v23 = vpack.c.b16 %v3006_v2, %v3005_v60  ;;  %v2486_v27 = vmul.f32 %v12174_v19, %v11962_v11  ;;  %v12258_v52 = vpop.f32.mrf.mxu2  ;;  %v3001_v60 = vunpack.c.l.b16 %v12154_v10 }
 0x449   : > { %v12209_v49 = vpack.c.bf16 %v2568_v43, %v2568_v43  ;;  %2745 = vrot.lane.b32.xlu0 %v12154_v10, %s10266_s30  ;;  %2873 = vrot.lane.b32.xlu2 %v12202_v48, %s10266_s30  ;;  %v2563_v42 = vadd.f32 %v2547_v29, %v2531_v6  ;;  %v2528_v6 = vmul.f32 %v12103_v36, %v11992_v62 }
 0x44a   : > { %2617 = vrot.lane.b32.xlu1 %v12207_v58, %s10266_s30  ;;  %v2382_v43 = vpop.f32.mrf.mxu3  ;;  %v12307_v10 = vpack.c.bf16 %v12167_v46, %v12167_v46 }
 0x44b   : > { %16696 = vst [vmem:[#allocation32_spill] sm:$0xff] %v12209_v49  ;;  %v3008_v18 = vunpack.c.l.b16 %v12209_v49  ;;  %v2501_v22 = vmul.f32 %v2469_v3, %v2382_v43  ;;  %v2564_v49 = vadd.f32 %v2548_v5, %v2532_v39  ;;  %v12243_v3 = vpack.c.bf16 %v2562_v37, %v2562_v37  ;;  %v2418_v39 = vpop.f32.mrf.mxu0 }
 0x44d   : > { %v3016_v28 = vpack.c.b16 %v3008_v18, %v3007_v4  ;;  %v12237_v45 = vadd.f32 %v2501_v22, %v11955_v15  ;;  %v2482_v15 = vmul.f32 %v2450_v50, %v12013_v31  ;;  %v12252_v26 = vpack.c.bf16 %v2564_v49, %v2564_v49 }
 0x44e   : > { %v12263_v4 = vpack.c.bf16 %v2563_v42, %v2563_v42  ;;  %v3061_v50 = vsel %vm3017_vm2, %v3015_v23, 0 }
 0x44f   : > { %v3064_v38 = vsel %vm3017_vm2, %v3016_v28, 0  ;;  %v2514_v18 = vadd.f32 %v2498_v8, %v2482_v15  ;;  %v3004_v49 = vunpack.c.l.b16 %v12252_v26  ;;  %v3002_v8 = vunpack.c.l.b16 %v12243_v3 }
 0x450   : > { %3066 = vmatpush.bf16.xpose.msra.mxu1 %v3064_v38  ;;  %v3003_v11 = vunpack.c.l.b16 %v12263_v4  ;;  %v12284_v2 = vpop.f32.mrf.mxu2 }
 0x451   : > { %2729 = vrot.lane.b32.xlu0 %v12081_v9, %s10266_s30  ;;  %2649 = vrot.lane.b32.xlu2 %v12207_v58, %s10265_s20  ;;  %v12269_v22 = vpack.c.bf16 %v2514_v18, %v2514_v18  ;;  %v3013_v62 = vpack.c.b16 %v3002_v8, %v3001_v60 }
 0x452   : > { %2811 = vrot.lane.b32.xlu1 %v12243_v3, %s10267_s6  ;;  %v2384_v38 = vpop.f32.mrf.mxu3  ;;  %v3014_v37 = vpack.c.b16 %v3004_v49, %v3003_v11  ;;  %v12330_v49 = vpack.c.bf16 %v12140_v20, %v12140_v20 }
 0x453   : > { %v2502_v5 = vmul.f32 %v12172_v12, %v2384_v38  ;;  %v12261_v43 = vpop.permute.xlu2 %2603  ;;  %v2544_v12 = vmul.f32 %v12105_v30, %v2418_v39 }
 0x454   : > { %v3058_v30 = vsel %vm3017_vm2, %v3014_v37, 0  ;;  %v2499_v37 = vmul.f32 %v12212_v47, %v12161_v14 }
 0x455   : > { %v12265_v31 = vadd.f32 %v2502_v5, %v2486_v27  ;;  %v2560_v42 = vadd.f32 %v2544_v12, %v2528_v6  ;;  %v3055_v5 = vsel %vm3017_vm2, %v3013_v62, 0  ;;  %v2483_v6 = vmul.f32 %v12228_v40, %v12026_v53 }
 0x457   : > { %v12296_v36 = vpack.c.bf16 %v2560_v42, %v2560_v42 }
 0x458   : > { %3067 = vmatpush.bf16.xpose.msra.mxu1 %v3061_v50  ;;  %v2335_v50 = vpop.f32.mrf.mxu2 }
 0x459   : > { %2793 = vrot.lane.b32.xlu0 %v12081_v9, %s10267_s6  ;;  %2747 = vrot.lane.b32.xlu2 %v12243_v3, %s10266_s30  ;;  %v3000_v18 = vunpack.c.l.b16 %v12296_v36 }
 0x45a   : > { %2651 = vrot.lane.b32.xlu1 %v12269_v22, %s10265_s20  ;;  %v2387_v19 = vpop.f32.mrf.mxu3 }
 0x45b   : > { %v2503_v29 = vmul.f32 %v12163_v57, %v2387_v19  ;;  %v12280_v28 = vpop.permute.xlu2 %2667  ;;  %v2488_v57 = vmul.f32 %v12178_v32, %v11986_v41  ;;  %v2999_v41 = vunpack.c.l.b16 %v12307_v10  ;;  %v12322_v32 = vpack.c.bf16 %v12152_v16, %v12152_v16 }
 0x45c   : > { %v12340_v16 = vpack.c.bf16 %v12214_v35, %v12214_v35 }
 0x45d   : > { %v12287_v9 = vadd.f32 %v2503_v29, %v11979_v0  ;;  %v3012_v46 = vpack.c.b16 %v3000_v18, %v2999_v41  ;;  %v2998_v19 = vunpack.c.l.b16 %v12322_v32  ;;  %v2997_v29 = vunpack.c.l.b16 %v12330_v49 }
 0x45f   : > { %v3052_v12 = vsel %vm3017_vm2, %v3012_v46, 0  ;;  %v3011_v35 = vpack.c.b16 %v2998_v19, %v2997_v29  ;;  %v3043_v19 = vsel %vm3017_vm2, %v12100_v59, 0 }
 0x460   : > { %3068 = vmatpush.bf16.xpose.msra.mxu1 %v3058_v30  ;;  %v2338_v20 = vpop.f32.mrf.mxu2  ;;  %v2515_v30 = vadd.f32 %v2499_v37, %v2483_v6 }
 0x461   : > { %2905 = vrot.lane.b32.xlu0 %v12202_v48, %s10265_s20  ;;  %2731 = vrot.lane.b32.xlu2 %v12083_v33, %s10266_s30  ;;  %v3049_v8 = vsel %vm3017_vm2, %v3011_v35, 0 }
 0x462   : > { %2781 = vrot.lane.b32.xlu1 %v12263_v4, %s10265_s20  ;;  %v2389_v0 = vpop.f32.mrf.mxu3 }
 0x463   : > { %v2504_v15 = vmul.f32 %v12183_v13, %v2389_v0  ;;  %v12303_v38 = vpop.permute.xlu0 %2601  ;;  %v12309_v23 = vpop.permute.xlu2 %2637 }
 0x464   : > { %16697 = vst [vmem:[#allocation33_spill] sm:$0xff] %v12309_v23  ;;  %v12332_v39 = vpop.permute.xlu1 %2633 }
 0x465   : > { %v12311_v27 = vadd.f32 %v2504_v15, %v2488_v57  ;;  %16698 = vst [vmem:[#allocation34_spill] sm:$0xff] %v12332_v39  ;;  %v3046_v57 = vsel %vm3017_vm2, %v12137_v54, 0  ;;  %v12382_v15 = vpack.c.bf16 %v2338_v20, %v2338_v20 }
 0x467   : > { %v4252_v41 = vunpack.c.l.b16 %v12382_v15  ;;  %v12645_v39 = vpack.c.bf16 %v12311_v27, %v12311_v27 }
 0x468   : > { %3069 = vmatpush.bf16.xpose.msra.mxu1 %v3055_v5  ;;  %v2340_v53 = vpop.f32.mrf.mxu2  ;;  %v12388_v5 = vpack.c.bf16 %v2335_v50, %v2335_v50  ;;  %v12406_v50 = vpack.c.bf16 %v12258_v52, %v12258_v52  ;;  %v2484_v52 = vmul.f32 %v12204_v25, %v12044_v44 }
 0x469   : > { %2681 = vrot.lane.b32.xlu0 %v12207_v58, %s10267_s6  ;;  %2795 = vrot.lane.b32.xlu2 %v12083_v33, %s10267_s6  ;;  %v12374_v62 = vpack.c.bf16 %v2340_v53, %v2340_v53 }
 0x46a   : > { %2765 = vrot.lane.b32.xlu1 %v12118_v55, %s10265_s20  ;;  %v4251_v29 = vunpack.c.l.b16 %v12388_v5  ;;  %v4249_v6 = vunpack.c.l.b16 %v12406_v50 }
 0x46b   : > { %v12326_v13 = vpop.permute.xlu0 %2665  ;;  %v12334_v11 = vpop.permute.xlu2 %2671  ;;  %v4253_v54 = vunpack.c.l.b16 %v12374_v62 }
 0x46c   : > { %16699 = vst [vmem:[#allocation35_spill] sm:$0xff] %v12334_v11 }
 0x46d   : > { %v4261_v37 = vpack.c.b16 %v4253_v54, %v4252_v41  ;;  %v12442_v54 = vpack.c.bf16 %v12071_v21, %v12071_v21  ;;  %v4245_v41 = vunpack.c.l.b16 %v12122_v24 }
 0x470   : > { %3070 = vmatpush.bf16.xpose.msra.mxu1 %v3052_v12 }
 0x471   : > { %2779 = vrot.lane.b32.xlu0 %v12243_v3, %s10265_s20  ;;  %2683 = vrot.lane.b32.xlu2 %v12269_v22, %s10267_s6  ;;  %v12360_v3 = vpack.c.bf16 %v2515_v30, %v2515_v30 }
 0x472   : > { %2877 = vrot.lane.b32.xlu1 %v12340_v16, %s10266_s30 }
 0x473   : > { %v12353_v42 = vpop.permute.xlu0 %2635  ;;  %v12357_v47 = vpop.permute.xlu2 %2641 }
 0x474   : > { %16700 = vst [vmem:[#allocation36_spill] sm:$0xff] %v12353_v42  ;;  %v12355_v14 = vpop.permute.xlu1 %2605 }
 0x475   : > { %16701 = vst [vmem:[#allocation37_spill] sm:$0xff] %v12355_v14 }
 0x476   : > { %16702 = vst [vmem:[#allocation38_spill] sm:$0xff] %v12357_v47 }
 0x478   : > { %3071 = vmatpush.bf16.xpose.msra.mxu1 %v3049_v8  ;;  %v4248_v8 = vunpack.c.l.b16 %v12340_v16 }
 0x479   : > { %2763 = vrot.lane.b32.xlu0 %v12083_v33, %s10265_s20  ;;  %2813 = vrot.lane.b32.xlu2 %v12263_v4, %s10267_s6  ;;  %v12380_v33 = vpack.c.bf16 %v12170_v7, %v12170_v7  ;;  %v12397_v7 = vpack.c.bf16 %v12284_v2, %v12284_v2  ;;  %v2500_v2 = vmul.f32 %v12200_v56, %v12189_v51 }
 0x47a   : > { %2621 = vrot.lane.b32.xlu1 %v12360_v3, %s10266_s30  ;;  %v4259_v44 = vpack.c.b16 %v4249_v6, %v4248_v8  ;;  %v16716_v8 = vld [vmem:[#allocation25_spill] sm:$0xff] }
 0x47b   : > { %v12368_v40 = vpop.permute.xlu0 %2669  ;;  %v12372_v0 = vpop.permute.xlu2 %2675  ;;  %v4250_v20 = vunpack.c.l.b16 %v12397_v7  ;;  %v2516_v56 = vadd.f32 %v2500_v2, %v2484_v52  ;;  %v4247_v25 = vunpack.c.l.b16 %v12380_v33  ;;  %v16715_v52 = vld [vmem:[#allocation26_spill] sm:$0xff] }
 0x47c   : > { %v12370_v60 = vpop.permute.xlu1 %2639  ;;  %16704 = vst [vmem:[#allocation40_spill] sm:$0xff] %v12372_v0 }
 0x47d   : > { %16703 = vst [vmem:[#allocation39_spill] sm:$0xff] %v12370_v60  ;;  %v4260_v59 = vpack.c.b16 %v4251_v29, %v4250_v20  ;;  %v12433_v53 = vpack.c.bf16 %v2516_v56, %v2516_v56  ;;  %v16714_v20 = vld [vmem:[#allocation29_spill] sm:$0xff]  ;;  %v4243_v56 = vunpack.c.l.b16 %v12442_v54 }
 0x47e   : > { %v4244_v21 = vunpack.c.l.b16 %v16714_v20 }
 0x480   : > { %3072 = vmatpush.bf16.xpose.msra.mxu1 %v3046_v57  ;;  %v4246_v57 = vunpack.c.l.b16 %v12202_v48  ;;  %v4257_v6 = vpack.c.b16 %v4245_v41, %v4244_v21 }
 0x481   : > { %2797 = vrot.lane.b32.xlu2 %v12118_v55, %s10267_s6  ;;  %2875 = vrot.lane.b32.xlu0 %v12380_v33, %s10266_s30 }
 0x482   : > { %2815 = vrot.lane.b32.xlu1 %v12252_v26, %s10267_s6 }
 0x483   : > { %v12393_v18 = vpop.permute.xlu0 %2607  ;;  %v12402_v12 = vpop.permute.xlu2 %2901 }
 0x484   : > { %16705 = vst [vmem:[#allocation41_spill] sm:$0xff] %v12393_v18  ;;  %v12400_v46 = vpop.permute.xlu1 %2609 }
 0x485   : > { %16706 = vst [vmem:[#allocation42_spill] sm:$0xff] %v12400_v46 }
 0x486   : > { %16707 = vst [vmem:[#allocation43_spill] sm:$0xff] %v12402_v12 }
 0x488   : > { %3073 = vmatpush.bf16.xpose.msra.mxu1 %v3043_v19 }
 0x489   : > { %2907 = vrot.lane.b32.xlu0 %v12380_v33, %s10265_s20  ;;  %2909 = vrot.lane.b32.xlu2 %v12340_v16, %s10265_s20 }
 0x48a   : > { %2799 = vrot.lane.b32.xlu1 %v12124_v63, %s10267_s6 }
 0x48b   : > { %v12423_v35 = vpop.permute.xlu0 %2673  ;;  %v12427_v30 = vpop.permute.xlu2 %2645 }
 0x48c   : > { %16708 = vst [vmem:[#allocation44_spill] sm:$0xff] %v12423_v35  ;;  %v12425_v51 = vpop.permute.xlu1 %2643 }
 0x48d   : > { %16709 = vst [vmem:[#allocation45_spill] sm:$0xff] %v12425_v51 }
 0x48e   : > { %16710 = vst [vmem:[#allocation46_spill] sm:$0xff] %v12427_v30  ;;  %v16721_v30 = vld [vmem:[#allocation27_spill] sm:$0xff] }
 0x48f   : > { %8632 = vmatmul.msk.bf16.vlgmr.msra.gmra.mxu1 %vm3017_vm2, %v12030_v34  ;;  %v4258_v34 = vpack.c.b16 %v4247_v25, %v4246_v57  ;;  %v16717_v25 = vld [vmem:[#allocation24_spill] sm:$0xff] }
 0x490   : > { %4270 = vmatpush.bf16.msrb.mxu1 %v4261_v37  ;;  %v12451_v37 = vpack.c.bf16 %v12053_v17, %v12053_v17  ;;  %v12474_v57 = vpack.c.bf16 %v16717_v25, %v16717_v25 }
 0x491   : > { %2619 = vrot.lane.b32.xlu0 %v12269_v22, %s10266_s30  ;;  %2653 = vrot.lane.b32.xlu2 %v12360_v3, %s10265_s20 }
 0x492   : > { %2655 = vrot.lane.b32.xlu1 %v12433_v53, %s10265_s20  ;;  %v4242_v17 = vunpack.c.l.b16 %v12451_v37 }
 0x493   : > { %v12447_v19 = vpop.permute.xlu0 %2611  ;;  %v12455_v2 = vpop.permute.xlu2 %2679 }
 0x494   : > { %4271 = vmatpush.bf16.msrb.mxu1 %v4260_v59  ;;  %16711 = vst [vmem:[#allocation47_spill] sm:$0xff] %v12447_v19  ;;  %v12453_v29 = vpop.permute.xlu1 %2613  ;;  %v12460_v59 = vpack.c.bf16 %v16715_v52, %v16715_v52  ;;  %v16719_v52 = vld [vmem:[#allocation23_spill] sm:$0xff]  ;;  %v16743_v19 = vld [vmem:[#allocation32_spill] sm:$0xff] }
 0x495   : > { %16712 = vst [vmem:[#allocation48_spill] sm:$0xff] %v12453_v29 }
 0x496   : > { %16713 = vst [vmem:[#allocation49_spill] sm:$0xff] %v12455_v2  ;;  %v4241_v41 = vunpack.c.l.b16 %v12460_v59 }
 0x498   : > { %4272 = vmatpush.bf16.msrb.mxu1 %v4259_v44  ;;  %v12465_v44 = vpack.c.bf16 %v16716_v8, %v16716_v8 }
 0x499   : > { %2749 = vrot.lane.b32.xlu0 %v12263_v4, %s10266_s30  ;;  %2751 = vrot.lane.b32.xlu2 %v12252_v26, %s10266_s30 }
 0x49a   : > { %2753 = vrot.lane.b32.xlu1 %v12234_v61, %s10266_s30  ;;  %v4240_v25 = vunpack.c.l.b16 %v12465_v44 }
 0x49b   : > { %v12479_v21 = vpop.permute.xlu0 %2869  ;;  %v12485_v4 = vpop.permute.xlu2 %2809 }
 0x49c   : > { %4273 = vmatpush.bf16.msrb.mxu1 %v4258_v34  ;;  %v4256_v34 = vpack.c.b16 %v4243_v56, %v4242_v17  ;;  %16718 = vst [vmem:[#allocation29_spill] sm:$0xff] %v12479_v21  ;;  %v12487_v8 = vpop.permute.xlu1 %2903  ;;  %v4255_v47 = vpack.c.b16 %v4241_v41, %v4240_v25  ;;  %v4239_v56 = vunpack.c.l.b16 %v12474_v57 }
 0x49d   : > { %16720 = vst [vmem:[#allocation26_spill] sm:$0xff] %v12487_v8 }
 0x49f   : > { %8633 = vmatmul.msk.bf16.gmra.mxu1 %vm3017_vm2, %v16721_v30 }
 0x4a0   : > { %4274 = vmatpush.bf16.msrb.mxu1 %v4257_v6  ;;  %v12483_v6 = vpack.c.bf16 %v16719_v52, %v16719_v52 }
 0x4a1   : > { %2733 = vrot.lane.b32.xlu0 %v12118_v55, %s10266_s30  ;;  %2735 = vrot.lane.b32.xlu2 %v12124_v63, %s10266_s30 }
 0x4a2   : > { %v4238_v17 = vunpack.c.l.b16 %v12483_v6  ;;  %2769 = vrot.lane.b32.xlu1 %v12330_v49, %s10265_s20 }
 0x4a3   : > { %v12500_v52 = vpop.permute.xlu0 %2677  ;;  %v12504_v30 = vpop.permute.xlu2 %2873 }
 0x4a4   : > { %4275 = vmatpush.bf16.msrb.mxu1 %v4256_v34  ;;  %v4254_v34 = vpack.c.b16 %v4239_v56, %v4238_v17  ;;  %16722 = vst [vmem:[#allocation25_spill] sm:$0xff] %v12500_v52  ;;  %v12502_v51 = vpop.permute.xlu1 %2647  ;;  %v16727_v56 = vld [vmem:[#allocation28_spill] sm:$0xff] }
 0x4a5   : > { %16723 = vst [vmem:[#allocation24_spill] sm:$0xff] %v12502_v51  ;;  %v16731_v51 = vld [vmem:[#allocation30_spill] sm:$0xff] }
 0x4a6   : > { %16724 = vst [vmem:[#allocation23_spill] sm:$0xff] %v12504_v30 }
 0x4a8   : > { %4276 = vmatpush.bf16.msrb.mxu1 %v4255_v47  ;;  %v12508_v47 = vpack.c.bf16 %v12237_v45, %v12237_v45 }
 0x4a9   : > { %2685 = vrot.lane.b32.xlu0 %v12360_v3, %s10267_s6  ;;  %2687 = vrot.lane.b32.xlu2 %v12433_v53, %s10267_s6 }
 0x4aa   : > { %2625 = vrot.lane.b32.xlu1 %v12508_v47, %s10266_s30 }
 0x4ab   : > { %v12516_v55 = vpop.permute.xlu0 %2871  ;;  %v12520_v25 = vpop.permute.xlu2 %2649 }
 0x4ac   : > { %4277 = vmatpush.bf16.msrb.mxu1 %v4254_v34  ;;  %16725 = vst [vmem:[#allocation27_spill] sm:$0xff] %v12516_v55  ;;  %v12518_v41 = vpop.permute.xlu1 %2777 }
 0x4ad   : > { %16726 = vst [vmem:[#allocation50_spill] sm:$0xff] %v12520_v25 }
 0x4af   : > { %8634 = vmatmul.msk.bf16.gmra.mxu1 %vm3017_vm2, %v16727_v56 }
 0x4b1   : > { %2783 = vrot.lane.b32.xlu0 %v12252_v26, %s10265_s20  ;;  %2785 = vrot.lane.b32.xlu2 %v12234_v61, %s10265_s20 }
 0x4b2   : > { %2787 = vrot.lane.b32.xlu1 %v12222_v1, %s10265_s20 }
 0x4b3   : > { %v12530_v45 = vpop.permute.xlu0 %2615  ;;  %v12534_v34 = vpop.permute.xlu2 %2747 }
 0x4b4   : > { %16728 = vst [vmem:[#allocation28_spill] sm:$0xff] %v12530_v45  ;;  %v12532_v17 = vpop.permute.xlu1 %2761  ;;  %v2977_v45 = vunpack.c.l.b16 %v12207_v58 }
 0x4b5   : > { %16729 = vst [vmem:[#allocation51_spill] sm:$0xff] %v12532_v17 }
 0x4b9   : > { %2767 = vrot.lane.b32.xlu0 %v12124_v63, %s10265_s20  ;;  %2817 = vrot.lane.b32.xlu2 %v12234_v61, %s10267_s6 }
 0x4ba   : > { %2819 = vrot.lane.b32.xlu1 %v12222_v1, %s10267_s6 }
 0x4bb   : > { %v12542_v26 = vpop.permute.xlu0 %2745  ;;  %v12546_v25 = vpop.permute.xlu2 %2731 }
 0x4bc   : > { %v12544_v56 = vpop.permute.xlu1 %2617 }
 0x4bd   : > { %16730 = vst [vmem:[#allocation52_spill] sm:$0xff] %v12544_v56  ;;  %v12564_v56 = vpack.c.bf16 %v12265_v31, %v12265_v31 }
 0x4bf   : > { %8635 = vmatmul.msk.bf16.gmra.mxu1 %vm3017_vm2, %v16731_v51  ;;  %v2978_v51 = vunpack.c.l.b16 %v12269_v22  ;;  %v16734_v22 = vld [vmem:[#allocation31_spill] sm:$0xff] }
 0x4c1   : > { %2801 = vrot.lane.b32.xlu2 %v12330_v49, %s10267_s6  ;;  %2879 = vrot.lane.b32.xlu0 %v12406_v50, %s10266_s30  ;;  %v2989_v31 = vpack.c.b16 %v2978_v51, %v2977_v45  ;;  %v2979_v45 = vunpack.c.l.b16 %v12360_v3 }
 0x4c2   : > { %2803 = vrot.lane.b32.xlu1 %v12322_v32, %s10267_s6 }
 0x4c3   : > { %v12556_v63 = vpop.permute.xlu0 %2729  ;;  %v12560_v29 = vpop.permute.xlu2 %2795 }
 0x4c4   : > { %v12558_v61 = vpop.permute.xlu1 %2811 }
 0x4c9   : > { %2657 = vrot.lane.b32.xlu2 %v12508_v47, %s10265_s20  ;;  %2911 = vrot.lane.b32.xlu0 %v12406_v50, %s10265_s20 }
 0x4ca   : > { %2659 = vrot.lane.b32.xlu1 %v12564_v56, %s10265_s20 }
 0x4cb   : > { %v12574_v23 = vpop.permute.xlu0 %2793  ;;  %v12578_v12 = vpop.permute.xlu2 %2683 }
 0x4cc   : > { %v12576_v60 = vpop.permute.xlu1 %2651  ;;  %16733 = vst [vmem:[#allocation53_spill] sm:$0xff] %v12578_v12 }
 0x4cd   : > { %16732 = vst [vmem:[#allocation30_spill] sm:$0xff] %v12576_v60  ;;  %v2980_v60 = vunpack.c.l.b16 %v12433_v53 }
 0x4cf   : > { %8636 = vmatmul.msk.bf16.gmra.mxu1 %vm3017_vm2, %v2989_v31  ;;  %v2990_v46 = vpack.c.b16 %v2980_v60, %v2979_v45  ;;  %v2982_v60 = vunpack.c.l.b16 %v12564_v56 }
 0x4d1   : > { %2739 = vrot.lane.b32.xlu2 %v12322_v32, %s10266_s30  ;;  %2623 = vrot.lane.b32.xlu0 %v12433_v53, %s10266_s30 }
 0x4d2   : > { %2757 = vrot.lane.b32.xlu1 %v16734_v22, %s10266_s30 }
 0x4d3   : > { %v12587_v8 = vpop.permute.xlu0 %2905  ;;  %v12591_v2 = vpop.permute.xlu2 %2813 }
 0x4d4   : > { %16735 = vst [vmem:[#allocation31_spill] sm:$0xff] %v12587_v8  ;;  %v12589_v58 = vpop.permute.xlu1 %2781 }
 0x4d9   : > { %2737 = vrot.lane.b32.xlu0 %v12330_v49, %s10266_s30  ;;  %2883 = vrot.lane.b32.xlu2 %v12388_v5, %s10266_s30  ;;  %v2583_v49 = vpack.c.bf16 %v12287_v9, %v12287_v9  ;;  %v2981_v9 = vunpack.c.l.b16 %v12508_v47 }
 0x4da   : > { %2773 = vrot.lane.b32.xlu1 %v12307_v10, %s10265_s20 }
 0x4db   : > { %v12601_v51 = vpop.permute.xlu0 %2681  ;;  %v12605_v12 = vpop.permute.xlu2 %2797  ;;  %v2991_v52 = vpack.c.b16 %v2982_v60, %v2981_v9 }
 0x4dc   : > { %16736 = vst [vmem:[#allocation54_spill] sm:$0xff] %v12601_v51  ;;  %v12603_v31 = vpop.permute.xlu1 %2765 }
 0x4dd   : > { %16737 = vst [vmem:[#allocation55_spill] sm:$0xff] %v12603_v31 }
 0x4df   : > { %8637 = vmatmul.msk.bf16.gmra.mxu1 %vm3017_vm2, %v2990_v46 }
 0x4e1   : > { %2881 = vrot.lane.b32.xlu0 %v12397_v7, %s10266_s30  ;;  %2691 = vrot.lane.b32.xlu2 %v12564_v56, %s10267_s6 }
 0x4e2   : > { %2629 = vrot.lane.b32.xlu1 %v2583_v49, %s10266_s30 }
 0x4e3   : > { %v12615_v3 = vpop.permute.xlu0 %2779  ;;  %v12617_v53 = vpop.permute.xlu2 %2909 }
 0x4e4   : > { %16738 = vst [vmem:[#allocation56_spill] sm:$0xff] %v12617_v53  ;;  %v12619_v51 = vpop.permute.xlu1 %2877 }
 0x4e5   : > { %16739 = vst [vmem:[#allocation57_spill] sm:$0xff] %v12619_v51 }
 0x4e9   : > { %2913 = vrot.lane.b32.xlu0 %v12397_v7, %s10265_s20  ;;  %2821 = vrot.lane.b32.xlu2 %v16734_v22, %s10267_s6 }
 0x4ea   : > { %2693 = vrot.lane.b32.xlu1 %v2583_v49, %s10267_s6 }
 0x4eb   : > { %v12628_v46 = vpop.permute.xlu0 %2763  ;;  %v12630_v45 = vpop.permute.xlu2 %2653 }
 0x4ec   : > { %16740 = vst [vmem:[#allocation58_spill] sm:$0xff] %v12628_v46  ;;  %v12632_v8 = vpop.permute.xlu1 %2621 }
 0x4ed   : > { %16741 = vst [vmem:[#allocation59_spill] sm:$0xff] %v12630_v45 }
 0x4ee   : > { %16742 = vst [vmem:[#allocation60_spill] sm:$0xff] %v12632_v8 }
 0x4ef   : > { %8638 = vmatmul.msk.bf16.gmra.mxu1 %vm3017_vm2, %v2991_v52  ;;  %v2984_v52 = vunpack.c.l.b16 %v12645_v39 }
 0x4f1   : > { %2689 = vrot.lane.b32.xlu0 %v12508_v47, %s10267_s6  ;;  %2805 = vrot.lane.b32.xlu2 %v12307_v10, %s10267_s6  ;;  %v2983_v47 = vunpack.c.l.b16 %v2583_v49 }
 0x4f2   : > { %2823 = vrot.lane.b32.xlu1 %v16743_v19, %s10267_s6 }
 0x4f3   : > { %v12641_v53 = vpop.permute.xlu0 %2875  ;;  %v12647_v45 = vpop.permute.xlu2 %2751  ;;  %v2992_v42 = vpack.c.b16 %v2984_v52, %v2983_v47 }
 0x4f4   : > { %16744 = vst [vmem:[#allocation32_spill] sm:$0xff] %v12641_v53  ;;  %v12649_v60 = vpop.permute.xlu1 %2815 }
 0x4f9   : > { %2755 = vrot.lane.b32.xlu0 %v12222_v1, %s10266_s30  ;;  %2917 = vrot.lane.b32.xlu2 %v12382_v15, %s10265_s20 }
 0x4fa   : > { %2807 = vrot.lane.b32.xlu1 %v12296_v36, %s10267_s6 }
 0x4fb   : > { %v12658_v9 = vpop.permute.xlu0 %2907  ;;  %v12660_v27 = vpop.permute.xlu2 %2735 }
 0x4fc   : > { %16745 = vst [vmem:[#allocation61_spill] sm:$0xff] %v12658_v9  ;;  %v12662_v8 = vpop.permute.xlu1 %2799 }
 0x4ff   : > { %8639 = vmatmul.msk.bf16.gmra.mxu1 %vm3017_vm2, %v2992_v42 }
 0x501   : > { %2771 = vrot.lane.b32.xlu0 %v12322_v32, %s10265_s20  ;;  %2661 = vrot.lane.b32.xlu2 %v2583_v49, %s10265_s20 }
 0x502   : > { %2919 = vrot.lane.b32.xlu1 %v12374_v62, %s10265_s20 }
 0x503   : > { %v12670_v1 = vpop.permute.xlu0 %2619  ;;  %v12672_v0 = vpop.permute.xlu2 %2687 }
 0x504   : > { %16746 = vst [vmem:[#allocation62_spill] sm:$0xff] %v12670_v1  ;;  %v12674_v9 = vpop.permute.xlu1 %2655 }
 0x505   : > { %16747 = vst [vmem:[#allocation63_spill] sm:$0xff] %v12672_v0 }
 0x506   : > { %16748 = vst [vmem:[#allocation64_spill] sm:$0xff] %v12674_v9 }
 0x509   : > { %2915 = vrot.lane.b32.xlu0 %v12388_v5, %s10265_s20  ;;  %2759 = vrot.lane.b32.xlu2 %v16743_v19, %s10266_s30 }
 0x50a   : > { %2663 = vrot.lane.b32.xlu1 %v12645_v39, %s10265_s20 }
 0x50b   : > { %v12682_v32 = vpop.permute.xlu0 %2749  ;;  %v12684_v42 = vpop.permute.xlu2 %2785 }
 0x50c   : > { %v12686_v49 = vpop.permute.xlu1 %2753 }
 0x511   : > { %2627 = vrot.lane.b32.xlu0 %v12564_v56, %s10266_s30  ;;  %2791 = vrot.lane.b32.xlu2 %v16743_v19, %s10265_s20 }
 0x512   : > { %2899 = vrot.lane.b32.xlu1 %v12442_v54, %s10265_s20 }
 0x513   : > { %v12694_v52 = vpop.permute.xlu0 %2733  ;;  %v12696_v47 = vpop.permute.xlu2 %2817 }
 0x514   : > { %v12698_v9 = vpop.permute.xlu1 %2769 }
 0x519   : > { %2789 = vrot.lane.b32.xlu0 %v16734_v22, %s10265_s20  ;;  %2743 = vrot.lane.b32.xlu2 %v12296_v36, %s10266_s30 }
 0x51a   : > { %2943 = vrot.lane.b32.xlu1 %v12406_v50, %s10267_s6 }
 0x51b   : > { %v12706_v56 = vpop.permute.xlu0 %2685  ;;  %v12708_v19 = vpop.permute.xlu2 %2801 }
 0x51c   : > { %16749 = vst [vmem:[#allocation65_spill] sm:$0xff] %v12706_v56  ;;  %v12710_v0 = vpop.permute.xlu1 %2625 }
 0x51d   : > { %16750 = vst [vmem:[#allocation66_spill] sm:$0xff] %v12710_v0 }
 0x521   : > { %2741 = vrot.lane.b32.xlu0 %v12307_v10, %s10266_s30  ;;  %2887 = vrot.lane.b32.xlu2 %v12374_v62, %s10266_s30 }
 0x522   : > { %2895 = vrot.lane.b32.xlu1 %v12460_v59, %s10265_s20 }
 0x523   : > { %v12718_v22 = vpop.permute.xlu0 %2783  ;;  %v12720_v1 = vpop.permute.xlu2 %2657 }
 0x524   : > { %16751 = vst [vmem:[#allocation67_spill] sm:$0xff] %v12720_v1  ;;  %v12722_v50 = vpop.permute.xlu1 %2787 }
 0x529   : > { %2885 = vrot.lane.b32.xlu0 %v12382_v15, %s10266_s30  ;;  %2951 = vrot.lane.b32.xlu2 %v12374_v62, %s10267_s6 }
 0x52a   : > { %2937 = vrot.lane.b32.xlu1 %v12202_v48, %s10267_s6 }
 0x52b   : > { %v12730_v10 = vpop.permute.xlu0 %2767  ;;  %v12732_v0 = vpop.permute.xlu2 %2739 }
 0x52c   : > { %16752 = vst [vmem:[#allocation68_spill] sm:$0xff] %v12730_v10  ;;  %v12734_v56 = vpop.permute.xlu1 %2819 }
 0x531   : > { %2949 = vrot.lane.b32.xlu0 %v12382_v15, %s10267_s6  ;;  %2867 = vrot.lane.b32.xlu2 %v12442_v54, %s10266_s30 }
 0x532   : > { %2935 = vrot.lane.b32.xlu1 %v12122_v24, %s10267_s6 }
 0x533   : > { %v12742_v1 = vpop.permute.xlu0 %2879  ;;  %v12746_v48 = vpop.permute.xlu2 %2883 }
 0x534   : > { %16753 = vst [vmem:[#allocation69_spill] sm:$0xff] %v12742_v1  ;;  %v12744_v62 = vpop.permute.xlu1 %2803 }
 0x539   : > { %2775 = vrot.lane.b32.xlu0 %v12296_v36, %s10265_s20  ;;  %2857 = vrot.lane.b32.xlu2 %v12483_v6, %s10266_s30  ;;  %v3075_v36 = vpop.f32.mrf.mxu1 }
 0x53a   : > { %2931 = vrot.lane.b32.xlu1 %v12442_v54, %s10267_s6 }
 0x53b   : > { %v12754_v15 = vpop.permute.xlu0 %2911  ;;  %v12758_v24 = vpop.permute.xlu2 %2691 }
 0x53c   : > { %16754 = vst [vmem:[#allocation70_spill] sm:$0xff] %v12754_v15  ;;  %v12756_v14 = vpop.permute.xlu1 %2659 }
 0x53d   : > { %16755 = vst [vmem:[#allocation71_spill] sm:$0xff] %v12756_v14 }
 0x53e   : > { %16756 = vst [vmem:[#allocation72_spill] sm:$0xff] %v12758_v24 }
 0x541   : > { %2631 = vrot.lane.b32.xlu0 %v12645_v39, %s10266_s30  ;;  %2889 = vrot.lane.b32.xlu2 %v12483_v6, %s10265_s20  ;;  %v12778_v18 = vpop.f32.mrf.mxu1 }
 0x542   : > { %2921 = vrot.lane.b32.xlu1 %v12483_v6, %s10267_s6  ;;  %16758 = vst [vmem:[#allocation74_spill] sm:$0xff] %v12778_v18 }
 0x543   : > { %v12766_v17 = vpop.permute.xlu0 %2623  ;;  %v2822_v54 = vpop.permute.xlu2 %2821 }
 0x544   : > { %16757 = vst [vmem:[#allocation73_spill] sm:$0xff] %v12766_v17  ;;  %v2758_v35 = vpop.permute.xlu1 %2757  ;;  %v3443_v10 = vunpack.c.l.b16 %v2822_v54 }
 0x545   : > { %v3153_v30 = vunpack.c.l.b16 %v2758_v35  ;;  %v3441_v35 = vunpack.c.l.b16 %v12696_v47 }
 0x549   : > { %2695 = vrot.lane.b32.xlu0 %v12645_v39, %s10267_s6  ;;  %2891 = vrot.lane.b32.xlu2 %v12474_v57, %s10265_s20  ;;  %v12790_v46 = vpop.f32.mrf.mxu1 }
 0x54b   : > { %v12772_v14 = vpop.permute.xlu0 %2737  ;;  %v12776_v15 = vpop.permute.xlu2 %2805 }
 0x54c   : > { %v12774_v24 = vpop.permute.xlu1 %2773 }
 0x551   : > { %2865 = vrot.lane.b32.xlu0 %v12451_v37, %s10266_s30  ;;  %2929 = vrot.lane.b32.xlu2 %v12451_v37, %s10267_s6  ;;  %v3082_v31 = vpop.f32.mrf.mxu1 }
 0x553   : > { %v12784_v6 = vpop.permute.xlu0 %2881  ;;  %v12788_v17 = vpop.permute.xlu2 %2917 }
 0x554   : > { %v12786_v39 = vpop.permute.xlu1 %2629  ;;  %16760 = vst [vmem:[#allocation76_spill] sm:$0xff] %v12788_v17 }
 0x555   : > { %16759 = vst [vmem:[#allocation75_spill] sm:$0xff] %v12786_v39 }
 0x559   : > { %2945 = vrot.lane.b32.xlu0 %v12397_v7, %s10267_s6  ;;  %2927 = vrot.lane.b32.xlu2 %v12460_v59, %s10267_s6 }
 0x55b   : > { %v12796_v18 = vpop.permute.xlu0 %2913  ;;  %v12800_v55 = vpop.permute.xlu2 %2661 }
 0x55c   : > { %16761 = vst [vmem:[#allocation77_spill] sm:$0xff] %v12796_v18  ;;  %v12798_v21 = vpop.permute.xlu1 %2693  ;;  %v12808_v18 = vld [vmem:[#allocation2 + $0x30] sm:$0xff] }
 0x55d   : > { %16762 = vst [vmem:[#allocation78_spill] sm:$0xff] %v12798_v21 }
 0x55e   : > { %16763 = vst [vmem:[#allocation79_spill] sm:$0xff] %v12800_v55  ;;  %v3442_v55 = vunpack.c.l.b16 %v12734_v56  ;;  %v12823_v56 = vld [vmem:[#allocation2 + $0x18] sm:$0xff] }
 0x561   : > { %2947 = vrot.lane.b32.xlu0 %v12388_v5, %s10267_s6  ;;  %2923 = vrot.lane.b32.xlu2 %v12474_v57, %s10267_s6 }
 0x563   : > { %v12806_v39 = vpop.permute.xlu0 %2689  ;;  %v2760_v7 = vpop.permute.xlu2 %2759 }
 0x564   : > { %16764 = vst [vmem:[#allocation80_spill] sm:$0xff] %v12806_v39  ;;  %v2824_v17 = vpop.permute.xlu1 %2823  ;;  %v3154_v51 = vunpack.c.l.b16 %v2760_v7  ;;  %v12816_v39 = vadd.f32 %v3075_v36, %v12808_v18  ;;  %v3150_v36 = vunpack.c.l.b16 %v12647_v45  ;;  %v3437_v45 = vunpack.c.l.b16 %v12485_v4 }
 0x565   : > { %v3444_v53 = vunpack.c.l.b16 %v2824_v17  ;;  %v12819_v17 = vpop.f32.mrf.mxu1 }
 0x566   : > { %v3162_v11 = vpack.c.b16 %v3154_v51, %v3153_v30  ;;  %v3151_v30 = vunpack.c.l.b16 %v12686_v49  ;;  %v12832_v49 = vadd.f32 %v3082_v31, %v12823_v56 }
 0x567   : > { %v3452_v21 = vpack.c.b16 %v3444_v53, %v3443_v10  ;;  %v3440_v10 = vunpack.c.l.b16 %v12649_v60 }
 0x568   : > { %v3209_v1 = vsel %vm3017_vm2, %v3162_v11, 0  ;;  %v3451_v11 = vpack.c.b16 %v3442_v55, %v3441_v35  ;;  %v3439_v55 = vunpack.c.l.b16 %v12591_v2  ;;  %v3147_v35 = vunpack.c.l.b16 %v12542_v26 }
 0x569   : > { %v3499_v5 = vsel %vm3017_vm2, %v3452_v21, 0  ;;  %2897 = vrot.lane.b32.xlu0 %v12451_v37, %s10265_s20  ;;  %3211 = vmatpush.bf16.xpose.msra.mxu2 %v3209_v1  ;;  %v3149_v1 = vunpack.c.l.b16 %v12682_v32 }
 0x56a   : > { %3501 = vmatpush.bf16.xpose.msra.mxu0 %v3499_v5  ;;  %v3496_v47 = vsel %vm3017_vm2, %v3451_v11, 0  ;;  %v3450_v7 = vpack.c.b16 %v3440_v10, %v3439_v55  ;;  %v12839_v5 = vld [vmem:[#allocation2 + $0x68] sm:$0xff] }
 0x56b   : > { %v2756_v53 = vpop.permute.xlu0 %2755  ;;  %v3160_v32 = vpack.c.b16 %v3150_v36, %v3149_v1  ;;  %v2792_v55 = vpop.permute.xlu2 %2791 }
 0x56c   : > { %v3152_v51 = vunpack.c.l.b16 %v2756_v53  ;;  %3550 = vmax.xlane.f32.xlu1 %v12816_v39  ;;  %v3438_v53 = vunpack.c.l.b16 %v12558_v61 }
 0x56d   : > { %v3087_v60 = vpop.f32.mrf.mxu1  ;;  %v3203_v31 = vsel %vm3017_vm2, %v3160_v32, 0 }
 0x56e   : > { %v3161_v21 = vpack.c.b16 %v3152_v51, %v3151_v30  ;;  %v3493_v30 = vsel %vm3017_vm2, %v3450_v7, 0  ;;  %v12848_v2 = vadd.f32 %v3087_v60, %v12839_v5  ;;  %v3148_v51 = vunpack.c.l.b16 %v12534_v34  ;;  %v12868_v60 = vld [vmem:[#allocation2 + $0x58] sm:$0xff] }
 0x56f   : > { %v3449_v61 = vpack.c.b16 %v3438_v53, %v3437_v45  ;;  %v3435_v34 = vunpack.c.l.b16 %v12776_v15  ;;  %v12872_v7 = vadd.f32 %v12790_v46, %v12868_v60  ;;  %v3433_v15 = vunpack.c.l.b16 %v12708_v19  ;;  %v12880_v45 = vld [vmem:[#allocation2 + $0x50] sm:$0xff] }
 0x570   : > { %v3206_v37 = vsel %vm3017_vm2, %v3161_v21, 0  ;;  %v3159_v26 = vpack.c.b16 %v3148_v51, %v3147_v35  ;;  %v2808_v21 = vpop.permute.xlu1 %2807 }
 0x571   : > { %2861 = vrot.lane.b32.xlu0 %v12465_v44, %s10266_s30  ;;  %3212 = vmatpush.bf16.xpose.msra.mxu2 %v3206_v37  ;;  %v12855_v37 = vld [vmem:[#allocation2 + $0x8] sm:$0xff] }
 0x572   : > { %3502 = vmatpush.bf16.xpose.msra.mxu0 %v3496_v47  ;;  %v3200_v1 = vsel %vm3017_vm2, %v3159_v26, 0  ;;  %v3490_v47 = vsel %vm3017_vm2, %v3449_v61, 0  ;;  %v12885_v61 = vadd.f32 %v12819_v17, %v12880_v45 }
 0x573   : > { %v12836_v54 = vpop.permute.xlu0 %2771  ;;  %v2744_v51 = vpop.permute.xlu2 %2743 }
 0x574   : > { %3556 = vmax.xlane.f32.xlu1 %v12832_v49  ;;  %v3146_v17 = vunpack.c.l.b16 %v2744_v51 }
 0x575   : > { %v3090_v10 = vpop.f32.mrf.mxu1 }
 0x576   : > { %v12862_v4 = vadd.f32 %v3090_v10, %v12855_v37  ;;  %v3432_v10 = vunpack.c.l.b16 %v12662_v8 }
 0x579   : > { %2863 = vrot.lane.b32.xlu0 %v12460_v59, %s10266_s30  ;;  %3213 = vmatpush.bf16.xpose.msra.mxu2 %v3203_v31  ;;  %v3436_v59 = vunpack.c.l.b16 %v2808_v21  ;;  %v3299_v31 = vunpack.c.l.b16 %v2792_v55 }
 0x57a   : > { %3503 = vmatpush.bf16.xpose.msra.mxu0 %v3493_v30 }
 0x57b   : > { %v12852_v11 = vpop.permute.xlu0 %2915  ;;  %v3448_v32 = vpack.c.b16 %v3436_v59, %v3435_v34  ;;  %v3296_v59 = vunpack.c.l.b16 %v12684_v42  ;;  %v2888_v8 = vpop.permute.xlu2 %2887 }
 0x57c   : > { %3560 = vmax.xlane.f32.xlu1 %v12848_v2 }
 0x57d   : > { %v3487_v35 = vsel %vm3017_vm2, %v3448_v32, 0 }
 0x581   : > { %2941 = vrot.lane.b32.xlu0 %v12340_v16, %s10267_s6  ;;  %3214 = vmatpush.bf16.xpose.msra.mxu2 %v3200_v1  ;;  %v3434_v16 = vunpack.c.l.b16 %v12744_v62  ;;  %v3297_v62 = vunpack.c.l.b16 %v12722_v50  ;;  %v3431_v50 = vunpack.c.l.b16 %v12605_v12 }
 0x582   : > { %3504 = vmatpush.bf16.xpose.msra.mxu0 %v3490_v47 }
 0x583   : > { %v12865_v36 = vpop.permute.xlu0 %2627  ;;  %v3447_v46 = vpack.c.b16 %v3434_v16, %v3433_v15  ;;  %v3306_v34 = vpack.c.b16 %v3297_v62, %v3296_v59  ;;  %v3446_v55 = vpack.c.b16 %v3432_v10, %v3431_v50  ;;  %v3295_v16 = vunpack.c.l.b16 %v12718_v22 }
 0x584   : > { %3562 = vmax.xlane.f32.xlu1 %v12862_v4  ;;  %v3429_v15 = vunpack.c.l.b16 %v12574_v23  ;;  %v3141_v23 = vunpack.c.l.b16 %v12694_v52  ;;  %v3292_v52 = vunpack.c.l.b16 %v12518_v41  ;;  %v3290_v41 = vunpack.c.l.b16 %v12774_v24 }
 0x585   : > { %v3484_v19 = vsel %vm3017_vm2, %v3447_v46, 0  ;;  %v3351_v42 = vsel %vm3017_vm2, %v3306_v34, 0  ;;  %v3481_v12 = vsel %vm3017_vm2, %v3446_v55, 0  ;;  %v3139_v34 = vunpack.c.l.b16 %v12556_v63 }
 0x586   : > { %v3407_v24 = vunpack.c.l.b16 %v12368_v40 }
 0x589   : > { %2893 = vrot.lane.b32.xlu0 %v12465_v44, %s10265_s20 }
 0x58a   : > { %3505 = vmatpush.bf16.xpose.msra.mxu0 %v3487_v35  ;;  %3554 = vmax.xlane.f32.xlu2 %v12872_v7  ;;  %v3143_v35 = vunpack.c.l.b16 %v12772_v14  ;;  %v3430_v14 = vunpack.c.l.b16 %v12560_v29  ;;  %v3405_v29 = vunpack.c.l.b16 %v12326_v13 }
 0x58b   : > { %v2790_v53 = vpop.permute.xlu0 %2789 }
 0x58c   : > { %v3298_v30 = vunpack.c.l.b16 %v2790_v53  ;;  %v3294_v53 = vunpack.c.l.b16 %v12589_v58  ;;  %v3445_v46 = vpack.c.b16 %v3430_v14, %v3429_v15  ;;  %v3293_v58 = vunpack.c.l.b16 %v12615_v3  ;;  %v16765_v14 = vld [vmem:[#allocation69_spill] sm:$0xff] }
 0x58d   : > { %v3406_v3 = vunpack.c.l.b16 %v12280_v28 }
 0x58e   : > { %v3307_v26 = vpack.c.b16 %v3299_v31, %v3298_v30  ;;  %v3144_v31 = vunpack.c.l.b16 %v12732_v0  ;;  %v3305_v51 = vpack.c.b16 %v3295_v16, %v3294_v53  ;;  %v3478_v0 = vsel %vm3017_vm2, %v3445_v46, 0 }
 0x58f   : > { %v4382_v16 = vunpack.c.l.b16 %v2888_v8  ;;  %v4380_v53 = vunpack.c.l.b16 %v12746_v48  ;;  %v3288_v8 = vunpack.c.l.b16 %v12698_v9  ;;  %v16769_v9 = vld [vmem:[#allocation68_spill] sm:$0xff] }
 0x590   : > { %v3354_v21 = vsel %vm3017_vm2, %v3307_v26, 0  ;;  %v3157_v30 = vpack.c.b16 %v3144_v31, %v3143_v35  ;;  %v3348_v62 = vsel %vm3017_vm2, %v3305_v51, 0  ;;  %v16766_v51 = vld [vmem:[#allocation35_spill] sm:$0xff] }
 0x591   : > { %3356 = vmatpush.bf16.xpose.msra.mxu3 %v3354_v21  ;;  %2859 = vrot.lane.b32.xlu0 %v12474_v57, %s10266_s30  ;;  %v2952_v21 = vpop.permute.xlu2 %2951 }
 0x592   : > { %3506 = vmatpush.bf16.xpose.msra.mxu0 %v3484_v19  ;;  %3558 = vmax.xlane.f32.xlu2 %v12885_v61  ;;  %v3194_v26 = vsel %vm3017_vm2, %v3157_v30, 0  ;;  %v4640_v19 = vunpack.c.l.b16 %v2952_v21  ;;  %v3287_v21 = vunpack.c.l.b16 %v16769_v9 }
 0x593   : > { %v2742_v1 = vpop.permute.xlu0 %2741 }
 0x594   : > { %v3145_v47 = vunpack.c.l.b16 %v2742_v1  ;;  %v3304_v1 = vpack.c.b16 %v3293_v58, %v3292_v52 }
 0x596   : > { %v3158_v32 = vpack.c.b16 %v3146_v17, %v3145_v47  ;;  %v3421_v47 = vpack.c.b16 %v3406_v3, %v3405_v29  ;;  %v3345_v13 = vsel %vm3017_vm2, %v3304_v1, 0  ;;  %v16771_v29 = vld [vmem:[#allocation55_spill] sm:$0xff]  ;;  %v16773_v1 = vld [vmem:[#allocation29_spill] sm:$0xff] }
 0x597   : > { %v3286_v52 = vunpack.c.l.b16 %v16771_v29  ;;  %v16785_v29 = vld [vmem:[#allocation56_spill] sm:$0xff] }
 0x598   : > { %v3197_v57 = vsel %vm3017_vm2, %v3158_v32, 0 }
 0x599   : > { %3215 = vmatpush.bf16.xpose.msra.mxu2 %v3197_v57  ;;  %3357 = vmatpush.bf16.xpose.msra.mxu3 %v3351_v42  ;;  %v4379_v57 = vunpack.c.l.b16 %v12784_v6  ;;  %v3116_v6 = vunpack.c.l.b16 %v12261_v43  ;;  %v3301_v3 = vpack.c.b16 %v3287_v21, %v3286_v52  ;;  %v16784_v21 = vld [vmem:[#allocation70_spill] sm:$0xff] }
 0x59a   : > { %3507 = vmatpush.bf16.xpose.msra.mxu0 %v3481_v12  ;;  %2939 = vrot.lane.b32.xlu0 %v12380_v33, %s10267_s6  ;;  %v3142_v33 = vunpack.c.l.b16 %v12660_v27  ;;  %v12967_v52 = vld [vmem:[#allocation2] sm:$0xff] }
 0x59b   : > { %v2886_v22 = vpop.permute.xlu0 %2885  ;;  %v4389_v30 = vpack.c.b16 %v4380_v53, %v4379_v57 }
 0x59c   : > { %v3156_v50 = vpack.c.b16 %v3142_v33, %v3141_v23  ;;  %v4381_v55 = vunpack.c.l.b16 %v2886_v22  ;;  %v4378_v22 = vunpack.c.l.b16 %v16765_v14 }
 0x59e   : > { %v3191_v27 = vsel %vm3017_vm2, %v3156_v50, 0  ;;  %v4390_v42 = vpack.c.b16 %v4382_v16, %v4381_v55  ;;  %v2920_v55 = vpop.permute.xlu1 %2919  ;;  %v16777_v16 = vld [vmem:[#allocation51_spill] sm:$0xff] }
 0x5a1   : > { %3216 = vmatpush.bf16.xpose.msra.mxu2 %v3194_v26  ;;  %3358 = vmatpush.bf16.xpose.msra.mxu3 %v3348_v62  ;;  %v16768_v62 = vld [vmem:[#allocation32_spill] sm:$0xff] }
 0x5a2   : > { %3508 = vmatpush.bf16.xpose.msra.mxu0 %v3478_v0  ;;  %2933 = vrot.lane.b32.xlu0 %v16714_v20, %s10267_s6  ;;  %v3140_v20 = vunpack.c.l.b16 %v12546_v25  ;;  %v3289_v25 = vunpack.c.l.b16 %v12836_v54  ;;  %v3408_v54 = vunpack.c.l.b16 %v16766_v51  ;;  %v4376_v58 = vunpack.c.l.b16 %v16768_v62  ;;  %v16770_v0 = vld [vmem:[#allocation23_spill] sm:$0xff] }
 0x5a3   : > { %v2950_v10 = vpop.permute.xlu0 %2949  ;;  %v4375_v33 = vunpack.c.l.b16 %v16770_v0 }
 0x5a4   : > { %v4639_v59 = vunpack.c.l.b16 %v2950_v10  ;;  %v3155_v63 = vpack.c.b16 %v3140_v20, %v3139_v34  ;;  %v3302_v46 = vpack.c.b16 %v3289_v25, %v3288_v8  ;;  %v3422_v48 = vpack.c.b16 %v3408_v54, %v3407_v24  ;;  %v16774_v34 = vld [vmem:[#allocation58_spill] sm:$0xff] }
 0x5a5   : > { %v4387_v50 = vpack.c.b16 %v4376_v58, %v4375_v33  ;;  %v3336_v20 = vsel %vm3017_vm2, %v3301_v3, 0  ;;  %v4511_v24 = vunpack.c.l.b16 %v2920_v55  ;;  %v16791_v55 = vld [vmem:[#allocation42_spill] sm:$0xff] }
 0x5a6   : > { %v4648_v17 = vpack.c.b16 %v4640_v19, %v4639_v59  ;;  %v3188_v15 = vsel %vm3017_vm2, %v3155_v63, 0  ;;  %v3339_v43 = vsel %vm3017_vm2, %v3302_v46, 0  ;;  %v16772_v19 = vld [vmem:[#allocation27_spill] sm:$0xff]  ;;  %v4509_v46 = vunpack.c.l.b16 %v12852_v11 }
 0x5a7   : > { %v4374_v59 = vunpack.c.l.b16 %v16772_v19  ;;  %v4506_v11 = vunpack.c.l.b16 %v16785_v29  ;;  %v12969_v19 = vpop.permute.xlu1 %2663  ;;  %v16799_v29 = vld [vmem:[#allocation48_spill] sm:$0xff] }
 0x5a9   : > { %8656 = vmatmul.msk.bf16.vlgmr.msra.gmra.mxu0 %vm3017_vm2, %v3421_v47  ;;  %3217 = vmatpush.bf16.xpose.msra.mxu2 %v3191_v27  ;;  %v3285_v27 = vunpack.c.l.b16 %v16774_v34 }
 0x5aa   : > { %4657 = vmatpush.bf16.msrb.mxu0 %v4648_v17  ;;  %3359 = vmatpush.bf16.xpose.msra.mxu3 %v3345_v13  ;;  %v4373_v17 = vunpack.c.l.b16 %v16773_v1  ;;  %v2868_v13 = vpop.permute.xlu2 %2867  ;;  %v16787_v1 = vld [vmem:[#allocation47_spill] sm:$0xff] }
 0x5ab   : > { %2925 = vrot.lane.b32.xlu0 %v12465_v44, %s10267_s6  ;;  %v2776_v28 = vpop.permute.xlu0 %2775  ;;  %v3115_v44 = vunpack.c.l.b16 %v12303_v38  ;;  %v16767_v38 = vld [vmem:[#allocation57_spill] sm:$0xff] }
 0x5ac   : > { %v3291_v32 = vunpack.c.l.b16 %v2776_v28  ;;  %v4377_v26 = vunpack.c.l.b16 %v16767_v38  ;;  %v4386_v47 = vpack.c.b16 %v4374_v59, %v4373_v17  ;;  %v16775_v28 = vld [vmem:[#allocation41_spill] sm:$0xff]  ;;  %v16781_v38 = vld [vmem:[#allocation36_spill] sm:$0xff]  ;;  %v3120_v17 = vunpack.c.l.b16 %v16787_v1 }
 0x5ad   : > { %v3131_v23 = vpack.c.b16 %v3116_v6, %v3115_v44  ;;  %v16779_v44 = vld [vmem:[#allocation40_spill] sm:$0xff]  ;;  %v16786_v59 = vld [vmem:[#allocation61_spill] sm:$0xff] }
 0x5ae   : > { %v3303_v35 = vpack.c.b16 %v3291_v32, %v3290_v41  ;;  %v4388_v40 = vpack.c.b16 %v4378_v22, %v4377_v26  ;;  %v3118_v41 = vunpack.c.l.b16 %v16775_v28  ;;  %v16776_v32 = vld [vmem:[#allocation44_spill] sm:$0xff]  ;;  %v3410_v53 = vunpack.c.l.b16 %v16779_v44 }
 0x5af   : > { %v3409_v63 = vunpack.c.l.b16 %v16776_v32  ;;  %v3261_v26 = vunpack.c.l.b16 %v16781_v38  ;;  %v3119_v32 = vunpack.c.l.b16 %v16791_v55 }
 0x5b0   : > { %v3342_v12 = vsel %vm3017_vm2, %v3303_v35, 0  ;;  %v3284_v35 = vunpack.c.l.b16 %v16777_v16 }
 0x5b1   : > { %3218 = vmatpush.bf16.xpose.msra.mxu2 %v3188_v15  ;;  %v3423_v22 = vpack.c.b16 %v3410_v53, %v3409_v63  ;;  %v16794_v53 = vld [vmem:[#allocation43_spill] sm:$0xff] }
 0x5b2   : > { %3360 = vmatpush.bf16.xpose.msra.mxu3 %v3342_v12  ;;  %v4372_v12 = vunpack.c.l.b16 %v2868_v13  ;;  %v3300_v8 = vpack.c.b16 %v3285_v27, %v3284_v35  ;;  %v16789_v27 = vld [vmem:[#allocation25_spill] sm:$0xff] }
 0x5b3   : > { %v12933_v31 = vpop.permute.xlu0 %2631  ;;  %v3411_v13 = vunpack.c.l.b16 %v16789_v27  ;;  %v16792_v35 = vld [vmem:[#allocation49_spill] sm:$0xff] }
 0x5b8   : > { %8640 = vmatmul.msk.bf16.vlgmr.msra.gmra.mxu2 %vm3017_vm2, %v3131_v23  ;;  %v3333_v23 = vsel %vm3017_vm2, %v3300_v8, 0 }
 0x5b9   : > { %4399 = vmatpush.bf16.msrb.mxu2 %v4390_v42  ;;  %8657 = vmatmul.msk.bf16.gmra.mxu0 %vm3017_vm2, %v3422_v48  ;;  %v16778_v42 = vld [vmem:[#allocation37_spill] sm:$0xff] }
 0x5ba   : > { %3361 = vmatpush.bf16.xpose.msra.mxu3 %v3339_v43  ;;  %v3117_v15 = vunpack.c.l.b16 %v16778_v42  ;;  %v16782_v48 = vld [vmem:[#allocation77_spill] sm:$0xff]  ;;  %v4507_v43 = vunpack.c.l.b16 %v16784_v21  ;;  %v16793_v42 = vld [vmem:[#allocation26_spill] sm:$0xff] }
 0x5bb   : > { %v12946_v10 = vpop.permute.xlu0 %2695  ;;  %v4508_v62 = vunpack.c.l.b16 %v16782_v48  ;;  %v16796_v48 = vld [vmem:[#allocation33_spill] sm:$0xff] }
 0x5bc   : > { %v3132_v6 = vpack.c.b16 %v3118_v41, %v3117_v15  ;;  %v4517_v3 = vpack.c.b16 %v4507_v43, %v4506_v11  ;;  %v4503_v15 = vunpack.c.l.b16 %v16793_v42  ;;  %v16798_v43 = vld [vmem:[#allocation54_spill] sm:$0xff]  ;;  %v3121_v11 = vunpack.c.l.b16 %v16799_v29 }
 0x5bd   : > { %4400 = vmatpush.bf16.msrb.mxu2 %v4389_v30  ;;  %v16780_v30 = vld [vmem:[#allocation76_spill] sm:$0xff]  ;;  %v4518_v0 = vpack.c.b16 %v4509_v46, %v4508_v62  ;;  %v3262_v62 = vunpack.c.l.b16 %v16796_v48 }
 0x5be   : > { %v4510_v51 = vunpack.c.l.b16 %v16780_v30  ;;  %v2900_v30 = vpop.permute.xlu1 %2899 }
 0x5bf   : > { %v4501_v38 = vunpack.c.l.b16 %v2900_v30 }
 0x5c0   : > { %v4519_v54 = vpack.c.b16 %v4511_v24, %v4510_v51  ;;  %v4502_v24 = vunpack.c.l.b16 %v16794_v53 }
 0x5c1   : > { %4401 = vmatpush.bf16.msrb.mxu2 %v4388_v40  ;;  %v16783_v40 = vld [vmem:[#allocation34_spill] sm:$0xff] }
 0x5c2   : > { %3362 = vmatpush.bf16.xpose.msra.mxu3 %v3336_v20  ;;  %v3260_v9 = vunpack.c.l.b16 %v16783_v40  ;;  %v16790_v20 = vld [vmem:[#allocation31_spill] sm:$0xff] }
 0x5c3   : > { %v2866_v57 = vpop.permute.xlu0 %2865  ;;  %v4504_v28 = vunpack.c.l.b16 %v16790_v20 }
 0x5c4   : > { %v4371_v25 = vunpack.c.l.b16 %v2866_v57  ;;  %v3276_v33 = vpack.c.b16 %v3261_v26, %v3260_v9  ;;  %v3412_v57 = vunpack.c.l.b16 %v16792_v35  ;;  %v16797_v9 = vld [vmem:[#allocation28_spill] sm:$0xff] }
 0x5c5   : > { %4402 = vmatpush.bf16.msrb.mxu2 %v4387_v50  ;;  %v4505_v50 = vunpack.c.l.b16 %v16786_v59  ;;  %v3122_v21 = vunpack.c.l.b16 %v16797_v9  ;;  %v16800_v59 = vld [vmem:[#allocation53_spill] sm:$0xff]  ;;  %v16808_v9 = vld [vmem:[#allocation46_spill] sm:$0xff] }
 0x5c6   : > { %v4385_v14 = vpack.c.b16 %v4372_v12, %v4371_v25  ;;  %v3133_v25 = vpack.c.b16 %v3120_v17, %v3119_v32  ;;  %v3424_v8 = vpack.c.b16 %v3412_v57, %v3411_v13  ;;  %v2858_v17 = vpop.permute.xlu2 %2857  ;;  %v2944_v32 = vpop.permute.xlu1 %2943  ;;  %v16803_v57 = vld [vmem:[#allocation62_spill] sm:$0xff] }
 0x5c7   : > { %v4516_v12 = vpack.c.b16 %v4505_v50, %v4504_v28  ;;  %v3414_v50 = vunpack.c.l.b16 %v16800_v59  ;;  %v3124_v42 = vunpack.c.l.b16 %v16803_v57  ;;  %v16809_v59 = vld [vmem:[#allocation73_spill] sm:$0xff] }
 0x5c8   : > { %8641 = vmatmul.msk.bf16.gmra.mxu2 %vm3017_vm2, %v3132_v6  ;;  %v12985_v6 = vld [vmem:[#allocation2 + $0x48] sm:$0xff] }
 0x5c9   : > { %4403 = vmatpush.bf16.msrb.mxu2 %v4386_v47  ;;  %8658 = vmatmul.msk.bf16.gmra.mxu0 %vm3017_vm2, %v3423_v22  ;;  %v16788_v47 = vld [vmem:[#allocation74_spill] sm:$0xff]  ;;  %v4515_v22 = vpack.c.b16 %v4503_v15, %v4502_v24  ;;  %v16804_v15 = vld [vmem:[#allocation65_spill] sm:$0xff]  ;;  %v4636_v24 = vunpack.c.l.b16 %v2944_v32 }
 0x5ca   : > { %3363 = vmatpush.bf16.xpose.msra.mxu3 %v3333_v23  ;;  %v12976_v34 = vadd.f32 %v16788_v47, %v12967_v52  ;;  %v16801_v47 = vld [vmem:[#allocation45_spill] sm:$0xff] }
 0x5cb   : > { %v2946_v58 = vpop.permute.xlu0 %2945  ;;  %v3265_v27 = vunpack.c.l.b16 %v16801_v47 }
 0x5cc   : > { %v4637_v63 = vunpack.c.l.b16 %v2946_v58 }
 0x5cd   : > { %4404 = vmatpush.bf16.msrb.mxu2 %v4385_v14  ;;  %v3092_v14 = vpop.f32.mrf.mxu1 }
 0x5ce   : > { %v12990_v51 = vadd.f32 %v3092_v14, %v12985_v6  ;;  %v2890_v35 = vpop.permute.xlu2 %2889  ;;  %v16806_v14 = vld [vmem:[#allocation63_spill] sm:$0xff] }
 0x5cf   : > { %v4496_v29 = vunpack.c.l.b16 %v2890_v35 }
 0x5d1   : > { %8648 = vmatmul.msk.bf16.vlgmr.msra.gmra.mxu3 %vm3017_vm2, %v3276_v33 }
 0x5d2   : > { %4528 = vmatpush.bf16.msrb.mxu3 %v4519_v54  ;;  %v16795_v54 = vld [vmem:[#allocation39_spill] sm:$0xff] }
 0x5d3   : > { %v2948_v41 = vpop.permute.xlu0 %2947  ;;  %v3263_v46 = vunpack.c.l.b16 %v16795_v54 }
 0x5d4   : > { %v4638_v16 = vunpack.c.l.b16 %v2948_v41  ;;  %v16802_v41 = vld [vmem:[#allocation38_spill] sm:$0xff] }
 0x5d5   : > { %3552 = vmax.xlane.f32.xlu0 %v12976_v34  ;;  %v3277_v40 = vpack.c.b16 %v3263_v46, %v3262_v62  ;;  %v3264_v55 = vunpack.c.l.b16 %v16802_v41 }
 0x5d6   : > { %4529 = vmatpush.bf16.msrb.mxu3 %v4518_v0  ;;  %v4647_v44 = vpack.c.b16 %v4638_v16, %v4637_v63  ;;  %v3413_v0 = vunpack.c.l.b16 %v16798_v43  ;;  %v2892_v48 = vpop.permute.xlu2 %2891 }
 0x5d7   : > { %v3278_v16 = vpack.c.b16 %v3265_v27, %v3264_v55  ;;  %v4497_v43 = vunpack.c.l.b16 %v2892_v48  ;;  %v16812_v55 = vld [vmem:[#allocation72_spill] sm:$0xff] }
 0x5d8   : > { %8642 = vmatmul.msk.bf16.gmra.mxu2 %vm3017_vm2, %v3133_v25  ;;  %4658 = vmatpush.bf16.msrb.mxu0 %v4647_v44  ;;  %v3425_v1 = vpack.c.b16 %v3414_v50, %v3413_v0  ;;  %v16805_v44 = vld [vmem:[#allocation52_spill] sm:$0xff]  ;;  %v3126_v50 = vunpack.c.l.b16 %v16809_v59  ;;  %v3418_v32 = vunpack.c.l.b16 %v16812_v55  ;;  %v16818_v59 = vld [vmem:[#allocation59_spill] sm:$0xff] }
 0x5d9   : > { %8659 = vmatmul.msk.bf16.gmra.mxu0 %vm3017_vm2, %v3424_v8  ;;  %v3123_v53 = vunpack.c.l.b16 %v16805_v44  ;;  %v16814_v44 = vld [vmem:[#allocation50_spill] sm:$0xff] }
 0x5da   : > { %4530 = vmatpush.bf16.msrb.mxu3 %v4517_v3  ;;  %v3134_v3 = vpack.c.b16 %v3122_v21, %v3121_v11  ;;  %v3266_v21 = vunpack.c.l.b16 %v16808_v9 }
 0x5db   : > { %v2898_v23 = vpop.permute.xlu0 %2897  ;;  %v3135_v30 = vpack.c.b16 %v3124_v42, %v3123_v53  ;;  %v16813_v42 = vld [vmem:[#allocation30_spill] sm:$0xff]  ;;  %v3268_v53 = vunpack.c.l.b16 %v16814_v44 }
 0x5dc   : > { %v4500_v26 = vunpack.c.l.b16 %v2898_v23  ;;  %v2896_v23 = vpop.permute.xlu1 %2895 }
 0x5dd   : > { %3564 = vmax.xlane.f32.xlu0 %v12990_v51 }
 0x5de   : > { %4531 = vmatpush.bf16.msrb.mxu3 %v4516_v12  ;;  %v4514_v58 = vpack.c.b16 %v4501_v38, %v4500_v26  ;;  %v3415_v12 = vunpack.c.l.b16 %v16804_v15  ;;  %v16807_v38 = vld [vmem:[#allocation24_spill] sm:$0xff]  ;;  %v2930_v57 = vpop.permute.xlu2 %2929  ;;  %v3269_v15 = vunpack.c.l.b16 %v16813_v42 }
 0x5df   : > { %v3267_v26 = vunpack.c.l.b16 %v16807_v38 }
 0x5e1   : > { %8649 = vmatmul.msk.bf16.gmra.mxu3 %vm3017_vm2, %v3277_v40 }
 0x5e2   : > { %4532 = vmatpush.bf16.msrb.mxu3 %v4515_v22  ;;  %v3416_v22 = vunpack.c.l.b16 %v16806_v14 }
 0x5e3   : > { %v2862_v33 = vpop.permute.xlu0 %2861 }
 0x5e4   : > { %v4369_v20 = vunpack.c.l.b16 %v2862_v33  ;;  %v3426_v46 = vpack.c.b16 %v3416_v22, %v3415_v12  ;;  %v3279_v33 = vpack.c.b16 %v3267_v26, %v3266_v21  ;;  %v2938_v11 = vpop.permute.xlu1 %2937  ;;  %v3128_v22 = vunpack.c.l.b16 %v12865_v36  ;;  %v16816_v26 = vld [vmem:[#allocation78_spill] sm:$0xff]  ;;  %v16817_v36 = vld [vmem:[#allocation64_spill] sm:$0xff] }
 0x5e5   : > { %v3419_v48 = vunpack.c.l.b16 %v16816_v26 }
 0x5e6   : > { %4533 = vmatpush.bf16.msrb.mxu3 %v4514_v58  ;;  %v4499_v58 = vunpack.c.l.b16 %v2896_v23 }
 0x5e8   : > { %8643 = vmatmul.msk.bf16.gmra.mxu2 %vm3017_vm2, %v3134_v3  ;;  %v4512_v3 = vpack.c.b16 %v4497_v43, %v4496_v29 }
 0x5e9   : > { %8660 = vmatmul.msk.bf16.gmra.mxu0 %vm3017_vm2, %v3425_v1  ;;  %v16810_v1 = vld [vmem:[#allocation80_spill] sm:$0xff] }
 0x5ea   : > { %v3417_v47 = vunpack.c.l.b16 %v16810_v1 }
 0x5eb   : > { %v2864_v13 = vpop.permute.xlu0 %2863 }
 0x5ec   : > { %v4370_v28 = vunpack.c.l.b16 %v2864_v13  ;;  %v16811_v13 = vld [vmem:[#allocation60_spill] sm:$0xff]  ;;  %v3427_v35 = vpack.c.b16 %v3418_v32, %v3417_v47  ;;  %v2936_v12 = vpop.permute.xlu1 %2935  ;;  %v16819_v32 = vld [vmem:[#allocation75_spill] sm:$0xff] }
 0x5ee   : > { %v4384_v63 = vpack.c.b16 %v4370_v28, %v4369_v20  ;;  %v3125_v20 = vunpack.c.l.b16 %v16811_v13  ;;  %v4367_v28 = vunpack.c.l.b16 %v2858_v17  ;;  %v4633_v17 = vunpack.c.l.b16 %v2938_v11 }
 0x5f0   : > { %4405 = vmatpush.bf16.msrb.mxu2 %v4384_v63  ;;  %v3136_v63 = vpack.c.b16 %v3126_v50, %v3125_v20  ;;  %v3270_v50 = vunpack.c.l.b16 %v16818_v59 }
 0x5f1   : > { %8650 = vmatmul.msk.bf16.gmra.mxu3 %vm3017_vm2, %v3278_v16 }
 0x5f3   : > { %v2942_v25 = vpop.permute.xlu0 %2941 }
 0x5f4   : > { %v4635_v8 = vunpack.c.l.b16 %v2942_v25 }
 0x5f6   : > { %v4646_v54 = vpack.c.b16 %v4636_v24, %v4635_v8  ;;  %v3280_v8 = vpack.c.b16 %v3269_v15, %v3268_v53  ;;  %v16820_v15 = vld [vmem:[#allocation71_spill] sm:$0xff]  ;;  %v3275_v53 = vunpack.c.l.b16 %v12969_v19 }
 0x5f8   : > { %8644 = vmatmul.msk.bf16.gmra.mxu2 %vm3017_vm2, %v3135_v30  ;;  %4659 = vmatpush.bf16.msrb.mxu0 %v4646_v54  ;;  %v2928_v30 = vpop.permute.xlu2 %2927  ;;  %v3420_v54 = vunpack.c.l.b16 %v12946_v10  ;;  %v3271_v10 = vunpack.c.l.b16 %v16817_v36 }
 0x5f9   : > { %8661 = vmatmul.msk.bf16.gmra.mxu0 %vm3017_vm2, %v3426_v46  ;;  %v16815_v46 = vld [vmem:[#allocation66_spill] sm:$0xff] }
 0x5fa   : > { %v3127_v23 = vunpack.c.l.b16 %v16815_v46  ;;  %v3428_v21 = vpack.c.b16 %v3420_v54, %v3419_v48 }
 0x5fb   : > { %v2894_v62 = vpop.permute.xlu0 %2893 }
 0x5fc   : > { %v4498_v40 = vunpack.c.l.b16 %v2894_v62  ;;  %v4632_v62 = vunpack.c.l.b16 %v2936_v12  ;;  %v3137_v9 = vpack.c.b16 %v3128_v22, %v3127_v23  ;;  %v3273_v12 = vunpack.c.l.b16 %v16820_v15 }
 0x5fe   : > { %v4513_v0 = vpack.c.b16 %v4499_v58, %v4498_v40  ;;  %v2932_v58 = vpop.permute.xlu1 %2931 }
 0x600   : > { %4534 = vmatpush.bf16.msrb.mxu3 %v4513_v0  ;;  %v4630_v0 = vunpack.c.l.b16 %v2932_v58  ;;  %v2924_v1 = vpop.permute.xlu2 %2923 }
 0x601   : > { %8651 = vmatmul.msk.bf16.gmra.mxu3 %vm3017_vm2, %v3279_v33  ;;  %v4629_v33 = vunpack.c.l.b16 %v2930_v57 }
 0x603   : > { %v2860_v27 = vpop.permute.xlu0 %2859  ;;  %v4643_v29 = vpack.c.b16 %v4630_v0, %v4629_v33 }
 0x604   : > { %v4368_v41 = vunpack.c.l.b16 %v2860_v27  ;;  %4535 = vmatpush.bf16.msrb.mxu3 %v4512_v3  ;;  %v4628_v3 = vunpack.c.l.b16 %v2928_v30  ;;  %v3281_v27 = vpack.c.b16 %v3271_v10, %v3270_v50 }
 0x606   : > { %v4383_v16 = vpack.c.b16 %v4368_v41, %v4367_v28  ;;  %v2922_v13 = vpop.permute.xlu1 %2921  ;;  %v4626_v28 = vunpack.c.l.b16 %v2924_v1  ;;  %v3130_v41 = vunpack.c.l.b16 %v12933_v31 }
 0x607   : > { %v4625_v55 = vunpack.c.l.b16 %v2922_v13 }
 0x608   : > { %8645 = vmatmul.msk.bf16.gmra.mxu2 %vm3017_vm2, %v3136_v63  ;;  %v3129_v63 = vunpack.c.l.b16 %v16819_v32 }
 0x609   : > { %8662 = vmatmul.msk.bf16.gmra.mxu0 %vm3017_vm2, %v3427_v35  ;;  %4406 = vmatpush.bf16.msrb.mxu2 %v4383_v16  ;;  %v4641_v16 = vpack.c.b16 %v4626_v28, %v4625_v55 }
 0x60a   : > { %v3138_v35 = vpack.c.b16 %v3130_v41, %v3129_v63 }
 0x60c   : > { %v2940_v25 = vpop.permute.xlu0 %2939 }
 0x60d   : > { %v4634_v24 = vunpack.c.l.b16 %v2940_v25  ;;  %v16821_v25 = vld [vmem:[#allocation67_spill] sm:$0xff] }
 0x60e   : > { %v3272_v44 = vunpack.c.l.b16 %v16821_v25 }
 0x60f   : > { %v4645_v14 = vpack.c.b16 %v4634_v24, %v4633_v17  ;;  %v3551_v24 = vpop.xlane.xlu1 %3550 }
 0x610   : > { %v3282_v31 = vpack.c.b16 %v3273_v12, %v3272_v44  ;;  %v3678_v54 = vsub.f32 %v12816_v39, %v3551_v24  ;;  %v3555_v44 = vpop.xlane.xlu2 %3554 }
 0x611   : > { %8652 = vmatmul.msk.bf16.gmra.mxu3 %vm3017_vm2, %v3280_v8  ;;  %4660 = vmatpush.bf16.msrb.mxu0 %v4645_v14  ;;  %v16822_v14 = vld [vmem:[#allocation79_spill] sm:$0xff] }
 0x612   : > { %v3274_v22 = vunpack.c.l.b16 %v16822_v14  ;;  %v3742_v23 = vmul.f32 1.442695, %v3678_v54 }
 0x614   : > { %v2934_v38 = vpop.permute.xlu0 %2933  ;;  %v3283_v30 = vpack.c.b16 %v3275_v53, %v3274_v22  ;;  %9530 = vpow2.f32 %v3742_v23 }
 0x615   : > { %v4631_v40 = vunpack.c.l.b16 %v2934_v38 }
 0x617   : > { %v4644_v43 = vpack.c.b16 %v4632_v62, %v4631_v40 }
 0x618   : > { %8646 = vmatmul.msk.bf16.gmra.mxu2 %vm3017_vm2, %v3137_v9 }
 0x619   : > { %8663 = vmatmul.msk.bf16.gmra.mxu0 %vm3017_vm2, %v3428_v21 }
 0x61a   : > { %4661 = vmatpush.bf16.msrb.mxu0 %v4644_v43  ;;  %v13059_v40 = vpop.eup %9530 }
 0x61d   : > { %v2926_v11 = vpop.permute.xlu0 %2925 }
 0x61e   : > { %v4627_v47 = vunpack.c.l.b16 %v2926_v11  ;;  %4662 = vmatpush.bf16.msrb.mxu0 %v4643_v29 }
 0x620   : > { %v4642_v20 = vpack.c.b16 %v4628_v3, %v4627_v47 }
 0x621   : > { %8653 = vmatmul.msk.bf16.gmra.mxu3 %vm3017_vm2, %v3281_v27 }
 0x622   : > { %4663 = vmatpush.bf16.msrb.mxu0 %v4642_v20 }
 0x626   : > { %4664 = vmatpush.bf16.msrb.mxu0 %v4641_v16  ;;  %v3510_v57 = vpop.f32.mrf.mxu0 }
 0x627   : > { %v13035_v42 = vadd.f32 %v3510_v57, %v12808_v18 }
 0x628   : > { %8647 = vmatmul.msk.bf16.gmra.mxu2 %vm3017_vm2, %v3138_v35 }
 0x629   : > { %3646 = vmax.xlane.f32.xlu0 %v13035_v42 }
 0x62e   : > { %v3512_v46 = vpop.f32.mrf.mxu0 }
 0x62f   : > { %v13051_v26 = vadd.f32 %v3512_v46, %v12967_v52  ;;  %v13144_v46 = vld [vmem:[#allocation2 + $0x20] sm:$0xff] }
 0x631   : > { %8654 = vmatmul.msk.bf16.gmra.mxu3 %vm3017_vm2, %v3282_v31 }
 0x636   : > { %v3515_v21 = vpop.f32.mrf.mxu0 }
 0x637   : > { %v13070_v36 = vadd.f32 %v3515_v21, %v12868_v60 }
 0x63b   : > { %v3220_v17 = vpop.f32.mrf.mxu2 }
 0x63c   : > { %v13044_v8 = vadd.f32 %v3220_v17, %v12808_v18  ;;  %v13130_v17 = vld [vmem:[#allocation2 + $0x40] sm:$0xff] }
 0x63e   : > { %3582 = vmax.xlane.f32.xlu2 %v13044_v8  ;;  %v3517_v10 = vpop.f32.mrf.mxu0 }
 0x63f   : > { %v13086_v47 = vadd.f32 %v3517_v10, %v12823_v56  ;;  %v13169_v10 = vpop.xlane.xlu2 %3558 }
 0x641   : > { %8655 = vmatmul.msk.bf16.gmra.mxu3 %vm3017_vm2, %v3283_v30 }
 0x643   : > { %v3222_v38 = vpop.f32.mrf.mxu2 }
 0x644   : > { %v13054_v19 = vadd.f32 %v3222_v38, %v12967_v52 }
 0x646   : > { %3584 = vmax.xlane.f32.xlu1 %v13054_v19  ;;  %3648 = vmax.xlane.f32.xlu2 %v13051_v26  ;;  %v3520_v3 = vpop.f32.mrf.mxu0 }
 0x647   : > { %v13106_v16 = vadd.f32 %v3520_v3, %v12880_v45 }
 0x648   : > { %v3553_v48 = vpop.xlane.xlu0 %3552 }
 0x649   : > { %v3679_v62 = vsub.f32 %v12976_v34, %v3553_v48 }
 0x64b   : > { %v3744_v39 = vmul.f32 1.442695, %v3679_v62  ;;  %v3225_v58 = vpop.f32.mrf.mxu2 }
 0x64c   : > { %v13078_v50 = vadd.f32 %v3225_v58, %v12868_v60  ;;  %v13159_v58 = vpop.xlane.xlu1 %3556 }
 0x64d   : > { %9532 = vpow2.f32 %v3744_v39  ;;  %v3095_v39 = vpop.f32.mrf.mxu1 }
 0x64e   : > { %3870 = vadd.xlane.f32.xlu2 %v13059_v40  ;;  %v3522_v13 = vpop.f32.mrf.mxu0 }
 0x64f   : > { %v13122_v31 = vadd.f32 %v3522_v13, %v12839_v5 }
 0x650   : > { %v13151_v48 = vpop.xlane.xlu0 %3564 }
 0x653   : > { %v13062_v9 = vpop.eup %9532  ;;  %v3227_v43 = vpop.f32.mrf.mxu2 }
 0x654   : > { %3872 = vadd.xlane.f32.xlu1 %v13062_v9  ;;  %v3365_v0 = vpop.f32.mrf.mxu3  ;;  %v13094_v28 = vadd.f32 %v3227_v43, %v12823_v56  ;;  %v13172_v3 = vpop.xlane.xlu1 %3560 }
 0x655   : > { %v13066_v33 = vadd.f32 %v3365_v0, %v12808_v18 }
 0x656   : > { %v3525_v32 = vpop.f32.mrf.mxu0 }
 0x657   : > { %3614 = vmax.xlane.f32.xlu0 %v13066_v33 }
 0x65b   : > { %v3230_v11 = vpop.f32.mrf.mxu2 }
 0x65c   : > { %v3367_v34 = vpop.f32.mrf.mxu3  ;;  %v13114_v57 = vadd.f32 %v3230_v11, %v12880_v45 }
 0x65d   : > { %v13073_v29 = vadd.f32 %v3367_v34, %v12967_v52 }
 0x65e   : > { %v3527_v21 = vpop.f32.mrf.mxu0 }
 0x65f   : > { %3650 = vmax.xlane.f32.xlu0 %v13070_v36  ;;  %3616 = vmax.xlane.f32.xlu2 %v13073_v29 }
 0x663   : > { %v3232_v1 = vpop.f32.mrf.mxu2 }
 0x664   : > { %v3370_v59 = vpop.f32.mrf.mxu3  ;;  %v13133_v22 = vadd.f32 %v3232_v1, %v12839_v5 }
 0x665   : > { %v13081_v18 = vadd.f32 %v3370_v59, %v12868_v60  ;;  %v3097_v59 = vpop.f32.mrf.mxu1 }
 0x666   : > { %v13178_v13 = vadd.f32 %v3097_v59, %v13144_v46 }
 0x667   : > { %3618 = vmax.xlane.f32.xlu1 %v13081_v18  ;;  %3586 = vmax.xlane.f32.xlu2 %v13078_v50 }
 0x66b   : > { %v3235_v60 = vpop.f32.mrf.mxu2 }
 0x66c   : > { %v3372_v52 = vpop.f32.mrf.mxu3  ;;  %v13097_v41 = vadd.f32 %v3235_v60, %v12855_v37 }
 0x66d   : > { %v13089_v27 = vadd.f32 %v3372_v52, %v12823_v56  ;;  %v13109_v56 = vadd.f32 %v3525_v32, %v12855_v37 }
 0x66f   : > { %3620 = vmax.xlane.f32.xlu0 %v13089_v27  ;;  %3652 = vmax.xlane.f32.xlu1 %v13086_v47 }
 0x673   : > { %v3237_v12 = vpop.f32.mrf.mxu2 }
 0x674   : > { %v3375_v20 = vpop.f32.mrf.mxu3  ;;  %v13175_v1 = vadd.f32 %v3237_v12, %v12985_v6 }
 0x675   : > { %v13100_v55 = vadd.f32 %v3375_v20, %v12880_v45 }
 0x677   : > { %3594 = vmax.xlane.f32.xlu0 %v13097_v41  ;;  %3588 = vmax.xlane.f32.xlu1 %v13094_v28 }
 0x678   : > { %3622 = vmax.xlane.f32.xlu2 %v13100_v55 }
 0x67b   : > { %v3240_v45 = vpop.f32.mrf.mxu2 }
 0x67c   : > { %v3377_v63 = vpop.f32.mrf.mxu3  ;;  %v13136_v30 = vadd.f32 %v3240_v45, %v13130_v17 }
 0x67d   : > { %v13147_v23 = vadd.f32 %v3377_v63, %v12839_v5  ;;  %v13162_v5 = vadd.f32 %v3527_v21, %v12985_v6  ;;  %v13186_v63 = vpop.xlane.xlu1 %3562 }
 0x67f   : > { %3654 = vmax.xlane.f32.xlu1 %v13106_v16 }
 0x680   : > { %3658 = vmax.xlane.f32.xlu2 %v13109_v56 }
 0x684   : > { %v3380_v35 = vpop.f32.mrf.mxu3 }
 0x685   : > { %v13117_v15 = vadd.f32 %v3380_v35, %v12855_v37  ;;  %v3680_v37 = vsub.f32 %v12872_v7, %v3555_v44  ;;  %v3242_v7 = vpop.f32.mrf.mxu2 }
 0x686   : > { %v13154_v62 = vadd.f32 %v3242_v7, %v13144_v46 }
 0x687   : > { %3590 = vmax.xlane.f32.xlu1 %v13114_v57  ;;  %v3746_v24 = vmul.f32 1.442695, %v3680_v37  ;;  %v13195_v37 = vld [vmem:[#allocation2 + $0x10] sm:$0xff] }
 0x688   : > { %3626 = vmax.xlane.f32.xlu2 %v13117_v15 }
 0x689   : > { %9534 = vpow2.f32 %v3746_v24 }
 0x68c   : > { %v3382_v25 = vpop.f32.mrf.mxu3 }
 0x68d   : > { %v13125_v53 = vadd.f32 %v3382_v25, %v12985_v6  ;;  %v3245_v25 = vpop.f32.mrf.mxu2 }
 0x68e   : > { %v13199_v45 = vadd.f32 %v3245_v25, %v13195_v37 }
 0x68f   : > { %3628 = vmax.xlane.f32.xlu0 %v13125_v53  ;;  %3656 = vmax.xlane.f32.xlu1 %v13122_v31  ;;  %v13149_v38 = vpop.eup %9534 }
 0x694   : > { %v3385_v14 = vpop.f32.mrf.mxu3 }
 0x695   : > { %v13139_v54 = vadd.f32 %v3385_v14, %v13130_v17  ;;  %v3247_v21 = vpop.f32.mrf.mxu2 }
 0x697   : > { %3598 = vmax.xlane.f32.xlu0 %v13136_v30  ;;  %3592 = vmax.xlane.f32.xlu1 %v13133_v22 }
 0x698   : > { %3630 = vmax.xlane.f32.xlu2 %v13139_v54 }
 0x69c   : > { %v3387_v43 = vpop.f32.mrf.mxu3  ;;  %v3647_v34 = vpop.xlane.xlu0 %3646 }
 0x69d   : > { %v13165_v0 = vadd.f32 %v3387_v43, %v13144_v46  ;;  %v3726_v11 = vsub.f32 %v13035_v42, %v3647_v34  ;;  %v13184_v42 = vadd.f32 %v3095_v39, %v13130_v17 }
 0x69f   : > { %3624 = vmax.xlane.f32.xlu1 %v13147_v23  ;;  %3874 = vadd.xlane.f32.xlu0 %v13149_v38  ;;  %v3838_v52 = vmul.f32 1.442695, %v3726_v11  ;;  %v13206_v11 = vld [vmem:[#allocation2 + $0x38] sm:$0xff] }
 0x6a0   : > { %3600 = vmax.xlane.f32.xlu2 %v13154_v62 }
 0x6a1   : > { %9536 = vpow2.f32 %v3838_v52  ;;  %v13210_v52 = vadd.f32 %v3247_v21, %v13206_v11 }
 0x6a7   : > { %3660 = vmax.xlane.f32.xlu1 %v13162_v5  ;;  %v13188_v6 = vpop.eup %9536 }
 0x6a8   : > { %3632 = vmax.xlane.f32.xlu2 %v13165_v0 }
 0x6af   : > { %3596 = vmax.xlane.f32.xlu1 %v13175_v1 }
 0x6b0   : > { %3568 = vmax.xlane.f32.xlu2 %v13178_v13 }
 0x6b1   : > { %v3583_v60 = vpop.xlane.xlu2 %3582 }
 0x6b2   : > { %v3694_v20 = vsub.f32 %v13044_v8, %v3583_v60 }
 0x6b4   : > { %v3774_v32 = vmul.f32 1.442695, %v3694_v20 }
 0x6b6   : > { %9538 = vpow2.f32 %v3774_v32 }
 0x6b7   : > { %3566 = vmax.xlane.f32.xlu1 %v13184_v42 }
 0x6b8   : > { %3966 = vadd.xlane.f32.xlu2 %v13188_v6 }
 0x6b9   : > { %v3649_v35 = vpop.xlane.xlu2 %3648  ;;  %v3585_v24 = vpop.xlane.xlu1 %3584 }
 0x6ba   : > { %v3727_v12 = vsub.f32 %v13051_v26, %v3649_v35 }
 0x6bc   : > { %v13193_v44 = vpop.eup %9538  ;;  %v3840_v8 = vmul.f32 1.442695, %v3727_v12  ;;  %v3695_v12 = vsub.f32 %v13054_v19, %v3585_v24 }
 0x6bd   : > { %3902 = vadd.xlane.f32.xlu0 %v13193_v44 }
 0x6be   : > { %9540 = vpow2.f32 %v3840_v8 }
 0x6c0   : > { %3602 = vmax.xlane.f32.xlu2 %v13199_v45 }
 0x6c1   : > { %v3871_v14 = vpop.xlane.xlu2 %3870 }
 0x6c2   : > { %9542 = vrcp.f32 %v3871_v14 }
 0x6c4   : > { %v13202_v7 = vpop.eup %9540 }
 0x6c5   : > { %3968 = vadd.xlane.f32.xlu0 %v13202_v7 }
 0x6c7   : > { %v3873_v26 = vpop.xlane.xlu1 %3872 }
 0x6c8   : > { %9544 = vrcp.f32 %v3873_v26  ;;  %v9543_v39 = vpop.eup %9542  ;;  %v3776_v26 = vmul.f32 1.442695, %v3695_v12 }
 0x6c9   : > { %v4062_v43 = vmul.f32 %v9543_v39, %v13059_v40 }
 0x6ca   : > { %v3615_v34 = vpop.xlane.xlu0 %3614 }
 0x6cb   : > { %v3710_v59 = vsub.f32 %v13066_v33, %v3615_v34  ;;  %v4126_v32 = vpack.c.bf16 %v4062_v43, %v4062_v43  ;;  %v3681_v43 = vsub.f32 %v12832_v49, %v13159_v58  ;;  %v3530_v49 = vpop.f32.mrf.mxu0 }
 0x6cd   : > { %v3806_v20 = vmul.f32 1.442695, %v3710_v59  ;;  %3604 = vmax.xlane.f32.xlu0 %v13210_v52  ;;  %v4206_v40 = vunpack.c.l.b16 %v4126_v32  ;;  %v3748_v19 = vmul.f32 1.442695, %v3681_v43 }
 0x6ce   : > { %v9545_v60 = vpop.eup %9544 }
 0x6cf   : > { %v4063_v35 = vmul.f32 %v9545_v60, %v13062_v9  ;;  %9546 = vpow2.f32 %v3806_v20 }
 0x6d0   : > { %9548 = vpow2.f32 %v3776_v26 }
 0x6d1   : > { %v4127_v25 = vpack.c.bf16 %v4063_v35, %v4063_v35 }
 0x6d2   : > { %v3617_v14 = vpop.xlane.xlu2 %3616 }
 0x6d3   : > { %v4207_v8 = vunpack.c.l.b16 %v4127_v25  ;;  %v3711_v33 = vsub.f32 %v13073_v29, %v3617_v14 }
 0x6d5   : > { %v4222_v39 = vpack.c.b16 %v4207_v8, %v4206_v40  ;;  %v13216_v21 = vpop.eup %9546  ;;  %v3808_v34 = vmul.f32 1.442695, %v3711_v33  ;;  %v3390_v40 = vpop.f32.mrf.mxu3  ;;  %v13240_v33 = vadd.f32 %v3530_v49, %v13130_v17 }
 0x6d6   : > { %3934 = vadd.xlane.f32.xlu1 %v13216_v21  ;;  %v13223_v29 = vpop.eup %9548  ;;  %v3532_v8 = vpop.f32.mrf.mxu0 }
 0x6d7   : > { %4278 = vmatmul.bf16.vlgmr.msrb.gmra.mxu1 %v4222_v39  ;;  %9550 = vpow2.f32 %v3808_v34  ;;  %v13243_v39 = vadd.f32 %v3532_v8, %v13144_v46 }
 0x6d8   : > { %9552 = vpow2.f32 %v3748_v19 }
 0x6da   : > { %v3619_v9 = vpop.xlane.xlu1 %3618  ;;  %v3587_v24 = vpop.xlane.xlu2 %3586 }
 0x6db   : > { %v3712_v59 = vsub.f32 %v13081_v18, %v3619_v9  ;;  %v3696_v60 = vsub.f32 %v13078_v50, %v3587_v24  ;;  %v3651_v50 = vpop.xlane.xlu0 %3650 }
 0x6dc   : > { %v3728_v19 = vsub.f32 %v13070_v36, %v3651_v50 }
 0x6dd   : > { %v3810_v20 = vmul.f32 1.442695, %v3712_v59  ;;  %v3778_v32 = vmul.f32 1.442695, %v3696_v60  ;;  %v13225_v35 = vpop.eup %9550  ;;  %v3392_v59 = vpop.f32.mrf.mxu3 }
 0x6de   : > { %3904 = vadd.xlane.f32.xlu1 %v13223_v29  ;;  %3936 = vadd.xlane.f32.xlu2 %v13225_v35  ;;  %v13229_v12 = vpop.eup %9552  ;;  %v3842_v17 = vmul.f32 1.442695, %v3728_v19  ;;  %v13252_v60 = vadd.f32 %v3392_v59, %v13206_v11 }
 0x6df   : > { %9554 = vpow2.f32 %v3810_v20 }
 0x6e0   : > { %9556 = vpow2.f32 %v3778_v32  ;;  %16823 = vst [vmem:[#allocation69_spill] sm:$0xff] %v13252_v60 }
 0x6e2   : > { %v3653_v58 = vpop.xlane.xlu1 %3652 }
 0x6e3   : > { %v3621_v34 = vpop.xlane.xlu0 %3620 }
 0x6e4   : > { %v3713_v24 = vsub.f32 %v13089_v27, %v3621_v34 }
 0x6e5   : > { %v13231_v18 = vpop.eup %9554 }
 0x6e6   : > { %v13233_v25 = vpop.eup %9556  ;;  %3876 = vadd.xlane.f32.xlu1 %v13229_v12  ;;  %3938 = vadd.xlane.f32.xlu0 %v13231_v18  ;;  %v3812_v46 = vmul.f32 1.442695, %v3713_v24 }
 0x6e7   : > { %3906 = vadd.xlane.f32.xlu2 %v13233_v25 }
 0x6ea   : > { %v3589_v14 = vpop.xlane.xlu1 %3588 }
 0x6eb   : > { %v3697_v26 = vsub.f32 %v13094_v28, %v3589_v14  ;;  %v3623_v9 = vpop.xlane.xlu2 %3622  ;;  %v3729_v14 = vsub.f32 %v13086_v47, %v3653_v58  ;;  %v13282_v59 = vpop.xlane.xlu0 %3594 }
 0x6ed   : > { %v3780_v43 = vmul.f32 1.442695, %v3697_v26  ;;  %v3844_v34 = vmul.f32 1.442695, %v3729_v14 }
 0x6ee   : > { %3662 = vmax.xlane.f32.xlu1 %v13240_v33 }
 0x6ef   : > { %3664 = vmax.xlane.f32.xlu2 %v13243_v39  ;;  %9558 = vpow2.f32 %v3780_v43 }
 0x6f0   : > { %9560 = vpow2.f32 %v3842_v17 }
 0x6f1   : > { %9562 = vpow2.f32 %v3812_v46 }
 0x6f2   : > { %v13249_v28 = vpop.xlane.xlu1 %3654 }
 0x6f3   : > { %v13258_v36 = vpop.xlane.xlu2 %3658 }
 0x6f5   : > { %v13254_v20 = vpop.eup %9558 }
 0x6f6   : > { %3636 = vmax.xlane.f32.xlu1 %v13252_v60  ;;  %3908 = vadd.xlane.f32.xlu0 %v13254_v20  ;;  %v13261_v49 = vpop.eup %9560 }
 0x6f7   : > { %16824 = vst [vmem:[#allocation35_spill] sm:$0xff] %v13261_v49  ;;  %v13263_v8 = vpop.eup %9562 }
 0x6fa   : > { %v3591_v27 = vpop.xlane.xlu1 %3590 }
 0x6fb   : > { %v3698_v32 = vsub.f32 %v13114_v57, %v3591_v27  ;;  %v13270_v43 = vpop.xlane.xlu2 %3626  ;;  %v13275_v57 = vadd.f32 %v3390_v40, %v13195_v37  ;;  %v3683_v27 = vsub.f32 %v12848_v2, %v13172_v3  ;;  %v3714_v40 = vsub.f32 %v13100_v55, %v3623_v9 }
 0x6fc   : > { %v3682_v2 = vsub.f32 %v12885_v61, %v13169_v10  ;;  %v3250_v61 = vpop.f32.mrf.mxu2  ;;  %v3395_v10 = vpop.f32.mrf.mxu3 }
 0x6fd   : > { %v3782_v50 = vmul.f32 1.442695, %v3698_v32  ;;  %v3100_v32 = vpop.f32.mrf.mxu1 }
 0x6fe   : > { %3970 = vadd.xlane.f32.xlu1 %v13261_v49  ;;  %3940 = vadd.xlane.f32.xlu0 %v13263_v8  ;;  %v3750_v55 = vmul.f32 1.442695, %v3682_v2 }
 0x6ff   : > { %9564 = vpow2.f32 %v3782_v50  ;;  %v3752_v50 = vmul.f32 1.442695, %v3683_v27 }
 0x700   : > { %9566 = vpow2.f32 %v3844_v34 }
 0x702   : > { %v13268_v26 = vpop.xlane.xlu1 %3656 }
 0x705   : > { %v13272_v19 = vpop.eup %9564 }
 0x706   : > { %16825 = vst [vmem:[#allocation57_spill] sm:$0xff] %v13272_v19  ;;  %3910 = vadd.xlane.f32.xlu2 %v13272_v19  ;;  %3634 = vmax.xlane.f32.xlu0 %v13275_v57  ;;  %v13284_v17 = vpop.eup %9566  ;;  %v3814_v19 = vmul.f32 1.442695, %v3714_v40 }
 0x707   : > { %16826 = vst [vmem:[#allocation32_spill] sm:$0xff] %v13284_v17 }
 0x70a   : > { %v3593_v24 = vpop.xlane.xlu1 %3592 }
 0x70b   : > { %v3699_v47 = vsub.f32 %v13133_v22, %v3593_v24  ;;  %v13280_v58 = vpop.xlane.xlu2 %3630  ;;  %v13294_v24 = vadd.f32 %v3100_v32, %v13195_v37 }
 0x70d   : > { %v3784_v46 = vmul.f32 1.442695, %v3699_v47  ;;  %16827 = vst [vmem:[#allocation68_spill] sm:$0xff] %v13294_v24  ;;  %v3629_v47 = vpop.xlane.xlu0 %3628 }
 0x70e   : > { %3972 = vadd.xlane.f32.xlu2 %v13284_v17 }
 0x70f   : > { %9568 = vpow2.f32 %v3784_v46 }
 0x710   : > { %9570 = vpow2.f32 %v3752_v50 }
 0x712   : > { %v3625_v14 = vpop.xlane.xlu1 %3624 }
 0x713   : > { %v3715_v22 = vsub.f32 %v13147_v23, %v3625_v14  ;;  %v13291_v34 = vpop.xlane.xlu2 %3600 }
 0x715   : > { %v3816_v60 = vmul.f32 1.442695, %v3715_v22  ;;  %v13296_v49 = vpop.eup %9568  ;;  %v13310_v27 = vpop.xlane.xlu0 %3598  ;;  %v3730_v22 = vsub.f32 %v13106_v16, %v13249_v28 }
 0x716   : > { %16828 = vst [vmem:[#allocation23_spill] sm:$0xff] %v13296_v49  ;;  %3570 = vmax.xlane.f32.xlu2 %v13294_v24  ;;  %3912 = vadd.xlane.f32.xlu0 %v13296_v49  ;;  %v13302_v23 = vpop.eup %9570 }
 0x717   : > { %9572 = vpow2.f32 %v3816_v60  ;;  %16829 = vst [vmem:[#allocation55_spill] sm:$0xff] %v13302_v23  ;;  %v3535_v60 = vpop.f32.mrf.mxu0 }
 0x718   : > { %9574 = vpow2.f32 %v3814_v19  ;;  %v3102_v19 = vpop.f32.mrf.mxu1  ;;  %v13318_v32 = vadd.f32 %v3535_v60, %v13195_v37  ;;  %v3252_v37 = vpop.f32.mrf.mxu2 }
 0x719   : > { %9576 = vpow2.f32 %v3750_v55  ;;  %v13323_v14 = vadd.f32 %v3102_v19, %v13206_v11  ;;  %v3397_v60 = vpop.f32.mrf.mxu3  ;;  %v13336_v19 = vld [vmem:[#allocation2 + $0x60] sm:$0xff] }
 0x71a   : > { %v13315_v40 = vpop.xlane.xlu1 %3660  ;;  %16832 = vst [vmem:[#allocation58_spill] sm:$0xff] %v13318_v32  ;;  %v13345_v28 = vadd.f32 %v3250_v61, %v13336_v19  ;;  %v13355_v17 = vadd.f32 %v3395_v10, %v13336_v19 }
 0x71b   : > { %v13306_v9 = vpop.xlane.xlu2 %3632  ;;  %16834 = vst [vmem:[#allocation44_spill] sm:$0xff] %v13323_v14 }
 0x71d   : > { %v13304_v3 = vpop.eup %9572  ;;  %v13332_v55 = vpop.xlane.xlu0 %3874 }
 0x71e   : > { %16830 = vst [vmem:[#allocation27_spill] sm:$0xff] %v13304_v3  ;;  %v13308_v46 = vpop.eup %9574  ;;  %3944 = vadd.xlane.f32.xlu1 %v13304_v3  ;;  %3880 = vadd.xlane.f32.xlu2 %v13302_v23  ;;  %v13334_v23 = vld [vmem:[#allocation2 + $0x70] sm:$0xff] }
 0x71f   : > { %16831 = vst [vmem:[#allocation29_spill] sm:$0xff] %v13308_v46  ;;  %3942 = vadd.xlane.f32.xlu0 %v13308_v46  ;;  %v13320_v50 = vpop.eup %9576  ;;  %v3846_v46 = vmul.f32 1.442695, %v3730_v22  ;;  %v3537_v49 = vpop.f32.mrf.mxu0 }
 0x720   : > { %16833 = vst [vmem:[#allocation41_spill] sm:$0xff] %v13320_v50 }
 0x721   : > { %9578 = vpow2.f32 %v3846_v46  ;;  %v13360_v46 = vadd.f32 %v3537_v49, %v13206_v11 }
 0x722   : > { %v3597_v16 = vpop.xlane.xlu1 %3596 }
 0x723   : > { %v13329_v2 = vpop.xlane.xlu2 %3568  ;;  %v3701_v22 = vsub.f32 %v13175_v1, %v3597_v16  ;;  %v3684_v1 = vsub.f32 %v12862_v4, %v13186_v63 }
 0x725   : > { %v3788_v61 = vmul.f32 1.442695, %v3701_v22 }
 0x726   : > { %3878 = vadd.xlane.f32.xlu1 %v13320_v50  ;;  %3666 = vmax.xlane.f32.xlu2 %v13318_v32  ;;  %v13339_v50 = vadd.f32 %v3252_v37, %v13334_v23  ;;  %v13342_v32 = vadd.f32 %v3397_v60, %v13334_v23  ;;  %v3700_v37 = vsub.f32 %v13097_v41, %v13282_v59 }
 0x727   : > { %3572 = vmax.xlane.f32.xlu0 %v13323_v14  ;;  %v3717_v14 = vsub.f32 %v13125_v53, %v3629_v47  ;;  %v13357_v47 = vpop.eup %9578  ;;  %v3716_v41 = vsub.f32 %v13117_v15, %v13270_v43  ;;  %v3731_v59 = vsub.f32 %v13122_v31, %v13268_v26  ;;  %v3105_v43 = vpop.f32.mrf.mxu1 }
 0x728   : > { %v3786_v53 = vmul.f32 1.442695, %v3700_v37  ;;  %v3255_v31 = vpop.f32.mrf.mxu2 }
 0x729   : > { %v3820_v24 = vmul.f32 1.442695, %v3717_v14  ;;  %v3818_v4 = vmul.f32 1.442695, %v3716_v41 }
 0x72a   : > { %v13381_v16 = vpop.xlane.xlu1 %3566 }
 0x72b   : > { %v3967_v3 = vpop.xlane.xlu2 %3966 }
 0x72c   : > { %9580 = vrcp.f32 %v3967_v3  ;;  %v3754_v3 = vmul.f32 1.442695, %v3684_v1 }
 0x72d   : > { %9582 = vpow2.f32 %v3820_v24  ;;  %v3848_v24 = vmul.f32 1.442695, %v3731_v59 }
 0x72e   : > { %3608 = vmax.xlane.f32.xlu1 %v13339_v50  ;;  %3640 = vmax.xlane.f32.xlu2 %v13342_v32  ;;  %9584 = vpow2.f32 %v3788_v61 }
 0x72f   : > { %3606 = vmax.xlane.f32.xlu0 %v13345_v28  ;;  %9586 = vpow2.f32 %v3786_v53 }
 0x730   : > { %v3903_v60 = vpop.xlane.xlu0 %3902 }
 0x732   : > { %v9581_v49 = vpop.eup %9580 }
 0x733   : > { %v13371_v63 = vpop.eup %9582  ;;  %v4110_v14 = vmul.f32 %v9581_v49, %v13188_v6  ;;  %v3107_v49 = vpop.f32.mrf.mxu1 }
 0x734   : > { %v13373_v10 = vpop.eup %9584 }
 0x735   : > { %v13376_v15 = vpop.eup %9586  ;;  %v4174_v22 = vpack.c.bf16 %v4110_v14, %v4110_v14  ;;  %v13397_v14 = vld [vmem:[#allocation2 + $0x28] sm:$0xff] }
 0x736   : > { %3638 = vmax.xlane.f32.xlu1 %v13355_v17  ;;  %3974 = vadd.xlane.f32.xlu2 %v13357_v47 }
 0x737   : > { %3668 = vmax.xlane.f32.xlu0 %v13360_v46  ;;  %v4593_v1 = vunpack.c.l.b16 %v4174_v22 }
 0x738   : > { %v3969_v11 = vpop.xlane.xlu0 %3968 }
 0x739   : > { %9588 = vrcp.f32 %v3969_v11 }
 0x73a   : > { %9590 = vpow2.f32 %v3754_v3  ;;  %v3257_v3 = vpop.f32.mrf.mxu2 }
 0x73b   : > { %9592 = vpow2.f32 %v3818_v4 }
 0x73c   : > { %9594 = vpow2.f32 %v3848_v24  ;;  %v13395_v24 = vpop.xlane.xlu2 %3602 }
 0x73d   : > { %9596 = vrcp.f32 %v3903_v60 }
 0x73e   : > { %3916 = vadd.xlane.f32.xlu1 %v13373_v10  ;;  %3948 = vadd.xlane.f32.xlu2 %v13371_v63 }
 0x73f   : > { %3914 = vadd.xlane.f32.xlu0 %v13376_v15  ;;  %v9589_v26 = vpop.eup %9588 }
 0x740   : > { %v4111_v37 = vmul.f32 %v9589_v26, %v13202_v7  ;;  %v13384_v61 = vpop.eup %9590  ;;  %v3685_v7 = vsub.f32 %v12990_v51, %v13151_v48  ;;  %v13400_v26 = vadd.f32 %v3107_v49, %v13334_v23  ;;  %v3540_v51 = vpop.f32.mrf.mxu0  ;;  %v3703_v48 = vsub.f32 %v13154_v62, %v13291_v34 }
 0x741   : > { %16835 = vst [vmem:[#allocation51_spill] sm:$0xff] %v13384_v61  ;;  %v13386_v53 = vpop.eup %9592 }
 0x742   : > { %v4175_v6 = vpack.c.bf16 %v4111_v37, %v4111_v37  ;;  %v13388_v59 = vpop.eup %9594  ;;  %v3756_v22 = vmul.f32 1.442695, %v3685_v7  ;;  %v13403_v37 = vadd.f32 %v3257_v3, %v13397_v14  ;;  %v3792_v7 = vmul.f32 1.442695, %v3703_v48 }
 0x744   : > { %v4594_v41 = vunpack.c.l.b16 %v4175_v6  ;;  %v13406_v6 = vadd.f32 %v3105_v43, %v13336_v19  ;;  %v13413_v43 = vld [vmem:[#allocation2 + $0x78] sm:$0xff] }
 0x745   : > { %v13416_v3 = vadd.f32 %v3255_v31, %v13413_v43  ;;  %v3718_v31 = vsub.f32 %v13139_v54, %v13280_v58 }
 0x746   : > { %3882 = vadd.xlane.f32.xlu2 %v13384_v61  ;;  %3946 = vadd.xlane.f32.xlu1 %v13386_v53  ;;  %v4609_v11 = vpack.c.b16 %v4594_v41, %v4593_v1  ;;  %v3400_v1 = vpop.f32.mrf.mxu3 }
 0x747   : > { %3976 = vadd.xlane.f32.xlu0 %v13388_v59  ;;  %16836 = vst [vmem:[#allocation37_spill] sm:$0xff] %v13416_v3 }
 0x748   : > { %4665 = vmatmul.bf16.vlgmr.msrb.gmra.mxu0 %v4609_v11  ;;  %v9597_v11 = vpop.eup %9596 }
 0x749   : > { %v3935_v4 = vpop.xlane.xlu1 %3934  ;;  %v4078_v62 = vmul.f32 %v9597_v11, %v13193_v44  ;;  %v3542_v44 = vpop.f32.mrf.mxu0 }
 0x74a   : > { %9598 = vrcp.f32 %v3935_v4  ;;  %v13419_v4 = vadd.f32 %v3400_v1, %v13413_v43  ;;  %v13438_v58 = vadd.f32 %v3542_v44, %v13334_v23  ;;  %v3733_v23 = vsub.f32 %v13162_v5, %v13315_v40 }
 0x74b   : > { %9600 = vpow2.f32 %v3756_v22  ;;  %v3702_v22 = vsub.f32 %v13136_v30, %v13310_v27  ;;  %v4142_v1 = vpack.c.bf16 %v4078_v62, %v4078_v62  ;;  %v13443_v62 = vadd.f32 %v3540_v51, %v13336_v19 }
 0x74c   : > { %16837 = vst [vmem:[#allocation40_spill] sm:$0xff] %v13419_v4  ;;  %v3732_v51 = vsub.f32 %v13109_v56, %v13258_v36 }
 0x74d   : > { %v3790_v27 = vmul.f32 1.442695, %v3702_v22 }
 0x74e   : > { %3612 = vmax.xlane.f32.xlu2 %v13403_v37  ;;  %3576 = vmax.xlane.f32.xlu1 %v13400_v26  ;;  %v3850_v5 = vmul.f32 1.442695, %v3732_v51 }
 0x74f   : > { %3574 = vmax.xlane.f32.xlu0 %v13406_v6 }
 0x750   : > { %v9599_v49 = vpop.eup %9598 }
 0x751   : > { %v3905_v41 = vpop.xlane.xlu1 %3904  ;;  %v3937_v60 = vpop.xlane.xlu2 %3936 }
 0x752   : > { %9602 = vrcp.f32 %v3905_v41  ;;  %v13423_v34 = vpop.eup %9600  ;;  %v4094_v41 = vmul.f32 %v9599_v49, %v13216_v21  ;;  %v13434_v21 = vpop.xlane.xlu0 %3604 }
 0x753   : > { %9604 = vrcp.f32 %v3937_v60  ;;  %16838 = vst [vmem:[#allocation76_spill] sm:$0xff] %v13423_v34  ;;  %v3545_v51 = vpop.f32.mrf.mxu0 }
 0x754   : > { %9606 = vrcp.f32 %v13332_v55  ;;  %v4158_v49 = vpack.c.bf16 %v4094_v41, %v4094_v41 }
 0x755   : > { %9608 = vpow2.f32 %v3792_v7 }
 0x756   : > { %3642 = vmax.xlane.f32.xlu2 %v13419_v4  ;;  %3610 = vmax.xlane.f32.xlu1 %v13416_v3  ;;  %v3822_v4 = vmul.f32 1.442695, %v3718_v31  ;;  %v4464_v41 = vunpack.c.l.b16 %v4158_v49  ;;  %v3402_v31 = vpop.f32.mrf.mxu3  ;;  %v3719_v49 = vsub.f32 %v13165_v0, %v13306_v9  ;;  %v3705_v9 = vsub.f32 %v13210_v52, %v13434_v21 }
 0x757   : > { %3884 = vadd.xlane.f32.xlu0 %v13423_v34  ;;  %v13492_v21 = vadd.f32 %v3545_v51, %v13413_v43 }
 0x758   : > { %v9603_v55 = vpop.eup %9602 }
 0x759   : > { %v9605_v48 = vpop.eup %9604  ;;  %v4079_v11 = vmul.f32 %v9603_v55, %v13223_v29  ;;  %v3877_v60 = vpop.xlane.xlu1 %3876  ;;  %v4335_v29 = vunpack.c.l.b16 %v4142_v1 }
 0x75a   : > { %v9607_v30 = vpop.eup %9606  ;;  %v4095_v61 = vmul.f32 %v9605_v48, %v13225_v35  ;;  %9610 = vrcp.f32 %v3877_v60  ;;  %v3110_v35 = vpop.f32.mrf.mxu1 }
 0x75b   : > { %v4143_v54 = vpack.c.bf16 %v4079_v11, %v4079_v11  ;;  %v13440_v34 = vpop.eup %9608  ;;  %v4064_v22 = vmul.f32 %v9607_v30, %v13149_v38  ;;  %9612 = vpow2.f32 %v3790_v27  ;;  %v3939_v1 = vpop.xlane.xlu0 %3938  ;;  %v13459_v27 = vadd.f32 %v3402_v31, %v13397_v14 }
 0x75c   : > { %v4159_v7 = vpack.c.bf16 %v4095_v61, %v4095_v61  ;;  %9614 = vpow2.f32 %v3822_v4  ;;  %v3907_v11 = vpop.xlane.xlu2 %3906  ;;  %v3852_v4 = vmul.f32 1.442695, %v3733_v23  ;;  %v3687_v23 = vsub.f32 %v13178_v13, %v13329_v2 }
 0x75d   : > { %v4336_v55 = vunpack.c.l.b16 %v4143_v54  ;;  %v4128_v44 = vpack.c.bf16 %v4064_v22, %v4064_v22  ;;  %9616 = vrcp.f32 %v3907_v11  ;;  %v3824_v22 = vmul.f32 1.442695, %v3719_v49 }
 0x75e   : > { %v4465_v3 = vunpack.c.l.b16 %v4159_v7  ;;  %3672 = vmax.xlane.f32.xlu1 %v13438_v58  ;;  %3920 = vadd.xlane.f32.xlu2 %v13440_v34  ;;  %9618 = vpow2.f32 %v3852_v4  ;;  %v3686_v13 = vsub.f32 %v13184_v42, %v13381_v16  ;;  %v3796_v11 = vmul.f32 1.442695, %v3705_v9 }
 0x75f   : > { %v4351_v61 = vpack.c.b16 %v4336_v55, %v4335_v29  ;;  %3670 = vmax.xlane.f32.xlu0 %v13443_v62  ;;  %v4208_v36 = vunpack.c.l.b16 %v4128_v44  ;;  %9620 = vpow2.f32 %v3850_v5  ;;  %v13489_v52 = vadd.f32 %v3110_v35, %v13413_v43 }
 0x760   : > { %v9611_v19 = vpop.eup %9610  ;;  %v4480_v38 = vpack.c.b16 %v4465_v3, %v4464_v41  ;;  %v3758_v4 = vmul.f32 1.442695, %v3686_v13  ;;  %v3704_v16 = vsub.f32 %v13199_v45, %v13395_v24 }
 0x761   : > { %4407 = vmatmul.bf16.vlgmr.msrb.gmra.mxu2 %v4351_v61  ;;  %v4065_v48 = vmul.f32 %v9611_v19, %v13229_v12  ;;  %v13454_v30 = vpop.eup %9612  ;;  %v13461_v56 = vpop.xlane.xlu1 %3662 }
 0x762   : > { %4536 = vmatmul.bf16.vlgmr.msrb.gmra.mxu3 %v4480_v38  ;;  %v13456_v40 = vpop.eup %9614  ;;  %v3112_v54 = vpop.f32.mrf.mxu1  ;;  %v3760_v38 = vmul.f32 1.442695, %v3687_v23  ;;  %v3794_v49 = vmul.f32 1.442695, %v3704_v16 }
 0x763   : > { %v4129_v60 = vpack.c.bf16 %v4065_v48, %v4065_v48  ;;  %v9617_v29 = vpop.eup %9616  ;;  %v13469_v55 = vadd.f32 %v3112_v54, %v13397_v14 }
 0x764   : > { %v13471_v41 = vpop.eup %9618  ;;  %v4080_v0 = vmul.f32 %v9617_v29, %v13233_v25  ;;  %v3665_v31 = vpop.xlane.xlu2 %3664 }
 0x765   : > { %v4209_v3 = vunpack.c.l.b16 %v4129_v60  ;;  %v13475_v61 = vpop.eup %9620 }
 0x766   : > { %3918 = vadd.xlane.f32.xlu1 %v13454_v30  ;;  %3950 = vadd.xlane.f32.xlu2 %v13456_v40 }
 0x767   : > { %3644 = vmax.xlane.f32.xlu0 %v13459_v27  ;;  %v4223_v12 = vpack.c.b16 %v4209_v3, %v4208_v36 }
 0x769   : > { %4283 = vmatmul.bf16.gmra.mxu1 %v4223_v12  ;;  %v3909_v7 = vpop.xlane.xlu0 %3908  ;;  %v13482_v19 = vpop.xlane.xlu1 %3636 }
 0x76a   : > { %9622 = vrcp.f32 %v3909_v7 }
 0x76b   : > { %9624 = vrcp.f32 %v3939_v1  ;;  %v4144_v1 = vpack.c.bf16 %v4080_v0, %v4080_v0 }
 0x76c   : > { %9626 = vpow2.f32 %v3824_v22 }
 0x76e   : > { %3980 = vadd.xlane.f32.xlu1 %v13471_v41  ;;  %3580 = vmax.xlane.f32.xlu2 %v13469_v55 }
 0x76f   : > { %3978 = vadd.xlane.f32.xlu0 %v13475_v61 }
 0x770   : > { %v9623_v2 = vpop.eup %9622 }
 0x771   : > { %v3941_v48 = vpop.xlane.xlu0 %3940  ;;  %v4081_v44 = vmul.f32 %v9623_v2, %v13254_v20  ;;  %v9625_v25 = vpop.eup %9624  ;;  %v4337_v20 = vunpack.c.l.b16 %v4144_v1 }
 0x772   : > { %9628 = vrcp.f32 %v3941_v48  ;;  %v13494_v42 = vpop.eup %9626  ;;  %v4096_v35 = vmul.f32 %v9625_v25, %v13231_v18  ;;  %v3971_v3 = vpop.xlane.xlu1 %3970 }
 0x773   : > { %v4145_v60 = vpack.c.bf16 %v4081_v44, %v4081_v44  ;;  %9630 = vpow2.f32 %v3760_v38  ;;  %v3547_v48 = vpop.f32.mrf.mxu0 }
 0x774   : > { %9632 = vpow2.f32 %v3796_v11  ;;  %v4160_v24 = vpack.c.bf16 %v4096_v35, %v4096_v35 }
 0x775   : > { %v4338_v5 = vunpack.c.l.b16 %v4145_v60  ;;  %9634 = vpow2.f32 %v3758_v4 }
 0x776   : > { %3578 = vmax.xlane.f32.xlu1 %v13489_v52  ;;  %3674 = vmax.xlane.f32.xlu2 %v13492_v21  ;;  %9636 = vrcp.f32 %v3971_v3  ;;  %v4466_v9 = vunpack.c.l.b16 %v4160_v24 }
 0x777   : > { %3952 = vadd.xlane.f32.xlu0 %v13494_v42  ;;  %v4352_v43 = vpack.c.b16 %v4338_v5, %v4337_v20  ;;  %9638 = vpow2.f32 %v3794_v49  ;;  %v16841_v20 = vld [vmem:[#allocation32_spill] sm:$0xff] }
 0x778   : > { %v9629_v36 = vpop.eup %9628 }
 0x779   : > { %v3911_v12 = vpop.xlane.xlu2 %3910  ;;  %v3635_v54 = vpop.xlane.xlu0 %3634  ;;  %4412 = vmatmul.bf16.gmra.mxu2 %v4352_v43  ;;  %v4097_v45 = vmul.f32 %v9629_v36, %v13263_v8  ;;  %v3735_v8 = vsub.f32 %v13243_v39, %v3665_v31  ;;  %v13521_v39 = vadd.f32 %v3547_v48, %v13397_v14  ;;  %v16839_v31 = vld [vmem:[#allocation35_spill] sm:$0xff]  ;;  %v16842_v43 = vld [vmem:[#allocation68_spill] sm:$0xff] }
 0x77a   : > { %v13503_v7 = vpop.eup %9630  ;;  %v3720_v29 = vsub.f32 %v13275_v57, %v3635_v54  ;;  %v3734_v57 = vsub.f32 %v13240_v33, %v13461_v56  ;;  %v16840_v56 = vld [vmem:[#allocation69_spill] sm:$0xff] }
 0x77b   : > { %v4161_v18 = vpack.c.bf16 %v4097_v45, %v4097_v45  ;;  %v13506_v22 = vpop.eup %9632  ;;  %v3856_v44 = vmul.f32 1.442695, %v3735_v8  ;;  %v3721_v60 = vsub.f32 %v16840_v56, %v13482_v19  ;;  %v16843_v19 = vld [vmem:[#allocation57_spill] sm:$0xff] }
 0x77c   : > { %v3826_v23 = vmul.f32 1.442695, %v3720_v29  ;;  %v13508_v0 = vpop.eup %9634  ;;  %v3854_v25 = vmul.f32 1.442695, %v3734_v57 }
 0x77d   : > { %v4467_v13 = vunpack.c.l.b16 %v4161_v18  ;;  %v9637_v38 = vpop.eup %9636  ;;  %v3828_v49 = vmul.f32 1.442695, %v3721_v60 }
 0x77e   : > { %3924 = vadd.xlane.f32.xlu2 %v13506_v22  ;;  %3888 = vadd.xlane.f32.xlu1 %v13503_v7  ;;  %9640 = vpow2.f32 %v3826_v23  ;;  %v13516_v1 = vpop.eup %9638  ;;  %v4112_v4 = vmul.f32 %v9637_v38, %v16839_v31 }
 0x77f   : > { %3886 = vadd.xlane.f32.xlu0 %v13508_v0  ;;  %v4481_v2 = vpack.c.b16 %v4467_v13, %v4466_v9 }
 0x780   : > { %v4176_v14 = vpack.c.bf16 %v4112_v4, %v4112_v4 }
 0x781   : > { %v3973_v51 = vpop.xlane.xlu2 %3972  ;;  %4541 = vmatmul.bf16.gmra.mxu3 %v4481_v2 }
 0x782   : > { %9642 = vrcp.f32 %v3973_v51  ;;  %v4595_v24 = vunpack.c.l.b16 %v4176_v14  ;;  %v16844_v51 = vld [vmem:[#allocation23_spill] sm:$0xff] }
 0x783   : > { %9644 = vrcp.f32 %v3911_v12  ;;  %v16845_v14 = vld [vmem:[#allocation27_spill] sm:$0xff] }
 0x784   : > { %v13518_v11 = vpop.eup %9640  ;;  %9646 = vpow2.f32 %v3856_v44 }
 0x785   : > { %9648 = vpow2.f32 %v3854_v25 }
 0x786   : > { %3954 = vadd.xlane.f32.xlu2 %v13518_v11  ;;  %3922 = vadd.xlane.f32.xlu1 %v13516_v1 }
 0x787   : > { %3676 = vmax.xlane.f32.xlu0 %v13521_v39 }
 0x788   : > { %v9643_v33 = vpop.eup %9642 }
 0x789   : > { %v3571_v16 = vpop.xlane.xlu2 %3570  ;;  %v4113_v5 = vmul.f32 %v9643_v33, %v16841_v20  ;;  %v3913_v35 = vpop.xlane.xlu0 %3912 }
 0x78a   : > { %v3688_v36 = vsub.f32 %v16842_v43, %v3571_v16  ;;  %v9645_v3 = vpop.eup %9644  ;;  %9650 = vrcp.f32 %v3913_v35 }
 0x78b   : > { %v4177_v12 = vpack.c.bf16 %v4113_v5, %v4113_v5  ;;  %v13531_v45 = vpop.eup %9646  ;;  %v4082_v23 = vmul.f32 %v9645_v3, %v16843_v19  ;;  %v16846_v3 = vld [vmem:[#allocation29_spill] sm:$0xff] }
 0x78c   : > { %v3762_v54 = vmul.f32 1.442695, %v3688_v36  ;;  %v13533_v18 = vpop.eup %9648 }
 0x78d   : > { %v4596_v29 = vunpack.c.l.b16 %v4177_v12  ;;  %v4146_v48 = vpack.c.bf16 %v4082_v23, %v4082_v23 }
 0x78e   : > { %9652 = vpow2.f32 %v3762_v54  ;;  %3984 = vadd.xlane.f32.xlu1 %v13531_v45 }
 0x78f   : > { %3982 = vadd.xlane.f32.xlu0 %v13533_v18  ;;  %v4610_v9 = vpack.c.b16 %v4596_v29, %v4595_v24  ;;  %9654 = vpow2.f32 %v3828_v49  ;;  %v4339_v4 = vunpack.c.l.b16 %v4146_v48  ;;  %v16847_v49 = vld [vmem:[#allocation44_spill] sm:$0xff]  ;;  %v16848_v29 = vld [vmem:[#allocation58_spill] sm:$0xff] }
 0x790   : > { %v9651_v13 = vpop.eup %9650 }
 0x791   : > { %v3945_v8 = vpop.xlane.xlu1 %3944  ;;  %4670 = vmatmul.bf16.gmra.mxu0 %v4610_v9  ;;  %v3881_v57 = vpop.xlane.xlu2 %3880  ;;  %v4083_v38 = vmul.f32 %v9651_v13, %v16844_v51 }
 0x792   : > { %9656 = vrcp.f32 %v3945_v8  ;;  %v3943_v2 = vpop.xlane.xlu0 %3942  ;;  %v16849_v8 = vld [vmem:[#allocation55_spill] sm:$0xff] }
 0x793   : > { %9658 = vrcp.f32 %v3943_v2  ;;  %v4147_v25 = vpack.c.bf16 %v4083_v38, %v4083_v38 }
 0x794   : > { %v13539_v44 = vpop.eup %9652  ;;  %9660 = vrcp.f32 %v3881_v57 }
 0x795   : > { %v13541_v31 = vpop.eup %9654  ;;  %v4340_v33 = vunpack.c.l.b16 %v4147_v25 }
 0x796   : > { %3890 = vadd.xlane.f32.xlu1 %v13539_v44 }
 0x797   : > { %3956 = vadd.xlane.f32.xlu0 %v13541_v31  ;;  %v4353_v60 = vpack.c.b16 %v4340_v33, %v4339_v4  ;;  %v16850_v33 = vld [vmem:[#allocation41_spill] sm:$0xff] }
 0x798   : > { %v9657_v56 = vpop.eup %9656 }
 0x799   : > { %v9659_v16 = vpop.eup %9658  ;;  %v3879_v20 = vpop.xlane.xlu1 %3878  ;;  %v4099_v35 = vmul.f32 %v9657_v56, %v16845_v14  ;;  %4417 = vmatmul.bf16.gmra.mxu2 %v4353_v60 }
 0x79a   : > { %v3667_v5 = vpop.xlane.xlu2 %3666  ;;  %v9661_v43 = vpop.eup %9660  ;;  %9662 = vrcp.f32 %v3879_v20  ;;  %v4098_v12 = vmul.f32 %v9659_v16, %v16846_v3 }
 0x79b   : > { %v3573_v36 = vpop.xlane.xlu0 %3572  ;;  %v4163_v24 = vpack.c.bf16 %v4099_v35, %v4099_v35  ;;  %v3736_v19 = vsub.f32 %v16848_v29, %v3667_v5  ;;  %v4067_v57 = vmul.f32 %v9661_v43, %v16849_v8 }
 0x79c   : > { %v3689_v54 = vsub.f32 %v16847_v49, %v3573_v36  ;;  %v4162_v23 = vpack.c.bf16 %v4098_v12, %v4098_v12 }
 0x79d   : > { %v4469_v13 = vunpack.c.l.b16 %v4163_v24  ;;  %v3858_v38 = vmul.f32 1.442695, %v3736_v19  ;;  %v4131_v60 = vpack.c.bf16 %v4067_v57, %v4067_v57 }
 0x79e   : > { %v3764_v9 = vmul.f32 1.442695, %v3689_v54  ;;  %v4468_v2 = vunpack.c.l.b16 %v4162_v23 }
 0x79f   : > { %v4211_v49 = vunpack.c.l.b16 %v4131_v60 }
 0x7a0   : > { %9664 = vpow2.f32 %v3764_v9  ;;  %v9663_v51 = vpop.eup %9662  ;;  %v4482_v48 = vpack.c.b16 %v4469_v13, %v4468_v2 }
 0x7a1   : > { %v3609_v25 = vpop.xlane.xlu1 %3608  ;;  %v4066_v56 = vmul.f32 %v9663_v51, %v16850_v33  ;;  %9666 = vpow2.f32 %v3858_v38 }
 0x7a2   : > { %v3641_v4 = vpop.xlane.xlu2 %3640  ;;  %v3707_v16 = vsub.f32 %v13339_v50, %v3609_v25  ;;  %4546 = vmatmul.bf16.gmra.mxu3 %v4482_v48 }
 0x7a3   : > { %v3607_v20 = vpop.xlane.xlu0 %3606  ;;  %v4130_v14 = vpack.c.bf16 %v4066_v56, %v4066_v56  ;;  %v3723_v3 = vsub.f32 %v13342_v32, %v3641_v4 }
 0x7a4   : > { %v3706_v5 = vsub.f32 %v13345_v28, %v3607_v20  ;;  %v3800_v35 = vmul.f32 1.442695, %v3707_v16 }
 0x7a5   : > { %v4210_v12 = vunpack.c.l.b16 %v4130_v14  ;;  %v3832_v50 = vmul.f32 1.442695, %v3723_v3 }
 0x7a6   : > { %v13553_v43 = vpop.eup %9664  ;;  %v3798_v36 = vmul.f32 1.442695, %v3706_v5  ;;  %9668 = vpow2.f32 %v3800_v35 }
 0x7a7   : > { %3892 = vadd.xlane.f32.xlu2 %v13553_v43  ;;  %v4224_v54 = vpack.c.b16 %v4211_v49, %v4210_v12  ;;  %v13557_v28 = vpop.eup %9666 }
 0x7a8   : > { %9670 = vpow2.f32 %v3798_v36 }
 0x7a9   : > { %v3639_v24 = vpop.xlane.xlu1 %3638  ;;  %4288 = vmatmul.bf16.gmra.mxu1 %v4224_v54  ;;  %9672 = vpow2.f32 %v3832_v50 }
 0x7aa   : > { %v3975_v29 = vpop.xlane.xlu2 %3974  ;;  %v3722_v19 = vsub.f32 %v13355_v17, %v3639_v24 }
 0x7ab   : > { %v3669_v23 = vpop.xlane.xlu0 %3668 }
 0x7ac   : > { %v3737_v9 = vsub.f32 %v13360_v46, %v3669_v23  ;;  %v13561_v13 = vpop.eup %9668  ;;  %v3830_v32 = vmul.f32 1.442695, %v3722_v19 }
 0x7ad   : > { %3928 = vadd.xlane.f32.xlu1 %v13561_v13 }
 0x7ae   : > { %v13563_v8 = vpop.eup %9670  ;;  %v3860_v57 = vmul.f32 1.442695, %v3737_v9  ;;  %9674 = vpow2.f32 %v3830_v32 }
 0x7af   : > { %3926 = vadd.xlane.f32.xlu0 %v13563_v8  ;;  %3986 = vadd.xlane.f32.xlu2 %v13557_v28  ;;  %v13568_v46 = vpop.eup %9672 }
 0x7b0   : > { %9676 = vpow2.f32 %v3860_v57 }
 0x7b1   : > { %v3917_v2 = vpop.xlane.xlu1 %3916 }
 0x7b2   : > { %v3949_v17 = vpop.xlane.xlu2 %3948  ;;  %9678 = vrcp.f32 %v3917_v2 }
 0x7b3   : > { %v3915_v51 = vpop.xlane.xlu0 %3914 }
 0x7b4   : > { %9680 = vrcp.f32 %v3915_v51  ;;  %v13570_v38 = vpop.eup %9674 }
 0x7b5   : > { %9682 = vrcp.f32 %v3949_v17  ;;  %3958 = vadd.xlane.f32.xlu1 %v13570_v38 }
 0x7b6   : > { %v13572_v48 = vpop.eup %9676  ;;  %9684 = vrcp.f32 %v3975_v29 }
 0x7b7   : > { %3988 = vadd.xlane.f32.xlu0 %v13572_v48  ;;  %3960 = vadd.xlane.f32.xlu2 %v13568_v46 }
 0x7b8   : > { %v9679_v25 = vpop.eup %9678 }
 0x7b9   : > { %v3947_v33 = vpop.xlane.xlu1 %3946  ;;  %v4085_v60 = vmul.f32 %v9679_v25, %v13373_v10 }
 0x7ba   : > { %v9681_v4 = vpop.eup %9680  ;;  %v3883_v56 = vpop.xlane.xlu2 %3882  ;;  %9686 = vrcp.f32 %v3947_v33 }
 0x7bb   : > { %v9683_v16 = vpop.eup %9682  ;;  %v3977_v20 = vpop.xlane.xlu0 %3976  ;;  %v4084_v5 = vmul.f32 %v9681_v4, %v13376_v15  ;;  %v4149_v35 = vpack.c.bf16 %v4085_v60, %v4085_v60 }
 0x7bc   : > { %v9685_v14 = vpop.eup %9684  ;;  %9688 = vrcp.f32 %v3977_v20  ;;  %v4101_v12 = vmul.f32 %v9683_v16, %v13371_v63 }
 0x7bd   : > { %v4148_v36 = vpack.c.bf16 %v4084_v5, %v4084_v5  ;;  %v4342_v3 = vunpack.c.l.b16 %v4149_v35  ;;  %v4114_v54 = vmul.f32 %v9685_v14, %v13357_v47  ;;  %9690 = vrcp.f32 %v3883_v56 }
 0x7be   : > { %v4165_v9 = vpack.c.bf16 %v4101_v12, %v4101_v12 }
 0x7bf   : > { %v4341_v49 = vunpack.c.l.b16 %v4148_v36  ;;  %v4178_v2 = vpack.c.bf16 %v4114_v54, %v4114_v54  ;;  %v16852_v54 = vld [vmem:[#allocation40_spill] sm:$0xff] }
 0x7c0   : > { %v9687_v50 = vpop.eup %9686  ;;  %v4471_v33 = vunpack.c.l.b16 %v4165_v9 }
 0x7c1   : > { %v4354_v24 = vpack.c.b16 %v4342_v3, %v4341_v49  ;;  %v3577_v19 = vpop.xlane.xlu1 %3576  ;;  %v4100_v23 = vmul.f32 %v9687_v50, %v13386_v53  ;;  %v4597_v60 = vunpack.c.l.b16 %v4178_v2 }
 0x7c2   : > { %v9689_v29 = vpop.eup %9688  ;;  %v3613_v10 = vpop.xlane.xlu2 %3612  ;;  %v3691_v15 = vsub.f32 %v13400_v26, %v3577_v19 }
 0x7c3   : > { %v3575_v32 = vpop.xlane.xlu0 %3574  ;;  %4422 = vmatmul.bf16.gmra.mxu2 %v4354_v24  ;;  %v4115_v57 = vmul.f32 %v9689_v29, %v13388_v59  ;;  %v4164_v17 = vpack.c.bf16 %v4100_v23, %v4100_v23  ;;  %v3709_v16 = vsub.f32 %v13403_v37, %v3613_v10  ;;  %v9691_v36 = vpop.eup %9690  ;;  %v16853_v37 = vld [vmem:[#allocation51_spill] sm:$0xff] }
 0x7c4   : > { %v3690_v63 = vsub.f32 %v13406_v6, %v3575_v32  ;;  %v3768_v51 = vmul.f32 1.442695, %v3691_v15  ;;  %v16851_v6 = vld [vmem:[#allocation37_spill] sm:$0xff]  ;;  %v4068_v24 = vmul.f32 %v9691_v36, %v16853_v37  ;;  %v16854_v15 = vld [vmem:[#allocation76_spill] sm:$0xff] }
 0x7c5   : > { %v4179_v47 = vpack.c.bf16 %v4115_v57, %v4115_v57  ;;  %v4470_v4 = vunpack.c.l.b16 %v4164_v17  ;;  %v3804_v56 = vmul.f32 1.442695, %v3709_v16 }
 0x7c6   : > { %v3766_v25 = vmul.f32 1.442695, %v3690_v63  ;;  %9692 = vpow2.f32 %v3768_v51  ;;  %v4132_v2 = vpack.c.bf16 %v4068_v24, %v4068_v24 }
 0x7c7   : > { %v4598_v53 = vunpack.c.l.b16 %v4179_v47  ;;  %v4483_v26 = vpack.c.b16 %v4471_v33, %v4470_v4 }
 0x7c8   : > { %9694 = vpow2.f32 %v3766_v25 }
 0x7c9   : > { %v4611_v20 = vpack.c.b16 %v4598_v53, %v4597_v60  ;;  %v3611_v5 = vpop.xlane.xlu1 %3610  ;;  %4551 = vmatmul.bf16.gmra.mxu3 %v4483_v26 }
 0x7ca   : > { %v3643_v59 = vpop.xlane.xlu2 %3642  ;;  %v3708_v35 = vsub.f32 %v16851_v6, %v3611_v5 }
 0x7cb   : > { %v3885_v14 = vpop.xlane.xlu0 %3884  ;;  %4675 = vmatmul.bf16.gmra.mxu0 %v4611_v20  ;;  %v3724_v50 = vsub.f32 %v16852_v54, %v3643_v59 }
 0x7cc   : > { %9696 = vrcp.f32 %v3885_v14  ;;  %v13587_v3 = vpop.eup %9692  ;;  %v3802_v12 = vmul.f32 1.442695, %v3708_v35 }
 0x7cd   : > { %3896 = vadd.xlane.f32.xlu1 %v13587_v3  ;;  %v3834_v19 = vmul.f32 1.442695, %v3724_v50 }
 0x7ce   : > { %v13589_v49 = vpop.eup %9694  ;;  %9698 = vpow2.f32 %v3802_v12 }
 0x7cf   : > { %3894 = vadd.xlane.f32.xlu0 %v13589_v49  ;;  %9700 = vpow2.f32 %v3804_v56 }
 0x7d1   : > { %v3673_v10 = vpop.xlane.xlu1 %3672 }
 0x7d2   : > { %v9697_v29 = vpop.eup %9696  ;;  %v3921_v23 = vpop.xlane.xlu2 %3920  ;;  %v3739_v32 = vsub.f32 %v13438_v58, %v3673_v10  ;;  %v4212_v58 = vunpack.c.l.b16 %v4132_v2 }
 0x7d3   : > { %v3671_v9 = vpop.xlane.xlu0 %3670  ;;  %v4069_v57 = vmul.f32 %v9697_v29, %v16854_v15  ;;  %9702 = vrcp.f32 %v3921_v23 }
 0x7d4   : > { %v3738_v63 = vsub.f32 %v13443_v62, %v3671_v9  ;;  %v13598_v17 = vpop.eup %9698  ;;  %v3864_v51 = vmul.f32 1.442695, %v3739_v32  ;;  %9704 = vpow2.f32 %v3834_v19 }
 0x7d5   : > { %v4133_v47 = vpack.c.bf16 %v4069_v57, %v4069_v57  ;;  %v13600_v25 = vpop.eup %9700  ;;  %3930 = vadd.xlane.f32.xlu2 %v13598_v17 }
 0x7d6   : > { %v3862_v4 = vmul.f32 1.442695, %v3738_v63  ;;  %9706 = vpow2.f32 %v3864_v51 }
 0x7d7   : > { %3932 = vadd.xlane.f32.xlu0 %v13600_v25  ;;  %v4213_v33 = vunpack.c.l.b16 %v4133_v47 }
 0x7d8   : > { %9708 = vpow2.f32 %v3862_v4 }
 0x7d9   : > { %v4225_v60 = vpack.c.b16 %v4213_v33, %v4212_v58  ;;  %v3919_v53 = vpop.xlane.xlu1 %3918  ;;  %v9703_v16 = vpop.eup %9702 }
 0x7da   : > { %v3951_v62 = vpop.xlane.xlu2 %3950  ;;  %9710 = vrcp.f32 %v3919_v53  ;;  %v13604_v20 = vpop.eup %9704  ;;  %v4087_v35 = vmul.f32 %v9703_v16, %v13440_v34 }
 0x7db   : > { %v3645_v26 = vpop.xlane.xlu0 %3644  ;;  %4293 = vmatmul.bf16.gmra.mxu1 %v4225_v60 }
 0x7dc   : > { %v3725_v5 = vsub.f32 %v13459_v27, %v3645_v26  ;;  %v13607_v59 = vpop.eup %9706  ;;  %v4151_v27 = vpack.c.bf16 %v4087_v35, %v4087_v35 }
 0x7dd   : > { %3992 = vadd.xlane.f32.xlu2 %v13607_v59 }
 0x7de   : > { %v13609_v14 = vpop.eup %9708  ;;  %v3836_v6 = vmul.f32 1.442695, %v3725_v5  ;;  %v4344_v10 = vunpack.c.l.b16 %v4151_v27 }
 0x7df   : > { %3990 = vadd.xlane.f32.xlu1 %v13609_v14  ;;  %3962 = vadd.xlane.f32.xlu0 %v13604_v20 }
 0x7e0   : > { %9712 = vpow2.f32 %v3836_v6  ;;  %v9711_v36 = vpop.eup %9710 }
 0x7e1   : > { %v3981_v56 = vpop.xlane.xlu1 %3980  ;;  %v4086_v54 = vmul.f32 %v9711_v36, %v13454_v30 }
 0x7e2   : > { %v3581_v12 = vpop.xlane.xlu2 %3580  ;;  %9714 = vrcp.f32 %v3981_v56 }
 0x7e3   : > { %v3979_v50 = vpop.xlane.xlu0 %3978  ;;  %v3693_v37 = vsub.f32 %v13469_v55, %v3581_v12  ;;  %v4150_v24 = vpack.c.bf16 %v4086_v54, %v4086_v54 }
 0x7e4   : > { %9716 = vrcp.f32 %v3979_v50 }
 0x7e5   : > { %v3772_v29 = vmul.f32 1.442695, %v3693_v37  ;;  %9718 = vrcp.f32 %v3951_v62  ;;  %v4343_v34 = vunpack.c.l.b16 %v4150_v24 }
 0x7e6   : > { %v13617_v19 = vpop.eup %9712 }
 0x7e7   : > { %9720 = vpow2.f32 %v3772_v29  ;;  %3964 = vadd.xlane.f32.xlu1 %v13617_v19  ;;  %v4355_v23 = vpack.c.b16 %v4344_v10, %v4343_v34 }
 0x7e8   : > { %v9715_v9 = vpop.eup %9714 }
 0x7e9   : > { %v3579_v30 = vpop.xlane.xlu1 %3578  ;;  %4427 = vmatmul.bf16.gmra.mxu2 %v4355_v23  ;;  %v4117_v57 = vmul.f32 %v9715_v9, %v13471_v41 }
 0x7ea   : > { %v9717_v32 = vpop.eup %9716  ;;  %v3675_v15 = vpop.xlane.xlu2 %3674  ;;  %v3692_v55 = vsub.f32 %v13489_v52, %v3579_v30 }
 0x7eb   : > { %v3953_v2 = vpop.xlane.xlu0 %3952  ;;  %v3740_v63 = vsub.f32 %v13492_v21, %v3675_v15  ;;  %v4116_v51 = vmul.f32 %v9717_v32, %v13475_v61  ;;  %v9719_v47 = vpop.eup %9718  ;;  %v4181_v4 = vpack.c.bf16 %v4117_v57, %v4117_v57 }
 0x7ec   : > { %9722 = vrcp.f32 %v3953_v2  ;;  %v3770_v33 = vmul.f32 1.442695, %v3692_v55  ;;  %v4102_v52 = vmul.f32 %v9719_v47, %v13456_v40 }
 0x7ed   : > { %v13624_v58 = vpop.eup %9720  ;;  %v3866_v60 = vmul.f32 1.442695, %v3740_v63  ;;  %v4180_v53 = vpack.c.bf16 %v4116_v51, %v4116_v51  ;;  %v4600_v62 = vunpack.c.l.b16 %v4181_v4 }
 0x7ee   : > { %3900 = vadd.xlane.f32.xlu0 %v13624_v58  ;;  %9724 = vpow2.f32 %v3770_v33  ;;  %v4166_v35 = vpack.c.bf16 %v4102_v52, %v4102_v52 }
 0x7ef   : > { %v4599_v41 = vunpack.c.l.b16 %v4180_v53  ;;  %9726 = vpow2.f32 %v3866_v60 }
 0x7f0   : > { %v4472_v40 = vunpack.c.l.b16 %v4166_v35 }
 0x7f1   : > { %v4612_v16 = vpack.c.b16 %v4600_v62, %v4599_v41  ;;  %v3889_v26 = vpop.xlane.xlu1 %3888 }
 0x7f2   : > { %v9723_v21 = vpop.eup %9722  ;;  %v3925_v61 = vpop.xlane.xlu2 %3924  ;;  %9728 = vrcp.f32 %v3889_v26 }
 0x7f3   : > { %v3887_v5 = vpop.xlane.xlu0 %3886  ;;  %4680 = vmatmul.bf16.gmra.mxu0 %v4612_v16  ;;  %v4103_v6 = vmul.f32 %v9723_v21, %v13494_v42 }
 0x7f4   : > { %9730 = vrcp.f32 %v3887_v5  ;;  %v13629_v36 = vpop.eup %9724 }
 0x7f5   : > { %9732 = vrcp.f32 %v3925_v61  ;;  %v4167_v56 = vpack.c.bf16 %v4103_v6, %v4103_v6  ;;  %v13631_v12 = vpop.eup %9726  ;;  %3898 = vadd.xlane.f32.xlu2 %v13629_v36 }
 0x7f6   : > { %3994 = vadd.xlane.f32.xlu1 %v13631_v12 }
 0x7f7   : > { %v4473_v54 = vunpack.c.l.b16 %v4167_v56 }
 0x7f8   : > { %v9729_v27 = vpop.eup %9728 }
 0x7f9   : > { %v4484_v50 = vpack.c.b16 %v4473_v54, %v4472_v40  ;;  %v3923_v24 = vpop.xlane.xlu1 %3922  ;;  %v4071_v42 = vmul.f32 %v9729_v27, %v13503_v7 }
 0x7fa   : > { %v9731_v37 = vpop.eup %9730  ;;  %9734 = vrcp.f32 %v3923_v24  ;;  %v3955_v4 = vpop.xlane.xlu2 %3954 }
 0x7fb   : > { %v9733_v29 = vpop.eup %9732  ;;  %v3677_v34 = vpop.xlane.xlu0 %3676  ;;  %4556 = vmatmul.bf16.gmra.mxu3 %v4484_v50  ;;  %v4070_v10 = vmul.f32 %v9731_v37, %v13508_v0  ;;  %v4135_v9 = vpack.c.bf16 %v4071_v42, %v4071_v42 }
 0x7fc   : > { %v3741_v23 = vsub.f32 %v13521_v39, %v3677_v34  ;;  %v4089_v57 = vmul.f32 %v9733_v29, %v13506_v22 }
 0x7fd   : > { %v4134_v32 = vpack.c.bf16 %v4070_v10, %v4070_v10  ;;  %v4215_v15 = vunpack.c.l.b16 %v4135_v9 }
 0x7fe   : > { %v3868_v30 = vmul.f32 1.442695, %v3741_v23  ;;  %v4153_v47 = vpack.c.bf16 %v4089_v57, %v4089_v57 }
 0x7ff   : > { %v4214_v55 = vunpack.c.l.b16 %v4134_v32 }
 0x800   : > { %9736 = vpow2.f32 %v3868_v30  ;;  %v9735_v2 = vpop.eup %9734  ;;  %v4346_v53 = vunpack.c.l.b16 %v4153_v47 }
 0x801   : > { %v4226_v63 = vpack.c.b16 %v4215_v15, %v4214_v55  ;;  %v3985_v51 = vpop.xlane.xlu1 %3984  ;;  %v4088_v7 = vmul.f32 %v9735_v2, %v13516_v1 }
 0x802   : > { %9738 = vrcp.f32 %v3985_v51 }
 0x803   : > { %v3983_v33 = vpop.xlane.xlu0 %3982  ;;  %4298 = vmatmul.bf16.gmra.mxu1 %v4226_v63  ;;  %v4152_v0 = vpack.c.bf16 %v4088_v7, %v4088_v7 }
 0x804   : > { %9740 = vrcp.f32 %v3983_v33 }
 0x805   : > { %9742 = vrcp.f32 %v3955_v4  ;;  %v4345_v60 = vunpack.c.l.b16 %v4152_v0 }
 0x806   : > { %v13640_v39 = vpop.eup %9736 }
 0x807   : > { %3996 = vadd.xlane.f32.xlu2 %v13640_v39  ;;  %v4356_v22 = vpack.c.b16 %v4346_v53, %v4345_v60 }
 0x808   : > { %v9739_v62 = vpop.eup %9738 }
 0x809   : > { %4432 = vmatmul.bf16.gmra.mxu2 %v4356_v22  ;;  %v4119_v1 = vmul.f32 %v9739_v62, %v13531_v45  ;;  %v3891_v54 = vpop.xlane.xlu1 %3890 }
 0x80a   : > { %v9741_v41 = vpop.eup %9740 }
 0x80b   : > { %v3957_v52 = vpop.xlane.xlu0 %3956  ;;  %v4118_v16 = vmul.f32 %v9741_v41, %v13533_v18  ;;  %v9743_v21 = vpop.eup %9742  ;;  %v4183_v26 = vpack.c.bf16 %v4119_v1, %v4119_v1 }
 0x80c   : > { %9744 = vrcp.f32 %v3957_v52  ;;  %v4104_v35 = vmul.f32 %v9743_v21, %v13518_v11 }
 0x80d   : > { %v4182_v61 = vpack.c.bf16 %v4118_v16, %v4118_v16  ;;  %v4602_v5 = vunpack.c.l.b16 %v4183_v26  ;;  %9746 = vrcp.f32 %v3891_v54  ;;  %v9237_v54 = vld [vmem:[%s10478_s28 + $0x18] sm:$0xff] }
 0x80e   : > { %v4168_v50 = vpack.c.bf16 %v4104_v35, %v4104_v35  ;;  %4993 = vmatpush.bf16.msra.mxu2 %v9237_v54 }
 0x80f   : > { %v4601_v6 = vunpack.c.l.b16 %v4182_v61 }
 0x810   : > { %v4474_v37 = vunpack.c.l.b16 %v4168_v50  ;;  %v9235_v50 = vld [vmem:[%s10478_s28 + $0x8] sm:$0xff] }
 0x811   : > { %v4613_v56 = vpack.c.b16 %v4602_v5, %v4601_v6  ;;  %4868 = vmatpush.bf16.msra.mxu1 %v9235_v50 }
 0x812   : > { %v9745_v40 = vpop.eup %9744 }
 0x813   : > { %4685 = vmatmul.bf16.gmra.mxu0 %v4613_v56  ;;  %v4105_v27 = vmul.f32 %v9745_v40, %v13541_v31  ;;  %v9747_v29 = vpop.eup %9746 }
 0x814   : > { %v4072_v34 = vmul.f32 %v9747_v29, %v13539_v44 }
 0x815   : > { %v4169_v45 = vpack.c.bf16 %v4105_v27, %v4105_v27  ;;  %v9239_v27 = vld [vmem:[%s10478_s28 + $0x28] sm:$0xff] }
 0x816   : > { %v4136_v31 = vpack.c.bf16 %v4072_v34, %v4072_v34  ;;  %5118 = vmatpush.bf16.msra.mxu3 %v9239_v27 }
 0x817   : > { %v4475_v24 = vunpack.c.l.b16 %v4169_v45  ;;  %v9236_v45 = vld [vmem:[%s10478_s28 + $0x10] sm:$0xff] }
 0x818   : > { %v4216_v15 = vunpack.c.l.b16 %v4136_v31  ;;  %4994 = vmatpush.bf16.msra.mxu2 %v9236_v45 }
 0x819   : > { %v4485_v18 = vpack.c.b16 %v4475_v24, %v4474_v37  ;;  %v9241_v37 = vld [vmem:[%s10478_s28 + $0x38] sm:$0xff] }
 0x81a   : > { %v3893_v42 = vpop.xlane.xlu2 %3892  ;;  %5243 = vmatpush.bf16.msra.mxu0 %v9241_v37 }
 0x81b   : > { %9748 = vrcp.f32 %v3893_v42  ;;  %4561 = vmatmul.bf16.gmra.mxu3 %v4485_v18  ;;  %v4408_v42 = vpop.f32.mrf.mxu2 }
 0x820   : > { %v3929_v11 = vpop.xlane.xlu1 %3928 }
 0x821   : > { %v9749_v10 = vpop.eup %9748  ;;  %9750 = vrcp.f32 %v3929_v11 }
 0x822   : > { %v3927_v23 = vpop.xlane.xlu0 %3926  ;;  %v3987_v9 = vpop.xlane.xlu2 %3986  ;;  %v4073_v32 = vmul.f32 %v9749_v10, %v13553_v43 }
 0x823   : > { %9752 = vrcp.f32 %v3927_v23 }
 0x824   : > { %v4137_v30 = vpack.c.bf16 %v4073_v32, %v4073_v32  ;;  %9754 = vrcp.f32 %v3987_v9 }
 0x826   : > { %v4217_v57 = vunpack.c.l.b16 %v4137_v30 }
 0x827   : > { %v9751_v55 = vpop.eup %9750 }
 0x828   : > { %v4227_v2 = vpack.c.b16 %v4217_v57, %v4216_v15  ;;  %v3959_v51 = vpop.xlane.xlu1 %3958  ;;  %v4091_v7 = vmul.f32 %v9751_v55, %v13561_v13 }
 0x829   : > { %v9753_v63 = vpop.eup %9752  ;;  %9756 = vrcp.f32 %v3959_v51 }
 0x82a   : > { %v3989_v44 = vpop.xlane.xlu0 %3988  ;;  %v3961_v47 = vpop.xlane.xlu2 %3960  ;;  %4303 = vmatmul.bf16.gmra.mxu1 %v4227_v2  ;;  %v4090_v4 = vmul.f32 %v9753_v63, %v13563_v8  ;;  %v4155_v43 = vpack.c.bf16 %v4091_v7, %v4091_v7 }
 0x82b   : > { %v9755_v33 = vpop.eup %9754  ;;  %9758 = vrcp.f32 %v3989_v44  ;;  %v4410_v7 = vpop.f32.mrf.mxu2 }
 0x82c   : > { %9760 = vrcp.f32 %v3961_v47  ;;  %v4154_v0 = vpack.c.bf16 %v4090_v4, %v4090_v4  ;;  %v4348_v60 = vunpack.c.l.b16 %v4155_v43  ;;  %v4120_v22 = vmul.f32 %v9755_v33, %v13557_v28  ;;  %v4537_v43 = vpop.f32.mrf.mxu3 }
 0x82e   : > { %v4347_v53 = vunpack.c.l.b16 %v4154_v0  ;;  %v4184_v16 = vpack.c.bf16 %v4120_v22, %v4120_v22 }
 0x82f   : > { %v9757_v62 = vpop.eup %9756 }
 0x830   : > { %v4357_v41 = vpack.c.b16 %v4348_v60, %v4347_v53  ;;  %v4106_v13 = vmul.f32 %v9757_v62, %v13570_v38  ;;  %v4603_v28 = vunpack.c.l.b16 %v4184_v16  ;;  %v9238_v62 = vld [vmem:[%s10478_s28 + $0x20] sm:$0xff] }
 0x831   : > { %v9759_v1 = vpop.eup %9758  ;;  %5119 = vmatpush.bf16.msra.mxu3 %v9238_v62 }
 0x832   : > { %v9761_v52 = vpop.eup %9760  ;;  %4437 = vmatmul.bf16.gmra.mxu2 %v4357_v41  ;;  %v4121_v8 = vmul.f32 %v9759_v1, %v13572_v48  ;;  %v4170_v26 = vpack.c.bf16 %v4106_v13, %v4106_v13 }
 0x833   : > { %v4107_v21 = vmul.f32 %v9761_v52, %v13568_v46  ;;  %v4413_v41 = vpop.f32.mrf.mxu2 }
 0x834   : > { %v4185_v61 = vpack.c.bf16 %v4121_v8, %v4121_v8  ;;  %v4476_v6 = vunpack.c.l.b16 %v4170_v26 }
 0x835   : > { %v4171_v5 = vpack.c.bf16 %v4107_v21, %v4107_v21  ;;  %v4723_v21 = vpack.c.bf16 %v4410_v7, %v4410_v7 }
 0x836   : > { %v4604_v35 = vunpack.c.l.b16 %v4185_v61 }
 0x837   : > { %v4477_v56 = vunpack.c.l.b16 %v4171_v5 }
 0x838   : > { %v4614_v38 = vpack.c.b16 %v4604_v35, %v4603_v28  ;;  %v4928_v35 = vunpack.c.l.b16 %v4723_v21 }
 0x839   : > { %v4486_v40 = vpack.c.b16 %v4477_v56, %v4476_v6  ;;  %v4539_v6 = vpop.f32.mrf.mxu3 }
 0x83a   : > { %4690 = vmatmul.bf16.gmra.mxu0 %v4614_v38 }
 0x83b   : > { %4566 = vmatmul.bf16.gmra.mxu3 %v4486_v40  ;;  %v4415_v38 = vpop.f32.mrf.mxu2  ;;  %v13669_v40 = vpop.f32.mrf.mxu1 }
 0x840   : > { %v3897_v48 = vpop.xlane.xlu1 %3896 }
 0x841   : > { %9762 = vrcp.f32 %v3897_v48  ;;  %v13671_v37 = vpop.f32.mrf.mxu3 }
 0x842   : > { %v3895_v46 = vpop.xlane.xlu0 %3894 }
 0x843   : > { %9764 = vrcp.f32 %v3895_v46 }
 0x847   : > { %v9763_v24 = vpop.eup %9762 }
 0x848   : > { %v3931_v29 = vpop.xlane.xlu2 %3930  ;;  %v4075_v34 = vmul.f32 %v9763_v24, %v13587_v3  ;;  %v4418_v24 = vpop.f32.mrf.mxu2 }
 0x849   : > { %v9765_v18 = vpop.eup %9764  ;;  %9766 = vrcp.f32 %v3931_v29  ;;  %v4281_v29 = vpop.f32.mrf.mxu1 }
 0x84a   : > { %v3933_v10 = vpop.xlane.xlu0 %3932  ;;  %v4074_v11 = vmul.f32 %v9765_v18, %v13589_v49  ;;  %v4139_v23 = vpack.c.bf16 %v4075_v34, %v4075_v34  ;;  %v4739_v34 = vpack.c.bf16 %v4539_v6, %v4539_v6 }
 0x84b   : > { %9768 = vrcp.f32 %v3933_v10  ;;  %v4725_v10 = vpack.c.bf16 %v4415_v38, %v4415_v38 }
 0x84c   : > { %v4138_v9 = vpack.c.bf16 %v4074_v11, %v4074_v11  ;;  %v4219_v32 = vunpack.c.l.b16 %v4139_v23 }
 0x84e   : > { %v4218_v31 = vunpack.c.l.b16 %v4138_v9  ;;  %v4738_v9 = vpack.c.bf16 %v4537_v43, %v4537_v43 }
 0x84f   : > { %v9767_v30 = vpop.eup %9766 }
 0x850   : > { %v4228_v15 = vpack.c.b16 %v4219_v32, %v4218_v31  ;;  %v3993_v55 = vpop.xlane.xlu2 %3992  ;;  %v4092_v2 = vmul.f32 %v9767_v30, %v13598_v17  ;;  %v4724_v32 = vpack.c.bf16 %v4413_v41, %v4413_v41  ;;  %v4420_v7 = vpop.f32.mrf.mxu2 }
 0x851   : > { %v9769_v57 = vpop.eup %9768  ;;  %9770 = vrcp.f32 %v3993_v55  ;;  %v4544_v55 = vpop.f32.mrf.mxu3 }
 0x852   : > { %v3991_v63 = vpop.xlane.xlu1 %3990  ;;  %v3963_v51 = vpop.xlane.xlu0 %3962  ;;  %4308 = vmatmul.bf16.gmra.mxu1 %v4228_v15  ;;  %v4093_v3 = vmul.f32 %v9769_v57, %v13600_v25  ;;  %v4156_v49 = vpack.c.bf16 %v4092_v2, %v4092_v2  ;;  %v5053_v15 = vunpack.c.l.b16 %v4739_v34  ;;  %v4930_v57 = vunpack.c.l.b16 %v4725_v10 }
 0x853   : > { %9772 = vrcp.f32 %v3991_v63 }
 0x854   : > { %v4157_v44 = vpack.c.bf16 %v4093_v3, %v4093_v3  ;;  %9774 = vrcp.f32 %v3963_v51  ;;  %v4349_v47 = vunpack.c.l.b16 %v4156_v49  ;;  %v4929_v51 = vunpack.c.l.b16 %v4724_v32  ;;  %v13677_v3 = vpop.f32.mrf.mxu0 }
 0x856   : > { %v4350_v4 = vunpack.c.l.b16 %v4157_v44  ;;  %v4284_v44 = vpop.f32.mrf.mxu1 }
 0x857   : > { %v9771_v33 = vpop.eup %9770 }
 0x858   : > { %v4358_v0 = vpack.c.b16 %v4350_v4, %v4349_v47  ;;  %v4123_v17 = vmul.f32 %v9771_v33, %v13607_v59  ;;  %v4722_v59 = vpack.c.bf16 %v4408_v42, %v4408_v42  ;;  %v4944_v47 = vpack.c.b16 %v4930_v57, %v4929_v51  ;;  %v9240_v33 = vld [vmem:[%s10478_s28 + $0x30] sm:$0xff] }
 0x859   : > { %v9773_v60 = vpop.eup %9772  ;;  %5244 = vmatpush.bf16.msra.mxu0 %v9240_v33 }
 0x85a   : > { %v3965_v53 = vpop.xlane.xlu1 %3964  ;;  %4442 = vmatmul.bf16.gmra.mxu2 %v4358_v0  ;;  %v4122_v22 = vmul.f32 %v9773_v60, %v13609_v14  ;;  %v9775_v25 = vpop.eup %9774  ;;  %v4187_v1 = vpack.c.bf16 %v4123_v17, %v4123_v17  ;;  %v4927_v54 = vunpack.c.l.b16 %v4722_v59  ;;  %v4707_v17 = vpack.c.bf16 %v4281_v29, %v4281_v29 }
 0x85b   : > { %9776 = vrcp.f32 %v3965_v53  ;;  %v4108_v16 = vmul.f32 %v9775_v25, %v13604_v20  ;;  %v4547_v0 = vpop.f32.mrf.mxu3  ;;  %v4423_v53 = vpop.f32.mrf.mxu2  ;;  %v4706_v25 = vpack.c.bf16 %v13669_v40, %v13669_v40 }
 0x85c   : > { %v4186_v13 = vpack.c.bf16 %v4122_v22, %v4122_v22  ;;  %v4606_v52 = vunpack.c.l.b16 %v4187_v1  ;;  %v4943_v48 = vpack.c.b16 %v4928_v35, %v4927_v54  ;;  %v4727_v22 = vpack.c.bf16 %v4420_v7, %v4420_v7  ;;  %v4668_v41 = vpop.f32.mrf.mxu0 }
 0x85d   : > { %v4172_v28 = vpack.c.bf16 %v4108_v16, %v4108_v16  ;;  %v4741_v1 = vpack.c.bf16 %v4544_v55, %v4544_v55  ;;  %v4803_v21 = vunpack.c.l.b16 %v4707_v17  ;;  %v4728_v29 = vpack.c.bf16 %v4423_v53, %v4423_v53 }
 0x85e   : > { %v4605_v8 = vunpack.c.l.b16 %v4186_v13  ;;  %v4286_v13 = vpop.f32.mrf.mxu1 }
 0x85f   : > { %v4478_v27 = vunpack.c.l.b16 %v4172_v28  ;;  %v5055_v59 = vunpack.c.l.b16 %v4741_v1  ;;  %v4933_v57 = vunpack.c.l.b16 %v4728_v29 }
 0x860   : > { %v4615_v26 = vpack.c.b16 %v4606_v52, %v4605_v8  ;;  %v4726_v52 = vpack.c.bf16 %v4418_v24, %v4418_v24 }
 0x861   : > { %v9777_v61 = vpop.eup %9776  ;;  %v3901_v5 = vpop.xlane.xlu0 %3900 }
 0x862   : > { %4695 = vmatmul.bf16.gmra.mxu0 %v4615_v26  ;;  %v4109_v14 = vmul.f32 %v9777_v61, %v13617_v19  ;;  %9778 = vrcp.f32 %v3901_v5  ;;  %v9234_v19 = vld [vmem:[%s10478_s28] sm:$0xff]  ;;  %v4740_v26 = vpack.c.bf16 %v13671_v37, %v13671_v37  ;;  %v4932_v61 = vunpack.c.l.b16 %v4727_v22 }
 0x863   : > { %4869 = vmatpush.bf16.msra.mxu1 %v9234_v19  ;;  %v4802_v5 = vunpack.c.l.b16 %v4706_v25  ;;  %v4931_v6 = vunpack.c.l.b16 %v4726_v52  ;;  %v4708_v19 = vpack.c.bf16 %v4284_v44, %v4284_v44 }
 0x864   : > { %v4173_v56 = vpack.c.bf16 %v4109_v14, %v4109_v14  ;;  %v4549_v14 = vpop.f32.mrf.mxu3  ;;  %v5054_v38 = vunpack.c.l.b16 %v4740_v26 }
 0x865   : > { %v4945_v40 = vpack.c.b16 %v4932_v61, %v4931_v6  ;;  %v4743_v24 = vpack.c.bf16 %v4549_v14, %v4549_v14 }
 0x866   : > { %v4479_v20 = vunpack.c.l.b16 %v4173_v56  ;;  %v4818_v56 = vpack.c.b16 %v4803_v21, %v4802_v5 }
 0x868   : > { %v4487_v46 = vpack.c.b16 %v4479_v20, %v4478_v27  ;;  %v3899_v50 = vpop.xlane.xlu2 %3898  ;;  %v9779_v45 = vpop.eup %9778  ;;  %v5069_v27 = vpack.c.b16 %v5055_v59, %v5054_v38 }
 0x869   : > { %9780 = vrcp.f32 %v3899_v50  ;;  %v4077_v18 = vmul.f32 %v9779_v45, %v13624_v58  ;;  %v3995_v31 = vpop.xlane.xlu1 %3994  ;;  %v5052_v58 = vunpack.c.l.b16 %v4738_v9  ;;  %v4671_v20 = vpop.f32.mrf.mxu0  ;;  %v4709_v50 = vpack.c.bf16 %v4286_v13, %v4286_v13 }
 0x86a   : > { %4571 = vmatmul.bf16.gmra.mxu3 %v4487_v46  ;;  %8688 = vmatmul.msk.bf16.vlgmr.msra.gmra.mxu2 %vm3017_vm2, %v4943_v48  ;;  %9782 = vrcp.f32 %v3995_v31  ;;  %v4289_v48 = vpop.f32.mrf.mxu1  ;;  %v4755_v45 = vpack.c.bf16 %v4668_v41, %v4668_v41  ;;  %v4804_v31 = vunpack.c.l.b16 %v4708_v19 }
 0x86b   : > { %v4141_v23 = vpack.c.bf16 %v4077_v18, %v4077_v18  ;;  %v4805_v34 = vunpack.c.l.b16 %v4709_v50 }
 0x86c   : > { %v4552_v46 = vpop.f32.mrf.mxu3 }
 0x86d   : > { %v4221_v63 = vunpack.c.l.b16 %v4141_v23  ;;  %v5178_v23 = vunpack.c.l.b16 %v4755_v45  ;;  %v4819_v55 = vpack.c.b16 %v4805_v34, %v4804_v31  ;;  %v4744_v22 = vpack.c.bf16 %v4552_v46, %v4552_v46 }
 0x86f   : > { %v9781_v42 = vpop.eup %9780  ;;  %v5058_v61 = vunpack.c.l.b16 %v4744_v22 }
 0x870   : > { %v4076_v11 = vmul.f32 %v9781_v42, %v13629_v36  ;;  %v5068_v36 = vpack.c.b16 %v5053_v15, %v5052_v58  ;;  %v9783_v43 = vpop.eup %9782  ;;  %v4754_v42 = vpack.c.bf16 %v13677_v3, %v13677_v3 }
 0x871   : > { %v4124_v60 = vmul.f32 %v9783_v43, %v13631_v12  ;;  %v4673_v10 = vpop.f32.mrf.mxu0  ;;  %v4710_v43 = vpack.c.bf16 %v4289_v48, %v4289_v48 }
 0x872   : > { %v4140_v30 = vpack.c.bf16 %v4076_v11, %v4076_v11  ;;  %v4742_v11 = vpack.c.bf16 %v4547_v0, %v4547_v0  ;;  %v4291_v9 = vpop.f32.mrf.mxu1  ;;  %v5177_v15 = vunpack.c.l.b16 %v4754_v42 }
 0x873   : > { %v4188_v16 = vpack.c.bf16 %v4124_v60, %v4124_v60  ;;  %v4756_v60 = vpack.c.bf16 %v4671_v20, %v4671_v20  ;;  %v4806_v1 = vunpack.c.l.b16 %v4710_v43 }
 0x874   : > { %v4220_v2 = vunpack.c.l.b16 %v4140_v30  ;;  %v5057_v30 = vunpack.c.l.b16 %v4743_v24  ;;  %v4554_v51 = vpop.f32.mrf.mxu3 }
 0x875   : > { %v4607_v28 = vunpack.c.l.b16 %v4188_v16  ;;  %v4745_v0 = vpack.c.bf16 %v4554_v51, %v4554_v51 }
 0x876   : > { %v4229_v49 = vpack.c.b16 %v4221_v63, %v4220_v2  ;;  %v5056_v2 = vunpack.c.l.b16 %v4742_v11  ;;  %v5193_v63 = vpack.c.b16 %v5178_v23, %v5177_v15 }
 0x877   : > { %v5059_v52 = vunpack.c.l.b16 %v4745_v0 }
 0x878   : > { %4313 = vmatmul.bf16.gmra.mxu1 %v4229_v49  ;;  %v5070_v7 = vpack.c.b16 %v5057_v30, %v5056_v2 }
 0x879   : > { %v4676_v3 = vpop.f32.mrf.mxu0  ;;  %v5071_v59 = vpack.c.b16 %v5059_v52, %v5058_v61 }
 0x87a   : > { %8689 = vmatmul.msk.bf16.gmra.mxu2 %vm3017_vm2, %v4944_v47  ;;  %8704 = vmatmul.msk.bf16.vlgmr.msra.gmra.mxu3 %vm3017_vm2, %v5068_v36  ;;  %v3997_v4 = vpop.xlane.xlu2 %3996  ;;  %v4294_v44 = vpop.f32.mrf.mxu1  ;;  %v4711_v36 = vpack.c.bf16 %v4291_v9, %v4291_v9  ;;  %v4757_v47 = vpack.c.bf16 %v4673_v10, %v4673_v10  ;;  %v4758_v20 = vpack.c.bf16 %v4676_v3, %v4676_v3 }
 0x87b   : > { %9784 = vrcp.f32 %v3997_v4 }
 0x87c   : > { %v4807_v53 = vunpack.c.l.b16 %v4711_v36  ;;  %v5180_v25 = vunpack.c.l.b16 %v4757_v47  ;;  %v5181_v42 = vunpack.c.l.b16 %v4758_v20 }
 0x87e   : > { %v4557_v33 = vpop.f32.mrf.mxu3  ;;  %v4820_v26 = vpack.c.b16 %v4807_v53, %v4806_v1 }
 0x87f   : > { %v4746_v50 = vpack.c.bf16 %v4557_v33, %v4557_v33 }
 0x881   : > { %v9785_v62 = vpop.eup %9784  ;;  %v4678_v13 = vpop.f32.mrf.mxu0  ;;  %v5060_v11 = vunpack.c.l.b16 %v4746_v50 }
 0x882   : > { %v4125_v8 = vmul.f32 %v9785_v62, %v13640_v39  ;;  %v4425_v39 = vpop.f32.mrf.mxu2  ;;  %v4296_v16 = vpop.f32.mrf.mxu1  ;;  %v4759_v38 = vpack.c.bf16 %v4678_v13, %v4678_v13 }
 0x883   : > { %v4729_v37 = vpack.c.bf16 %v4425_v39, %v4425_v39 }
 0x884   : > { %v4189_v12 = vpack.c.bf16 %v4125_v8, %v4125_v8  ;;  %v5179_v8 = vunpack.c.l.b16 %v4756_v60  ;;  %v5182_v45 = vunpack.c.l.b16 %v4759_v38 }
 0x885   : > { %v4934_v32 = vunpack.c.l.b16 %v4729_v37 }
 0x886   : > { %v4608_v35 = vunpack.c.l.b16 %v4189_v12  ;;  %v5194_v12 = vpack.c.b16 %v5180_v25, %v5179_v8  ;;  %v4559_v6 = vpop.f32.mrf.mxu3  ;;  %v5195_v23 = vpack.c.b16 %v5182_v45, %v5181_v42 }
 0x887   : > { %v4946_v58 = vpack.c.b16 %v4934_v32, %v4933_v57 }
 0x888   : > { %v4616_v54 = vpack.c.b16 %v4608_v35, %v4607_v28  ;;  %8672 = vmatmul.msk.bf16.vlgmr.msra.gmra.mxu1 %vm3017_vm2, %v4818_v56  ;;  %v4713_v56 = vpack.c.bf16 %v4296_v16, %v4296_v16 }
 0x889   : > { %v4681_v14 = vpop.f32.mrf.mxu0 }
 0x88a   : > { %4700 = vmatmul.bf16.gmra.mxu0 %v4616_v54  ;;  %8690 = vmatmul.msk.bf16.gmra.mxu2 %vm3017_vm2, %v4945_v40  ;;  %v4428_v18 = vpop.f32.mrf.mxu2  ;;  %v4299_v35 = vpop.f32.mrf.mxu1  ;;  %v4712_v54 = vpack.c.bf16 %v4294_v44, %v4294_v44  ;;  %v4809_v46 = vunpack.c.l.b16 %v4713_v56  ;;  %v4760_v3 = vpack.c.bf16 %v4681_v14, %v4681_v14 }
 0x88b   : > { %8705 = vmatmul.msk.bf16.gmra.mxu3 %vm3017_vm2, %v5069_v27  ;;  %v4730_v17 = vpack.c.bf16 %v4428_v18, %v4428_v18  ;;  %v4747_v27 = vpack.c.bf16 %v4559_v6, %v4559_v6  ;;  %v4714_v51 = vpack.c.bf16 %v4299_v35, %v4299_v35 }
 0x88c   : > { %v4808_v19 = vunpack.c.l.b16 %v4712_v54  ;;  %v5183_v60 = vunpack.c.l.b16 %v4760_v3 }
 0x88d   : > { %v4935_v21 = vunpack.c.l.b16 %v4730_v17  ;;  %v5061_v24 = vunpack.c.l.b16 %v4747_v27  ;;  %v4810_v43 = vunpack.c.l.b16 %v4714_v51 }
 0x88e   : > { %v4821_v34 = vpack.c.b16 %v4809_v46, %v4808_v19 }
 0x88f   : > { %v5072_v31 = vpack.c.b16 %v5061_v24, %v5060_v11 }
 0x891   : > { %v4683_v10 = vpop.f32.mrf.mxu0 }
 0x892   : > { %v4430_v49 = vpop.f32.mrf.mxu2  ;;  %v4301_v9 = vpop.f32.mrf.mxu1  ;;  %v4761_v2 = vpack.c.bf16 %v4683_v10, %v4683_v10 }
 0x893   : > { %v4731_v4 = vpack.c.bf16 %v4430_v49, %v4430_v49  ;;  %v4715_v57 = vpack.c.bf16 %v4301_v9, %v4301_v9 }
 0x894   : > { %v5184_v47 = vunpack.c.l.b16 %v4761_v2 }
 0x895   : > { %v4936_v41 = vunpack.c.l.b16 %v4731_v4  ;;  %v4811_v44 = vunpack.c.l.b16 %v4715_v57 }
 0x897   : > { %v4947_v5 = vpack.c.b16 %v4936_v41, %v4935_v21  ;;  %v4822_v53 = vpack.c.b16 %v4811_v44, %v4810_v43 }
 0x898   : > { %8673 = vmatmul.msk.bf16.gmra.mxu1 %vm3017_vm2, %v4819_v55 }
 0x899   : > { %v4686_v55 = vpop.f32.mrf.mxu0 }
 0x89a   : > { %8691 = vmatmul.msk.bf16.gmra.mxu2 %vm3017_vm2, %v4946_v58  ;;  %8720 = vmatmul.msk.bf16.vlgmr.msra.gmra.mxu0 %vm3017_vm2, %v5193_v63  ;;  %v4433_v62 = vpop.f32.mrf.mxu2 }
 0x89b   : > { %8706 = vmatmul.msk.bf16.gmra.mxu3 %vm3017_vm2, %v5070_v7  ;;  %v4732_v39 = vpack.c.bf16 %v4433_v62, %v4433_v62  ;;  %v5196_v62 = vpack.c.b16 %v5184_v47, %v5183_v60 }
 0x89d   : > { %v4937_v29 = vunpack.c.l.b16 %v4732_v39 }
 0x89e   : > { %v4562_v48 = vpop.f32.mrf.mxu3 }
 0x89f   : > { %v4748_v36 = vpack.c.bf16 %v4562_v48, %v4562_v48 }
 0x8a1   : > { %v5062_v22 = vunpack.c.l.b16 %v4748_v36  ;;  %v4688_v41 = vpop.f32.mrf.mxu0 }
 0x8a2   : > { %v4435_v28 = vpop.f32.mrf.mxu2  ;;  %v4763_v16 = vpack.c.bf16 %v4688_v41, %v4688_v41 }
 0x8a3   : > { %v4733_v40 = vpack.c.bf16 %v4435_v28, %v4435_v28 }
 0x8a4   : > { %v5186_v14 = vunpack.c.l.b16 %v4763_v16 }
 0x8a5   : > { %v4938_v37 = vunpack.c.l.b16 %v4733_v40 }
 0x8a6   : > { %v4564_v30 = vpop.f32.mrf.mxu3 }
 0x8a7   : > { %v4948_v32 = vpack.c.b16 %v4938_v37, %v4937_v29  ;;  %v4304_v63 = vpop.f32.mrf.mxu1  ;;  %v4749_v7 = vpack.c.bf16 %v4564_v30, %v4564_v30 }
 0x8a8   : > { %8674 = vmatmul.msk.bf16.gmra.mxu1 %vm3017_vm2, %v4820_v26  ;;  %v4716_v21 = vpack.c.bf16 %v4304_v63, %v4304_v63 }
 0x8a9   : > { %v5063_v0 = vunpack.c.l.b16 %v4749_v7 }
 0x8aa   : > { %8692 = vmatmul.msk.bf16.gmra.mxu2 %vm3017_vm2, %v4947_v5  ;;  %8721 = vmatmul.msk.bf16.gmra.mxu0 %vm3017_vm2, %v5194_v12  ;;  %v4762_v12 = vpack.c.bf16 %v4686_v55, %v4686_v55  ;;  %v4812_v28 = vunpack.c.l.b16 %v4716_v21 }
 0x8ab   : > { %8707 = vmatmul.msk.bf16.gmra.mxu3 %vm3017_vm2, %v5071_v59  ;;  %v5073_v1 = vpack.c.b16 %v5063_v0, %v5062_v22 }
 0x8ac   : > { %v5185_v56 = vunpack.c.l.b16 %v4762_v12 }
 0x8ae   : > { %v5197_v54 = vpack.c.b16 %v5186_v14, %v5185_v56 }
 0x8af   : > { %v4306_v13 = vpop.f32.mrf.mxu1 }
 0x8b0   : > { %v4717_v8 = vpack.c.bf16 %v4306_v13, %v4306_v13 }
 0x8b2   : > { %v4813_v59 = vunpack.c.l.b16 %v4717_v8 }
 0x8b4   : > { %v4823_v38 = vpack.c.b16 %v4813_v59, %v4812_v28 }
 0x8b5   : > { %v4438_v18 = vpop.f32.mrf.mxu2 }
 0x8b6   : > { %v4734_v49 = vpack.c.bf16 %v4438_v18, %v4438_v18 }
 0x8b7   : > { %v4691_v26 = vpop.f32.mrf.mxu0 }
 0x8b8   : > { %8675 = vmatmul.msk.bf16.gmra.mxu1 %vm3017_vm2, %v4821_v34  ;;  %v4939_v17 = vunpack.c.l.b16 %v4734_v49  ;;  %v4764_v37 = vpack.c.bf16 %v4691_v26, %v4691_v26 }
 0x8ba   : > { %8693 = vmatmul.msk.bf16.gmra.mxu2 %vm3017_vm2, %v4948_v32  ;;  %8722 = vmatmul.msk.bf16.gmra.mxu0 %vm3017_vm2, %v5195_v23  ;;  %v5187_v10 = vunpack.c.l.b16 %v4764_v37 }
 0x8bb   : > { %8708 = vmatmul.msk.bf16.gmra.mxu3 %vm3017_vm2, %v5072_v31 }
 0x8bd   : > { %v4440_v15 = vpop.f32.mrf.mxu2 }
 0x8be   : > { %v4735_v58 = vpack.c.bf16 %v4440_v15, %v4440_v15  ;;  %v4567_v33 = vpop.f32.mrf.mxu3 }
 0x8bf   : > { %v4750_v6 = vpack.c.bf16 %v4567_v33, %v4567_v33  ;;  %v4693_v20 = vpop.f32.mrf.mxu0 }
 0x8c0   : > { %v4940_v4 = vunpack.c.l.b16 %v4735_v58  ;;  %v4765_v50 = vpack.c.bf16 %v4693_v20, %v4693_v20 }
 0x8c1   : > { %v5064_v40 = vunpack.c.l.b16 %v4750_v6 }
 0x8c2   : > { %v4949_v25 = vpack.c.b16 %v4940_v4, %v4939_v17  ;;  %v5188_v18 = vunpack.c.l.b16 %v4765_v50 }
 0x8c4   : > { %v5198_v9 = vpack.c.b16 %v5188_v18, %v5187_v10 }
 0x8c6   : > { %v4569_v52 = vpop.f32.mrf.mxu3 }
 0x8c7   : > { %v4751_v61 = vpack.c.bf16 %v4569_v52, %v4569_v52 }
 0x8c8   : > { %8676 = vmatmul.msk.bf16.gmra.mxu1 %vm3017_vm2, %v4822_v53 }
 0x8c9   : > { %v5065_v35 = vunpack.c.l.b16 %v4751_v61 }
 0x8ca   : > { %8694 = vmatmul.msk.bf16.gmra.mxu2 %vm3017_vm2, %v4949_v25  ;;  %8723 = vmatmul.msk.bf16.gmra.mxu0 %vm3017_vm2, %v5196_v62 }
 0x8cb   : > { %8709 = vmatmul.msk.bf16.gmra.mxu3 %vm3017_vm2, %v5073_v1  ;;  %v5074_v27 = vpack.c.b16 %v5065_v35, %v5064_v40 }
 0x8cf   : > { %v4309_v5 = vpop.f32.mrf.mxu1 }
 0x8d0   : > { %v4718_v45 = vpack.c.bf16 %v4309_v5, %v4309_v5 }
 0x8d2   : > { %v4814_v29 = vunpack.c.l.b16 %v4718_v45 }
 0x8d7   : > { %v4311_v39 = vpop.f32.mrf.mxu1 }
 0x8d8   : > { %8677 = vmatmul.msk.bf16.gmra.mxu1 %vm3017_vm2, %v4823_v38  ;;  %v4719_v46 = vpack.c.bf16 %v4311_v39, %v4311_v39 }
 0x8da   : > { %8724 = vmatmul.msk.bf16.gmra.mxu0 %vm3017_vm2, %v5197_v54  ;;  %v4815_v19 = vunpack.c.l.b16 %v4719_v46 }
 0x8db   : > { %8710 = vmatmul.msk.bf16.gmra.mxu3 %vm3017_vm2, %v5074_v27  ;;  %v10074_v27 = vld [vmem:[#allocation11] sm:$0xff] }
 0x8dc   : > { %v4824_v23 = vpack.c.b16 %v4815_v19, %v4814_v29 }
 0x8dd   : > { %v4443_v48 = vpop.f32.mrf.mxu2 }
 0x8de   : > { %v4736_v42 = vpack.c.bf16 %v4443_v48, %v4443_v48 }
 0x8df   : > { %v4696_v24 = vpop.f32.mrf.mxu0 }
 0x8e0   : > { %v4941_v32 = vunpack.c.l.b16 %v4736_v42  ;;  %v4766_v2 = vpack.c.bf16 %v4696_v24, %v4696_v24  ;;  %v10075_v24 = vld [vmem:[#allocation11 + $0x8] sm:$0xff] }
 0x8e2   : > { %v5189_v7 = vunpack.c.l.b16 %v4766_v2 }
 0x8e5   : > { %v4445_v34 = vpop.f32.mrf.mxu2 }
 0x8e6   : > { %v4737_v11 = vpack.c.bf16 %v4445_v34, %v4445_v34 }
 0x8e7   : > { %v4698_v15 = vpop.f32.mrf.mxu0 }
 0x8e8   : > { %v4942_v31 = vunpack.c.l.b16 %v4737_v11  ;;  %8678 = vmatmul.msk.bf16.gmra.mxu1 %vm3017_vm2, %v4824_v23  ;;  %v4767_v55 = vpack.c.bf16 %v4698_v15, %v4698_v15 }
 0x8ea   : > { %v4950_v30 = vpack.c.b16 %v4942_v31, %v4941_v32  ;;  %8725 = vmatmul.msk.bf16.gmra.mxu0 %vm3017_vm2, %v5198_v9  ;;  %v5190_v63 = vunpack.c.l.b16 %v4767_v55  ;;  %v10076_v31 = vld [vmem:[#allocation11 + $0x10] sm:$0xff] }
 0x8ec   : > { %8695 = vmatmul.msk.bf16.gmra.mxu2 %vm3017_vm2, %v4950_v30  ;;  %v5199_v36 = vpack.c.b16 %v5190_v63, %v5189_v7  ;;  %v10077_v7 = vld [vmem:[#allocation11 + $0x18] sm:$0xff] }
 0x8ed   : > { %v4572_v57 = vpop.f32.mrf.mxu3  ;;  %v4996_v44 = vpop.f32.mrf.mxu2 }
 0x8ee   : > { %v4752_v58 = vpack.c.bf16 %v4572_v57, %v4572_v57 }
 0x8f0   : > { %v5066_v47 = vunpack.c.l.b16 %v4752_v58 }
 0x8f5   : > { %v4574_v51 = vpop.f32.mrf.mxu3  ;;  %v4314_v49 = vpop.f32.mrf.mxu1 }
 0x8f6   : > { %v4753_v3 = vpack.c.bf16 %v4574_v51, %v4574_v51  ;;  %v4720_v43 = vpack.c.bf16 %v4314_v49, %v4314_v49  ;;  %v4998_v53 = vpop.f32.mrf.mxu2 }
 0x8f8   : > { %v5067_v4 = vunpack.c.l.b16 %v4753_v3  ;;  %v4816_v22 = vunpack.c.l.b16 %v4720_v43 }
 0x8fa   : > { %v5075_v33 = vpack.c.b16 %v5067_v4, %v5066_v47  ;;  %8726 = vmatmul.msk.bf16.gmra.mxu0 %vm3017_vm2, %v5199_v36 }
 0x8fc   : > { %8711 = vmatmul.msk.bf16.gmra.mxu3 %vm3017_vm2, %v5075_v33 }
 0x8fd   : > { %v5121_v0 = vpop.f32.mrf.mxu3  ;;  %v4316_v60 = vpop.f32.mrf.mxu1 }
 0x8fe   : > { %v4721_v17 = vpack.c.bf16 %v4316_v60, %v4316_v60  ;;  %v5001_v52 = vpop.f32.mrf.mxu2  ;;  %v10078_v60 = vld [vmem:[#allocation11 + $0x20] sm:$0xff] }
 0x900   : > { %v4817_v62 = vunpack.c.l.b16 %v4721_v17 }
 0x902   : > { %v4825_v25 = vpack.c.b16 %v4817_v62, %v4816_v22 }
 0x904   : > { %8679 = vmatmul.msk.bf16.gmra.mxu1 %vm3017_vm2, %v4825_v25 }
 0x905   : > { %v5123_v41 = vpop.f32.mrf.mxu3  ;;  %v4871_v1 = vpop.f32.mrf.mxu1 }
 0x906   : > { %v5286_v5 = vadd.f32 %v4996_v44, %v4871_v1  ;;  %v5003_v14 = vpop.f32.mrf.mxu2 }
 0x907   : > { %v4701_v13 = vpop.f32.mrf.mxu0 }
 0x908   : > { %v4768_v8 = vpack.c.bf16 %v4701_v13, %v4701_v13  ;;  %v5287_v35 = vadd.f32 %v5286_v5, %v5121_v0 }
 0x90a   : > { %v5191_v12 = vunpack.c.l.b16 %v4768_v8  ;;  %v10079_v8 = vld [vmem:[#allocation11 + $0x28] sm:$0xff] }
 0x90d   : > { %v4873_v16 = vpop.f32.mrf.mxu1 }
 0x90e   : > { %v5126_v21 = vpop.f32.mrf.mxu3  ;;  %v5289_v54 = vadd.f32 %v4998_v53, %v4873_v16  ;;  %v5006_v50 = vpop.f32.mrf.mxu2 }
 0x90f   : > { %v4703_v26 = vpop.f32.mrf.mxu0 }
 0x910   : > { %v4769_v61 = vpack.c.bf16 %v4703_v26, %v4703_v26  ;;  %v5290_v46 = vadd.f32 %v5289_v54, %v5123_v41 }
 0x912   : > { %v5192_v59 = vunpack.c.l.b16 %v4769_v61 }
 0x914   : > { %v5200_v6 = vpack.c.b16 %v5192_v59, %v5191_v12 }
 0x915   : > { %v4876_v28 = vpop.f32.mrf.mxu1 }
 0x916   : > { %8727 = vmatmul.msk.bf16.gmra.mxu0 %vm3017_vm2, %v5200_v6  ;;  %v5128_v40 = vpop.f32.mrf.mxu3  ;;  %v5292_v19 = vadd.f32 %v5001_v52, %v4876_v28  ;;  %v5008_v9 = vpop.f32.mrf.mxu2 }
 0x917   : > { %v5246_v56 = vpop.f32.mrf.mxu0 }
 0x918   : > { %v5288_v38 = vadd.f32 %v5287_v35, %v5246_v56  ;;  %v5293_v10 = vadd.f32 %v5292_v19, %v5126_v21 }
 0x91a   : > { %v13719_v20 = vadd.f32 %v10074_v27, %v5288_v38 }
 0x91c   : > { %16855 = vst [vmem:[#allocation36_spill] sm:$0xff] %v13719_v20  ;;  %v5351_v39 = vmul.f32 %v13719_v20, %v13719_v20 }
 0x91d   : > { %v4878_v48 = vpop.f32.mrf.mxu1 }
 0x91e   : > { %5367 = vadd.xlane.f32.xlu0 %v5351_v39  ;;  %v5131_v42 = vpop.f32.mrf.mxu3  ;;  %v5295_v32 = vadd.f32 %v5003_v14, %v4878_v48  ;;  %v5011_v49 = vpop.f32.mrf.mxu2  ;;  %v10080_v14 = vld [vmem:[#allocation11 + $0x30] sm:$0xff] }
 0x91f   : > { %v5248_v45 = vpop.f32.mrf.mxu0 }
 0x920   : > { %v5291_v37 = vadd.f32 %v5290_v46, %v5248_v45  ;;  %v5296_v2 = vadd.f32 %v5295_v32, %v5128_v40  ;;  %v10081_v46 = vld [vmem:[#allocation11 + $0x38] sm:$0xff] }
 0x922   : > { %v13723_v18 = vadd.f32 %v10075_v24, %v5291_v37 }
 0x924   : > { %16856 = vst [vmem:[#allocation77_spill] sm:$0xff] %v13723_v18  ;;  %v5352_v29 = vmul.f32 %v13723_v18, %v13723_v18 }
 0x925   : > { %v4881_v34 = vpop.f32.mrf.mxu1 }
 0x926   : > { %5369 = vadd.xlane.f32.xlu1 %v5352_v29  ;;  %v5133_v57 = vpop.f32.mrf.mxu3  ;;  %v5298_v51 = vadd.f32 %v5006_v50, %v4881_v34  ;;  %v5013_v22 = vpop.f32.mrf.mxu2 }
 0x927   : > { %v5251_v11 = vpop.f32.mrf.mxu0 }
 0x928   : > { %v5294_v23 = vadd.f32 %v5293_v10, %v5251_v11  ;;  %v5299_v47 = vadd.f32 %v5298_v51, %v5131_v42  ;;  %v10082_v10 = vld [vmem:[#allocation11 + $0x40] sm:$0xff] }
 0x929   : > { %v9298_v51 = vld [vmem:[%s10460_s23 + $0x1c4] sm:$0xf] }
 0x92a   : > { %v13727_v30 = vadd.f32 %v10076_v31, %v5294_v23 }
 0x92c   : > { %16857 = vst [vmem:[#allocation34_spill] sm:$0xff] %v13727_v30  ;;  %v5353_v15 = vmul.f32 %v13727_v30, %v13727_v30 }
 0x92d   : > { %v4883_v55 = vpop.f32.mrf.mxu1 }
 0x92e   : > { %5371 = vadd.xlane.f32.xlu2 %v5353_v15  ;;  %v5136_v4 = vpop.f32.mrf.mxu3  ;;  %v5301_v0 = vadd.f32 %v5008_v9, %v4883_v55  ;;  %v5016_v12 = vpop.f32.mrf.mxu2 }
 0x92f   : > { %v5253_v63 = vpop.f32.mrf.mxu0 }
 0x930   : > { %v5297_v58 = vadd.f32 %v5296_v2, %v5253_v63  ;;  %v5302_v25 = vadd.f32 %v5301_v0, %v5133_v57  ;;  %v10083_v2 = vld [vmem:[#allocation11 + $0x48] sm:$0xff] }
 0x932   : > { %v13731_v3 = vadd.f32 %v10077_v7, %v5297_v58  ;;  %v8956_v7 = vld [vmem:[%s10460_s23 + $0x1e0] sm:$0xf0] }
 0x934   : > { %16858 = vst [vmem:[#allocation70_spill] sm:$0xff] %v13731_v3  ;;  %v5354_v44 = vmul.f32 %v13731_v3, %v13731_v3 }
 0x935   : > { %v4886_v36 = vpop.f32.mrf.mxu1 }
 0x936   : > { %5373 = vadd.xlane.f32.xlu0 %v5354_v44  ;;  %v5138_v13 = vpop.f32.mrf.mxu3  ;;  %v5304_v52 = vadd.f32 %v5011_v49, %v4886_v36  ;;  %v5018_v39 = vpop.f32.mrf.mxu2  ;;  %v8962_v49 = vld [vmem:[%s10460_s23 + $0x1c8] sm:$0xf]  ;;  %v8959_v36 = vor.u32 %v9298_v51, %v8956_v7  ;;  %v9294_v51 = vld [vmem:[%s10460_s23 + $0x19c] sm:$0xf0] }
 0x937   : > { %v5256_v33 = vpop.f32.mrf.mxu0 }
 0x938   : > { %v5300_v43 = vadd.f32 %v5299_v47, %v5256_v33  ;;  %v5305_v61 = vadd.f32 %v5304_v52, %v5136_v4  ;;  %v9303_v47 = vld [vmem:[%s10460_s23 + $0x1e4] sm:$0xf0]  ;;  %6067 = vmatpush.bf16.msrb.mxu2 %v8959_v36  ;;  %v8932_v36 = vld [vmem:[%s10460_s23 + $0x1a8] sm:$0xf0] }
 0x939   : > { %v8963_v33 = vor.u32 %v9303_v47, %v8962_v49 }
 0x93a   : > { %v13735_v17 = vadd.f32 %v10078_v60, %v5300_v43 }
 0x93b   : > { %6116 = vmatpush.bf16.msrb.mxu3 %v8963_v33  ;;  %v8890_v33 = vld [vmem:[%s10460_s23 + $0x140] sm:$0xf] }
 0x93c   : > { %16859 = vst [vmem:[#allocation56_spill] sm:$0xff] %v13735_v17  ;;  %v5355_v53 = vmul.f32 %v13735_v17, %v13735_v17 }
 0x93d   : > { %v4888_v62 = vpop.f32.mrf.mxu1 }
 0x93e   : > { %5375 = vadd.xlane.f32.xlu1 %v5355_v53  ;;  %v5307_v6 = vadd.f32 %v5013_v22, %v4888_v62  ;;  %v5141_v35 = vpop.f32.mrf.mxu3  ;;  %v5021_v23 = vpop.f32.mrf.mxu2  ;;  %v10084_v62 = vld [vmem:[#allocation11 + $0x50] sm:$0xff] }
 0x93f   : > { %v5258_v41 = vpop.f32.mrf.mxu0 }
 0x940   : > { %v5303_v1 = vadd.f32 %v5302_v25, %v5258_v41  ;;  %v5308_v38 = vadd.f32 %v5307_v6, %v5138_v13  ;;  %v8954_v41 = vld [vmem:[%s10460_s23 + $0x1c0] sm:$0xf] }
 0x942   : > { %v13739_v16 = vadd.f32 %v10079_v8, %v5303_v1  ;;  %v9302_v1 = vld [vmem:[%s10460_s23 + $0x1dc] sm:$0xf0] }
 0x943   : > { %v8955_v52 = vor.u32 %v9302_v1, %v8954_v41  ;;  %v9287_v41 = vld [vmem:[%s10460_s23 + $0x164] sm:$0xf0] }
 0x944   : > { %16860 = vst [vmem:[#allocation61_spill] sm:$0xff] %v13739_v16  ;;  %v5356_v21 = vmul.f32 %v13739_v16, %v13739_v16 }
 0x945   : > { %v4891_v26 = vpop.f32.mrf.mxu1  ;;  %6018 = vmatpush.bf16.msrb.mxu1 %v8955_v52  ;;  %v9283_v52 = vld [vmem:[%s10460_s23 + $0x14c] sm:$0xf] }
 0x946   : > { %5377 = vadd.xlane.f32.xlu2 %v5356_v21  ;;  %v5310_v48 = vadd.f32 %v5016_v12, %v4891_v26  ;;  %v5143_v37 = vpop.f32.mrf.mxu3  ;;  %v5023_v4 = vpop.f32.mrf.mxu2 }
 0x947   : > { %v5261_v5 = vpop.f32.mrf.mxu0 }
 0x948   : > { %v5306_v59 = vadd.f32 %v5305_v61, %v5261_v5  ;;  %v5311_v19 = vadd.f32 %v5310_v48, %v5141_v35  ;;  %v10086_v48 = vld [vmem:[#allocation11 + $0x60] sm:$0xff] }
 0x94a   : > { %v13743_v28 = vadd.f32 %v10080_v14, %v5306_v59  ;;  %v10085_v59 = vld [vmem:[#allocation11 + $0x58] sm:$0xff] }
 0x94c   : > { %16861 = vst [vmem:[#allocation47_spill] sm:$0xff] %v13743_v28  ;;  %v5357_v56 = vmul.f32 %v13743_v28, %v13743_v28 }
 0x94d   : > { %v4893_v40 = vpop.f32.mrf.mxu1 }
 0x94e   : > { %5379 = vadd.xlane.f32.xlu0 %v5357_v56  ;;  %v5313_v34 = vadd.f32 %v5018_v39, %v4893_v40  ;;  %v5146_v31 = vpop.f32.mrf.mxu3  ;;  %v5026_v26 = vpop.f32.mrf.mxu2 }
 0x94f   : > { %v5263_v54 = vpop.f32.mrf.mxu0 }
 0x950   : > { %v5309_v27 = vadd.f32 %v5308_v38, %v5263_v54  ;;  %v5314_v32 = vadd.f32 %v5313_v34, %v5143_v37 }
 0x952   : > { %v13747_v50 = vadd.f32 %v10081_v46, %v5309_v27 }
 0x954   : > { %16862 = vst [vmem:[#allocation74_spill] sm:$0xff] %v13747_v50  ;;  %v5358_v45 = vmul.f32 %v13747_v50, %v13747_v50 }
 0x955   : > { %v4896_v29 = vpop.f32.mrf.mxu1 }
 0x956   : > { %5381 = vadd.xlane.f32.xlu1 %v5358_v45  ;;  %v5316_v55 = vadd.f32 %v5021_v23, %v4896_v29  ;;  %v5148_v53 = vpop.f32.mrf.mxu3  ;;  %v5028_v27 = vpop.f32.mrf.mxu2  ;;  %v10087_v29 = vld [vmem:[#allocation11 + $0x68] sm:$0xff] }
 0x957   : > { %v5266_v24 = vpop.f32.mrf.mxu0  ;;  %v8964_v23 = vld [vmem:[%s10460_s23 + $0x1e8] sm:$0xf0] }
 0x958   : > { %v5312_v42 = vadd.f32 %v5311_v19, %v5266_v24  ;;  %v5317_v43 = vadd.f32 %v5316_v55, %v5146_v31  ;;  %v9290_v31 = vld [vmem:[%s10460_s23 + $0x184] sm:$0xf] }
 0x95a   : > { %v13751_v11 = vadd.f32 %v10082_v10, %v5312_v42  ;;  %v9299_v10 = vld [vmem:[%s10460_s23 + $0x1cc] sm:$0xf] }
 0x95c   : > { %16863 = vst [vmem:[#allocation25_spill] sm:$0xff] %v13751_v11  ;;  %v5359_v9 = vmul.f32 %v13751_v11, %v13751_v11 }
 0x95d   : > { %v4898_v58 = vpop.f32.mrf.mxu1 }
 0x95e   : > { %5383 = vadd.xlane.f32.xlu2 %v5359_v9  ;;  %v5319_v22 = vadd.f32 %v5023_v4, %v4898_v58  ;;  %v5151_v14 = vpop.f32.mrf.mxu3  ;;  %v8967_v9 = vor.u32 %v9299_v10, %v8964_v23  ;;  %v8922_v58 = vld [vmem:[%s10460_s23 + $0x180] sm:$0xf]  ;;  %v9266_v10 = vld [vmem:[%s10460_s23 + $0xc4] sm:$0xf] }
 0x95f   : > { %v5268_v15 = vpop.f32.mrf.mxu0  ;;  %v8923_v49 = vor.u32 %v9294_v51, %v8922_v58 }
 0x960   : > { %v5315_v57 = vadd.f32 %v5314_v32, %v5268_v15  ;;  %v5320_v21 = vadd.f32 %v5319_v22, %v5148_v53  ;;  %6165 = vmatpush.bf16.msrb.mxu0 %v8967_v9  ;;  %v8924_v15 = vld [vmem:[%s10460_s23 + $0x1a0] sm:$0xf0] }
 0x961   : > { %v8927_v55 = vor.u32 %v9290_v31, %v8924_v15  ;;  %6019 = vmatpush.bf16.msrb.mxu1 %v8923_v49  ;;  %v8892_v22 = vld [vmem:[%s10460_s23 + $0x160] sm:$0xf0]  ;;  %v8834_v15 = vld [vmem:[%s10460_s23 + $0xc8] sm:$0xf]  ;;  %v8836_v49 = vld [vmem:[%s10460_s23 + $0xe8] sm:$0xf0] }
 0x962   : > { %v13755_v63 = vadd.f32 %v10083_v2, %v5315_v57  ;;  %v8930_v57 = vld [vmem:[%s10460_s23 + $0x188] sm:$0xf]  ;;  %v8828_v31 = vld [vmem:[%s10460_s23 + $0xe0] sm:$0xf0] }
 0x963   : > { %v9295_v2 = vld [vmem:[%s10460_s23 + $0x1a4] sm:$0xf0]  ;;  %6068 = vmatpush.bf16.msrb.mxu2 %v8927_v55  ;;  %v8831_v58 = vor.u32 %v9266_v10, %v8828_v31  ;;  %v8772_v10 = vld [vmem:[%s10460_s23 + $0x68] sm:$0xf0] }
 0x964   : > { %16864 = vst [vmem:[#allocation31_spill] sm:$0xff] %v13755_v63  ;;  %v5360_v44 = vmul.f32 %v13755_v63, %v13755_v63  ;;  %v8931_v7 = vor.u32 %v9295_v2, %v8930_v57  ;;  %v9271_v57 = vld [vmem:[%s10460_s23 + $0xe4] sm:$0xf0] }
 0x965   : > { %v4901_v8 = vpop.f32.mrf.mxu1  ;;  %v8835_v51 = vor.u32 %v9271_v57, %v8834_v15  ;;  %v8730_v15 = vld [vmem:[%s10460_s23] sm:$0xf] }
 0x966   : > { %5385 = vadd.xlane.f32.xlu0 %v5360_v44  ;;  %v5322_v5 = vadd.f32 %v5026_v26, %v4901_v8  ;;  %v5153_v37 = vpop.f32.mrf.mxu3  ;;  %v9291_v44 = vld [vmem:[%s10460_s23 + $0x18c] sm:$0xf]  ;;  %6117 = vmatpush.bf16.msrb.mxu3 %v8931_v7  ;;  %v9246_v57 = vld [vmem:[%s10460_s23 + $0x1c] sm:$0xf0] }
 0x967   : > { %v5271_v0 = vpop.f32.mrf.mxu0  ;;  %v8935_v4 = vor.u32 %v9291_v44, %v8932_v36  ;;  %v8900_v8 = vld [vmem:[%s10460_s23 + $0x168] sm:$0xf0] }
 0x968   : > { %v5318_v60 = vadd.f32 %v5317_v43, %v5271_v0  ;;  %v5323_v56 = vadd.f32 %v5322_v5, %v5151_v14  ;;  %v9286_v43 = vld [vmem:[%s10460_s23 + $0x15c] sm:$0xf0]  ;;  %v9282_v0 = vld [vmem:[%s10460_s23 + $0x144] sm:$0xf]  ;;  %v9267_v7 = vld [vmem:[%s10460_s23 + $0xcc] sm:$0xf] }
 0x969   : > { %6166 = vmatpush.bf16.msrb.mxu0 %v8935_v4  ;;  %v8891_v53 = vor.u32 %v9286_v43, %v8890_v33  ;;  %v8895_v1 = vor.u32 %v9282_v0, %v8892_v22  ;;  %v9274_v5 = vld [vmem:[%s10460_s23 + $0x104] sm:$0xf]  ;;  %v8839_v36 = vor.u32 %v9267_v7, %v8836_v49  ;;  %v10088_v4 = vld [vmem:[#allocation11 + $0x70] sm:$0xff]  ;;  %v8794_v43 = vld [vmem:[%s10460_s23 + $0x80] sm:$0xf] }
 0x96a   : > { %v13763_v25 = vadd.f32 %v10084_v62, %v5318_v60  ;;  %v8898_v62 = vld [vmem:[%s10460_s23 + $0x148] sm:$0xf]  ;;  %v9262_v0 = vld [vmem:[%s10460_s23 + $0x9c] sm:$0xf0]  ;;  %v8796_v22 = vld [vmem:[%s10460_s23 + $0xa0] sm:$0xf0] }
 0x96b   : > { %6020 = vmatpush.bf16.msrb.mxu1 %v8891_v53  ;;  %6069 = vmatpush.bf16.msrb.mxu2 %v8895_v1  ;;  %v8795_v53 = vor.u32 %v9262_v0, %v8794_v43  ;;  %v8732_v7 = vld [vmem:[%s10460_s23 + $0x20] sm:$0xf0]  ;;  %v8738_v49 = vld [vmem:[%s10460_s23 + $0x8] sm:$0xf]  ;;  %v8740_v43 = vld [vmem:[%s10460_s23 + $0x28] sm:$0xf0] }
 0x96c   : > { %16865 = vst [vmem:[#allocation42_spill] sm:$0xff] %v13763_v25  ;;  %v5361_v13 = vmul.f32 %v13763_v25, %v13763_v25 }
 0x96d   : > { %v4903_v38 = vpop.f32.mrf.mxu1 }
 0x96e   : > { %5387 = vadd.xlane.f32.xlu1 %v5361_v13  ;;  %v5325_v39 = vadd.f32 %v5028_v27, %v4903_v38  ;;  %v8899_v13 = vor.u32 %v9287_v41, %v8898_v62  ;;  %v9279_v38 = vld [vmem:[%s10460_s23 + $0x124] sm:$0xf0]  ;;  %v9275_v27 = vld [vmem:[%s10460_s23 + $0x10c] sm:$0xf] }
 0x96f   : > { %v5273_v61 = vpop.f32.mrf.mxu0  ;;  %v5031_v60 = vpop.f32.mrf.mxu2  ;;  %v8802_v62 = vld [vmem:[%s10460_s23 + $0x88] sm:$0xf] }
 0x970   : > { %v5321_v12 = vadd.f32 %v5320_v21, %v5273_v61  ;;  %v5326_v19 = vadd.f32 %v5325_v39, %v5153_v37  ;;  %v8903_v21 = vor.u32 %v9283_v52, %v8900_v8  ;;  %v8858_v61 = vld [vmem:[%s10460_s23 + $0x100] sm:$0xf]  ;;  %6118 = vmatpush.bf16.msrb.mxu3 %v8899_v13  ;;  %v8868_v39 = vld [vmem:[%s10460_s23 + $0x128] sm:$0xf0]  ;;  %v9263_v41 = vld [vmem:[%s10460_s23 + $0xa4] sm:$0xf0] }
 0x971   : > { %v16869_v37 = vld [vmem:[#allocation22_spill] sm:$0xff]  ;;  %v8803_v52 = vor.u32 %v9263_v41, %v8802_v62  ;;  %v9259_v8 = vld [vmem:[%s10460_s23 + $0x8c] sm:$0xf] }
 0x972   : > { %v13769_v6 = vadd.f32 %v10085_v59, %v5321_v12  ;;  %v9278_v12 = vld [vmem:[%s10460_s23 + $0x11c] sm:$0xf0]  ;;  %6167 = vmatpush.bf16.msrb.mxu0 %v8903_v21  ;;  %v8804_v21 = vld [vmem:[%s10460_s23 + $0xa8] sm:$0xf0] }
 0x973   : > { %v8859_v14 = vor.u32 %v9278_v12, %v8858_v61  ;;  %v8807_v12 = vor.u32 %v9259_v8, %v8804_v21 }
 0x974   : > { %16866 = vst [vmem:[#allocation49_spill] sm:$0xff] %v13769_v6  ;;  %v5362_v35 = vmul.f32 %v13769_v6, %v13769_v6 }
 0x975   : > { %6021 = vmatpush.bf16.msrb.mxu1 %v8859_v14  ;;  %v8762_v14 = vld [vmem:[%s10460_s23 + $0x40] sm:$0xf] }
 0x976   : > { %5389 = vadd.xlane.f32.xlu2 %v5362_v35  ;;  %v8860_v35 = vld [vmem:[%s10460_s23 + $0x120] sm:$0xf0] }
 0x977   : > { %v5276_v40 = vpop.f32.mrf.mxu0  ;;  %v5033_v44 = vpop.f32.mrf.mxu2 }
 0x978   : > { %v5324_v54 = vadd.f32 %v5323_v56, %v5276_v40  ;;  %v8866_v56 = vld [vmem:[%s10460_s23 + $0x108] sm:$0xf]  ;;  %v8863_v40 = vor.u32 %v9274_v5, %v8860_v35  ;;  %v9254_v35 = vld [vmem:[%s10460_s23 + $0x5c] sm:$0xf0] }
 0x97a   : > { %v13773_v46 = vadd.f32 %v10086_v48, %v5324_v54  ;;  %v8867_v54 = vor.u32 %v9279_v38, %v8866_v56  ;;  %6070 = vmatpush.bf16.msrb.mxu2 %v8863_v40  ;;  %v9250_v56 = vld [vmem:[%s10460_s23 + $0x44] sm:$0xf]  ;;  %v8763_v40 = vor.u32 %v9254_v35, %v8762_v14 }
 0x97c   : > { %16867 = vst [vmem:[#allocation26_spill] sm:$0xff] %v13773_v46  ;;  %v5363_v45 = vmul.f32 %v13773_v46, %v13773_v46  ;;  %6119 = vmatpush.bf16.msrb.mxu3 %v8867_v54  ;;  %v8764_v54 = vld [vmem:[%s10460_s23 + $0x60] sm:$0xf0] }
 0x97e   : > { %5391 = vadd.xlane.f32.xlu0 %v5363_v45  ;;  %v8871_v45 = vor.u32 %v9275_v27, %v8868_v39  ;;  %6071 = vmatpush.bf16.msrb.mxu2 %v8831_v58  ;;  %v8770_v27 = vld [vmem:[%s10460_s23 + $0x48] sm:$0xf]  ;;  %v8731_v58 = vor.u32 %v9246_v57, %v8730_v15 }
 0x97f   : > { %v5278_v24 = vpop.f32.mrf.mxu0  ;;  %v5156_v59 = vpop.f32.mrf.mxu3  ;;  %v9255_v39 = vld [vmem:[%s10460_s23 + $0x64] sm:$0xf0] }
 0x980   : > { %v5327_v42 = vadd.f32 %v5326_v19, %v5278_v24  ;;  %6168 = vmatpush.bf16.msrb.mxu0 %v8871_v45  ;;  %6120 = vmatpush.bf16.msrb.mxu3 %v8835_v51  ;;  %v9242_v51 = vld [vmem:[%s10460_s23 + $0x4] sm:$0xf] }
 0x981   : > { %v4906_v47 = vpop.f32.mrf.mxu1 }
 0x982   : > { %v13777_v34 = vadd.f32 %v10087_v29, %v5327_v42  ;;  %v5328_v26 = vadd.f32 %v5031_v60, %v4906_v47  ;;  %v8826_v42 = vld [vmem:[%s10460_s23 + $0xc0] sm:$0xf]  ;;  %v9258_v60 = vld [vmem:[%s10460_s23 + $0x84] sm:$0xf] }
 0x983   : > { %v9270_v29 = vld [vmem:[%s10460_s23 + $0xdc] sm:$0xf0]  ;;  %v8799_v13 = vor.u32 %v9258_v60, %v8796_v22 }
 0x984   : > { %16868 = vst [vmem:[#allocation43_spill] sm:$0xff] %v13777_v34  ;;  %v5364_v32 = vmul.f32 %v13777_v34, %v13777_v34  ;;  %v5329_v24 = vadd.f32 %v5328_v26, %v5156_v59  ;;  %6169 = vmatpush.bf16.msrb.mxu0 %v8839_v36  ;;  %6121 = vmatpush.bf16.msrb.mxu3 %v8803_v52 }
 0x985   : > { %6072 = vmatpush.bf16.msrb.mxu2 %v8799_v13  ;;  %v8735_v36 = vor.u32 %v9242_v51, %v8732_v7 }
 0x986   : > { %5393 = vadd.xlane.f32.xlu1 %v5364_v32  ;;  %v8827_v32 = vor.u32 %v9270_v29, %v8826_v42  ;;  %v8771_v42 = vor.u32 %v9255_v39, %v8770_v27  ;;  %v9251_v29 = vld [vmem:[%s10460_s23 + $0x4c] sm:$0xf] }
 0x987   : > { %v5158_v26 = vpop.f32.mrf.mxu3 }
 0x988   : > { %6022 = vmatpush.bf16.msrb.mxu1 %v8827_v32  ;;  %6170 = vmatpush.bf16.msrb.mxu0 %v8807_v12  ;;  %v10089_v32 = vld [vmem:[#allocation11 + $0x78] sm:$0xff] }
 0x989   : > { %v4908_v23 = vpop.f32.mrf.mxu1  ;;  %6122 = vmatpush.bf16.msrb.mxu3 %v8771_v42 }
 0x98a   : > { %v5331_v47 = vadd.f32 %v5033_v44, %v4908_v23 }
 0x98c   : > { %v5332_v59 = vadd.f32 %v5331_v47, %v5158_v26  ;;  %6023 = vmatpush.bf16.msrb.mxu1 %v8795_v53  ;;  %v9247_v47 = vld [vmem:[%s10460_s23 + $0x24] sm:$0xf0] }
 0x98d   : > { %v8739_v53 = vor.u32 %v9247_v47, %v8738_v49 }
 0x98f   : > { %6123 = vmatpush.bf16.msrb.mxu3 %v8739_v53 }
 0x990   : > { %6024 = vmatpush.bf16.msrb.mxu1 %v8763_v40  ;;  %v13861_v40 = vld [vmem:[%s577_s3] ss:$0 sm:$0xff] }
 0x991   : > { %v5368_v48 = vpop.xlane.xlu0 %5367 }
 0x992   : > { %v5399_v19 = vmul.f32 %v5368_v48, %v16869_v37 }
 0x993   : > { %v5281_v9 = vpop.f32.mrf.mxu0 }
 0x994   : > { %v13814_v55 = vadd.f32 1e-05, %v5399_v19  ;;  %v5330_v2 = vadd.f32 %v5329_v24, %v5281_v9  ;;  %v8767_v24 = vor.u32 %v9250_v56, %v8764_v54  ;;  %v8775_v9 = vor.u32 %v9251_v29, %v8772_v10  ;;  %6025 = vmatpush.bf16.msrb.mxu1 %v8731_v58 }
 0x996   : > { %9786 = vrsqrt.f32 %v13814_v55  ;;  %v13819_v33 = vadd.f32 %v10088_v4, %v5330_v2  ;;  %6073 = vmatpush.bf16.msrb.mxu2 %v8767_v24  ;;  %6171 = vmatpush.bf16.msrb.mxu0 %v8775_v9  ;;  %v9243_v4 = vld [vmem:[%s10460_s23 + $0xc] sm:$0xf]  ;;  %vm5437_vm12 = vweird.f32 %v13814_v55 }
 0x997   : > { %v8743_v22 = vor.u32 %v9243_v4, %v8740_v43 }
 0x998   : > { %16870 = vst [vmem:[#allocation39_spill] sm:$0xff] %v13819_v33  ;;  %v5365_v1 = vmul.f32 %v13819_v33, %v13819_v33 }
 0x999   : > { %v5370_v61 = vpop.xlane.xlu1 %5369 }
 0x99a   : > { %v5400_v5 = vmul.f32 %v5370_v61, %v16869_v37  ;;  %5395 = vadd.xlane.f32.xlu2 %v5365_v1  ;;  %6074 = vmatpush.bf16.msrb.mxu2 %v8735_v36 }
 0x99b   : > { %v5283_v38 = vpop.f32.mrf.mxu0  ;;  %6172 = vmatpush.bf16.msrb.mxu0 %v8743_v22 }
 0x99c   : > { %v9787_v48 = vpop.eup %9786  ;;  %v5416_v45 = vadd.f32 1e-05, %v5400_v5  ;;  %v5333_v19 = vadd.f32 %v5332_v59, %v5283_v38 }
 0x99d   : > { %v5432_v23 = vmul.f32 %v9787_v48, %v13814_v55  ;;  %vm5438_vm11 = vweird.f32 %v9787_v48 }
 0x99e   : > { %9788 = vrsqrt.f32 %v5416_v45  ;;  %v13841_v31 = vadd.f32 %v10089_v32, %v5333_v19  ;;  %vm5439_vm13 = vmor %vm5437_vm12, %vm5438_vm11  ;;  %vm5447_vm15 = vweird.f32 %v5416_v45 }
 0x99f   : > { %v5433_v2 = vmul.f32 %v9787_v48, %v5432_v23 }
 0x9a0   : > { %16871 = vst [vmem:[#allocation33_spill] sm:$0xff] %v13841_v31  ;;  %v5366_v44 = vmul.f32 %v13841_v31, %v13841_v31 }
 0x9a1   : > { %v5434_v0 = vmul.f32 0.5, %v5433_v2  ;;  %v5372_v60 = vpop.xlane.xlu2 %5371 }
 0x9a2   : > { %v5401_v62 = vmul.f32 %v5372_v60, %v16869_v37  ;;  %5397 = vadd.xlane.f32.xlu0 %v5366_v44 }
 0x9a3   : > { %v5435_v41 = vsub.f32 1.5, %v5434_v0 }
 0x9a4   : > { %v9789_v1 = vpop.eup %9788  ;;  %v5417_v13 = vadd.f32 1e-05, %v5401_v62 }
 0x9a5   : > { %v5442_v52 = vmul.f32 %v9789_v1, %v5416_v45  ;;  %v5436_v8 = vmul.f32 %v9787_v48, %v5435_v41  ;;  %vm5448_vm14 = vweird.f32 %v9789_v1 }
 0x9a6   : > { %9790 = vrsqrt.f32 %v5417_v13  ;;  %vm5449_vm0 = vmor %vm5447_vm15, %vm5448_vm14  ;;  %vm5457_vm4 = vweird.f32 %v5417_v13 }
 0x9a7   : > { %v5443_v21 = vmul.f32 %v9789_v1, %v5442_v52  ;;  %v5440_v5 = vsel %vm5439_vm13, %v9787_v48, %v5436_v8 }
 0x9a8   : > { %v5591_v55 = vmul.f32 %v5440_v5, %v13719_v20 }
 0x9a9   : > { %v5444_v26 = vmul.f32 0.5, %v5443_v21  ;;  %v5374_v61 = vpop.xlane.xlu0 %5373 }
 0x9aa   : > { %v5402_v12 = vmul.f32 %v5374_v61, %v16869_v37  ;;  %v5610_v24 = vmul.f32 %v13861_v40, %v5591_v55 }
 0x9ab   : > { %v5445_v59 = vsub.f32 1.5, %v5444_v26 }
 0x9ac   : > { %v9791_v14 = vpop.eup %9790  ;;  %v5418_v35 = vadd.f32 1e-05, %v5402_v12 }
 0x9ad   : > { %v5446_v56 = vmul.f32 %v9789_v1, %v5445_v59  ;;  %v5452_v38 = vmul.f32 %v9791_v14, %v5417_v13  ;;  %vm5458_vm3 = vweird.f32 %v9791_v14 }
 0x9ae   : > { %9792 = vrsqrt.f32 %v5418_v35  ;;  %vm5459_vm5 = vmor %vm5457_vm4, %vm5458_vm3  ;;  %vm5467_vm7 = vweird.f32 %v5418_v35 }
 0x9af   : > { %v5450_v54 = vsel %vm5449_vm0, %v9789_v1, %v5446_v56  ;;  %v5453_v27 = vmul.f32 %v9791_v14, %v5452_v38 }
 0x9b0   : > { %v5592_v39 = vmul.f32 %v5450_v54, %v13723_v18 }
 0x9b1   : > { %v5454_v48 = vmul.f32 0.5, %v5453_v27  ;;  %v5376_v19 = vpop.xlane.xlu1 %5375 }
 0x9b2   : > { %v5611_v45 = vmul.f32 %v13861_v40, %v5592_v39  ;;  %v5403_v42 = vmul.f32 %v5376_v19, %v16869_v37 }
 0x9b3   : > { %v5455_v29 = vsub.f32 1.5, %v5454_v48 }
 0x9b4   : > { %v9793_v10 = vpop.eup %9792  ;;  %v13868_v23 = vpack.c.bf16 %v5611_v45, %v5610_v24  ;;  %v5419_v9 = vadd.f32 1e-05, %v5403_v42 }
 0x9b5   : > { %v5462_v32 = vmul.f32 %v9793_v10, %v5418_v35  ;;  %v5456_v15 = vmul.f32 %v9791_v14, %v5455_v29  ;;  %vm5468_vm6 = vweird.f32 %v9793_v10 }
 0x9b6   : > { %9794 = vrsqrt.f32 %v5419_v9  ;;  %6026 = vmatmul.bf16.vlgmr.msrb.gmra.mxu1 %v13868_v23  ;;  %6075 = vmatmul.bf16.vlgmr.msrb.gmra.mxu2 %v13868_v23  ;;  %vm5469_vm8 = vmor %vm5467_vm7, %vm5468_vm6  ;;  %vm5477_vm10 = vweird.f32 %v5419_v9 }
 0x9b7   : > { %v5463_v57 = vmul.f32 %v9793_v10, %v5462_v32  ;;  %6124 = vmatmul.bf16.vlgmr.msrb.gmra.mxu3 %v13868_v23  ;;  %6173 = vmatmul.bf16.vlgmr.msrb.gmra.mxu0 %v13868_v23  ;;  %v5460_v7 = vsel %vm5459_vm5, %v9791_v14, %v5456_v15 }
 0x9b8   : > { %v5593_v43 = vmul.f32 %v5460_v7, %v13727_v30 }
 0x9b9   : > { %v5464_v2 = vmul.f32 0.5, %v5463_v57  ;;  %v5378_v58 = vpop.xlane.xlu2 %5377 }
 0x9ba   : > { %v5404_v51 = vmul.f32 %v5378_v58, %v16869_v37  ;;  %v5612_v41 = vmul.f32 %v13861_v40, %v5593_v43 }
 0x9bb   : > { %v5465_v49 = vsub.f32 1.5, %v5464_v2 }
 0x9bc   : > { %v9795_v44 = vpop.eup %9794  ;;  %v5420_v36 = vadd.f32 1e-05, %v5404_v51 }
 0x9bd   : > { %v5466_v47 = vmul.f32 %v9793_v10, %v5465_v49  ;;  %v5472_v4 = vmul.f32 %v9795_v44, %v5419_v9  ;;  %vm5478_vm9 = vweird.f32 %v9795_v44 }
 0x9be   : > { %9796 = vrsqrt.f32 %v5420_v36  ;;  %vm5479_vm1 = vmor %vm5477_vm10, %vm5478_vm9  ;;  %vm5487_vm11 = vweird.f32 %v5420_v36 }
 0x9bf   : > { %v5470_v0 = vsel %vm5469_vm8, %v9793_v10, %v5466_v47  ;;  %v5473_v60 = vmul.f32 %v9795_v44, %v5472_v4 }
 0x9c0   : > { %v5594_v53 = vmul.f32 %v5470_v0, %v13731_v3 }
 0x9c1   : > { %v5474_v22 = vmul.f32 0.5, %v5473_v60  ;;  %v5380_v62 = vpop.xlane.xlu0 %5379 }
 0x9c2   : > { %v5613_v1 = vmul.f32 %v13861_v40, %v5594_v53  ;;  %v5405_v13 = vmul.f32 %v5380_v62, %v16869_v37 }
 0x9c3   : > { %v5475_v52 = vsub.f32 1.5, %v5474_v22 }
 0x9c4   : > { %v9797_v8 = vpop.eup %9796  ;;  %v13880_v21 = vpack.c.bf16 %v5613_v1, %v5612_v41  ;;  %v5421_v26 = vadd.f32 1e-05, %v5405_v13 }
 0x9c5   : > { %v5482_v61 = vmul.f32 %v9797_v8, %v5420_v36  ;;  %v5476_v12 = vmul.f32 %v9795_v44, %v5475_v52  ;;  %vm5488_vm2 = vweird.f32 %v9797_v8 }
 0x9c6   : > { %9798 = vrsqrt.f32 %v5421_v26  ;;  %6031 = vmatmul.bf16.gmra.mxu1 %v13880_v21  ;;  %6080 = vmatmul.bf16.gmra.mxu2 %v13880_v21  ;;  %vm5489_vm12 = vmor %vm5487_vm11, %vm5488_vm2  ;;  %vm5497_vm14 = vweird.f32 %v5421_v26 }
 0x9c7   : > { %v5483_v5 = vmul.f32 %v9797_v8, %v5482_v61  ;;  %6129 = vmatmul.bf16.gmra.mxu3 %v13880_v21  ;;  %6178 = vmatmul.bf16.gmra.mxu0 %v13880_v21  ;;  %v5480_v56 = vsel %vm5479_vm1, %v9795_v44, %v5476_v12 }
 0x9c8   : > { %v5595_v48 = vmul.f32 %v5480_v56, %v13735_v17 }
 0x9c9   : > { %v5484_v59 = vmul.f32 0.5, %v5483_v5  ;;  %v5382_v14 = vpop.xlane.xlu1 %5381 }
 0x9ca   : > { %v5406_v35 = vmul.f32 %v5382_v14, %v16869_v37  ;;  %v5614_v10 = vmul.f32 %v13861_v40, %v5595_v48 }
 0x9cb   : > { %v5485_v38 = vsub.f32 1.5, %v5484_v59 }
 0x9cc   : > { %v9799_v55 = vpop.eup %9798  ;;  %v5422_v54 = vadd.f32 1e-05, %v5406_v35 }
 0x9cd   : > { %v5486_v27 = vmul.f32 %v9797_v8, %v5485_v38  ;;  %v5492_v39 = vmul.f32 %v9799_v55, %v5421_v26  ;;  %vm5498_vm13 = vweird.f32 %v9799_v55 }
 0x9ce   : > { %9800 = vrsqrt.f32 %v5422_v54  ;;  %vm5499_vm15 = vmor %vm5497_vm14, %vm5498_vm13  ;;  %vm5507_vm3 = vweird.f32 %v5422_v54 }
 0x9cf   : > { %v5490_v19 = vsel %vm5489_vm12, %v9797_v8, %v5486_v27  ;;  %v5493_v24 = vmul.f32 %v9799_v55, %v5492_v39 }
 0x9d0   : > { %v5596_v45 = vmul.f32 %v5490_v19, %v13739_v16 }
 0x9d1   : > { %v5494_v42 = vmul.f32 0.5, %v5493_v24  ;;  %v5384_v29 = vpop.xlane.xlu2 %5383 }
 0x9d2   : > { %v5615_v9 = vmul.f32 %v13861_v40, %v5596_v45  ;;  %v5407_v32 = vmul.f32 %v5384_v29, %v16869_v37 }
 0x9d3   : > { %v5495_v15 = vsub.f32 1.5, %v5494_v42 }
 0x9d4   : > { %v9801_v57 = vpop.eup %9800  ;;  %v13892_v2 = vpack.c.bf16 %v5615_v9, %v5614_v10  ;;  %v5423_v58 = vadd.f32 1e-05, %v5407_v32 }
 0x9d5   : > { %v5502_v51 = vmul.f32 %v9801_v57, %v5422_v54  ;;  %v5496_v7 = vmul.f32 %v9799_v55, %v5495_v15  ;;  %vm5508_vm0 = vweird.f32 %v9801_v57 }
 0x9d6   : > { %9802 = vrsqrt.f32 %v5423_v58  ;;  %6036 = vmatmul.bf16.gmra.mxu1 %v13892_v2  ;;  %6085 = vmatmul.bf16.gmra.mxu2 %v13892_v2  ;;  %vm5509_vm4 = vmor %vm5507_vm3, %vm5508_vm0  ;;  %vm5517_vm6 = vweird.f32 %v5423_v58 }
 0x9d7   : > { %v5503_v49 = vmul.f32 %v9801_v57, %v5502_v51  ;;  %6134 = vmatmul.bf16.gmra.mxu3 %v13892_v2  ;;  %6183 = vmatmul.bf16.gmra.mxu0 %v13892_v2  ;;  %v5500_v4 = vsel %vm5499_vm15, %v9799_v55, %v5496_v7 }
 0x9d8   : > { %v5597_v62 = vmul.f32 %v5500_v4, %v13743_v28 }
 0x9d9   : > { %v5504_v44 = vmul.f32 0.5, %v5503_v49  ;;  %v5386_v36 = vpop.xlane.xlu0 %5385 }
 0x9da   : > { %v5408_v47 = vmul.f32 %v5386_v36, %v16869_v37  ;;  %v5616_v26 = vmul.f32 %v13861_v40, %v5597_v62  ;;  %v9305_v62 = vld [vmem:[%s10460_s23 + $0x1f4] sm:$0xf0] }
 0x9db   : > { %v5505_v43 = vsub.f32 1.5, %v5504_v44 }
 0x9dc   : > { %v9803_v0 = vpop.eup %9802  ;;  %v5424_v60 = vadd.f32 1e-05, %v5408_v47 }
 0x9dd   : > { %v5506_v53 = vmul.f32 %v9801_v57, %v5505_v43  ;;  %v5512_v22 = vmul.f32 %v9803_v0, %v5423_v58  ;;  %vm5518_vm5 = vweird.f32 %v9803_v0  ;;  %v9300_v43 = vld [vmem:[%s10460_s23 + $0x1d4] sm:$0xf] }
 0x9de   : > { %9804 = vrsqrt.f32 %v5424_v60  ;;  %vm5519_vm7 = vmor %vm5517_vm6, %vm5518_vm5  ;;  %vm5527_vm9 = vweird.f32 %v5424_v60 }
 0x9df   : > { %v5510_v41 = vsel %vm5509_vm4, %v9801_v57, %v5506_v53  ;;  %v5513_v1 = vmul.f32 %v9803_v0, %v5512_v22  ;;  %v8978_v22 = vld [vmem:[%s10460_s23 + $0x1d8] sm:$0xf] }
 0x9e0   : > { %v5598_v13 = vmul.f32 %v5510_v41, %v13747_v50  ;;  %v8979_v41 = vor.u32 %v9305_v62, %v8978_v22 }
 0x9e1   : > { %v5514_v52 = vmul.f32 0.5, %v5513_v1  ;;  %v5388_v8 = vpop.xlane.xlu1 %5387 }
 0x9e2   : > { %v5617_v61 = vmul.f32 %v13861_v40, %v5598_v13  ;;  %v5409_v12 = vmul.f32 %v5388_v8, %v16869_v37  ;;  %6312 = vmatpush.bf16.msra.mxu3 %v8979_v41 }
 0x9e3   : > { %v5515_v5 = vsub.f32 1.5, %v5514_v52 }
 0x9e4   : > { %v9805_v59 = vpop.eup %9804  ;;  %v13904_v14 = vpack.c.bf16 %v5617_v61, %v5616_v26  ;;  %v5425_v35 = vadd.f32 1e-05, %v5409_v12 }
 0x9e5   : > { %v5522_v56 = vmul.f32 %v9805_v59, %v5424_v60  ;;  %v5516_v38 = vmul.f32 %v9803_v0, %v5515_v5  ;;  %vm5528_vm8 = vweird.f32 %v9805_v59 }
 0x9e6   : > { %9806 = vrsqrt.f32 %v5425_v35  ;;  %6041 = vmatmul.bf16.gmra.mxu1 %v13904_v14  ;;  %6090 = vmatmul.bf16.gmra.mxu2 %v13904_v14  ;;  %vm5529_vm10 = vmor %vm5527_vm9, %vm5528_vm8  ;;  %vm5537_vm2 = vweird.f32 %v5425_v35 }
 0x9e7   : > { %v5523_v55 = vmul.f32 %v9805_v59, %v5522_v56  ;;  %6139 = vmatmul.bf16.gmra.mxu3 %v13904_v14  ;;  %6188 = vmatmul.bf16.gmra.mxu0 %v13904_v14  ;;  %v5520_v48 = vsel %vm5519_vm7, %v9803_v0, %v5516_v38  ;;  %v8972_v0 = vld [vmem:[%s10460_s23 + $0x1f0] sm:$0xf0] }
 0x9e8   : > { %v5599_v10 = vmul.f32 %v5520_v48, %v13751_v11  ;;  %v8975_v53 = vor.u32 %v9300_v43, %v8972_v0  ;;  %v9297_v43 = vld [vmem:[%s10460_s23 + $0x1b4] sm:$0xf0] }
 0x9e9   : > { %v5524_v54 = vmul.f32 0.5, %v5523_v55  ;;  %v5390_v27 = vpop.xlane.xlu2 %5389 }
 0x9ea   : > { %v5410_v39 = vmul.f32 %v5390_v27, %v16869_v37  ;;  %v5618_v51 = vmul.f32 %v13861_v40, %v5599_v10  ;;  %6263 = vmatpush.bf16.msra.mxu2 %v8975_v53  ;;  %v8970_v10 = vld [vmem:[%s10460_s23 + $0x1d0] sm:$0xf] }
 0x9eb   : > { %v5525_v19 = vsub.f32 1.5, %v5524_v54 }
 0x9ec   : > { %v9807_v24 = vpop.eup %9806  ;;  %v5426_v45 = vadd.f32 1e-05, %v5410_v39 }
 0x9ed   : > { %v5526_v42 = vmul.f32 %v9805_v59, %v5525_v19  ;;  %v5532_v29 = vmul.f32 %v9807_v24, %v5425_v35  ;;  %vm5538_vm1 = vweird.f32 %v9807_v24 }
 0x9ee   : > { %9808 = vrsqrt.f32 %v5426_v45  ;;  %vm5539_vm11 = vmor %vm5537_vm2, %vm5538_vm1  ;;  %vm5547_vm13 = vweird.f32 %v5426_v45 }
 0x9ef   : > { %v5530_v9 = vsel %vm5529_vm10, %v9805_v59, %v5526_v42  ;;  %v5533_v32 = vmul.f32 %v9807_v24, %v5532_v29 }
 0x9f0   : > { %v5600_v15 = vmul.f32 %v5530_v9, %v13755_v63  ;;  %v9304_v9 = vld [vmem:[%s10460_s23 + $0x1ec] sm:$0xf0] }
 0x9f1   : > { %v5534_v57 = vmul.f32 0.5, %v5533_v32  ;;  %v5392_v58 = vpop.xlane.xlu0 %5391 }
 0x9f2   : > { %v5619_v7 = vmul.f32 %v13861_v40, %v5600_v15  ;;  %v5411_v49 = vmul.f32 %v5392_v58, %v16869_v37  ;;  %v9292_v58 = vld [vmem:[%s10460_s23 + $0x194] sm:$0xf] }
 0x9f3   : > { %v5535_v44 = vsub.f32 1.5, %v5534_v57  ;;  %v8971_v57 = vor.u32 %v9304_v9, %v8970_v10  ;;  %v9285_v10 = vld [vmem:[%s10460_s23 + $0x15c] sm:$0xf] }
 0x9f4   : > { %v9809_v36 = vpop.eup %9808  ;;  %v13916_v47 = vpack.c.bf16 %v5619_v7, %v5618_v51  ;;  %v13918_v4 = vadd.f32 1e-05, %v5411_v49  ;;  %v8940_v51 = vld [vmem:[%s10460_s23 + $0x1b0] sm:$0xf0]  ;;  %v9301_v7 = vld [vmem:[%s10460_s23 + $0x1dc] sm:$0xf] }
 0x9f5   : > { %v5542_v60 = vmul.f32 %v9809_v36, %v5426_v45  ;;  %v5536_v1 = vmul.f32 %v9807_v24, %v5535_v44  ;;  %vm5548_vm12 = vweird.f32 %v9809_v36  ;;  %v8943_v49 = vor.u32 %v9292_v58, %v8940_v51  ;;  %v8980_v44 = vld [vmem:[%s10460_s23 + $0x1f8] sm:$0xf0]  ;;  %6214 = vmatpush.bf16.msra.mxu1 %v8971_v57  ;;  %v8874_v57 = vld [vmem:[%s10460_s23 + $0x110] sm:$0xf] }
 0x9f6   : > { %9810 = vrsqrt.f32 %v13918_v4  ;;  %6046 = vmatmul.bf16.gmra.mxu1 %v13916_v47  ;;  %6095 = vmatmul.bf16.gmra.mxu2 %v13916_v47  ;;  %vm5549_vm14 = vmor %vm5547_vm13, %vm5548_vm12  ;;  %vm5557_vm0 = vweird.f32 %v13918_v4  ;;  %v9280_v58 = vld [vmem:[%s10460_s23 + $0x12c] sm:$0xf0] }
 0x9f7   : > { %v5543_v13 = vmul.f32 %v9809_v36, %v5542_v60  ;;  %6144 = vmatmul.bf16.gmra.mxu3 %v13916_v47  ;;  %6193 = vmatmul.bf16.gmra.mxu0 %v13916_v47  ;;  %v5540_v61 = vsel %vm5539_vm11, %v9807_v24, %v5536_v1  ;;  %v8983_v60 = vor.u32 %v9301_v7, %v8980_v44  ;;  %v8876_v44 = vld [vmem:[%s10460_s23 + $0x130] sm:$0xf0] }
 0x9f8   : > { %v5601_v55 = vmul.f32 %v5540_v61, %v13763_v25  ;;  %6264 = vmatpush.bf16.msra.mxu2 %v8943_v49  ;;  %v8938_v61 = vld [vmem:[%s10460_s23 + $0x190] sm:$0xf]  ;;  %v9276_v49 = vld [vmem:[%s10460_s23 + $0x114] sm:$0xf] }
 0x9f9   : > { %v5544_v52 = vmul.f32 0.5, %v5543_v13  ;;  %v5394_v8 = vpop.xlane.xlu1 %5393  ;;  %6361 = vmatpush.bf16.msra.mxu0 %v8983_v60  ;;  %v9281_v60 = vld [vmem:[%s10460_s23 + $0x134] sm:$0xf0] }
 0x9fa   : > { %v5412_v26 = vmul.f32 %v5394_v8, %v16869_v37  ;;  %v5620_v48 = vmul.f32 %v13861_v40, %v5601_v55 }
 0x9fb   : > { %v5545_v12 = vsub.f32 1.5, %v5544_v52 }
 0x9fc   : > { %v9811_v5 = vpop.eup %9810  ;;  %v5428_v59 = vadd.f32 1e-05, %v5412_v26 }
 0x9fd   : > { %v5546_v56 = vmul.f32 %v9809_v36, %v5545_v12  ;;  %v5552_v38 = vmul.f32 %v9811_v5, %v13918_v4  ;;  %vm5558_vm15 = vweird.f32 %v9811_v5  ;;  %v9296_v12 = vld [vmem:[%s10460_s23 + $0x1ac] sm:$0xf0] }
 0x9fe   : > { %9812 = vrsqrt.f32 %v5428_v59  ;;  %vm5559_vm3 = vmor %vm5557_vm0, %vm5558_vm15  ;;  %vm5567_vm5 = vweird.f32 %v5428_v59 }
 0x9ff   : > { %v5550_v35 = vsel %vm5549_vm14, %v9809_v36, %v5546_v56  ;;  %v5553_v54 = vmul.f32 %v9811_v5, %v5552_v38  ;;  %v8946_v36 = vld [vmem:[%s10460_s23 + $0x198] sm:$0xf]  ;;  %v8908_v56 = vld [vmem:[%s10460_s23 + $0x170] sm:$0xf0]  ;;  %v9293_v38 = vld [vmem:[%s10460_s23 + $0x19c] sm:$0xf] }
 0xa00   : > { %v5602_v27 = vmul.f32 %v5550_v35, %v13769_v6  ;;  %v8947_v53 = vor.u32 %v9297_v43, %v8946_v36  ;;  %v8882_v36 = vld [vmem:[%s10460_s23 + $0x118] sm:$0xf] }
 0xa01   : > { %v5554_v39 = vmul.f32 0.5, %v5553_v54 }
 0xa02   : > { %v5621_v19 = vmul.f32 %v13861_v40, %v5602_v27  ;;  %6313 = vmatpush.bf16.msra.mxu3 %v8947_v53  ;;  %v8948_v27 = vld [vmem:[%s10460_s23 + $0x1b8] sm:$0xf0] }
 0xa03   : > { %v5555_v24 = vsub.f32 1.5, %v5554_v39  ;;  %v8914_v39 = vld [vmem:[%s10460_s23 + $0x158] sm:$0xf]  ;;  %v9277_v53 = vld [vmem:[%s10460_s23 + $0x11c] sm:$0xf] }
 0xa04   : > { %v9813_v45 = vpop.eup %9812  ;;  %v13935_v42 = vpack.c.bf16 %v5621_v19, %v5620_v48  ;;  %v9289_v48 = vld [vmem:[%s10460_s23 + $0x174] sm:$0xf0]  ;;  %v8951_v19 = vor.u32 %v9293_v38, %v8948_v27  ;;  %v8844_v38 = vld [vmem:[%s10460_s23 + $0xf0] sm:$0xf0] }
 0xa05   : > { %v5562_v29 = vmul.f32 %v9813_v45, %v5428_v59  ;;  %v5556_v32 = vmul.f32 %v9811_v5, %v5555_v24  ;;  %vm5568_vm4 = vweird.f32 %v9813_v45  ;;  %v9284_v59 = vld [vmem:[%s10460_s23 + $0x154] sm:$0xf]  ;;  %v8915_v24 = vor.u32 %v9289_v48, %v8914_v39  ;;  %v9273_v27 = vld [vmem:[%s10460_s23 + $0xf4] sm:$0xf0]  ;;  %v9269_v39 = vld [vmem:[%s10460_s23 + $0xdc] sm:$0xf] }
 0xa06   : > { %6051 = vmatmul.bf16.gmra.mxu1 %v13935_v42  ;;  %6100 = vmatmul.bf16.gmra.mxu2 %v13935_v42  ;;  %vm5569_vm6 = vmor %vm5567_vm5, %vm5568_vm4  ;;  %v8911_v54 = vor.u32 %v9284_v59, %v8908_v56  ;;  %v8852_v48 = vld [vmem:[%s10460_s23 + $0xf8] sm:$0xf0] }
 0xa07   : > { %v5563_v15 = vmul.f32 %v9813_v45, %v5562_v29  ;;  %6149 = vmatmul.bf16.gmra.mxu3 %v13935_v42  ;;  %6198 = vmatmul.bf16.gmra.mxu0 %v13935_v42  ;;  %v5560_v22 = vsel %vm5559_vm3, %v9811_v5, %v5556_v32  ;;  %v8939_v5 = vor.u32 %v9296_v12, %v8938_v61  ;;  %v9288_v29 = vld [vmem:[%s10460_s23 + $0x16c] sm:$0xf0] }
 0xa08   : > { %v5603_v1 = vmul.f32 %v5560_v22, %v13773_v46  ;;  %6265 = vmatpush.bf16.msra.mxu2 %v8911_v54  ;;  %6362 = vmatpush.bf16.msra.mxu0 %v8951_v19  ;;  %v8884_v22 = vld [vmem:[%s10460_s23 + $0x138] sm:$0xf0]  ;;  %v8842_v61 = vld [vmem:[%s10460_s23 + $0xd0] sm:$0xf] }
 0xa09   : > { %v5564_v0 = vmul.f32 0.5, %v5563_v15  ;;  %6215 = vmatpush.bf16.msra.mxu1 %v8939_v5  ;;  %v8916_v15 = vld [vmem:[%s10460_s23 + $0x178] sm:$0xf0]  ;;  %6314 = vmatpush.bf16.msra.mxu3 %v8915_v24  ;;  %v9272_v12 = vld [vmem:[%s10460_s23 + $0xec] sm:$0xf0] }
 0xa0a   : > { %v5622_v55 = vmul.f32 %v13861_v40, %v5603_v1  ;;  %v8919_v7 = vor.u32 %v9285_v10, %v8916_v15  ;;  %v9268_v5 = vld [vmem:[%s10460_s23 + $0xd4] sm:$0xf]  ;;  %v8843_v56 = vor.u32 %v9272_v12, %v8842_v61  ;;  %v9264_v10 = vld [vmem:[%s10460_s23 + $0xac] sm:$0xf0]  ;;  %v8786_v61 = vld [vmem:[%s10460_s23 + $0x58] sm:$0xf] }
 0xa0b   : > { %v5565_v62 = vsub.f32 1.5, %v5564_v0  ;;  %v8879_v0 = vor.u32 %v9276_v49, %v8876_v44  ;;  %v8847_v54 = vor.u32 %v9268_v5, %v8844_v38  ;;  %v9265_v44 = vld [vmem:[%s10460_s23 + $0xb4] sm:$0xf0] }
 0xa0c   : > { %6363 = vmatpush.bf16.msra.mxu0 %v8919_v7  ;;  %v8818_v7 = vld [vmem:[%s10460_s23 + $0x98] sm:$0xf] }
 0xa0d   : > { %v5566_v41 = vmul.f32 %v9813_v45, %v5565_v62  ;;  %v5396_v4 = vpop.xlane.xlu2 %5395  ;;  %v8883_v62 = vor.u32 %v9281_v60, %v8882_v36  ;;  %6266 = vmatpush.bf16.msra.mxu2 %v8879_v0  ;;  %v9261_v36 = vld [vmem:[%s10460_s23 + $0x9c] sm:$0xf]  ;;  %v9257_v5 = vld [vmem:[%s10460_s23 + $0x74] sm:$0xf0] }
 0xa0e   : > { %v5413_v13 = vmul.f32 %v5396_v4, %v16869_v37  ;;  %v8787_v38 = vor.u32 %v9257_v5, %v8786_v61 }
 0xa0f   : > { %v5570_v52 = vsel %vm5569_vm6, %v9813_v45, %v5566_v41  ;;  %v8906_v45 = vld [vmem:[%s10460_s23 + $0x150] sm:$0xf]  ;;  %6315 = vmatpush.bf16.msra.mxu3 %v8883_v62 }
 0xa10   : > { %v5604_v8 = vmul.f32 %v5570_v52, %v13777_v34  ;;  %v13954_v26 = vadd.f32 1e-05, %v5413_v13  ;;  %v8907_v32 = vor.u32 %v9288_v29, %v8906_v45  ;;  %v8887_v13 = vor.u32 %v9277_v53, %v8884_v22  ;;  %v8810_v29 = vld [vmem:[%s10460_s23 + $0x90] sm:$0xf] }
 0xa11   : > { %6267 = vmatpush.bf16.msra.mxu2 %v8847_v54  ;;  %v8855_v45 = vor.u32 %v9269_v39, %v8852_v48  ;;  %v8819_v53 = vor.u32 %v9265_v44, %v8818_v7  ;;  %v9256_v62 = vld [vmem:[%s10460_s23 + $0x6c] sm:$0xf0]  ;;  %v9244_v39 = vld [vmem:[%s10460_s23 + $0x14] sm:$0xf] }
 0xa12   : > { %v5623_v35 = vmul.f32 %v13861_v40, %v5604_v8  ;;  %9814 = vrsqrt.f32 %v13954_v26  ;;  %6216 = vmatpush.bf16.msra.mxu1 %v8907_v32  ;;  %6364 = vmatpush.bf16.msra.mxu0 %v8887_v13  ;;  %vm5577_vm8 = vweird.f32 %v13954_v26 }
 0xa14   : > { %v13970_v9 = vpack.c.bf16 %v5623_v35, %v5622_v55  ;;  %v8850_v55 = vld [vmem:[%s10460_s23 + $0xd8] sm:$0xf] }
 0xa15   : > { %v5398_v51 = vpop.xlane.xlu0 %5397  ;;  %v8851_v24 = vor.u32 %v9273_v27, %v8850_v55  ;;  %v9248_v27 = vld [vmem:[%s10460_s23 + $0x2c] sm:$0xf0] }
 0xa16   : > { %v5414_v43 = vmul.f32 %v5398_v51, %v16869_v37  ;;  %6056 = vmatmul.bf16.gmra.mxu1 %v13970_v9  ;;  %6105 = vmatmul.bf16.gmra.mxu2 %v13970_v9  ;;  %v8875_v37 = vor.u32 %v9280_v58, %v8874_v57  ;;  %v8811_v57 = vor.u32 %v9264_v10, %v8810_v29  ;;  %v9260_v58 = vld [vmem:[%s10460_s23 + $0x94] sm:$0xf]  ;;  %v9249_v29 = vld [vmem:[%s10460_s23 + $0x34] sm:$0xf0] }
 0xa17   : > { %6154 = vmatmul.bf16.gmra.mxu3 %v13970_v9  ;;  %6203 = vmatmul.bf16.gmra.mxu0 %v13970_v9  ;;  %v8812_v51 = vld [vmem:[%s10460_s23 + $0xb0] sm:$0xf0] }
 0xa18   : > { %v13986_v41 = vpop.eup %9814  ;;  %v13988_v4 = vadd.f32 1e-05, %v5414_v43  ;;  %6217 = vmatpush.bf16.msra.mxu1 %v8875_v37  ;;  %6316 = vmatpush.bf16.msra.mxu3 %v8851_v24  ;;  %v8815_v49 = vor.u32 %v9260_v58, %v8812_v51  ;;  %v8820_v43 = vld [vmem:[%s10460_s23 + $0xb8] sm:$0xf0]  ;;  %v9252_v37 = vld [vmem:[%s10460_s23 + $0x54] sm:$0xf] }
 0xa19   : > { %v5572_v1 = vmul.f32 %v13986_v41, %v13954_v26  ;;  %vm5578_vm7 = vweird.f32 %v13986_v41  ;;  %6365 = vmatpush.bf16.msra.mxu0 %v8855_v45  ;;  %v8823_v22 = vor.u32 %v9261_v36, %v8820_v43  ;;  %v8778_v26 = vld [vmem:[%s10460_s23 + $0x50] sm:$0xf]  ;;  %v8748_v24 = vld [vmem:[%s10460_s23 + $0x30] sm:$0xf0]  ;;  %v8754_v45 = vld [vmem:[%s10460_s23 + $0x18] sm:$0xf] }
 0xa1a   : > { %9816 = vrsqrt.f32 %v13988_v4  ;;  %vm14020_vm9 = vmor %vm5577_vm8, %vm5578_vm7  ;;  %6268 = vmatpush.bf16.msra.mxu2 %v8815_v49  ;;  %vm5587_vm1 = vweird.f32 %v13988_v4  ;;  %v8756_v58 = vld [vmem:[%s10460_s23 + $0x38] sm:$0xf0] }
 0xa1b   : > { %v5573_v52 = vmul.f32 %v13986_v41, %v5572_v1 }
 0xa1c   : > { %6218 = vmatpush.bf16.msra.mxu1 %v8843_v56  ;;  %6317 = vmatpush.bf16.msra.mxu3 %v8819_v53  ;;  %v8788_v56 = vld [vmem:[%s10460_s23 + $0x78] sm:$0xf0] }
 0xa1d   : > { %v5574_v8 = vmul.f32 0.5, %v5573_v52  ;;  %v8779_v52 = vor.u32 %v9256_v62, %v8778_v26  ;;  %6366 = vmatpush.bf16.msra.mxu0 %v8823_v22 }
 0xa1f   : > { %v5575_v59 = vsub.f32 1.5, %v5574_v8  ;;  %v8780_v8 = vld [vmem:[%s10460_s23 + $0x70] sm:$0xf0] }
 0xa20   : > { %v13999_v35 = vpop.eup %9816  ;;  %6219 = vmatpush.bf16.msra.mxu1 %v8811_v57  ;;  %v8783_v12 = vor.u32 %v9252_v37, %v8780_v8  ;;  %6318 = vmatpush.bf16.msra.mxu3 %v8787_v38  ;;  %v9245_v57 = vld [vmem:[%s10460_s23 + $0x1c] sm:$0xf] }
 0xa21   : > { %v5582_v19 = vmul.f32 %v13999_v35, %v13988_v4  ;;  %v5576_v32 = vmul.f32 %v13986_v41, %v5575_v59  ;;  %vm5588_vm10 = vweird.f32 %v13999_v35  ;;  %v9253_v59 = vld [vmem:[%s10460_s23 + $0x5c] sm:$0xf]  ;;  %v8746_v4 = vld [vmem:[%s10460_s23 + $0x10] sm:$0xf]  ;;  %v8759_v51 = vor.u32 %v9245_v57, %v8756_v58  ;;  %s10268_s23 = smov [#allocation11]  }
 0xa22   : > { %vm5589_vm2 = vmor %vm5587_vm1, %vm5588_vm10  ;;  %v8791_v55 = vor.u32 %v9253_v59, %v8788_v56  ;;  %6269 = vmatpush.bf16.msra.mxu2 %v8783_v12  ;;  %s8275_s16 = sshll.u32 %s10268_s23, 4  ;;  %s8276_s16 = int_to_ptr.vmem [resolvable:$true] %s8275_s16 }
 0xa23   : > { %v5583_v15 = vmul.f32 %v13999_v35, %v5582_v19  ;;  %v5580_v1 = vsel %vm14020_vm9, %v13986_v41, %v5576_v32  ;;  %v8747_v19 = vor.u32 %v9248_v27, %v8746_v4  ;;  %v8751_v32 = vor.u32 %v9244_v39, %v8748_v24 }
 0xa24   : > { %6220 = vmatpush.bf16.msra.mxu1 %v8779_v52  ;;  %v5605_v54 = vmul.f32 %v5580_v1, %v13819_v33  ;;  %6367 = vmatpush.bf16.msra.mxu0 %v8791_v55 }
 0xa25   : > { %v5584_v60 = vmul.f32 0.5, %v5583_v15  ;;  %v8755_v15 = vor.u32 %v9249_v29, %v8754_v45 }
 0xa26   : > { %v5624_v7 = vmul.f32 %v13861_v40, %v5605_v54  ;;  %6270 = vmatpush.bf16.msra.mxu2 %v8751_v32 }
 0xa27   : > { %v5585_v13 = vsub.f32 1.5, %v5584_v60  ;;  %6319 = vmatpush.bf16.msra.mxu3 %v8755_v15 }
 0xa28   : > { %6221 = vmatpush.bf16.msra.mxu1 %v8747_v19  ;;  %6368 = vmatpush.bf16.msra.mxu0 %v8759_v51 }
 0xa29   : > { %v5586_v41 = vmul.f32 %v13999_v35, %v5585_v13 }
 0xa2b   : > { %v5590_v48 = vsel %vm5589_vm2, %v13999_v35, %v5586_v41 }
 0xa2c   : > { %v5606_v10 = vmul.f32 %v5590_v48, %v13841_v31 }
 0xa2e   : > { %v5625_v49 = vmul.f32 %v13861_v40, %v5606_v10 }
 0xa30   : > { %v14053_v35 = vpack.c.bf16 %v5625_v49, %v5624_v7 }
 0xa32   : > { %6061 = vmatmul.bf16.gmra.mxu1 %v14053_v35  ;;  %6110 = vmatmul.bf16.gmra.mxu2 %v14053_v35 }
 0xa33   : > { %6159 = vmatmul.bf16.gmra.mxu3 %v14053_v35  ;;  %6208 = vmatmul.bf16.gmra.mxu0 %v14053_v35  ;;  %v14063_v40 = vpop.f32.mrf.mxu1 }
 0xa34   : > { %v14065_v44 = vpop.f32.mrf.mxu0  ;;  %v8984_v36 = vmul.f32 -1.442695, %v14063_v40 }
 0xa35   : > { %v8987_v43 = vmul.f32 -1.442695, %v14065_v44 }
 0xa36   : > { %9818 = vpow2.f32 %v8984_v36 }
 0xa37   : > { %9820 = vpow2.f32 %v8987_v43 }
 0xa39   : > { %v14071_v0 = vpop.f32.mrf.mxu2 }
 0xa3a   : > { %v8985_v60 = vmul.f32 -1.442695, %v14071_v0 }
 0xa3b   : > { %v14078_v53 = vpop.f32.mrf.mxu1 }
 0xa3c   : > { %v9819_v22 = vpop.eup %9818  ;;  %9822 = vpow2.f32 %v8985_v60  ;;  %v8988_v37 = vmul.f32 -1.442695, %v14078_v53  ;;  %v14082_v1 = vpop.f32.mrf.mxu0 }
 0xa3d   : > { %v9821_v62 = vpop.eup %9820  ;;  %v14084_v13 = vadd.f32 1.0, %v9819_v22 }
 0xa3e   : > { %v14086_v52 = vadd.f32 1.0, %v9821_v62 }
 0xa3f   : > { %v6677_v7 = vand.u32 2147483648, %v14084_v13  ;;  %v6675_v43 = vand.u32 2147483647, %v14084_v13  ;;  %vm6671_vm11 = vweird.f32 %v14084_v13 }
 0xa40   : > { %v6720_v60 = vand.u32 2147483647, %v14086_v52  ;;  %v6722_v22 = vand.u32 2147483648, %v14086_v52  ;;  %vm6716_vm12 = vweird.f32 %v14086_v52 }
 0xa41   : > { %v14089_v8 = vpop.f32.mrf.mxu2  ;;  %vm14160_vm14 = vcmp.eq.f32.partialorder %v6675_v43, 8.507059e+37 }
 0xa42   : > { %6222 = vmatmul.bf16.vlgmr.msra.gmra.mxu1 %v13868_v23  ;;  %6271 = vmatmul.bf16.vlgmr.msra.gmra.mxu2 %v13868_v23  ;;  %v9823_v61 = vpop.eup %9822  ;;  %v8989_v12 = vmul.f32 -1.442695, %v14089_v8  ;;  %vm14164_vm15 = vcmp.eq.f32.partialorder %v6720_v60, 8.507059e+37 }
 0xa43   : > { %6320 = vmatmul.bf16.vlgmr.msra.gmra.mxu3 %v13868_v23  ;;  %6369 = vmatmul.bf16.vlgmr.msra.gmra.mxu0 %v13868_v23  ;;  %v14075_v23 = vpop.f32.mrf.mxu3  ;;  %v14096_v59 = vadd.f32 1.0, %v9823_v61  ;;  %v14119_v45 = vpop.f32.mrf.mxu1 }
 0xa44   : > { %v8986_v26 = vmul.f32 -1.442695, %v14075_v23  ;;  %v14127_v57 = vpop.f32.mrf.mxu0  ;;  %v8992_v51 = vmul.f32 -1.442695, %v14119_v45 }
 0xa45   : > { %v8995_v61 = vmul.f32 -1.442695, %v14127_v57  ;;  %vm6686_vm3 = vweird.f32 %v14096_v59 }
 0xa46   : > { %9824 = vpow2.f32 %v8986_v26 }
 0xa47   : > { %9826 = vpow2.f32 %v8988_v37 }
 0xa48   : > { %9828 = vrcp.f32 %v14084_v13 }
 0xa49   : > { %9830 = vrcp.f32 %v14086_v52 }
 0xa4b   : > { %v14100_v41 = vpop.f32.mrf.mxu3  ;;  %v14181_v31 = vpop.f32.mrf.mxu1 }
 0xa4c   : > { %v9825_v5 = vpop.eup %9824  ;;  %v8990_v27 = vmul.f32 -1.442695, %v14100_v41  ;;  %v14196_v34 = vpop.f32.mrf.mxu0 }
 0xa4d   : > { %v9827_v56 = vpop.eup %9826  ;;  %v14104_v55 = vadd.f32 1.0, %v9825_v5  ;;  %v6678_v5 = vor.u32 1.1754944e-38, %v6677_v7 }
 0xa4e   : > { %v14102_v38 = vpop.eup %9828  ;;  %v14111_v39 = vadd.f32 1.0, %v9827_v56 }
 0xa4f   : > { %v14106_v54 = vpop.eup %9830  ;;  %vm6672_vm13 = vweird.f32 %v14102_v38  ;;  %vm6701_vm8 = vweird.f32 %v14104_v55 }
 0xa50   : > { %v6712_v48 = vmul.f32 %v14106_v54, %v14086_v52  ;;  %vm6717_vm0 = vweird.f32 %v14106_v54  ;;  %vm14189_vm4 = vmor %vm6671_vm11, %vm6672_vm13  ;;  %v6737_v6 = vand.u32 2147483648, %v14111_v39  ;;  %vm6731_vm9 = vweird.f32 %v14111_v39 }
 0xa51   : > { %vm14202_vm5 = vmor %vm6716_vm12, %vm6717_vm0 }
 0xa52   : > { %6227 = vmatmul.bf16.gmra.mxu1 %v13880_v21  ;;  %6276 = vmatmul.bf16.gmra.mxu2 %v13880_v21  ;;  %v6713_v32 = vsub.f32 1.0, %v6712_v48 }
 0xa53   : > { %6325 = vmatmul.bf16.gmra.mxu3 %v13880_v21  ;;  %6374 = vmatmul.bf16.gmra.mxu0 %v13880_v21  ;;  %v8991_v21 = vmul.f32 -1.442695, %v14082_v1 }
 0xa54   : > { %v6714_v62 = vmul.f32 %v14106_v54, %v6713_v32  ;;  %v6707_v32 = vand.u32 2147483648, %v14104_v55 }
 0xa55   : > { %9832 = vpow2.f32 %v8991_v21 }
 0xa56   : > { %9834 = vpow2.f32 %v8989_v12 }
 0xa57   : > { %9836 = vrcp.f32 %v14096_v59 }
 0xa58   : > { %9838 = vrcp.f32 %v14104_v55 }
 0xa59   : > { %9840 = vpow2.f32 %v8990_v27 }
 0xa5a   : > { %9842 = vrcp.f32 %v14111_v39 }
 0xa5b   : > { %v9833_v4 = vpop.eup %9832 }
 0xa5c   : > { %v14117_v19 = vadd.f32 1.0, %v9833_v4  ;;  %v9835_v24 = vpop.eup %9834  ;;  %v6692_v4 = vand.u32 2147483648, %v14096_v59 }
 0xa5d   : > { %v14121_v29 = vpop.eup %9836  ;;  %v14125_v15 = vadd.f32 1.0, %v9835_v24 }
 0xa5e   : > { %9844 = vrcp.f32 %v14117_v19  ;;  %v14129_v58 = vpop.eup %9838  ;;  %v6682_v49 = vmul.f32 %v14121_v29, %v14096_v59  ;;  %vm6687_vm6 = vweird.f32 %v14121_v29  ;;  %vm6776_vm1 = vweird.f32 %v14117_v19 }
 0xa5f   : > { %v9841_v36 = vpop.eup %9840  ;;  %v6697_v37 = vmul.f32 %v14129_v58, %v14104_v55  ;;  %9846 = vrcp.f32 %v14125_v15  ;;  %vm6702_vm10 = vweird.f32 %v14129_v58  ;;  %vm14253_vm11 = vmor %vm6686_vm3, %vm6687_vm6 }
 0xa60   : > { %v14145_v21 = vpop.eup %9842  ;;  %9848 = vpow2.f32 %v8992_v51  ;;  %v6683_v56 = vsub.f32 1.0, %v6682_v49  ;;  %v14155_v27 = vadd.f32 1.0, %v9841_v36  ;;  %v14170_v51 = vpop.f32.mrf.mxu3  ;;  %v6715_v49 = vadd.f32 %v14106_v54, %v6714_v62  ;;  %vm14294_vm0 = vmor %vm6701_vm8, %vm6702_vm10 }
 0xa61   : > { %v6698_v36 = vsub.f32 1.0, %v6697_v37  ;;  %v6727_v43 = vmul.f32 %v14145_v21, %v14111_v39  ;;  %9850 = vpow2.f32 %v8995_v61  ;;  %v6693_v37 = vor.u32 1.1754944e-38, %v6692_v4 }
 0xa62   : > { %6232 = vmatmul.bf16.gmra.mxu1 %v13892_v2  ;;  %6281 = vmatmul.bf16.gmra.mxu2 %v13892_v2  ;;  %v6684_v62 = vmul.f32 %v14121_v29, %v6683_v56  ;;  %9852 = vrcp.f32 %v14155_v27  ;;  %v8994_v61 = vmul.f32 -1.442695, %v14170_v51  ;;  %v6705_v56 = vand.u32 2147483647, %v14104_v55 }
 0xa63   : > { %6330 = vmatmul.bf16.gmra.mxu3 %v13892_v2  ;;  %6379 = vmatmul.bf16.gmra.mxu0 %v13892_v2  ;;  %v6667_v2 = vmul.f32 %v14102_v38, %v14084_v13  ;;  %v14208_v4 = vor.u32 1.1754944e-38, %v6707_v32  ;;  %v6719_v52 = vsel %vm14202_vm5, %v14106_v54, %v6715_v49  ;;  %v6699_v11 = vmul.f32 %v14129_v58, %v6698_v36 }
 0xa64   : > { %v14152_v12 = vpop.eup %9844  ;;  %v8996_v32 = vmul.f32 -1.442695, %v14181_v31  ;;  %v6728_v50 = vsub.f32 1.0, %v6727_v43  ;;  %v6735_v49 = vand.u32 2147483647, %v14111_v39  ;;  %v14233_v36 = vor.u32 1.1754944e-38, %v6737_v6 }
 0xa65   : > { %v6668_v10 = vsub.f32 1.0, %v6667_v2  ;;  %v14157_v2 = vpop.f32.mrf.mxu2  ;;  %v6772_v60 = vmul.f32 %v14152_v12, %v14117_v19  ;;  %v14183_v33 = vpop.eup %9846  ;;  %vm14242_vm2 = vcmp.eq.f32.partialorder %v6705_v56, 8.507059e+37  ;;  %vm6732_vm12 = vweird.f32 %v14145_v21 }
 0xa66   : > { %v9849_v46 = vpop.eup %9848  ;;  %v6742_v54 = vmul.f32 %v14183_v33, %v14125_v15  ;;  %vm14277_vm13 = vcmp.eq.f32.partialorder %v6735_v49, 8.507059e+37  ;;  %vm14316_vm3 = vmor %vm6731_vm9, %vm6732_vm12  ;;  %vm6746_vm5 = vweird.f32 %v14125_v15  ;;  %vm6761_vm10 = vweird.f32 %v14155_v27 }
 0xa67   : > { %v6669_v26 = vmul.f32 %v14102_v38, %v6668_v10  ;;  %v6690_v10 = vand.u32 2147483647, %v14096_v59  ;;  %v6773_v28 = vsub.f32 1.0, %v6772_v60 }
 0xa68   : > { %v14301_v49 = vpop.f32.mrf.mxu3 }
 0xa69   : > { %v6670_v7 = vadd.f32 %v14102_v38, %v6669_v26  ;;  %vm14217_vm7 = vcmp.eq.f32.partialorder %v6690_v10, 8.507059e+37  ;;  %v8999_v26 = vmul.f32 -1.442695, %v14196_v34  ;;  %v14229_v10 = vadd.f32 1.0, %v9849_v46 }
 0xa6a   : > { %v6774_v48 = vmul.f32 %v14152_v12, %v6773_v28 }
 0xa6b   : > { %v6674_v25 = vsel %vm14189_vm4, %v14102_v38, %v6670_v7  ;;  %v6685_v38 = vadd.f32 %v14121_v29, %v6684_v62  ;;  %v9851_v7 = vpop.eup %9850  ;;  %v6780_v62 = vand.u32 2147483647, %v14117_v19 }
 0xa6c   : > { %v14236_v43 = vpop.eup %9852  ;;  %v6679_v60 = vsel %vm14160_vm14, %v6678_v5, %v6674_v25  ;;  %v6700_v25 = vadd.f32 %v14129_v58, %v6699_v11  ;;  %v6729_v5 = vmul.f32 %v14145_v21, %v6728_v50  ;;  %v14264_v13 = vadd.f32 1.0, %v9851_v7 }
 0xa6d   : > { %v6689_v24 = vsel %vm14253_vm11, %v14121_v29, %v6685_v38  ;;  %v14267_v56 = vmul.f32 %v6679_v60, %v14063_v40  ;;  %v6782_v11 = vand.u32 2147483648, %v14117_v19  ;;  %v6757_v50 = vmul.f32 %v14236_v43, %v14155_v27 }
 0xa6e   : > { %vm6777_vm14 = vweird.f32 %v14152_v12  ;;  %v6730_v38 = vadd.f32 %v14145_v21, %v6729_v5  ;;  %v6750_v7 = vand.u32 2147483647, %v14125_v15  ;;  %v6704_v55 = vsel %vm14294_vm0, %v14129_v58, %v6700_v25 }
 0xa6f   : > { %16888 = vst [vmem:[#allocation28_spill] sm:$0xff] %v14267_v56  ;;  %v6758_v6 = vsub.f32 1.0, %v6757_v50  ;;  %vm14331_vm4 = vmor %vm6776_vm1, %vm6777_vm14  ;;  %vm6762_vm9 = vweird.f32 %v14236_v43  ;;  %vm6791_vm11 = vweird.f32 %v14229_v10 }
 0xa70   : > { %vm14347_vm6 = vcmp.eq.f32.partialorder %v6750_v7, 8.507059e+37 }
 0xa72   : > { %6237 = vmatmul.bf16.gmra.mxu1 %v13904_v14  ;;  %6286 = vmatmul.bf16.gmra.mxu2 %v13904_v14 }
 0xa73   : > { %6335 = vmatmul.bf16.gmra.mxu3 %v13904_v14  ;;  %6384 = vmatmul.bf16.gmra.mxu0 %v13904_v14  ;;  %v6723_v14 = vor.u32 1.1754944e-38, %v6722_v22  ;;  %v8993_v22 = vmul.f32 -1.442695, %v14157_v2 }
 0xa75   : > { %9854 = vpow2.f32 %v8993_v22  ;;  %v6724_v22 = vsel %vm14164_vm15, %v6723_v14, %v6719_v52  ;;  %v6743_v14 = vsub.f32 1.0, %v6742_v54  ;;  %vm14282_vm15 = vcmp.eq.f32.partialorder %v6780_v62, 8.507059e+37 }
 0xa76   : > { %9856 = vpow2.f32 %v8994_v61  ;;  %v14247_v61 = vpop.f32.mrf.mxu2  ;;  %v6775_v54 = vadd.f32 %v14152_v12, %v6774_v48  ;;  %v6752_v48 = vand.u32 2147483648, %v14125_v15 }
 0xa77   : > { %9858 = vpow2.f32 %v8996_v32  ;;  %v8997_v28 = vmul.f32 -1.442695, %v14247_v61  ;;  %v14274_v32 = vmul.f32 %v6724_v22, %v14065_v44  ;;  %v6694_v44 = vsel %vm14217_vm7, %v6693_v37, %v6689_v24 }
 0xa78   : > { %9860 = vpow2.f32 %v8999_v26  ;;  %v6744_v37 = vmul.f32 %v14183_v33, %v6743_v14  ;;  %v14325_v25 = vmul.f32 %v6694_v44, %v14071_v0  ;;  %v8998_v24 = vmul.f32 -1.442695, %v14301_v49 }
 0xa79   : > { %9862 = vrcp.f32 %v14229_v10  ;;  %16889 = vst [vmem:[#allocation54_spill] sm:$0xff] %v14274_v32  ;;  %v6709_v14 = vsel %vm14242_vm2, %v14208_v4, %v6704_v55  ;;  %v6734_v0 = vsel %vm14316_vm3, %v14145_v21, %v6730_v38  ;;  %v6779_v19 = vsel %vm14331_vm4, %v14152_v12, %v6775_v54  ;;  %v14370_v38 = vpop.f32.mrf.mxu0  ;;  %vm14421_vm2 = vmor %vm6761_vm10, %vm6762_vm9 }
 0xa7a   : > { %9864 = vrcp.f32 %v14264_v13  ;;  %16898 = vst [vmem:[#allocation48_spill] sm:$0xff] %v14325_v25  ;;  %v6745_v50 = vadd.f32 %v14183_v33, %v6744_v37  ;;  %vm6747_vm7 = vweird.f32 %v14183_v33  ;;  %v6759_v21 = vmul.f32 %v14236_v43, %v6758_v6 }
 0xa7b   : > { %v9855_v59 = vpop.eup %9854  ;;  %9866 = vpow2.f32 %v8997_v28  ;;  %v6753_v44 = vor.u32 1.1754944e-38, %v6752_v48  ;;  %v6739_v7 = vsel %vm14277_vm13, %v14233_v36, %v6734_v0  ;;  %vm14381_vm8 = vmor %vm6746_vm5, %vm6747_vm7  ;;  %v6765_v55 = vand.u32 2147483647, %v14155_v27 }
 0xa7c   : > { %v9857_v52 = vpop.eup %9856  ;;  %v14310_v60 = vadd.f32 1.0, %v9855_v59  ;;  %v6767_v37 = vand.u32 2147483648, %v14155_v27  ;;  %v6749_v29 = vsel %vm14381_vm8, %v14183_v33, %v6745_v50  ;;  %v6797_v36 = vand.u32 2147483648, %v14229_v10 }
 0xa7d   : > { %v9859_v63 = vpop.eup %9858  ;;  %v14320_v5 = vadd.f32 1.0, %v9857_v52  ;;  %v14367_v52 = vmul.f32 %v6709_v14, %v14075_v23  ;;  %v6760_v15 = vadd.f32 %v14236_v43, %v6759_v21  ;;  %v6754_v39 = vsel %vm14347_vm6, %v6753_v44, %v6749_v29  ;;  %v14429_v21 = vpop.f32.mrf.mxu3 }
 0xa7e   : > { %v9861_v22 = vpop.eup %9860  ;;  %9868 = vrcp.f32 %v14310_v60  ;;  %v14356_v4 = vadd.f32 1.0, %v9859_v63  ;;  %vm14409_vm1 = vcmp.eq.f32.partialorder %v6765_v55, 8.507059e+37  ;;  %v6795_v14 = vand.u32 2147483647, %v14229_v10  ;;  %v14414_v0 = vpop.f32.mrf.mxu2 }
 0xa7f   : > { %v14322_v58 = vpop.eup %9862  ;;  %9870 = vrcp.f32 %v14320_v5  ;;  %v14362_v12 = vadd.f32 1.0, %v9861_v22  ;;  %16903 = vst [vmem:[#allocation53_spill] sm:$0xff] %v14367_v52  ;;  %v14426_v59 = vor.u32 1.1754944e-38, %v6797_v36  ;;  %v9003_v50 = vmul.f32 -1.442695, %v14370_v38 }
 0xa80   : > { %v6787_v46 = vmul.f32 %v14322_v58, %v14229_v10  ;;  %v14364_v28 = vpop.eup %9864  ;;  %9872 = vpow2.f32 %v8998_v24  ;;  %v6768_v24 = vor.u32 1.1754944e-38, %v6767_v37  ;;  %vm14452_vm12 = vcmp.eq.f32.partialorder %v6795_v14, 8.507059e+37 }
 0xa81   : > { %v9867_v54 = vpop.eup %9866  ;;  %9874 = vrcp.f32 %v14356_v4  ;;  %v6832_v22 = vmul.f32 %v14364_v28, %v14264_v13  ;;  %vm6836_vm13 = vweird.f32 %v14264_v13  ;;  %v6812_v29 = vand.u32 2147483648, %v14310_v60  ;;  %v14468_v14 = vpop.f32.mrf.mxu0 }
 0xa82   : > { %6242 = vmatmul.bf16.gmra.mxu1 %v13916_v47  ;;  %6291 = vmatmul.bf16.gmra.mxu2 %v13916_v47  ;;  %v6788_v40 = vsub.f32 1.0, %v6787_v46  ;;  %9876 = vrcp.f32 %v14362_v12  ;;  %v14403_v33 = vadd.f32 1.0, %v9867_v54  ;;  %v6764_v46 = vsel %vm14421_vm2, %v14236_v43, %v6760_v15 }
 0xa83   : > { %6340 = vmatmul.bf16.gmra.mxu3 %v13916_v47  ;;  %6389 = vmatmul.bf16.gmra.mxu0 %v13916_v47  ;;  %v6783_v47 = vor.u32 1.1754944e-38, %v6782_v11  ;;  %v14351_v11 = vpop.f32.mrf.mxu1  ;;  %v6833_v44 = vsub.f32 1.0, %v6832_v22  ;;  %vm6792_vm14 = vweird.f32 %v14322_v58  ;;  %v6810_v22 = vand.u32 2147483647, %v14310_v60 }
 0xa84   : > { %v9000_v26 = vmul.f32 -1.442695, %v14351_v11  ;;  %v14397_v62 = vpop.eup %9868  ;;  %vm14494_vm0 = vmor %vm6791_vm11, %vm6792_vm14  ;;  %vm6837_vm3 = vweird.f32 %v14364_v28  ;;  %vm6821_vm5 = vweird.f32 %v14320_v5  ;;  %v9002_v20 = vmul.f32 -1.442695, %v14429_v21 }
 0xa85   : > { %v6784_v63 = vsel %vm14282_vm15, %v6783_v47, %v6779_v19  ;;  %v14400_v47 = vmul.f32 %v6739_v7, %v14078_v53  ;;  %v14405_v6 = vpop.eup %9870  ;;  %v14440_v7 = vmul.f32 %v6754_v39, %v14089_v8  ;;  %v6840_v8 = vand.u32 2147483647, %v14264_v13  ;;  %vm14530_vm7 = vmor %vm6836_vm13, %vm6837_vm3 }
 0xa86   : > { %9878 = vpow2.f32 %v9000_v26  ;;  %v9873_v53 = vpop.eup %9872  ;;  %v14417_v27 = vmul.f32 %v6784_v63, %v14082_v1  ;;  %v6789_v1 = vmul.f32 %v14322_v58, %v6788_v40  ;;  %v6802_v26 = vmul.f32 %v14397_v62, %v14310_v60 }
 0xa87   : > { %16906 = vst [vmem:[#allocation45_spill] sm:$0xff] %v14400_v47  ;;  %v14437_v54 = vpop.eup %9874  ;;  %v6842_v63 = vand.u32 2147483648, %v14264_v13  ;;  %v6817_v23 = vmul.f32 %v14405_v6, %v14320_v5  ;;  %9880 = vrcp.f32 %v14403_v33  ;;  %v14459_v36 = vadd.f32 1.0, %v9873_v53 }
 0xa88   : > { %16909 = vst [vmem:[#allocation38_spill] sm:$0xff] %v14417_v27  ;;  %v14450_v43 = vpop.eup %9876  ;;  %v6769_v40 = vsel %vm14409_vm1, %v6768_v24, %v6764_v46  ;;  %v6827_v39 = vand.u32 2147483648, %v14320_v5  ;;  %v6790_v19 = vadd.f32 %v14322_v58, %v6789_v1  ;;  %v6834_v53 = vmul.f32 %v14364_v28, %v6833_v44 }
 0xa89   : > { %16912 = vst [vmem:[#allocation62_spill] sm:$0xff] %v14440_v7  ;;  %v6803_v16 = vsub.f32 1.0, %v6802_v26  ;;  %9882 = vpow2.f32 %v9003_v50  ;;  %v14472_v17 = vor.u32 1.1754944e-38, %v6842_v63  ;;  %v6847_v48 = vmul.f32 %v14437_v54, %v14356_v4 }
 0xa8a   : > { %v9001_v24 = vmul.f32 -1.442695, %v14414_v0  ;;  %vm6806_vm15 = vweird.f32 %v14310_v60  ;;  %v14478_v46 = vor.u32 1.1754944e-38, %v6812_v29  ;;  %v6892_v3 = vmul.f32 %v14450_v43, %v14362_v12 }
 0xa8b   : > { %v14446_v55 = vpop.f32.mrf.mxu1  ;;  %9884 = vrcp.f32 %v14459_v36  ;;  %v14488_v44 = vmul.f32 %v6769_v40, %v14100_v41  ;;  %vm14499_vm4 = vcmp.eq.f32.partialorder %v6840_v8, 8.507059e+37  ;;  %v14505_v41 = vor.u32 1.1754944e-38, %v6827_v39  ;;  %v14513_v8 = vpop.f32.mrf.mxu2 }
 0xa8c   : > { %v9879_v15 = vpop.eup %9878  ;;  %v6794_v10 = vsel %vm14494_vm0, %v14322_v58, %v6790_v19  ;;  %v6835_v29 = vadd.f32 %v14364_v28, %v6834_v53  ;;  %v6857_v40 = vand.u32 2147483648, %v14356_v4  ;;  %v6848_v18 = vsub.f32 1.0, %v6847_v48  ;;  %v14517_v39 = vpop.f32.mrf.mxu3 }
 0xa8d   : > { %v14483_v1 = vadd.f32 1.0, %v9879_v15  ;;  %v14485_v50 = vpop.eup %9880  ;;  %16915 = vst [vmem:[#allocation65_spill] sm:$0xff] %v14488_v44  ;;  %v6804_v15 = vmul.f32 %v14397_v62, %v6803_v16  ;;  %9886 = vpow2.f32 %v9001_v24  ;;  %vm6807_vm6 = vweird.f32 %v14397_v62 }
 0xa8e   : > { %v6893_v58 = vsub.f32 1.0, %v6892_v3  ;;  %v6862_v19 = vmul.f32 %v14485_v50, %v14403_v33  ;;  %v6799_v16 = vsel %vm14452_vm12, %v14426_v59, %v6794_v10  ;;  %vm14534_vm8 = vcmp.eq.f32.partialorder %v6810_v22, 8.507059e+37  ;;  %vm14573_vm11 = vmor %vm6806_vm15, %vm6807_vm6 }
 0xa8f   : > { %v9883_v52 = vpop.eup %9882  ;;  %9888 = vrcp.f32 %v14483_v1  ;;  %vm6822_vm9 = vweird.f32 %v14405_v6  ;;  %vm6851_vm10 = vweird.f32 %v14356_v4  ;;  %v6855_v3 = vand.u32 2147483647, %v14356_v4 }
 0xa90   : > { %v9004_v59 = vmul.f32 -1.442695, %v14446_v55  ;;  %v6839_v13 = vsel %vm14530_vm7, %v14364_v28, %v6835_v29  ;;  %v6805_v22 = vadd.f32 %v14397_v62, %v6804_v15  ;;  %v14554_v26 = vor.u32 1.1754944e-38, %v6857_v40  ;;  %v14562_v28 = vpop.f32.mrf.mxu0  ;;  %vm14593_vm12 = vmor %vm6821_vm5, %vm6822_vm9 }
 0xa91   : > { %v14544_v48 = vpop.eup %9884  ;;  %vm6896_vm2 = vweird.f32 %v14362_v12  ;;  %v9007_v10 = vmul.f32 -1.442695, %v14468_v14  ;;  %v6849_v44 = vmul.f32 %v14437_v54, %v6848_v18  ;;  %v14560_v7 = vadd.f32 1.0, %v9883_v52 }
 0xa92   : > { %6247 = vmatmul.bf16.gmra.mxu1 %v13935_v42  ;;  %6296 = vmatmul.bf16.gmra.mxu2 %v13935_v42  ;;  %9890 = vpow2.f32 %v9002_v20  ;;  %v6894_v29 = vmul.f32 %v14450_v43, %v6893_v58  ;;  %v6863_v15 = vsub.f32 1.0, %v6862_v19  ;;  %v9005_v40 = vmul.f32 -1.442695, %v14513_v8 }
 0xa93   : > { %6345 = vmatmul.bf16.gmra.mxu3 %v13935_v42  ;;  %6394 = vmatmul.bf16.gmra.mxu0 %v13935_v42  ;;  %v6818_v42 = vsub.f32 1.0, %v6817_v23  ;;  %v6825_v23 = vand.u32 2147483647, %v14320_v5  ;;  %v14542_v37 = vpop.f32.mrf.mxu1  ;;  %v9887_v53 = vpop.eup %9886  ;;  %v6900_v20 = vand.u32 2147483647, %v14362_v12  ;;  %9892 = vpow2.f32 %v9004_v59 }
 0xa94   : > { %v6844_v58 = vsel %vm14499_vm4, %v14472_v17, %v6839_v13  ;;  %v6809_v60 = vsel %vm14573_vm11, %v14397_v62, %v6805_v22  ;;  %vm6852_vm13 = vweird.f32 %v14437_v54  ;;  %vm14598_vm14 = vcmp.eq.f32.partialorder %v6855_v3, 8.507059e+37  ;;  %v14614_v59 = vpop.f32.mrf.mxu2 }
 0xa95   : > { %v6819_v30 = vmul.f32 %v14405_v6, %v6818_v42  ;;  %vm14550_vm1 = vcmp.eq.f32.partialorder %v6825_v23, 8.507059e+37  ;;  %v14565_v23 = vmul.f32 %v6799_v16, %v14119_v45  ;;  %v6877_v45 = vmul.f32 %v14544_v48, %v14459_v36  ;;  %v14581_v52 = vpop.eup %9888  ;;  %vm14634_vm3 = vmor %vm6851_vm10, %vm6852_vm13 }
 0xa96   : > { %vm6866_vm15 = vweird.f32 %v14403_v33  ;;  %9894 = vpow2.f32 %v9007_v10  ;;  %v6850_v62 = vadd.f32 %v14437_v54, %v6849_v44  ;;  %vm6897_vm0 = vweird.f32 %v14450_v43  ;;  %v14625_v10 = vpop.f32.mrf.mxu3 }
 0xa97   : > { %v6820_v25 = vadd.f32 %v14405_v6, %v6819_v30  ;;  %16926 = vst [vmem:[#allocation52_spill] sm:$0xff] %v14565_v23  ;;  %v6902_v30 = vand.u32 2147483648, %v14362_v12  ;;  %9896 = vrcp.f32 %v14560_v7  ;;  %v6895_v5 = vadd.f32 %v14450_v43, %v6894_v29  ;;  %vm14654_vm5 = vmor %vm6896_vm2, %vm6897_vm0 }
 0xa98   : > { %v6864_v63 = vmul.f32 %v14485_v50, %v6863_v15  ;;  %9898 = vpow2.f32 %v9005_v40  ;;  %v9006_v3 = vmul.f32 -1.442695, %v14517_v39  ;;  %v6878_v44 = vsub.f32 1.0, %v6877_v45  ;;  %v14674_v19 = vpop.f32.mrf.mxu0 }
 0xa99   : > { %v6824_v17 = vsel %vm14593_vm12, %v14405_v6, %v6820_v25  ;;  %v9891_v25 = vpop.eup %9890  ;;  %v14619_v6 = vmul.f32 %v6844_v58, %v14127_v57  ;;  %v6907_v13 = vmul.f32 %v14581_v52, %v14483_v1  ;;  %v14623_v22 = vadd.f32 1.0, %v9887_v53 }
 0xa9a   : > { %v6814_v29 = vsel %vm14534_vm8, %v14478_v46, %v6809_v60  ;;  %vm14638_vm4 = vcmp.eq.f32.partialorder %v6900_v20, 8.507059e+37  ;;  %v6870_v15 = vand.u32 2147483647, %v14403_v33  ;;  %v6872_v40 = vand.u32 2147483648, %v14403_v33  ;;  %v9893_v53 = vpop.eup %9892 }
 0xa9b   : > { %16933 = vst [vmem:[#allocation63_spill] sm:$0xff] %v14619_v6  ;;  %v6829_v46 = vsel %vm14550_vm1, %v14505_v41, %v6824_v17  ;;  %v6854_v4 = vsel %vm14634_vm3, %v14437_v54, %v6850_v62  ;;  %v6903_v18 = vor.u32 1.1754944e-38, %v6902_v30  ;;  %vm6867_vm6 = vweird.f32 %v14485_v50  ;;  %v14659_v20 = vpop.f32.mrf.mxu1 }
 0xa9c   : > { %v9895_v45 = vpop.eup %9894  ;;  %v6899_v41 = vsel %vm14654_vm5, %v14450_v43, %v6895_v5  ;;  %v6865_v54 = vadd.f32 %v14485_v50, %v6864_v63  ;;  %v14665_v24 = vadd.f32 1.0, %v9891_v25  ;;  %9900 = vpow2.f32 %v9006_v3  ;;  %vm14693_vm8 = vmor %vm6866_vm15, %vm6867_vm6 }
 0xa9d   : > { %v14667_v12 = vpop.eup %9896  ;;  %v14670_v58 = vmul.f32 %v6814_v29, %v14157_v2  ;;  %v6879_v30 = vmul.f32 %v14544_v48, %v6878_v44  ;;  %v6908_v60 = vsub.f32 1.0, %v6907_v13  ;;  %9902 = vrcp.f32 %v14623_v22 }
 0xa9e   : > { %v9899_v17 = vpop.eup %9898  ;;  %v14677_v43 = vmul.f32 %v6829_v46, %v14170_v51  ;;  %vm14679_vm7 = vcmp.eq.f32.partialorder %v6870_v15, 8.507059e+37  ;;  %v6873_v5 = vor.u32 1.1754944e-38, %v6872_v40  ;;  %v6885_v63 = vand.u32 2147483647, %v14459_v36 }
 0xa9f   : > { %16940 = vst [vmem:[#allocation24_spill] sm:$0xff] %v14670_v58  ;;  %v6859_v2 = vsel %vm14598_vm14, %v14554_v26, %v6854_v4  ;;  %v6904_v3 = vsel %vm14638_vm4, %v6903_v18, %v6899_v41  ;;  %v6887_v25 = vand.u32 2147483648, %v14459_v36  ;;  %v14698_v44 = vadd.f32 1.0, %v9893_v53  ;;  %v14722_v53 = vpop.f32.mrf.mxu2 }
 0xaa0   : > { %16941 = vst [vmem:[#allocation46_spill] sm:$0xff] %v14677_v43  ;;  %v6869_v16 = vsel %vm14693_vm8, %v14485_v50, %v6865_v54  ;;  %vm6882_vm9 = vweird.f32 %v14544_v48  ;;  %9904 = vrcp.f32 %v14665_v24  ;;  %v14705_v26 = vadd.f32 1.0, %v9895_v45  ;;  %v14767_v51 = vpop.f32.mrf.mxu0 }
 0xaa1   : > { %v6880_v33 = vadd.f32 %v14544_v48, %v6879_v30  ;;  %v6909_v13 = vmul.f32 %v14581_v52, %v6908_v60  ;;  %v6952_v29 = vmul.f32 %v14667_v12, %v14560_v7  ;;  %v14714_v15 = vmul.f32 %v6859_v2, %v14181_v31  ;;  %v14731_v31 = vpop.f32.mrf.mxu3  ;;  %16955 = vst [vmem:[#allocation72_spill] sm:$0xff] %v14767_v51 }
 0xaa2   : > { %6252 = vmatmul.bf16.gmra.mxu1 %v13970_v9  ;;  %6301 = vmatmul.bf16.gmra.mxu2 %v13970_v9  ;;  %v9901_v57 = vpop.eup %9900  ;;  %vm6881_vm10 = vweird.f32 %v14459_v36  ;;  %vm14717_vm1 = vcmp.eq.f32.partialorder %v6885_v63, 8.507059e+37  ;;  %v9008_v40 = vmul.f32 -1.442695, %v14542_v37  ;;  %v14727_v4 = vmul.f32 %v6904_v3, %v14196_v34 }
 0xaa3   : > { %6350 = vmatmul.bf16.gmra.mxu3 %v13970_v9  ;;  %6399 = vmatmul.bf16.gmra.mxu0 %v13970_v9  ;;  %v14711_v9 = vadd.f32 1.0, %v9899_v17  ;;  %16946 = vst [vmem:[#allocation73_spill] sm:$0xff] %v14714_v15  ;;  %v14724_v46 = vpop.eup %9902  ;;  %v6888_v42 = vor.u32 1.1754944e-38, %v6887_v25  ;;  %v6915_v18 = vand.u32 2147483647, %v14483_v1  ;;  %9906 = vrcp.f32 %v14698_v44  ;;  %vm14737_vm2 = vmor %vm6881_vm10, %vm6882_vm9  ;;  %v14749_v60 = vpop.f32.mrf.mxu1 }
 0xaa4   : > { %16949 = vst [vmem:[#allocation80_spill] sm:$0xff] %v14727_v4  ;;  %v6874_v36 = vsel %vm14679_vm7, %v6873_v5, %v6869_v16  ;;  %vm6912_vm11 = vweird.f32 %v14581_v52  ;;  %v6917_v34 = vand.u32 2147483648, %v14483_v1  ;;  %9908 = vrcp.f32 %v14705_v26 }
 0xaa5   : > { %v6884_v41 = vsel %vm14737_vm2, %v14544_v48, %v6880_v33  ;;  %v6910_v54 = vadd.f32 %v14581_v52, %v6909_v13  ;;  %v6953_v30 = vsub.f32 1.0, %v6952_v29  ;;  %9910 = vrcp.f32 %v14711_v9 }
 0xaa6   : > { %v14751_v17 = vpop.eup %9904  ;;  %v6962_v62 = vand.u32 2147483648, %v14560_v7  ;;  %v6922_v5 = vmul.f32 %v14724_v46, %v14623_v22  ;;  %v14756_v63 = vadd.f32 1.0, %v9901_v57  ;;  %9912 = vpow2.f32 %v9008_v40 }
 0xaa7   : > { %v14759_v2 = vmul.f32 %v6874_v36, %v14247_v61  ;;  %vm6911_vm12 = vweird.f32 %v14483_v1  ;;  %vm14762_vm13 = vcmp.eq.f32.partialorder %v6915_v18, 8.507059e+37  ;;  %v9011_v3 = vmul.f32 -1.442695, %v14562_v28 }
 0xaa8   : > { %v6889_v25 = vsel %vm14717_vm1, %v6888_v42, %v6884_v41  ;;  %vm14775_vm14 = vmor %vm6911_vm12, %vm6912_vm11  ;;  %v6918_v1 = vor.u32 1.1754944e-38, %v6917_v34  ;;  %v6960_v16 = vand.u32 2147483647, %v14560_v7  ;;  %v6932_v33 = vand.u32 2147483648, %v14623_v22  ;;  %v14860_v4 = vpop.f32.mrf.mxu0 }
 0xaa9   : > { %16952 = vst [vmem:[#allocation60_spill] sm:$0xff] %v14759_v2  ;;  %v14783_v13 = vpop.eup %9906  ;;  %v6914_v29 = vsel %vm14775_vm14, %v14581_v52, %v6910_v54  ;;  %v6954_v57 = vmul.f32 %v14667_v12, %v6953_v30  ;;  %vm6956_vm15 = vweird.f32 %v14560_v7  ;;  %v6937_v50 = vmul.f32 %v14751_v17, %v14665_v24 }
 0xaaa   : > { %v14792_v40 = vpop.eup %9908  ;;  %v6963_v42 = vor.u32 1.1754944e-38, %v6962_v62  ;;  %v6923_v18 = vsub.f32 1.0, %v6922_v5  ;;  %9914 = vrcp.f32 %v14756_v63  ;;  %v14799_v45 = vmul.f32 %v6889_v25, %v14301_v49  ;;  %v14814_v5 = vpop.f32.mrf.mxu2  ;;  %16969 = vst [vmem:[#allocation59_spill] sm:$0xff] %v14860_v4 }
 0xaab   : > { %v14796_v36 = vpop.eup %9910  ;;  %v6930_v52 = vand.u32 2147483647, %v14623_v22  ;;  %v6947_v34 = vand.u32 2147483648, %v14665_v24  ;;  %9916 = vpow2.f32 %v9011_v3  ;;  %v6919_v54 = vsel %vm14762_vm13, %v6918_v1, %v6914_v29  ;;  %16961 = vst [vmem:[#allocation50_spill] sm:$0xff] %v14814_v5  ;;  %v14820_v1 = vpop.f32.mrf.mxu3 }
 0xaac   : > { %16958 = vst [vmem:[#allocation30_spill] sm:$0xff] %v14799_v45  ;;  %v9913_v41 = vpop.eup %9912  ;;  %vm6957_vm0 = vweird.f32 %v14667_v12  ;;  %vm14806_vm3 = vcmp.eq.f32.partialorder %v6960_v16, 8.507059e+37  ;;  %vm6926_vm4 = vweird.f32 %v14623_v22  ;;  %v14811_v62 = vor.u32 1.1754944e-38, %v6932_v33  ;;  %v14834_v43 = vpop.f32.mrf.mxu1 }
 0xaad   : > { %v6945_v49 = vand.u32 2147483647, %v14665_v24  ;;  %v6955_v3 = vadd.f32 %v14667_v12, %v6954_v57  ;;  %v6938_v25 = vsub.f32 1.0, %v6937_v50  ;;  %v6967_v48 = vmul.f32 %v14783_v13, %v14698_v44  ;;  %16962 = vst [vmem:[#allocation66_spill] sm:$0xff] %v14820_v1  ;;  %vm14845_vm7 = vmor %vm6956_vm15, %vm6957_vm0 }
 0xaae   : > { %v9010_v61 = vmul.f32 -1.442695, %v14625_v10  ;;  %v6924_v16 = vmul.f32 %v14724_v46, %v6923_v18  ;;  %v7012_v33 = vmul.f32 %v14792_v40, %v14705_v26  ;;  %v9012_v29 = vmul.f32 -1.442695, %v14659_v20  ;;  %16963 = vst [vmem:[#allocation78_spill] sm:$0xff] %v14834_v43 }
 0xaaf   : > { %vm6927_vm5 = vweird.f32 %v14724_v46  ;;  %vm6941_vm6 = vweird.f32 %v14665_v24  ;;  %v14828_v57 = vor.u32 1.1754944e-38, %v6947_v34  ;;  %v6982_v50 = vmul.f32 %v14796_v36, %v14711_v9 }
 0xab0   : > { %v14832_v45 = vadd.f32 1.0, %v9913_v41  ;;  %v14836_v18 = vpop.eup %9914  ;;  %v14839_v2 = vmul.f32 %v6919_v54, %v14351_v11  ;;  %vm14849_vm8 = vcmp.eq.f32.partialorder %v6930_v52, 8.507059e+37  ;;  %vm6942_vm9 = vweird.f32 %v14751_v17  ;;  %vm14885_vm11 = vmor %vm6926_vm4, %vm6927_vm5 }
 0xab1   : > { %v6975_v41 = vand.u32 2147483647, %v14698_v44  ;;  %v6977_v58 = vand.u32 2147483648, %v14698_v44  ;;  %v9917_v11 = vpop.eup %9916  ;;  %v6959_v54 = vsel %vm14845_vm7, %v14667_v12, %v6955_v3  ;;  %v6939_v7 = vmul.f32 %v14751_v17, %v6938_v25  ;;  %vm14915_vm14 = vmor %vm6941_vm6, %vm6942_vm9 }
 0xab2   : > { %6257 = vmatmul.bf16.gmra.mxu1 %v14053_v35  ;;  %6306 = vmatmul.bf16.gmra.mxu2 %v14053_v35  ;;  %16964 = vst [vmem:[#allocation64_spill] sm:$0xff] %v14839_v2  ;;  %v6968_v2 = vsub.f32 1.0, %v6967_v48  ;;  %v6925_v52 = vadd.f32 %v14724_v46, %v6924_v16  ;;  %v7013_v6 = vsub.f32 1.0, %v7012_v33  ;;  %v9015_v15 = vmul.f32 -1.442695, %v14674_v19  ;;  %v14897_v22 = vpop.f32.mrf.mxu2 }
 0xab3   : > { %6355 = vmatmul.bf16.gmra.mxu3 %v14053_v35  ;;  %6404 = vmatmul.bf16.gmra.mxu0 %v14053_v35  ;;  %v9009_v35 = vmul.f32 -1.442695, %v14614_v59  ;;  %vm6971_vm10 = vweird.f32 %v14698_v44  ;;  %v6983_v23 = vsub.f32 1.0, %v6982_v50  ;;  %v6997_v32 = vmul.f32 %v14836_v18, %v14756_v63  ;;  %16974 = vst [vmem:[#allocation75_spill] sm:$0xff] %v14897_v22 }
 0xab4   : > { %v9013_v12 = vmul.f32 -1.442695, %v14722_v53  ;;  %vm14869_vm1 = vcmp.eq.f32.partialorder %v6945_v49, 8.507059e+37  ;;  %v14873_v48 = vor.u32 1.1754944e-38, %v6977_v58  ;;  %vm7016_vm2 = vweird.f32 %v14705_v26  ;;  %v14906_v49 = vpop.f32.mrf.mxu3 }
 0xab5   : > { %9918 = vpow2.f32 %v9009_v35  ;;  %v14877_v16 = vadd.f32 1.0, %v9917_v11  ;;  %v6964_v33 = vsel %vm14806_vm3, %v6963_v42, %v6959_v54  ;;  %v6940_v58 = vadd.f32 %v14751_v17, %v6939_v7  ;;  %16977 = vst [vmem:[#allocation71_spill] sm:$0xff] %v14906_v49 }
 0xab6   : > { %9920 = vpow2.f32 %v9010_v61  ;;  %v7020_v61 = vand.u32 2147483647, %v14705_v26  ;;  %v7022_v50 = vand.u32 2147483648, %v14705_v26  ;;  %v6929_v35 = vsel %vm14885_vm11, %v14724_v46, %v6925_v52 }
 0xab7   : > { %9922 = vpow2.f32 %v9012_v29  ;;  %v6969_v29 = vmul.f32 %v14783_v13, %v6968_v2  ;;  %v7014_v42 = vmul.f32 %v14792_v40, %v7013_v6  ;;  %vm6986_vm12 = vweird.f32 %v14711_v9 }
 0xab8   : > { %9924 = vrcp.f32 %v14832_v45  ;;  %vm14899_vm13 = vcmp.eq.f32.partialorder %v6975_v41, 8.507059e+37  ;;  %v6984_v2 = vmul.f32 %v14796_v36, %v6983_v23  ;;  %v6998_v54 = vsub.f32 1.0, %v6997_v32 }
 0xab9   : > { %9926 = vpow2.f32 %v9015_v15  ;;  %v14909_v6 = vmul.f32 %v6964_v33, %v14370_v38  ;;  %vm6972_vm15 = vweird.f32 %v14783_v13  ;;  %v6990_v32 = vand.u32 2147483647, %v14711_v9 }
 0xaba   : > { %9928 = vpow2.f32 %v9013_v12  ;;  %v6934_v38 = vsel %vm14849_vm8, %v14811_v62, %v6929_v35  ;;  %v6944_v24 = vsel %vm14915_vm14, %v14751_v17, %v6940_v58  ;;  %v6970_v41 = vadd.f32 %v14783_v13, %v6969_v29  ;;  %v14947_v58 = vpop.f32.mrf.mxu0  ;;  %vm14956_vm5 = vmor %vm6971_vm10, %vm6972_vm15 }
 0xabb   : > { %v9919_v3 = vpop.eup %9918  ;;  %16978 = vst [vmem:[#allocation67_spill] sm:$0xff] %v14909_v6  ;;  %9930 = vrcp.f32 %v14877_v16  ;;  %vm14931_vm0 = vcmp.eq.f32.partialorder %v7020_v61, 8.507059e+37  ;;  %v6992_v12 = vand.u32 2147483648, %v14711_v9  ;;  %v7015_v33 = vadd.f32 %v14792_v40, %v7014_v42 }
 0xabc   : > { %v9921_v30 = vpop.eup %9920  ;;  %v14904_v7 = vadd.f32 1.0, %v9919_v3  ;;  %v14936_v3 = vpop.f32.mrf.mxu1  ;;  %vm7017_vm3 = vweird.f32 %v14792_v40  ;;  %vm6987_vm4 = vweird.f32 %v14796_v36  ;;  %v9014_v62 = vmul.f32 -1.442695, %v14731_v31 }
 0xabd   : > { %v9923_v46 = vpop.eup %9922  ;;  %v6985_v17 = vadd.f32 %v14796_v36, %v6984_v2  ;;  %v6999_v34 = vmul.f32 %v14836_v18, %v6998_v54  ;;  %v14945_v61 = vadd.f32 1.0, %v9921_v30  ;;  %v14950_v35 = vmul.f32 %v6934_v38, %v14414_v0  ;;  %vm14974_vm6 = vmor %vm7016_vm2, %vm7017_vm3 }
 0xabe   : > { %v14922_v23 = vpop.eup %9924  ;;  %9932 = vrcp.f32 %v14904_v7  ;;  %v7023_v2 = vor.u32 1.1754944e-38, %v7022_v50  ;;  %v14962_v30 = vadd.f32 1.0, %v9923_v46  ;;  %v6949_v0 = vsel %vm14869_vm1, %v14828_v57, %v6944_v24  ;;  %vm14988_vm8 = vmor %vm6986_vm12, %vm6987_vm4 }
 0xabf   : > { %v9927_v29 = vpop.eup %9926  ;;  %16983 = vst [vmem:[#allocation79_spill] sm:$0xff] %v14950_v35  ;;  %v7027_v54 = vmul.f32 %v14922_v23, %v14832_v45  ;;  %v6974_v38 = vsel %vm14956_vm5, %v14783_v13, %v6970_v41  ;;  %vm14978_vm7 = vcmp.eq.f32.partialorder %v6990_v32, 8.507059e+37  ;;  %v6993_v46 = vor.u32 1.1754944e-38, %v6992_v12 }
 0xac0   : > { %v9929_v15 = vpop.eup %9928  ;;  %vm7002_vm9 = vweird.f32 %v14836_v18  ;;  %v7005_v26 = vand.u32 2147483647, %v14756_v63  ;;  %v7007_v57 = vand.u32 2147483648, %v14756_v63  ;;  %9934 = vpow2.f32 %v9014_v62  ;;  %v15009_v62 = vpop.f32.mrf.mxu2 }
 0xac1   : > { %v14982_v35 = vpop.eup %9930  ;;  %v7019_v25 = vsel %vm14974_vm6, %v14792_v40, %v7015_v33  ;;  %v6989_v32 = vsel %vm14988_vm8, %v14796_v36, %v6985_v17  ;;  %v7000_v9 = vadd.f32 %v14836_v18, %v6999_v34  ;;  %9936 = vrcp.f32 %v14945_v61 }
 0xac2   : > { %v6979_v24 = vsel %vm14899_vm13, %v14873_v48, %v6974_v38  ;;  %v7028_v41 = vsub.f32 1.0, %v7027_v54  ;;  %9938 = vrcp.f32 %v14962_v30  ;;  %v15007_v12 = vadd.f32 1.0, %v9927_v29  ;;  %v15021_v48 = vpop.f32.mrf.mxu3 }
 0xac3   : > { %v15014_v33 = vmul.f32 %v6949_v0, %v14429_v21  ;;  %vm7001_vm10 = vweird.f32 %v14756_v63  ;;  %v7072_v36 = vmul.f32 %v14982_v35, %v14877_v16  ;;  %v15019_v17 = vadd.f32 1.0, %v9929_v15 }
 0xac4   : > { %v15011_v40 = vpop.eup %9932  ;;  %v7024_v11 = vsel %vm14931_vm0, %v7023_v2, %v7019_v25  ;;  %v6994_v34 = vsel %vm14978_vm7, %v6993_v46, %v6989_v32  ;;  %vm15029_vm1 = vmor %vm7001_vm10, %vm7002_vm9  ;;  %vm15033_vm2 = vcmp.eq.f32.partialorder %v7005_v26, 8.507059e+37  ;;  %v7008_v29 = vor.u32 1.1754944e-38, %v7007_v57  ;;  %v15045_v15 = vpop.f32.mrf.mxu1 }
 0xac5   : > { %16992 = vst [vmem:[#allocation35_spill] sm:$0xff] %v15014_v33  ;;  %v15038_v42 = vmul.f32 %v6979_v24, %v14446_v55  ;;  %v7004_v52 = vsel %vm15029_vm1, %v14836_v18, %v7000_v9  ;;  %v7035_v2 = vand.u32 2147483647, %v14832_v45  ;;  %v7037_v54 = vand.u32 2147483648, %v14832_v45  ;;  %v15061_v26 = vpop.f32.mrf.mxu0 }
 0xac6   : > { %16998 = vst [vmem:[#allocation32_spill] sm:$0xff] %v15045_v15  ;;  %v9935_v0 = vpop.eup %9934  ;;  %v7029_v38 = vmul.f32 %v14922_v23, %v7028_v41  ;;  %v7042_v44 = vmul.f32 %v15011_v40, %v14904_v7  ;;  %9940 = vrcp.f32 %v15007_v12  ;;  %v9016_v55 = vmul.f32 -1.442695, %v14749_v60 }
 0xac7   : > { %16997 = vst [vmem:[#allocation69_spill] sm:$0xff] %v15038_v42  ;;  %v15052_v50 = vpop.eup %9936  ;;  %v15055_v18 = vmul.f32 %v7024_v11, %v14468_v14  ;;  %v15058_v46 = vmul.f32 %v6994_v34, %v14513_v8  ;;  %v7073_v13 = vsub.f32 1.0, %v7072_v36  ;;  %9942 = vrcp.f32 %v15019_v17 }
 0xac8   : > { %17001 = vst [vmem:[#allocation23_spill] sm:$0xff] %v15061_v26  ;;  %v15063_v57 = vpop.eup %9938  ;;  %v7009_v25 = vsel %vm15033_vm2, %v7008_v29, %v7004_v52  ;;  %vm7031_vm11 = vweird.f32 %v14832_v45  ;;  %v9019_v32 = vmul.f32 -1.442695, %v14767_v51  ;;  %v9017_v14 = vmul.f32 -1.442695, %v14814_v5 }
 0xac9   : > { %16999 = vst [vmem:[#allocation68_spill] sm:$0xff] %v15055_v18  ;;  %vm15070_vm12 = vcmp.eq.f32.partialorder %v7035_v2, 8.507059e+37  ;;  %v7038_v8 = vor.u32 1.1754944e-38, %v7037_v54  ;;  %v7080_v24 = vand.u32 2147483647, %v14877_v16  ;;  %v7082_v41 = vand.u32 2147483648, %v14877_v16 }
 0xaca   : > { %17000 = vst [vmem:[#allocation57_spill] sm:$0xff] %v15058_v46  ;;  %v15076_v36 = vadd.f32 1.0, %v9935_v0  ;;  %v7030_v11 = vadd.f32 %v14922_v23, %v7029_v38  ;;  %vm7032_vm13 = vweird.f32 %v14922_v23  ;;  %v7043_v34 = vsub.f32 1.0, %v7042_v44  ;;  %v15094_v44 = vpop.f32.mrf.mxu2  ;;  %v15112_v46 = vpop.f32.mrf.mxu3 }
 0xacb   : > { %v7057_v21 = vmul.f32 %v15052_v50, %v14945_v61  ;;  %v15083_v63 = vmul.f32 %v7009_v25, %v14517_v39  ;;  %v7074_v29 = vmul.f32 %v14982_v35, %v7073_v13  ;;  %vm7076_vm14 = vweird.f32 %v14877_v16  ;;  %17005 = vst [vmem:[#allocation29_spill] sm:$0xff] %v15094_v44  ;;  %vm15100_vm15 = vmor %vm7031_vm11, %vm7032_vm13 }
 0xacc   : > { %v7087_v52 = vmul.f32 %v15063_v57, %v14962_v30  ;;  %v15089_v2 = vpop.eup %9940  ;;  %v7050_v54 = vand.u32 2147483647, %v14904_v7  ;;  %v7052_v0 = vand.u32 2147483648, %v14904_v7  ;;  %9944 = vpow2.f32 %v9016_v55  ;;  %17010 = vst [vmem:[#allocation44_spill] sm:$0xff] %v15112_v46  ;;  %v15121_v6 = vpop.f32.mrf.mxu1 }
 0xacd   : > { %17004 = vst [vmem:[#allocation27_spill] sm:$0xff] %v15083_v63  ;;  %v9018_v38 = vmul.f32 -1.442695, %v14820_v1  ;;  %v15096_v39 = vpop.eup %9942  ;;  %vm7077_vm0 = vweird.f32 %v14982_v35  ;;  %vm15105_vm3 = vcmp.eq.f32.partialorder %v7080_v24, 8.507059e+37  ;;  %v7083_v63 = vor.u32 1.1754944e-38, %v7082_v41 }
 0xace   : > { %vm7046_vm4 = vweird.f32 %v14904_v7  ;;  %v7065_v55 = vand.u32 2147483647, %v14945_v61  ;;  %9946 = vrcp.f32 %v15076_v36  ;;  %v7034_v45 = vsel %vm15100_vm15, %v14922_v23, %v7030_v11  ;;  %vm15142_vm8 = vmor %vm7076_vm14, %vm7077_vm0 }
 0xacf   : > { %v7044_v33 = vmul.f32 %v15011_v40, %v7043_v34  ;;  %v7058_v18 = vsub.f32 1.0, %v7057_v21  ;;  %9948 = vpow2.f32 %v9019_v32  ;;  %v7075_v24 = vadd.f32 %v14982_v35, %v7074_v29  ;;  %v15134_v34 = vpop.f32.mrf.mxu0 }
 0xad0   : > { %v7088_v42 = vsub.f32 1.0, %v7087_v52  ;;  %v7132_v41 = vmul.f32 %v15089_v2, %v15007_v12  ;;  %9950 = vpow2.f32 %v9017_v14  ;;  %v7067_v27 = vand.u32 2147483648, %v14945_v61 }
 0xad1   : > { %v7097_v47 = vand.u32 2147483648, %v14962_v30  ;;  %v7102_v23 = vmul.f32 %v15096_v39, %v15019_v17  ;;  %9952 = vpow2.f32 %v9018_v38  ;;  %vm15127_vm5 = vcmp.eq.f32.partialorder %v7050_v54, 8.507059e+37 }
 0xad2   : > { %v7053_v32 = vor.u32 1.1754944e-38, %v7052_v0  ;;  %vm7061_vm6 = vweird.f32 %v14945_v61  ;;  %vm7091_vm7 = vweird.f32 %v14962_v30  ;;  %v7095_v14 = vand.u32 2147483647, %v14962_v30  ;;  %v9945_v21 = vpop.eup %9944 }
 0xad3   : > { %v7039_v29 = vsel %vm15070_vm12, %v7038_v8, %v7034_v45  ;;  %vm7047_vm9 = vweird.f32 %v15011_v40  ;;  %v7059_v54 = vmul.f32 %v15052_v50, %v7058_v18  ;;  %v7142_v0 = vand.u32 2147483648, %v15007_v12 }
 0xad4   : > { %v15149_v38 = vpop.eup %9946  ;;  %v7079_v9 = vsel %vm15142_vm8, %v14982_v35, %v7075_v24  ;;  %v7045_v8 = vadd.f32 %v15011_v40, %v7044_v33  ;;  %v7089_v16 = vmul.f32 %v15063_v57, %v7088_v42  ;;  %v7133_v13 = vsub.f32 1.0, %v7132_v41  ;;  %vm15179_vm13 = vmor %vm7046_vm4, %vm7047_vm9  ;;  %v15187_v41 = vpop.f32.mrf.mxu2 }
 0xad5   : > { %v9949_v45 = vpop.eup %9948  ;;  %vm15156_vm10 = vcmp.eq.f32.partialorder %v7065_v55, 8.507059e+37  ;;  %v7068_v1 = vor.u32 1.1754944e-38, %v7067_v27  ;;  %v7098_v18 = vor.u32 1.1754944e-38, %v7097_v47  ;;  %v7140_v5 = vand.u32 2147483647, %v15007_v12 }
 0xad6   : > { %v7103_v51 = vsub.f32 1.0, %v7102_v23  ;;  %v9951_v46 = vpop.eup %9950  ;;  %v15162_v52 = vmul.f32 %v7039_v29, %v14542_v37  ;;  %vm7062_vm1 = vweird.f32 %v15052_v50  ;;  %vm7092_vm2 = vweird.f32 %v15063_v57  ;;  %v9313_v23 = vld [vmem:[%s10484_s21 + $0x38] sm:$0xff] }
 0xad7   : > { %vm15166_vm11 = vcmp.eq.f32.partialorder %v7095_v14, 8.507059e+37  ;;  %vm7136_vm12 = vweird.f32 %v15007_v12  ;;  %v15171_v27 = vadd.f32 1.0, %v9945_v21  ;;  %v9953_v47 = vpop.eup %9952  ;;  %v7084_v33 = vsel %vm15105_vm3, %v7083_v63, %v7079_v9  ;;  %v15197_v21 = vpop.f32.mrf.mxu3  ;;  %v9321_v9 = vld [vmem:[%s10484_s21 + $0x78] sm:$0xff]  ;;  %8042 = vmatpush.bf16.msrb.mxu1 %v9313_v23  ;;  %vm15212_vm15 = vmor %vm7061_vm6, %vm7062_vm1 }
 0xad8   : > { %17017 = vst [vmem:[#allocation58_spill] sm:$0xff] %v15162_v52  ;;  %v7060_v42 = vadd.f32 %v15052_v50, %v7059_v54  ;;  %v15184_v55 = vor.u32 1.1754944e-38, %v7142_v0  ;;  %v9024_v24 = vmul.f32 -1.442695, %v14936_v3  ;;  %v7049_v63 = vsel %vm15179_vm13, %v15011_v40, %v7045_v8  ;;  %vm15237_vm3 = vmor %vm7091_vm7, %vm7092_vm2  ;;  %8091 = vmatpush.bf16.msrb.mxu2 %v9321_v9  ;;  %v15248_v30 = vpop.f32.mrf.mxu0 }
 0xad9   : > { %v7090_v7 = vadd.f32 %v15063_v57, %v7089_v16  ;;  %v7134_v25 = vmul.f32 %v15089_v2, %v7133_v13  ;;  %v15195_v14 = vadd.f32 1.0, %v9949_v45  ;;  %v7104_v29 = vmul.f32 %v15096_v39, %v7103_v51  ;;  %v15226_v13 = vpop.f32.mrf.mxu1  ;;  %17030 = vst [vmem:[#allocation37_spill] sm:$0xff] %v15248_v30 }
 0xada   : > { %vm7106_vm14 = vweird.f32 %v15019_v17  ;;  %v7110_v54 = vand.u32 2147483647, %v15019_v17  ;;  %v15202_v0 = vadd.f32 1.0, %v9951_v46  ;;  %v15206_v40 = vmul.f32 %v7084_v33, %v14562_v28  ;;  %v9329_v28 = vld [vmem:[%s10484_s21 + $0xb8] sm:$0xff]  ;;  %17027 = vst [vmem:[#allocation41_spill] sm:$0xff] %v15226_v13 }
 0xadb   : > { %vm15216_vm0 = vcmp.eq.f32.partialorder %v7140_v5, 8.507059e+37  ;;  %v7117_v46 = vmul.f32 %v15149_v38, %v15076_v36  ;;  %9954 = vrcp.f32 %v15171_v27  ;;  %v15223_v16 = vadd.f32 1.0, %v9953_v47  ;;  %8140 = vmatpush.bf16.msrb.mxu3 %v9329_v28  ;;  %v9320_v28 = vld [vmem:[%s10484_s21 + $0x70] sm:$0xff] }
 0xadc   : > { %17022 = vst [vmem:[#allocation55_spill] sm:$0xff] %v15206_v40  ;;  %v7054_v61 = vsel %vm15127_vm5, %v7053_v32, %v7049_v63  ;;  %v7064_v5 = vsel %vm15212_vm15, %v15052_v50, %v7060_v42  ;;  %9956 = vpow2.f32 %v9024_v24  ;;  %v9027_v47 = vmul.f32 -1.442695, %v14947_v58  ;;  %8092 = vmatpush.bf16.msrb.mxu2 %v9320_v28 }
 0xadd   : > { %v7094_v11 = vsel %vm15237_vm3, %v15063_v57, %v7090_v7  ;;  %v7135_v32 = vadd.f32 %v15089_v2, %v7134_v25  ;;  %vm7137_vm4 = vweird.f32 %v15089_v2  ;;  %9958 = vrcp.f32 %v15195_v14  ;;  %v9337_v25 = vld [vmem:[%s10484_s21 + $0xf8] sm:$0xff] }
 0xade   : > { %v7105_v50 = vadd.f32 %v15096_v39, %v7104_v29  ;;  %vm7107_vm5 = vweird.f32 %v15096_v39  ;;  %v7112_v33 = vand.u32 2147483648, %v15019_v17  ;;  %9960 = vrcp.f32 %v15202_v0  ;;  %vm15265_vm6 = vmor %vm7136_vm12, %vm7137_vm4  ;;  %8189 = vmatpush.bf16.msrb.mxu0 %v9337_v25 }
 0xadf   : > { %v7069_v57 = vsel %vm15156_vm10, %v7068_v1, %v7064_v5  ;;  %v7118_v37 = vsub.f32 1.0, %v7117_v46  ;;  %9962 = vrcp.f32 %v15223_v16  ;;  %v9020_v42 = vmul.f32 -1.442695, %v14834_v43  ;;  %vm15277_vm7 = vmor %vm7106_vm14, %vm7107_vm5  ;;  %v15296_v46 = vpop.f32.mrf.mxu2  ;;  %v9312_v5 = vld [vmem:[%s10484_s21 + $0x30] sm:$0xff] }
 0xae0   : > { %v15259_v24 = vmul.f32 %v7054_v61, %v14614_v59  ;;  %v7099_v23 = vsel %vm15166_vm11, %v7098_v18, %v7094_v11  ;;  %9964 = vpow2.f32 %v9027_v47  ;;  %v9025_v56 = vmul.f32 -1.442695, %v15009_v62  ;;  %17039 = vst [vmem:[#allocation76_spill] sm:$0xff] %v15296_v46  ;;  %v9328_v61 = vld [vmem:[%s10484_s21 + $0xb0] sm:$0xff]  ;;  %8043 = vmatpush.bf16.msrb.mxu1 %v9312_v5  ;;  %v15329_v51 = vpop.f32.mrf.mxu0 }
 0xae1   : > { %v15270_v1 = vpop.eup %9954  ;;  %v7139_v59 = vsel %vm15265_vm6, %v15089_v2, %v7135_v32  ;;  %v7125_v18 = vand.u32 2147483647, %v15076_v36  ;;  %v7127_v35 = vand.u32 2147483648, %v15076_v36  ;;  %v9023_v7 = vmul.f32 -1.442695, %v14860_v4  ;;  %v15310_v32 = vpop.f32.mrf.mxu1  ;;  %8141 = vmatpush.bf16.msrb.mxu3 %v9328_v61  ;;  %17045 = vst [vmem:[#allocation83_spill] sm:$0xff] %v15329_v51 }
 0xae2   : > { %17031 = vst [vmem:[#allocation40_spill] sm:$0xff] %v15259_v24  ;;  %v9957_v29 = vpop.eup %9956  ;;  %v15286_v9 = vmul.f32 %v7069_v57, %v14625_v10  ;;  %v7109_v17 = vsel %vm15277_vm7, %v15096_v39, %v7105_v50  ;;  %vm15291_vm8 = vcmp.eq.f32.partialorder %v7110_v54, 8.507059e+37  ;;  %v9021_v8 = vmul.f32 -1.442695, %v14897_v22  ;;  %v15307_v39 = vpop.f32.mrf.mxu3  ;;  %v9336_v54 = vld [vmem:[%s10484_s21 + $0xf0] sm:$0xff]  ;;  %v9310_v22 = vld [vmem:[%s10484_s21 + $0x20] sm:$0xff] }
 0xae3   : > { %v15301_v45 = vpop.eup %9958  ;;  %v15304_v10 = vmul.f32 %v7099_v23, %v14659_v20  ;;  %v7113_v47 = vor.u32 1.1754944e-38, %v7112_v33  ;;  %v7119_v11 = vmul.f32 %v15149_v38, %v7118_v37  ;;  %9966 = vpow2.f32 %v9020_v42  ;;  %17041 = vst [vmem:[#allocation81_spill] sm:$0xff] %v15307_v39  ;;  %8190 = vmatpush.bf16.msrb.mxu0 %v9336_v54  ;;  %v9319_v42 = vld [vmem:[%s10484_s21 + $0x68] sm:$0xff] }
 0xae4   : > { %17036 = vst [vmem:[#allocation51_spill] sm:$0xff] %v15286_v9  ;;  %v15312_v50 = vpop.eup %9960  ;;  %v7144_v57 = vsel %vm15216_vm0, %v15184_v55, %v7139_v59  ;;  %vm7121_vm9 = vweird.f32 %v15076_v36  ;;  %v7147_v20 = vmul.f32 %v15270_v1, %v15171_v27  ;;  %9968 = vpow2.f32 %v9025_v56  ;;  %8093 = vmatpush.bf16.msrb.mxu2 %v9319_v42 }
 0xae5   : > { %17040 = vst [vmem:[#allocation22_spill] sm:$0xff] %v15304_v10  ;;  %v15320_v33 = vpop.eup %9962  ;;  %v7114_v37 = vsel %vm15291_vm8, %v7113_v47, %v7109_v17  ;;  %vm15324_vm10 = vcmp.eq.f32.partialorder %v7125_v18, 8.507059e+37  ;;  %v7128_v23 = vor.u32 1.1754944e-38, %v7127_v35  ;;  %9970 = vpow2.f32 %v9023_v7  ;;  %v9311_v47 = vld [vmem:[%s10484_s21 + $0x28] sm:$0xff] }
 0xae6   : > { %17042 = vst [vmem:[#allocation82_spill] sm:$0xff] %v15310_v32  ;;  %v9022_v55 = vmul.f32 -1.442695, %v14906_v49  ;;  %v9965_v63 = vpop.eup %9964  ;;  %v7157_v56 = vand.u32 2147483648, %v15171_v27  ;;  %v7192_v59 = vmul.f32 %v15301_v45, %v15195_v14  ;;  %9972 = vpow2.f32 %v9021_v8  ;;  %8044 = vmatpush.bf16.msrb.mxu1 %v9311_v47 }
 0xae7   : > { %v15334_v12 = vadd.f32 1.0, %v9957_v29  ;;  %v7120_v18 = vadd.f32 %v15149_v38, %v7119_v11  ;;  %vm7122_vm1 = vweird.f32 %v15149_v38  ;;  %v7162_v35 = vmul.f32 %v15312_v50, %v15202_v0  ;;  %v9335_v11 = vld [vmem:[%s10484_s21 + $0xe8] sm:$0xff] }
 0xae8   : > { %v9026_v7 = vmul.f32 -1.442695, %v15021_v48  ;;  %v15342_v25 = vmul.f32 %v7144_v57, %v14674_v19  ;;  %v15345_v17 = vmul.f32 %v7114_v37, %v14722_v53  ;;  %v7148_v2 = vsub.f32 1.0, %v7147_v20  ;;  %vm15361_vm2 = vmor %vm7121_vm9, %vm7122_vm1  ;;  %8191 = vmatpush.bf16.msrb.mxu0 %v9335_v11  ;;  %v15392_v11 = vpop.f32.mrf.mxu0 }
 0xae9   : > { %v7177_v29 = vmul.f32 %v15320_v33, %v15223_v16  ;;  %v9967_v8 = vpop.eup %9966  ;;  %v7202_v28 = vand.u32 2147483648, %v15195_v14  ;;  %9974 = vpow2.f32 %v9022_v55  ;;  %v15350_v61 = vadd.f32 1.0, %v9965_v63  ;;  %17053 = vst [vmem:[#allocation89_spill] sm:$0xff] %v15392_v11 }
 0xaea   : > { %17046 = vst [vmem:[#allocation84_spill] sm:$0xff] %v15342_v25  ;;  %v15353_v5 = vmul.f32 -1.442695, %v15045_v15  ;;  %v9969_v19 = vpop.eup %9968  ;;  %vm7151_vm11 = vweird.f32 %v15171_v27  ;;  %v7155_v54 = vand.u32 2147483647, %v15171_v27  ;;  %v15367_v57 = vor.u32 1.1754944e-38, %v7157_v56  ;;  %v15374_v15 = vpop.f32.mrf.mxu2  ;;  %8045 = vmatpush.bf16.msrb.mxu1 %v9310_v22 }
 0xaeb   : > { %17047 = vst [vmem:[#allocation85_spill] sm:$0xff] %v15345_v17  ;;  %v7193_v20 = vsub.f32 1.0, %v7192_v59  ;;  %9976 = vrcp.f32 %v15334_v12  ;;  %v9971_v37 = vpop.eup %9970  ;;  %v7124_v55 = vsel %vm15361_vm2, %v15149_v38, %v7120_v18  ;;  %v7200_v36 = vand.u32 2147483647, %v15195_v14  ;;  %v15376_v49 = vpop.f32.mrf.mxu3  ;;  %v9318_v27 = vld [vmem:[%s10484_s21 + $0x60] sm:$0xff] }
 0xaec   : > { %v7163_v63 = vsub.f32 1.0, %v7162_v35  ;;  %9978 = vpow2.f32 %v9026_v7  ;;  %17050 = vst [vmem:[#allocation86_spill] sm:$0xff] %v15374_v15  ;;  %v9973_v56 = vpop.eup %9972  ;;  %v7149_v59 = vmul.f32 %v15270_v1, %v7148_v2  ;;  %vm7196_vm12 = vweird.f32 %v15195_v14  ;;  %v15390_v2 = vpop.f32.mrf.mxu1  ;;  %v9326_v25 = vld [vmem:[%s10484_s21 + $0xa0] sm:$0xff]  ;;  %8094 = vmatpush.bf16.msrb.mxu2 %v9318_v27  ;;  %v9332_v14 = vld [vmem:[%s10484_s21 + $0xd0] sm:$0xff] }
 0xaed   : > { %17051 = vst [vmem:[#allocation87_spill] sm:$0xff] %v15376_v49  ;;  %v7172_v53 = vand.u32 2147483648, %v15202_v0  ;;  %v7178_v38 = vsub.f32 1.0, %v7177_v29  ;;  %v15381_v18 = vadd.f32 1.0, %v9967_v8  ;;  %v15383_v35 = vor.u32 1.1754944e-38, %v7202_v28  ;;  %v9334_v29 = vld [vmem:[%s10484_s21 + $0xe0] sm:$0xff] }
 0xaee   : > { %vm7166_vm13 = vweird.f32 %v15202_v0  ;;  %v7170_v7 = vand.u32 2147483647, %v15202_v0  ;;  %9980 = vrcp.f32 %v15350_v61  ;;  %v15388_v47 = vadd.f32 1.0, %v9969_v19  ;;  %17052 = vst [vmem:[#allocation88_spill] sm:$0xff] %v15390_v2  ;;  %8192 = vmatpush.bf16.msrb.mxu0 %v9334_v29  ;;  %v9325_v28 = vld [vmem:[%s10484_s21 + $0x98] sm:$0xff] }
 0xaef   : > { %v7129_v8 = vsel %vm15324_vm10, %v7128_v23, %v7124_v55  ;;  %vm15398_vm14 = vcmp.eq.f32.partialorder %v7155_v54, 8.507059e+37  ;;  %v7194_v4 = vmul.f32 %v15301_v45, %v7193_v20  ;;  %v7185_v43 = vand.u32 2147483647, %v15223_v16  ;;  %v9975_v17 = vpop.eup %9974  ;;  %v9327_v23 = vld [vmem:[%s10484_s21 + $0xa8] sm:$0xff] }
 0xaf0   : > { %v15404_v19 = vadd.f32 1.0, %v9971_v37  ;;  %vm7152_vm15 = vweird.f32 %v15270_v1  ;;  %v7164_v9 = vmul.f32 %v15312_v50, %v7163_v63  ;;  %vm7181_vm0 = vweird.f32 %v15223_v16  ;;  %8142 = vmatpush.bf16.msrb.mxu3 %v9327_v23 }
 0xaf1   : > { %v15409_v24 = vadd.f32 1.0, %v9973_v56  ;;  %v15413_v54 = vpop.eup %9976  ;;  %v7150_v20 = vadd.f32 %v15270_v1, %v7149_v59  ;;  %vm15416_vm3 = vcmp.eq.f32.partialorder %v7200_v36, 8.507059e+37  ;;  %v15420_v55 = vor.u32 1.1754944e-38, %v7172_v53  ;;  %v9309_v59 = vld [vmem:[%s10484_s21 + $0x18] sm:$0xff]  ;;  %vm15450_vm8 = vmor %vm7151_vm11, %vm7152_vm15 }
 0xaf2   : > { %v7179_v63 = vmul.f32 %v15320_v33, %v7178_v38  ;;  %9982 = vrcp.f32 %v15381_v18  ;;  %v9979_v56 = vpop.eup %9978  ;;  %v15425_v22 = vmul.f32 %v7129_v8, %v14731_v31  ;;  %vm7197_vm4 = vweird.f32 %v15301_v45  ;;  %v9333_v53 = vld [vmem:[%s10484_s21 + $0xd8] sm:$0xff]  ;;  %v15458_v23 = vpop.f32.mrf.mxu2  ;;  %8046 = vmatpush.bf16.msrb.mxu1 %v9309_v59 }
 0xaf3   : > { %17056 = vst [vmem:[#allocation90_spill] sm:$0xff] %v15409_v24  ;;  %vm15428_vm5 = vcmp.eq.f32.partialorder %v7170_v7, 8.507059e+37  ;;  %v7187_v36 = vand.u32 2147483648, %v15223_v16  ;;  %9984 = vrcp.f32 %v15388_v47  ;;  %v7195_v38 = vadd.f32 %v15301_v45, %v7194_v4  ;;  %8193 = vmatpush.bf16.msrb.mxu0 %v9333_v53  ;;  %vm15478_vm10 = vmor %vm7196_vm12, %vm7197_vm4 }
 0xaf4   : > { %17059 = vst [vmem:[#allocation91_spill] sm:$0xff] %v15425_v22  ;;  %vm7167_vm6 = vweird.f32 %v15312_v50  ;;  %vm15438_vm7 = vcmp.eq.f32.partialorder %v7185_v43, 8.507059e+37  ;;  %9986 = vrcp.f32 %v15404_v19  ;;  %v9032_v7 = vmul.f32 -1.442695, %v15121_v6  ;;  %v15444_v8 = vpop.eup %9980  ;;  %v15460_v22 = vpop.f32.mrf.mxu3  ;;  %8143 = vmatpush.bf16.msrb.mxu3 %v9326_v25 }
 0xaf5   : > { %v7165_v4 = vadd.f32 %v15312_v50, %v7164_v9  ;;  %vm7182_vm9 = vweird.f32 %v15320_v33  ;;  %9988 = vrcp.f32 %v15409_v24  ;;  %v9035_v43 = vmul.f32 -1.442695, %v15134_v34  ;;  %17066 = vst [vmem:[#allocation92_spill] sm:$0xff] %v15458_v23  ;;  %vm15501_vm1 = vmor %vm7166_vm13, %vm7167_vm6 }
 0xaf6   : > { %17067 = vst [vmem:[#allocation93_spill] sm:$0xff] %v15460_v22  ;;  %v7154_v9 = vsel %vm15450_vm8, %v15270_v1, %v7150_v20  ;;  %v7180_v10 = vadd.f32 %v15320_v33, %v7179_v63  ;;  %v15470_v40 = vmul.f32 %v15413_v54, %v15334_v12  ;;  %v15472_v52 = vadd.f32 1.0, %v9979_v56  ;;  %v15486_v20 = vpop.f32.mrf.mxu1  ;;  %v15488_v63 = vpop.f32.mrf.mxu0  ;;  %v9308_v56 = vld [vmem:[%s10484_s21 + $0x10] sm:$0xff]  ;;  %vm15522_vm2 = vmor %vm7181_vm0, %vm7182_vm9 }
 0xaf7   : > { %v7188_v53 = vor.u32 1.1754944e-38, %v7187_v36  ;;  %v15482_v24 = vadd.f32 1.0, %v9975_v17  ;;  %9990 = vpow2.f32 %v15353_v5  ;;  %v9031_v1 = vmul.f32 -1.442695, %v15061_v26  ;;  %8047 = vmatpush.bf16.msrb.mxu1 %v9308_v56  ;;  %8194 = vmatpush.bf16.msrb.mxu0 %v9332_v14  ;;  %v9324_v5 = vld [vmem:[%s10484_s21 + $0x90] sm:$0xff] }
 0xaf8   : > { %v15492_v42 = vpop.eup %9982  ;;  %v7199_v17 = vsel %vm15478_vm10, %v15301_v45, %v7195_v38  ;;  %v15507_v25 = vmul.f32 %v15444_v8, %v15350_v61  ;;  %9992 = vpow2.f32 %v9032_v7  ;;  %v9033_v36 = vmul.f32 -1.442695, %v15187_v41  ;;  %8144 = vmatpush.bf16.msrb.mxu3 %v9325_v28 }
 0xaf9   : > { %17070 = vst [vmem:[#allocation94_spill] sm:$0xff] %v15482_v24  ;;  %v15510_v27 = vpop.eup %9984  ;;  %v7159_v45 = vsel %vm15398_vm14, %v15367_v57, %v7154_v9  ;;  %v7169_v0 = vsel %vm15501_vm1, %v15312_v50, %v7165_v4  ;;  %v7277_v7 = vand.u32 2147483648, %v15334_v12  ;;  %9994 = vpow2.f32 %v9035_v43  ;;  %v9317_v57 = vld [vmem:[%s10484_s21 + $0x58] sm:$0xff] }
 0xafa   : > { %v15529_v9 = vpop.eup %9986  ;;  %v7184_v50 = vsel %vm15522_vm2, %v15320_v33, %v7180_v10  ;;  %v7268_v16 = vsub.f32 1.0, %v15470_v40  ;;  %9996 = vrcp.f32 %v15472_v52  ;;  %v9029_v4 = vmul.f32 -1.442695, %v15094_v44  ;;  %8095 = vmatpush.bf16.msrb.mxu2 %v9317_v57  ;;  %v9307_v40 = vld [vmem:[%s10484_s21 + $0x8] sm:$0xff]  ;;  %v15562_v28 = vpop.f32.mrf.mxu2 }
 0xafb   : > { %v15537_v43 = vpop.eup %9988  ;;  %v7204_v59 = vsel %vm15416_vm3, %v15383_v35, %v7199_v17  ;;  %9998 = vrcp.f32 %v15482_v24  ;;  %v7275_v56 = vand.u32 2147483647, %v15334_v12  ;;  %v9034_v10 = vmul.f32 -1.442695, %v15197_v21  ;;  %v9331_v33 = vld [vmem:[%s10484_s21 + $0xc8] sm:$0xff]  ;;  %v9316_v17 = vld [vmem:[%s10484_s21 + $0x50] sm:$0xff]  ;;  %8048 = vmatpush.bf16.msrb.mxu1 %v9307_v40 }
 0xafc   : > { %17075 = vst [vmem:[#allocation95_spill] sm:$0xff] %v15537_v43  ;;  %v7174_v14 = vsel %vm15428_vm5, %v15420_v55, %v7169_v0  ;;  %vm7271_vm11 = vweird.f32 %v15334_v12  ;;  %v7313_v35 = vsub.f32 1.0, %v15507_v25  ;;  %v7282_v37 = vmul.f32 %v15510_v27, %v15388_v47  ;;  %v17077_v55 = vld [vmem:[#allocation44_spill] sm:$0xff]  ;;  %v15564_v44 = vpop.f32.mrf.mxu3  ;;  %8195 = vmatpush.bf16.msrb.mxu0 %v9331_v33  ;;  %v9306_v25 = vld [vmem:[%s10484_s21] sm:$0xff]  ;;  %8145 = vmatpush.bf16.msrb.mxu3 %v9324_v5 }
 0xafd   : > { %10000 = vpow2.f32 %v9033_v36  ;;  %v9991_v38 = vpop.eup %9990  ;;  %v15557_v57 = vmul.f32 %v7159_v45, %v14749_v60  ;;  %v7189_v29 = vsel %vm15438_vm7, %v7188_v53, %v7184_v50  ;;  %v9030_v0 = vmul.f32 -1.442695, %v17077_v55  ;;  %v9330_v36 = vld [vmem:[%s10484_s21 + $0xc0] sm:$0xff]  ;;  %v17078_v24 = vld [vmem:[#allocation72_spill] sm:$0xff] }
 0xafe   : > { %10002 = vpow2.f32 %v9031_v1  ;;  %v9993_v26 = vpop.eup %9992  ;;  %v15569_v60 = vmul.f32 %v7204_v59, %v17078_v24  ;;  %v7269_v31 = vmul.f32 %v15413_v54, %v7268_v16  ;;  %v15572_v53 = vor.u32 1.1754944e-38, %v7277_v7  ;;  %v17080_v45 = vld [vmem:[#allocation50_spill] sm:$0xff]  ;;  %v6225_v55 = vpop.f32.mrf.mxu1  ;;  %8096 = vmatpush.bf16.msrb.mxu2 %v9316_v17  ;;  %v9315_v24 = vld [vmem:[%s10484_s21 + $0x48] sm:$0xff] }
 0xaff   : > { %17076 = vst [vmem:[#allocation96_spill] sm:$0xff] %v15557_v57  ;;  %10004 = vpow2.f32 %v9029_v4  ;;  %v9995_v1 = vpop.eup %9994  ;;  %v15575_v50 = vmul.f32 %v7174_v14, %v17080_v45  ;;  %v7320_v40 = vand.u32 2147483647, %v15350_v61  ;;  %v7322_v33 = vand.u32 2147483648, %v15350_v61  ;;  %v15579_v57 = vpop.f32.mrf.mxu0  ;;  %v9323_v59 = vld [vmem:[%s10484_s21 + $0x88] sm:$0xff]  ;;  %v17082_v7 = vld [vmem:[#allocation66_spill] sm:$0xff]  ;;  %8049 = vmatpush.bf16.msrb.mxu1 %v9306_v25 }
 0xb00   : > { %17079 = vst [vmem:[#allocation72_spill] sm:$0xff] %v15569_v60  ;;  %10006 = vpow2.f32 %v9034_v10  ;;  %v15583_v16 = vpop.eup %9996  ;;  %v15586_v4 = vmul.f32 %v7189_v29, %v17082_v7  ;;  %vm7272_vm12 = vweird.f32 %v15413_v54  ;;  %vm15589_vm13 = vcmp.eq.f32.partialorder %v7275_v56, 8.507059e+37  ;;  %8196 = vmatpush.bf16.msrb.mxu0 %v9330_v36  ;;  %8146 = vmatpush.bf16.msrb.mxu3 %v9323_v59  ;;  %v9322_v36 = vld [vmem:[%s10484_s21 + $0x80] sm:$0xff] }
 0xb01   : > { %17081 = vst [vmem:[#allocation50_spill] sm:$0xff] %v15575_v50  ;;  %v7314_v10 = vmul.f32 %v15444_v8, %v7313_v35  ;;  %v7283_v45 = vsub.f32 1.0, %v7282_v37  ;;  %v15594_v50 = vpop.eup %9998  ;;  %vm7316_vm14 = vweird.f32 %v15350_v61  ;;  %v7290_v17 = vand.u32 2147483647, %v15388_v47  ;;  %v17087_v35 = vld [vmem:[#allocation28_spill] sm:$0xff]  ;;  %vm15623_vm3 = vmor %vm7271_vm11, %vm7272_vm12 }
 0xb02   : > { %17083 = vst [vmem:[#allocation66_spill] sm:$0xff] %v15586_v4  ;;  %v15598_v5 = vadd.f32 1.0, %v9991_v38  ;;  %10008 = vpow2.f32 %v9030_v0  ;;  %v7270_v29 = vadd.f32 %v15413_v54, %v7269_v31  ;;  %v15601_v7 = vadd.f32 1.0, %v9993_v26  ;;  %v17088_v4 = vld [vmem:[#allocation45_spill] sm:$0xff]  ;;  %8097 = vmatpush.bf16.msrb.mxu2 %v9315_v24  ;;  %v9314_v26 = vld [vmem:[%s10484_s21 + $0x40] sm:$0xff]  ;;  %v6274_v59 = vpop.f32.mrf.mxu2 }
 0xb03   : > { %17086 = vst [vmem:[#allocation97_spill] sm:$0xff] %v15594_v50  ;;  %v10001_v56 = vpop.eup %10000  ;;  %v7690_v37 = vmul.f32 %v17087_v35, %v15486_v20  ;;  %v7694_v60 = vmul.f32 %v17088_v4, %v6225_v55  ;;  %vm15606_vm15 = vcmp.eq.f32.partialorder %v7320_v40, 8.507059e+37  ;;  %v7323_v38 = vor.u32 1.1754944e-38, %v7322_v33 }
 0xb04   : > { %v10003_v50 = vpop.eup %10002  ;;  %v7297_v0 = vmul.f32 %v15583_v16, %v15472_v52  ;;  %v15612_v25 = vadd.f32 1.0, %v9995_v1  ;;  %v7315_v20 = vadd.f32 %v15444_v8, %v7314_v10  ;;  %vm7317_vm0 = vweird.f32 %v15444_v8  ;;  %v6323_v10 = vpop.f32.mrf.mxu3  ;;  %8147 = vmatpush.bf16.msrb.mxu3 %v9322_v36 }
 0xb05   : > { %v10005_v31 = vpop.eup %10004  ;;  %v7284_v55 = vmul.f32 %v15510_v27, %v7283_v45  ;;  %v7754_v40 = vpack.c.bf16 %v7694_v60, %v7690_v37  ;;  %vm7286_vm4 = vweird.f32 %v15388_v47  ;;  %v7292_v33 = vand.u32 2147483648, %v15388_v47  ;;  %vm15646_vm6 = vmor %vm7316_vm14, %vm7317_vm0 }
 0xb06   : > { %v10007_v4 = vpop.eup %10006  ;;  %10010 = vrcp.f32 %v15598_v5  ;;  %v15630_v24 = vadd.f32 1.0, %v10001_v56  ;;  %v7274_v60 = vsel %vm15623_vm3, %v15413_v54, %v7270_v29  ;;  %vm15635_vm5 = vcmp.eq.f32.partialorder %v7290_v17, 8.507059e+37  ;;  %8098 = vmatpush.bf16.msrb.mxu2 %v9314_v26  ;;  %v17098_v26 = vld [vmem:[#allocation38_spill] sm:$0xff] }
 0xb07   : > { %v15639_v45 = vadd.f32 1.0, %v10003_v50  ;;  %10012 = vrcp.f32 %v15601_v7  ;;  %8050 = vmatmul.bf16.vlgmr.msrb.gmra.mxu1 %v7754_v40  ;;  %v7298_v37 = vsub.f32 1.0, %v7297_v0  ;;  %v7307_v54 = vand.u32 2147483648, %v15472_v52  ;;  %v15654_v50 = vpop.f32.mrf.mxu1  ;;  %v15656_v29 = vpop.f32.mrf.mxu0 }
 0xb08   : > { %v10009_v35 = vpop.eup %10008  ;;  %v15651_v17 = vadd.f32 1.0, %v10005_v31  ;;  %10014 = vrcp.f32 %v15612_v25  ;;  %v7319_v61 = vsel %vm15646_vm6, %v15444_v8, %v7315_v20  ;;  %v7285_v40 = vadd.f32 %v15510_v27, %v7284_v55 }
 0xb09   : > { %vm7287_vm7 = vweird.f32 %v15510_v27  ;;  %v15663_v0 = vadd.f32 1.0, %v10007_v4  ;;  %v7279_v31 = vsel %vm15589_vm13, %v15572_v53, %v7274_v60  ;;  %v7293_v1 = vor.u32 1.1754944e-38, %v7292_v33  ;;  %v17102_v4 = vld [vmem:[#allocation54_spill] sm:$0xff] }
 0xb0a   : > { %17097 = vst [vmem:[#allocation28_spill] sm:$0xff] %v15651_v17  ;;  %10016 = vrcp.f32 %v15630_v24  ;;  %v7697_v36 = vmul.f32 %v17098_v26, %v15579_v57  ;;  %vm7301_vm8 = vweird.f32 %v15472_v52  ;;  %v7305_v8 = vand.u32 2147483647, %v15472_v52  ;;  %vm15682_vm9 = vmor %vm7286_vm4, %vm7287_vm7 }
 0xb0b   : > { %10018 = vrcp.f32 %v15639_v45  ;;  %v15674_v20 = vadd.f32 1.0, %v10009_v35  ;;  %v7324_v14 = vsel %vm15606_vm15, %v7323_v38, %v7319_v61  ;;  %v7299_v57 = vmul.f32 %v15583_v16, %v7298_v37  ;;  %v6277_v61 = vpop.f32.mrf.mxu2 }
 0xb0c   : > { %v15676_v55 = vpop.eup %10010  ;;  %10020 = vrcp.f32 %v15651_v17  ;;  %v7693_v33 = vmul.f32 %v17102_v4, %v15488_v63  ;;  %v15693_v35 = vmul.f32 %v7279_v31, %v14936_v3  ;;  %v7289_v47 = vsel %vm15682_vm9, %v15510_v27, %v7285_v40  ;;  %v6326_v3 = vpop.f32.mrf.mxu3 }
 0xb0d   : > { %17099 = vst [vmem:[#allocation45_spill] sm:$0xff] %v15674_v20  ;;  %v15690_v60 = vpop.eup %10012  ;;  %v15698_v43 = vor.u32 1.1754944e-38, %v7307_v54  ;;  %10022 = vrcp.f32 %v15663_v0  ;;  %vm7302_vm10 = vweird.f32 %v15583_v16  ;;  %v7397_v56 = vand.u32 2147483648, %v15601_v7  ;;  %v17105_v54 = vld [vmem:[#allocation62_spill] sm:$0xff] }
 0xb0e   : > { %17103 = vst [vmem:[#allocation38_spill] sm:$0xff] %v15693_v35  ;;  %v15701_v38 = vpop.eup %10014  ;;  %v9036_v63 = vmul.f32 -1.442695, %v15226_v13  ;;  %v7757_v37 = vpack.c.bf16 %v7697_v36, %v7693_v33  ;;  %v15707_v31 = vmul.f32 %v7324_v14, %v14947_v58  ;;  %10024 = vrcp.f32 %v15674_v20  ;;  %v17106_v33 = vld [vmem:[#allocation65_spill] sm:$0xff]  ;;  %vm15745_vm2 = vmor %vm7301_vm8, %vm7302_vm10 }
 0xb0f   : > { %v7695_v40 = vmul.f32 %v17105_v54, %v6274_v59  ;;  %v7294_v53 = vsel %vm15635_vm5, %v7293_v1, %v7289_v47  ;;  %v7300_v4 = vadd.f32 %v15583_v16, %v7299_v57  ;;  %v7442_v36 = vand.u32 2147483648, %v15612_v25  ;;  %v6230_v58 = vpop.f32.mrf.mxu1  ;;  %v6377_v14 = vpop.f32.mrf.mxu0  ;;  %v17110_v1 = vld [vmem:[#allocation48_spill] sm:$0xff]  ;;  %v17111_v47 = vld [vmem:[#allocation53_spill] sm:$0xff] }
 0xb10   : > { %17104 = vst [vmem:[#allocation54_spill] sm:$0xff] %v15707_v31  ;;  %v15712_v26 = vpop.eup %10016  ;;  %8197 = vmatmul.bf16.vlgmr.msrb.gmra.mxu0 %v7757_v37  ;;  %v7696_v13 = vmul.f32 %v17106_v33, %v6323_v10  ;;  %vm15721_vm1 = vcmp.eq.f32.partialorder %v7305_v8, 8.507059e+37  ;;  %v7387_v59 = vmul.f32 %v15690_v60, %v15601_v7  ;;  %v7432_v12 = vmul.f32 %v15701_v38, %v15612_v25 }
 0xb11   : > { %v15719_v31 = vpop.eup %10018  ;;  %v7691_v57 = vmul.f32 %v17110_v1, %v15562_v28  ;;  %v7692_v10 = vmul.f32 %v17111_v47, %v15564_v44  ;;  %v15735_v54 = vor.u32 1.1754944e-38, %v7397_v56  ;;  %10026 = vpow2.f32 %v9036_v63 }
 0xb12   : > { %17107 = vst [vmem:[#allocation62_spill] sm:$0xff] %v15719_v31  ;;  %v15733_v37 = vpop.eup %10020  ;;  %v9040_v33 = vmul.f32 -1.442695, %v15310_v32  ;;  %v7402_v44 = vmul.f32 %v15712_v26, %v15630_v24  ;;  %v15753_v63 = vmul.f32 %v7294_v53, %v15009_v62  ;;  %v7304_v8 = vsel %vm15745_vm2, %v15583_v16, %v7300_v4  ;;  %v17117_v53 = vld [vmem:[#allocation73_spill] sm:$0xff] }
 0xb13   : > { %17112 = vst [vmem:[#allocation65_spill] sm:$0xff] %v15733_v37  ;;  %v15739_v35 = vpop.eup %10022  ;;  %v7755_v1 = vpack.c.bf16 %v7695_v40, %v7691_v57  ;;  %v7756_v47 = vpack.c.bf16 %v7696_v13, %v7692_v10  ;;  %v15758_v32 = vor.u32 1.1754944e-38, %v7442_v36  ;;  %v7412_v52 = vand.u32 2147483648, %v15630_v24  ;;  %v17116_v13 = vld [vmem:[#allocation52_spill] sm:$0xff]  ;;  %v6279_v36 = vpop.f32.mrf.mxu2  ;;  %v17118_v10 = vld [vmem:[#allocation63_spill] sm:$0xff] }
 0xb14   : > { %17115 = vst [vmem:[#allocation48_spill] sm:$0xff] %v15753_v63  ;;  %v15761_v20 = vpop.eup %10024  ;;  %v7388_v37 = vsub.f32 1.0, %v7387_v59  ;;  %v7433_v17 = vsub.f32 1.0, %v7432_v12  ;;  %v9039_v31 = vmul.f32 -1.442695, %v15248_v30  ;;  %v7417_v62 = vmul.f32 %v15739_v35, %v15663_v0  ;;  %v6328_v57 = vpop.f32.mrf.mxu3 }
 0xb15   : > { %v9043_v40 = vmul.f32 -1.442695, %v15329_v51  ;;  %8099 = vmatmul.bf16.vlgmr.msrb.gmra.mxu2 %v7755_v1  ;;  %8148 = vmatmul.bf16.vlgmr.msrb.gmra.mxu3 %v7756_v47  ;;  %10028 = vpow2.f32 %v9040_v33  ;;  %v7698_v16 = vmul.f32 %v17116_v13, %v15654_v50  ;;  %v7702_v4 = vmul.f32 %v17117_v53, %v6230_v58  ;;  %v17119_v1 = vld [vmem:[#allocation80_spill] sm:$0xff] }
 0xb16   : > { %vm7392_vm11 = vweird.f32 %v15690_v60  ;;  %v7403_v59 = vsub.f32 1.0, %v7402_v44  ;;  %v9037_v12 = vmul.f32 -1.442695, %v15296_v46  ;;  %v7701_v28 = vmul.f32 %v17118_v10, %v15656_v29  ;;  %v17120_v51 = vld [vmem:[#allocation24_spill] sm:$0xff]  ;;  %v17122_v44 = vld [vmem:[#allocation46_spill] sm:$0xff] }
 0xb17   : > { %v7705_v47 = vmul.f32 %v17119_v1, %v6377_v14  ;;  %v10027_v56 = vpop.eup %10026  ;;  %v9038_v33 = vmul.f32 -1.442695, %v15307_v39  ;;  %v15777_v30 = vmul.f32 %v17120_v51, %v6277_v61  ;;  %v7758_v50 = vpack.c.bf16 %v7702_v4, %v7698_v16  ;;  %v17121_v58 = vld [vmem:[#allocation60_spill] sm:$0xff]  ;;  %v6233_v53 = vpop.f32.mrf.mxu1  ;;  %v17123_v14 = vld [vmem:[#allocation30_spill] sm:$0xff] }
 0xb18   : > { %v15780_v13 = vmul.f32 %v17121_v58, %v6279_v36  ;;  %v6380_v63 = vpop.f32.mrf.mxu0  ;;  %vm7391_vm12 = vweird.f32 %v15601_v7  ;;  %10030 = vpow2.f32 %v9043_v40  ;;  %v15784_v46 = vmul.f32 %v17122_v44, %v6326_v3  ;;  %v17134_v40 = vld [vmem:[#allocation67_spill] sm:$0xff] }
 0xb19   : > { %v7761_v29 = vpack.c.bf16 %v7705_v47, %v7701_v28  ;;  %v15787_v10 = vmul.f32 %v17123_v14, %v6328_v57  ;;  %v15792_v51 = vsel %vm15721_vm1, %v15698_v43, %v7304_v8  ;;  %v7389_v61 = vmul.f32 %v15690_v60, %v7388_v37  ;;  %8055 = vmatmul.bf16.gmra.mxu1 %v7758_v50  ;;  %vm15855_vm7 = vmor %vm7391_vm12, %vm7392_vm11 }
 0xb1a   : > { %vm7436_vm13 = vweird.f32 %v15612_v25  ;;  %v7418_v16 = vsub.f32 1.0, %v7417_v62  ;;  %v7434_v3 = vmul.f32 %v15701_v38, %v7433_v17  ;;  %vm7406_vm14 = vweird.f32 %v15630_v24 }
 0xb1b   : > { %v15800_v4 = vadd.f32 1.0, %v10027_v56  ;;  %10032 = vpow2.f32 %v9039_v31  ;;  %v7760_v43 = vpack.c.bf16 %v15787_v10, %v15784_v46  ;;  %v10029_v27 = vpop.eup %10028  ;;  %vm7437_vm15 = vweird.f32 %v15701_v38  ;;  %v6282_v36 = vpop.f32.mrf.mxu2 }
 0xb1c   : > { %v7404_v37 = vmul.f32 %v15712_v26, %v7403_v59  ;;  %10034 = vpow2.f32 %v9037_v12  ;;  %v9041_v8 = vmul.f32 -1.442695, %v15374_v15  ;;  %v15807_v62 = vor.u32 1.1754944e-38, %v7412_v52  ;;  %v6331_v57 = vpop.f32.mrf.mxu3  ;;  %v17136_v15 = vld [vmem:[#allocation68_spill] sm:$0xff]  ;;  %vm15867_vm9 = vmor %vm7436_vm13, %vm7437_vm15 }
 0xb1d   : > { %vm7421_vm0 = vweird.f32 %v15663_v0  ;;  %v7425_v17 = vand.u32 2147483647, %v15663_v0  ;;  %10036 = vpow2.f32 %v9038_v33  ;;  %vm7407_vm3 = vweird.f32 %v15712_v26 }
 0xb1e   : > { %v7419_v31 = vmul.f32 %v15739_v35, %v7418_v16  ;;  %v7427_v46 = vand.u32 2147483648, %v15663_v0  ;;  %v9042_v56 = vmul.f32 -1.442695, %v15376_v49  ;;  %v10031_v59 = vpop.eup %10030  ;;  %v7390_v12 = vadd.f32 %v15690_v60, %v7389_v61  ;;  %vm15885_vm1 = vmor %vm7406_vm14, %vm7407_vm3 }
 0xb1f   : > { %v17124_v52 = vand.u32 2147483647, %v15601_v7  ;;  %v7435_v1 = vadd.f32 %v15701_v38, %v7434_v3  ;;  %v17127_v47 = vand.u32 2147483647, %v15612_v25  ;;  %10038 = vrcp.f32 %v15800_v4  ;;  %v6235_v10 = vpop.f32.mrf.mxu1 }
 0xb20   : > { %v15830_v50 = vadd.f32 1.0, %v10029_v27  ;;  %v15833_v58 = vadd.f32 %v15712_v26, %v7404_v37  ;;  %10040 = vpow2.f32 %v9041_v8  ;;  %v9044_v44 = vmul.f32 -1.442695, %v15390_v2  ;;  %8202 = vmatmul.bf16.gmra.mxu0 %v7761_v29  ;;  %v6382_v61 = vpop.f32.mrf.mxu0  ;;  %v17133_v27 = vld [vmem:[#allocation64_spill] sm:$0xff]  ;;  %v17135_v8 = vld [vmem:[#allocation69_spill] sm:$0xff] }
 0xb21   : > { %vm15818_vm4 = vcmp.eq.f32.partialorder %v17124_v52, 8.507059e+37  ;;  %vm15825_vm5 = vcmp.eq.f32.partialorder %v17127_v47, 8.507059e+37  ;;  %v9047_v14 = vmul.f32 -1.442695, %v15392_v11  ;;  %v10033_v16 = vpop.eup %10032  ;;  %v17130_v3 = vand.u32 2147483647, %v15630_v24 }
 0xb22   : > { %v7706_v47 = vmul.f32 %v17133_v27, %v6233_v53  ;;  %v15845_v37 = vmul.f32 %v17134_v40, %v6380_v63  ;;  %v7710_v49 = vmul.f32 %v17135_v8, %v6235_v10  ;;  %v15849_v2 = vmul.f32 %v17136_v15, %v6382_v61  ;;  %v10035_v29 = vpop.eup %10034  ;;  %v17148_v61 = vld [vmem:[#allocation79_spill] sm:$0xff] }
 0xb23   : > { %vm15839_vm6 = vcmp.eq.f32.partialorder %v17130_v3, 8.507059e+37  ;;  %v7420_v11 = vadd.f32 %v15739_v35, %v7419_v31  ;;  %vm7422_vm8 = vweird.f32 %v15739_v35  ;;  %v15861_v63 = vadd.f32 1.0, %v10031_v59  ;;  %v10037_v53 = vpop.eup %10036  ;;  %v17151_v27 = vld [vmem:[#allocation27_spill] sm:$0xff] }
 0xb24   : > { %10042 = vpow2.f32 %v9042_v56  ;;  %vm15871_vm10 = vcmp.eq.f32.partialorder %v7425_v17, 8.507059e+37  ;;  %v7762_v40 = vpack.c.bf16 %v7710_v49, %v7706_v47  ;;  %v7765_v31 = vpack.c.bf16 %v15849_v2, %v15845_v37  ;;  %vm15904_vm2 = vmor %vm7421_vm0, %vm7422_vm8  ;;  %v17165_v2 = vld [vmem:[#allocation94_spill] sm:$0xff] }
 0xb25   : > { %10044 = vrcp.f32 %v15830_v50  ;;  %v7394_v56 = vsel %vm15855_vm7, %v15690_v60, %v7390_v12  ;;  %v7428_v17 = vor.u32 1.1754944e-38, %v7427_v46  ;;  %v15889_v59 = vadd.f32 1.0, %v10033_v16  ;;  %v15891_v49 = vpop.eup %10038  ;;  %8153 = vmatmul.bf16.gmra.mxu3 %v7760_v43  ;;  %v17149_v16 = vld [vmem:[#allocation35_spill] sm:$0xff] }
 0xb26   : > { %10046 = vpow2.f32 %v9044_v44  ;;  %v7439_v10 = vsel %vm15867_vm9, %v15701_v38, %v7435_v1  ;;  %v7409_v60 = vsel %vm15885_vm1, %v15712_v26, %v15833_v58  ;;  %v15908_v46 = vadd.f32 1.0, %v10035_v29  ;;  %v10041_v38 = vpop.eup %10040  ;;  %v6284_v58 = vpop.f32.mrf.mxu2 }
 0xb27   : > { %10048 = vpow2.f32 %v9047_v14  ;;  %v17147_v12 = vpack.c.bf16 %v15780_v13, %v15777_v30  ;;  %v7424_v26 = vsel %vm15904_vm2, %v15739_v35, %v7420_v11  ;;  %v15916_v1 = vadd.f32 1.0, %v10037_v53  ;;  %v6333_v44 = vpop.f32.mrf.mxu3  ;;  %v17150_v13 = vld [vmem:[#allocation57_spill] sm:$0xff] }
 0xb28   : > { %10050 = vrcp.f32 %v15861_v63  ;;  %v9045_v0 = vmul.f32 -1.442695, %v15458_v23  ;;  %v15921_v14 = vmul.f32 %v17148_v61, %v6282_v36  ;;  %v15924_v30 = vmul.f32 %v17149_v16, %v6331_v57  ;;  %v6238_v57 = vpop.f32.mrf.mxu1  ;;  %v6385_v29 = vpop.f32.mrf.mxu0 }
 0xb29   : > { %8104 = vmatmul.bf16.gmra.mxu2 %v17147_v12  ;;  %v15927_v43 = vmul.f32 %v17150_v13, %v6284_v58  ;;  %v15930_v47 = vmul.f32 %v17151_v27, %v6333_v44  ;;  %v7399_v35 = vsel %vm15818_vm4, %v15735_v54, %v7394_v56  ;;  %v7444_v8 = vsel %vm15825_vm5, %v15758_v32, %v7439_v10 }
 0xb2a   : > { %v10043_v11 = vpop.eup %10042  ;;  %10052 = vrcp.f32 %v15889_v59  ;;  %v9046_v36 = vmul.f32 -1.442695, %v15460_v22  ;;  %v15943_v53 = vadd.f32 1.0, %v10041_v38  ;;  %v7414_v32 = vsel %vm15839_vm6, %v15807_v62, %v7409_v60  ;;  %8060 = vmatmul.bf16.gmra.mxu1 %v7762_v40 }
 0xb2b   : > { %v15940_v3 = vpop.eup %10044  ;;  %10054 = vrcp.f32 %v15908_v46  ;;  %v7763_v28 = vpack.c.bf16 %v15927_v43, %v15921_v14  ;;  %v7764_v54 = vpack.c.bf16 %v15930_v47, %v15924_v30  ;;  %v7429_v15 = vsel %vm15871_vm10, %v7428_v17, %v7424_v26 }
 0xb2c   : > { %17152 = vst [vmem:[#allocation53_spill] sm:$0xff] %v15943_v53  ;;  %v10047_v33 = vpop.eup %10046  ;;  %10056 = vrcp.f32 %v15916_v1  ;;  %v7207_v56 = vmul.f32 %v15492_v42, %v15381_v18  ;;  %v15959_v10 = vmul.f32 %v15792_v51, %v15021_v48  ;;  %v7517_v24 = vand.u32 2147483648, %v15830_v50 }
 0xb2d   : > { %v10049_v25 = vpop.eup %10048  ;;  %v7562_v12 = vand.u32 2147483648, %v15861_v63  ;;  %10058 = vpow2.f32 %v9045_v0  ;;  %v15966_v52 = vmul.f32 %v7399_v35, %v15121_v6  ;;  %v7507_v7 = vmul.f32 %v15940_v3, %v15830_v50  ;;  %v17160_v35 = vld [vmem:[#allocation95_spill] sm:$0xff] }
 0xb2e   : > { %v15963_v62 = vpop.eup %10050  ;;  %10060 = vpow2.f32 %v9046_v36  ;;  %v7252_v40 = vmul.f32 %v15529_v9, %v15404_v19  ;;  %v15973_v48 = vmul.f32 %v7444_v8, %v15134_v34  ;;  %v15976_v51 = vmul.f32 %v7414_v32, %v15187_v41  ;;  %v6287_v0 = vpop.f32.mrf.mxu2 }
 0xb2f   : > { %v15979_v17 = vmul.f32 %v7429_v15, %v15197_v21  ;;  %10062 = vrcp.f32 %v15943_v53  ;;  %v15986_v26 = vadd.f32 1.0, %v10043_v11  ;;  %v6336_v58 = vpop.f32.mrf.mxu3  ;;  %v7208_v34 = vsub.f32 1.0, %v7207_v56  ;;  %v17159_v11 = vld [vmem:[#allocation90_spill] sm:$0xff]  ;;  %v17162_v15 = vld [vmem:[#allocation55_spill] sm:$0xff] }
 0xb30   : > { %17153 = vst [vmem:[#allocation52_spill] sm:$0xff] %v15973_v48  ;;  %v15982_v6 = vpop.eup %10052  ;;  %v15990_v41 = vor.u32 1.1754944e-38, %v7517_v24  ;;  %v15992_v61 = vor.u32 1.1754944e-38, %v7562_v12  ;;  %v15994_v21 = vadd.f32 1.0, %v10047_v33  ;;  %v15996_v14 = vadd.f32 1.0, %v10049_v25  ;;  %8207 = vmatmul.bf16.gmra.mxu0 %v7765_v31  ;;  %v6240_v43 = vpop.f32.mrf.mxu1  ;;  %v17161_v33 = vld [vmem:[#allocation58_spill] sm:$0xff] }
 0xb31   : > { %17154 = vst [vmem:[#allocation73_spill] sm:$0xff] %v15976_v51  ;;  %v15988_v44 = vpop.eup %10054  ;;  %v7508_v30 = vsub.f32 1.0, %v7507_v7  ;;  %v16002_v13 = vmul.f32 %v15963_v62, %v15861_v63  ;;  %v6387_v27 = vpop.f32.mrf.mxu0  ;;  %v7253_v47 = vsub.f32 1.0, %v7252_v40  ;;  %v7222_v8 = vmul.f32 %v17160_v35, %v17159_v11  ;;  %v17163_v25 = vld [vmem:[#allocation22_spill] sm:$0xff]  ;;  %v17164_v12 = vld [vmem:[#allocation84_spill] sm:$0xff] }
 0xb32   : > { %17155 = vst [vmem:[#allocation63_spill] sm:$0xff] %v15979_v17  ;;  %v15998_v16 = vpop.eup %10056  ;;  %v7714_v32 = vmul.f32 %v17161_v33, %v6238_v57  ;;  %v16011_v56 = vmul.f32 %v17162_v15, %v6385_v29  ;;  %v7718_v24 = vmul.f32 %v17163_v25, %v6240_v43  ;;  %v16015_v7 = vmul.f32 %v17164_v12, %v6387_v27  ;;  %v17170_v43 = vld [vmem:[#allocation91_spill] sm:$0xff] }
 0xb33   : > { %17156 = vst [vmem:[#allocation80_spill] sm:$0xff] %v15986_v26  ;;  %v10059_v36 = vpop.eup %10058  ;;  %10064 = vrcp.f32 %v15986_v26  ;;  %v7209_v31 = vmul.f32 %v15492_v42, %v7208_v34  ;;  %v7553_v27 = vsub.f32 1.0, %v16002_v13  ;;  %v7254_v15 = vmul.f32 %v15529_v9, %v7253_v47 }
 0xb34   : > { %17157 = vst [vmem:[#allocation24_spill] sm:$0xff] %v15990_v41  ;;  %v10061_v38 = vpop.eup %10060  ;;  %10066 = vrcp.f32 %v15994_v21  ;;  %v7766_v29 = vpack.c.bf16 %v7718_v24, %v7714_v32  ;;  %v16029_v33 = vadd.f32 1.0, %v10059_v36  ;;  %v7509_v34 = vmul.f32 %v15940_v3, %v7508_v30  ;;  %v17166_v32 = vld [vmem:[#allocation97_spill] sm:$0xff] }
 0xb35   : > { %17158 = vst [vmem:[#allocation60_spill] sm:$0xff] %v15992_v61  ;;  %v16021_v40 = vpop.eup %10062  ;;  %10068 = vrcp.f32 %v15996_v14  ;;  %v16033_v25 = vadd.f32 1.0, %v10061_v38  ;;  %8158 = vmatmul.bf16.gmra.mxu3 %v7764_v54  ;;  %v7223_v12 = vsub.f32 1.0, %v7222_v8  ;;  %v7237_v24 = vmul.f32 %v17166_v32, %v17165_v2  ;;  %v17167_v38 = vld [vmem:[#allocation40_spill] sm:$0xff]  ;;  %v17169_v8 = vld [vmem:[#allocation85_spill] sm:$0xff] }
 0xb36   : > { %v16039_v57 = vmul.f32 %v16021_v40, %v15943_v53  ;;  %v6289_v13 = vpop.f32.mrf.mxu2  ;;  %v7210_v36 = vadd.f32 %v15492_v42, %v7209_v31  ;;  %vm7212_vm11 = vweird.f32 %v15492_v42  ;;  %v7217_v30 = vand.u32 2147483648, %v15381_v18 }
 0xb37   : > { %v6338_v37 = vpop.f32.mrf.mxu3  ;;  %v16045_v47 = vmul.f32 %v17167_v38, %v6287_v0  ;;  %v16051_v60 = vmul.f32 %v17169_v8, %v6289_v13  ;;  %vm7211_vm12 = vweird.f32 %v15381_v18  ;;  %v7215_v0 = vand.u32 2147483647, %v15381_v18 }
 0xb38   : > { %v16054_v22 = vmul.f32 %v17170_v43, %v6338_v37  ;;  %v16058_v61 = vpop.f32.mrf.mxu1  ;;  %v7255_v38 = vadd.f32 %v15529_v9, %v7254_v15  ;;  %vm7257_vm13 = vweird.f32 %v15529_v9  ;;  %vm16074_vm14 = vmor %vm7211_vm12, %vm7212_vm11  ;;  %v7224_v18 = vmul.f32 %v17160_v35, %v7223_v12 }
 0xb39   : > { %8109 = vmatmul.bf16.gmra.mxu2 %v7763_v28  ;;  %v17168_v28 = vld [vmem:[#allocation51_spill] sm:$0xff]  ;;  %v16056_v23 = vpop.eup %10064  ;;  %v16060_v31 = vpop.f32.mrf.mxu0  ;;  %v7767_v37 = vpack.c.bf16 %v16051_v60, %v16045_v47  ;;  %10070 = vrcp.f32 %v16029_v33  ;;  %v7214_v60 = vsel %vm16074_vm14, %v15492_v42, %v7210_v36  ;;  %v7327_v47 = vmul.f32 %v15676_v55, %v15598_v5 }
 0xb3a   : > { %v16048_v54 = vmul.f32 %v17168_v28, %v6336_v58  ;;  %17171 = vst [vmem:[#allocation46_spill] sm:$0xff] %v16056_v23  ;;  %v16066_v58 = vpop.eup %10066  ;;  %v7238_v28 = vsub.f32 1.0, %v7237_v24  ;;  %8065 = vmatmul.bf16.gmra.mxu1 %v7766_v29  ;;  %vm7256_vm15 = vweird.f32 %v15404_v19  ;;  %v7260_v12 = vand.u32 2147483647, %v15404_v19  ;;  %v17174_v24 = vld [vmem:[#allocation62_spill] sm:$0xff] }
 0xb3b   : > { %v16079_v15 = vpop.eup %10068  ;;  %v7372_v8 = vmul.f32 %v17174_v24, %v15639_v45  ;;  %v16093_v17 = vmul.f32 %v15963_v62, %v7553_v27  ;;  %v16097_v29 = vmul.f32 %v16056_v23, %v15986_v26  ;;  %vm7216_vm0 = vcmp.eq.f32.partialorder %v7215_v0, 8.507059e+37  ;;  %vm16101_vm3 = vmor %vm7256_vm15, %vm7257_vm13 }
 0xb3c   : > { %v7768_v43 = vpack.c.bf16 %v16054_v22, %v16048_v54  ;;  %v7262_v22 = vand.u32 2147483648, %v15404_v19  ;;  %v7218_v54 = vor.u32 1.1754944e-38, %v7217_v30  ;;  %vm7227_vm4 = vweird.f32 %v17160_v35 }
 0xb3d   : > { %v7259_v36 = vsel %vm16101_vm3, %v15529_v9, %v7255_v38  ;;  %v7225_v27 = vadd.f32 %v17160_v35, %v7224_v18  ;;  %v7239_v30 = vmul.f32 %v17166_v32, %v7238_v28  ;;  %10072 = vrcp.f32 %v16033_v25 }
 0xb3e   : > { %v7219_v19 = vsel %vm7216_vm0, %v7218_v54, %v7214_v60  ;;  %v16112_v0 = vpop.f32.mrf.mxu2  ;;  %v7263_v26 = vor.u32 1.1754944e-38, %v7262_v22  ;;  %v7232_v51 = vand.u32 2147483648, %v17159_v11  ;;  %v7328_v53 = vsub.f32 1.0, %v7327_v47  ;;  %v17178_v22 = vld [vmem:[#allocation78_spill] sm:$0xff] }
 0xb3f   : > { %v16114_v13 = vpop.f32.mrf.mxu3  ;;  %vm7261_vm5 = vcmp.eq.f32.partialorder %v7260_v12, 8.507059e+37  ;;  %vm7226_vm6 = vweird.f32 %v17159_v11  ;;  %v7230_v60 = vand.u32 2147483647, %v17159_v11  ;;  %v7373_v9 = vsub.f32 1.0, %v7372_v8  ;;  %v16119_v38 = vpop.eup %10070  ;;  %v17183_v12 = vld [vmem:[#allocation45_spill] sm:$0xff] }
 0xb40   : > { %v16122_v18 = vadd.f32 %v15940_v3, %v7509_v34  ;;  %v17177_v28 = vpack.c.bf16 %v16015_v7, %v16011_v56  ;;  %v6245_v54 = vpop.f32.mrf.mxu1  ;;  %v7662_v42 = vmul.f32 %v7219_v19, %v17178_v22  ;;  %v7264_v47 = vsel %vm7261_vm5, %v7263_v26, %v7259_v36  ;;  %vm16130_vm7 = vmor %vm7226_vm6, %vm7227_vm4  ;;  %v17181_v36 = vld [vmem:[#allocation28_spill] sm:$0xff] }
 0xb41   : > { %v6392_v39 = vpop.f32.mrf.mxu0  ;;  %v7245_v11 = vand.u32 2147483647, %v17165_v2  ;;  %v7229_v34 = vsel %vm16130_vm7, %v17160_v35, %v7225_v27  ;;  %v7240_v56 = vadd.f32 %v17166_v32, %v7239_v30  ;;  %vm7242_vm8 = vweird.f32 %v17166_v32  ;;  %v17184_v30 = vld [vmem:[#allocation96_spill] sm:$0xff] }
 0xb42   : > { %8212 = vmatmul.bf16.gmra.mxu0 %v17177_v28  ;;  %v7247_v7 = vand.u32 2147483648, %v17165_v2  ;;  %v7726_v8 = vmul.f32 %v7662_v42, %v6245_v54  ;;  %v7233_v26 = vor.u32 1.1754944e-38, %v7232_v51  ;;  %v7329_v19 = vmul.f32 %v15676_v55, %v7328_v53  ;;  %v17182_v28 = vld [vmem:[#allocation65_spill] sm:$0xff]  ;;  %v17185_v54 = vld [vmem:[#allocation59_spill] sm:$0xff] }
 0xb43   : > { %v7342_v22 = vmul.f32 %v17182_v28, %v17181_v36  ;;  %vm7231_vm9 = vcmp.eq.f32.partialorder %v7230_v60, 8.507059e+37  ;;  %vm7241_vm10 = vweird.f32 %v17165_v2  ;;  %v7374_v48 = vmul.f32 %v17174_v24, %v7373_v9  ;;  %v16148_v27 = vpop.eup %10072 }
 0xb44   : > { %v7357_v35 = vmul.f32 %v15761_v20, %v17183_v12  ;;  %v7722_v23 = vmul.f32 %v17184_v30, %v16058_v61  ;;  %v7665_v51 = vmul.f32 %v7264_v47, %v17185_v54  ;;  %v7234_v42 = vsel %vm7231_vm9, %v7233_v26, %v7229_v34  ;;  %vm16153_vm1 = vmor %vm7241_vm10, %vm7242_vm8 }
 0xb45   : > { %vm16157_vm2 = vcmp.eq.f32.partialorder %v7245_v11, 8.507059e+37  ;;  %8163 = vmatmul.bf16.gmra.mxu3 %v7768_v43  ;;  %v7244_v2 = vsel %vm16153_vm1, %v17166_v32, %v7240_v56  ;;  %v7248_v9 = vor.u32 1.1754944e-38, %v7247_v7  ;;  %vm7331_vm11 = vweird.f32 %v15598_v5 }
 0xb46   : > { %vm7332_vm12 = vweird.f32 %v15676_v55  ;;  %v7770_v61 = vpack.c.bf16 %v7726_v8, %v7722_v23  ;;  %v6294_v47 = vpop.f32.mrf.mxu2  ;;  %v7330_v26 = vadd.f32 %v15676_v55, %v7329_v19  ;;  %v7337_v11 = vand.u32 2147483648, %v15598_v5 }
 0xb47   : > { %v6343_v34 = vpop.f32.mrf.mxu3  ;;  %v7343_v30 = vsub.f32 1.0, %v7342_v22  ;;  %vm7377_vm13 = vweird.f32 %v17174_v24  ;;  %v7358_v43 = vsub.f32 1.0, %v7357_v35  ;;  %v7447_v32 = vmul.f32 %v15891_v49, %v15800_v4  ;;  %vm16184_vm14 = vmor %vm7331_vm11, %vm7332_vm12 }
 0xb48   : > { %v7729_v56 = vmul.f32 %v7665_v51, %v6392_v39  ;;  %v7249_v7 = vsel %vm16157_vm2, %v7248_v9, %v7244_v2  ;;  %v6248_v23 = vpop.f32.mrf.mxu1  ;;  %v7335_v19 = vand.u32 2147483647, %v15598_v5  ;;  %v7382_v54 = vand.u32 2147483648, %v15639_v45  ;;  %v17193_v51 = vld [vmem:[#allocation72_spill] sm:$0xff]  ;;  %v17202_v5 = vld [vmem:[#allocation23_spill] sm:$0xff] }
 0xb49   : > { %8114 = vmatmul.bf16.gmra.mxu2 %v7767_v37  ;;  %v7375_v37 = vadd.f32 %v17174_v24, %v7374_v48  ;;  %v16174_v8 = vpop.f32.mrf.mxu0  ;;  %v17190_v48 = vld [vmem:[#allocation75_spill] sm:$0xff]  ;;  %vm7376_vm15 = vweird.f32 %v15639_v45  ;;  %v7380_v35 = vand.u32 2147483647, %v15639_v45  ;;  %v7725_v60 = vmul.f32 %v17193_v51, %v16060_v31 }
 0xb4a   : > { %v7663_v53 = vmul.f32 %v7234_v42, %v17190_v48  ;;  %8070 = vmatmul.bf16.gmra.mxu1 %v7770_v61  ;;  %v7334_v42 = vsel %vm16184_vm14, %v15676_v55, %v7330_v26  ;;  %v7338_v2 = vor.u32 1.1754944e-38, %v7337_v11  ;;  %vm16197_vm0 = vmor %vm7376_vm15, %vm7377_vm13  ;;  %v7344_v9 = vmul.f32 %v17182_v28, %v7343_v30  ;;  %v17196_v48 = vld [vmem:[#allocation71_spill] sm:$0xff] }
 0xb4b   : > { %v7664_v22 = vmul.f32 %v7249_v7, %v17196_v48  ;;  %v7379_v45 = vsel %vm16197_vm0, %v17174_v24, %v7375_v37  ;;  %v7359_v31 = vmul.f32 %v15761_v20, %v7358_v43  ;;  %v7448_v61 = vsub.f32 1.0, %v7447_v32  ;;  %v17197_v37 = vld [vmem:[#allocation50_spill] sm:$0xff] }
 0xb4c   : > { %v7773_v39 = vpack.c.bf16 %v7729_v56, %v7725_v60  ;;  %vm7336_vm3 = vcmp.eq.f32.partialorder %v7335_v19, 8.507059e+37  ;;  %v7383_v55 = vor.u32 1.1754944e-38, %v7382_v54  ;;  %v7492_v26 = vmul.f32 %v15982_v6, %v15889_v59  ;;  %v17198_v32 = vld [vmem:[#allocation66_spill] sm:$0xff]  ;;  %v17199_v54 = vld [vmem:[#allocation32_spill] sm:$0xff] }
 0xb4d   : > { %v7727_v11 = vmul.f32 %v7663_v53, %v6294_v47  ;;  %v7728_v51 = vmul.f32 %v7664_v22, %v6343_v34  ;;  %v7339_v41 = vsel %vm7336_vm3, %v7338_v2, %v7334_v42  ;;  %vm7381_vm4 = vcmp.eq.f32.partialorder %v7380_v35, 8.507059e+37 }
 0xb4e   : > { %v16209_v30 = vpop.f32.mrf.mxu2  ;;  %v7384_v48 = vsel %vm7381_vm4, %v7383_v55, %v7379_v45  ;;  %v7345_v24 = vadd.f32 %v17182_v28, %v7344_v9  ;;  %vm7347_vm5 = vweird.f32 %v17182_v28  ;;  %vm7362_vm6 = vweird.f32 %v15761_v20 }
 0xb4f   : > { %v16211_v7 = vpop.f32.mrf.mxu3  ;;  %v7723_v43 = vmul.f32 %v17197_v37, %v16112_v0  ;;  %v7724_v47 = vmul.f32 %v17198_v32, %v16114_v13  ;;  %v7360_v34 = vadd.f32 %v15761_v20, %v7359_v31  ;;  %v7449_v56 = vmul.f32 %v15891_v49, %v7448_v61  ;;  %v17210_v31 = vld [vmem:[#allocation44_spill] sm:$0xff] }
 0xb50   : > { %v6250_v19 = vpop.f32.mrf.mxu1  ;;  %v7670_v22 = vmul.f32 %v7339_v41, %v17199_v54  ;;  %vm7346_vm7 = vweird.f32 %v17181_v36  ;;  %v7352_v35 = vand.u32 2147483648, %v17181_v36  ;;  %v7493_v60 = vsub.f32 1.0, %v7492_v26 }
 0xb51   : > { %v6397_v53 = vpop.f32.mrf.mxu0  ;;  %v7771_v42 = vpack.c.bf16 %v7727_v11, %v7723_v43  ;;  %v7772_v2 = vpack.c.bf16 %v7728_v51, %v7724_v47  ;;  %vm16227_vm8 = vmor %vm7346_vm7, %vm7347_vm5  ;;  %vm7361_vm9 = vweird.f32 %v17183_v12  ;;  %v7367_v13 = vand.u32 2147483648, %v17183_v12 }
 0xb52   : > { %8217 = vmatmul.bf16.gmra.mxu0 %v7773_v39  ;;  %vm7512_vm10 = vweird.f32 %v15940_v3  ;;  %v7734_v41 = vmul.f32 %v7670_v22, %v6250_v19  ;;  %v7673_v9 = vmul.f32 %v7384_v48, %v17202_v5  ;;  %v7350_v45 = vand.u32 2147483647, %v17181_v36  ;;  %vm16238_vm1 = vmor %vm7361_vm9, %vm7362_vm6  ;;  %v17205_v36 = vld [vmem:[#allocation38_spill] sm:$0xff] }
 0xb53   : > { %v7365_v61 = vand.u32 2147483647, %v17183_v12  ;;  %v7349_v39 = vsel %vm16227_vm8, %v17182_v28, %v7345_v24  ;;  %v7364_v55 = vsel %vm16238_vm1, %v15761_v20, %v7360_v34  ;;  %v7450_v26 = vadd.f32 %v15891_v49, %v7449_v56 }
 0xb54   : > { %vm7452_vm2 = vweird.f32 %v15891_v49  ;;  %vm7511_vm11 = vweird.f32 %v15830_v50  ;;  %v7730_v11 = vmul.f32 %v17205_v36, %v6248_v23  ;;  %v7494_v51 = vmul.f32 %v15982_v6, %v7493_v60 }
 0xb55   : > { %v7462_v12 = vmul.f32 %v15988_v44, %v15908_v46  ;;  %v7477_v28 = vmul.f32 %v15998_v16, %v15916_v1  ;;  %8168 = vmatmul.bf16.gmra.mxu3 %v7772_v2  ;;  %v7353_v48 = vor.u32 1.1754944e-38, %v7352_v35  ;;  %v7368_v20 = vor.u32 1.1754944e-38, %v7367_v13  ;;  %vm16304_vm7 = vmor %vm7511_vm11, %vm7512_vm10 }
 0xb56   : > { %vm7451_vm12 = vweird.f32 %v15800_v4  ;;  %v7457_v24 = vand.u32 2147483648, %v15800_v4  ;;  %v7774_v37 = vpack.c.bf16 %v7734_v41, %v7730_v11  ;;  %v6299_v43 = vpop.f32.mrf.mxu2  ;;  %vm7351_vm13 = vcmp.eq.f32.partialorder %v7350_v45, 8.507059e+37  ;;  %v17208_v41 = vld [vmem:[#allocation54_spill] sm:$0xff]  ;;  %v17209_v45 = vld [vmem:[#allocation29_spill] sm:$0xff] }
 0xb57   : > { %v6348_v23 = vpop.f32.mrf.mxu3  ;;  %vm7366_vm14 = vcmp.eq.f32.partialorder %v7365_v61, 8.507059e+37  ;;  %vm16262_vm15 = vmor %vm7451_vm12, %vm7452_vm2  ;;  %v7455_v47 = vand.u32 2147483647, %v15800_v4  ;;  %v7354_v34 = vsel %vm7351_vm13, %v7353_v48, %v7349_v39  ;;  %vm7497_vm0 = vweird.f32 %v15982_v6 }
 0xb58   : > { %v7369_v56 = vsel %vm7366_vm14, %v7368_v20, %v7364_v55  ;;  %v7454_v19 = vsel %vm16262_vm15, %v15891_v49, %v7450_v26  ;;  %v7737_v54 = vmul.f32 %v7673_v9, %v6397_v53  ;;  %v6253_v22 = vpop.f32.mrf.mxu1  ;;  %v7495_v60 = vadd.f32 %v15982_v6, %v7494_v51 }
 0xb59   : > { %8119 = vmatmul.bf16.gmra.mxu2 %v7771_v42  ;;  %v16271_v35 = vpop.f32.mrf.mxu0  ;;  %v7463_v42 = vsub.f32 1.0, %v7462_v12  ;;  %v7478_v2 = vsub.f32 1.0, %v7477_v28  ;;  %v16276_v0 = vadd.f32 %v15963_v62, %v16093_v17  ;;  %v7458_v4 = vor.u32 1.1754944e-38, %v7457_v24 }
 0xb5a   : > { %v7502_v13 = vand.u32 2147483648, %v15889_v59  ;;  %v7567_v49 = vmul.f32 %v16066_v58, %v15994_v21  ;;  %v7733_v53 = vmul.f32 %v17208_v41, %v16174_v8  ;;  %8075 = vmatmul.bf16.gmra.mxu1 %v7774_v37  ;;  %vm7456_vm3 = vcmp.eq.f32.partialorder %v7455_v47, 8.507059e+37  ;;  %v17215_v37 = vld [vmem:[#allocation41_spill] sm:$0xff]  ;;  %v17219_v47 = vld [vmem:[#allocation48_spill] sm:$0xff] }
 0xb5b   : > { %vm7496_vm4 = vweird.f32 %v15889_v59  ;;  %v7500_v5 = vand.u32 2147483647, %v15889_v59  ;;  %v7538_v9 = vsub.f32 1.0, %v16097_v29  ;;  %v7671_v17 = vmul.f32 %v7354_v34, %v17209_v45 }
 0xb5c   : > { %v7672_v61 = vmul.f32 %v7369_v56, %v17210_v31  ;;  %v7459_v39 = vsel %vm7456_vm3, %v7458_v4, %v7454_v19  ;;  %vm16290_vm5 = vmor %vm7496_vm4, %vm7497_vm0  ;;  %vm7557_vm6 = vweird.f32 %v15963_v62  ;;  %v7777_v8 = vpack.c.bf16 %v7737_v54, %v7733_v53  ;;  %v17240_v31 = vld [vmem:[#allocation73_spill] sm:$0xff] }
 0xb5d   : > { %v7499_v59 = vsel %vm16290_vm5, %v15982_v6, %v7495_v60  ;;  %v7464_v26 = vmul.f32 %v15988_v44, %v7463_v42  ;;  %v7479_v36 = vmul.f32 %v15998_v16, %v7478_v2  ;;  %v7735_v51 = vmul.f32 %v7671_v17, %v6299_v43 }
 0xb5e   : > { %v7736_v12 = vmul.f32 %v7672_v61, %v6348_v23  ;;  %v7503_v28 = vor.u32 1.1754944e-38, %v7502_v13  ;;  %v7568_v48 = vsub.f32 1.0, %v7567_v49  ;;  %v7514_v6 = vsel %vm16304_vm7, %v15940_v3, %v16122_v18  ;;  %v16313_v20 = vpop.f32.mrf.mxu2 }
 0xb5f   : > { %vm7556_vm8 = vweird.f32 %v15861_v63  ;;  %v16315_v24 = vpop.f32.mrf.mxu3  ;;  %v7678_v32 = vmul.f32 %v7459_v39, %v17215_v37  ;;  %vm7501_vm9 = vcmp.eq.f32.partialorder %v7500_v5, 8.507059e+37  ;;  %vm7467_vm10 = vweird.f32 %v15988_v44  ;;  %v17223_v5 = vld [vmem:[#allocation37_spill] sm:$0xff] }
 0xb60   : > { %v17216_v43 = vand.u32 2147483647, %v15830_v50  ;;  %v7731_v3 = vmul.f32 %v17219_v47, %v16209_v30  ;;  %v7732_v18 = vmul.f32 %v15959_v10, %v16211_v7  ;;  %v7504_v34 = vsel %vm7501_vm9, %v7503_v28, %v7499_v59  ;;  %v6255_v19 = vpop.f32.mrf.mxu1  ;;  %vm16375_vm3 = vmor %vm7556_vm8, %vm7557_vm6 }
 0xb61   : > { %v7472_v56 = vand.u32 2147483648, %v15908_v46  ;;  %v7465_v54 = vadd.f32 %v15988_v44, %v7464_v26  ;;  %v7480_v60 = vadd.f32 %v15998_v16, %v7479_v36  ;;  %vm7482_vm2 = vweird.f32 %v15998_v16  ;;  %v6402_v30 = vpop.f32.mrf.mxu0 }
 0xb62   : > { %vm16321_vm1 = vcmp.eq.f32.partialorder %v17216_v43, 8.507059e+37  ;;  %8222 = vmatmul.bf16.gmra.mxu0 %v7777_v8  ;;  %v7612_v50 = vmul.f32 %v16079_v15, %v15996_v14  ;;  %v7775_v42 = vpack.c.bf16 %v7735_v51, %v7731_v3  ;;  %v7776_v2 = vpack.c.bf16 %v7736_v12, %v7732_v18  ;;  %v17228_v12 = vld [vmem:[#allocation24_spill] sm:$0xff]  ;;  %v17231_v18 = vld [vmem:[#allocation46_spill] sm:$0xff] }
 0xb63   : > { %vm7466_vm11 = vweird.f32 %v15908_v46  ;;  %v7569_v10 = vmul.f32 %v16066_v58, %v7568_v48  ;;  %v7742_v7 = vmul.f32 %v7678_v32, %v6255_v19  ;;  %v7470_v13 = vand.u32 2147483647, %v15908_v46  ;;  %v17250_v43 = vld [vmem:[#allocation80_spill] sm:$0xff] }
 0xb64   : > { %vm16339_vm12 = vmor %vm7466_vm11, %vm7467_vm10  ;;  %vm7481_vm13 = vweird.f32 %v15916_v1  ;;  %v7487_v49 = vand.u32 2147483648, %v15916_v1  ;;  %v17222_v41 = vsub.f32 1.0, %v16039_v57  ;;  %v7681_v45 = vmul.f32 %v7504_v34, %v17223_v5  ;;  %v17239_v5 = vld [vmem:[#allocation82_spill] sm:$0xff] }
 0xb65   : > { %v7473_v17 = vor.u32 1.1754944e-38, %v7472_v56  ;;  %vm16352_vm14 = vmor %vm7481_vm13, %vm7482_vm2  ;;  %v7485_v61 = vand.u32 2147483647, %v15916_v1  ;;  %v7738_v46 = vmul.f32 %v15966_v52, %v6253_v22  ;;  %v7469_v39 = vsel %vm16339_vm12, %v15988_v44, %v7465_v54  ;;  %8173 = vmatmul.bf16.gmra.mxu3 %v7776_v2  ;;  %v17232_v56 = vld [vmem:[#allocation52_spill] sm:$0xff] }
 0xb66   : > { %v7524_v53 = vmul.f32 %v16021_v40, %v17222_v41  ;;  %v7484_v57 = vsel %vm16352_vm14, %v15998_v16, %v7480_v60  ;;  %v7613_v55 = vsub.f32 1.0, %v7612_v50  ;;  %v7570_v8 = vadd.f32 %v16066_v58, %v7569_v10  ;;  %v6304_v59 = vpop.f32.mrf.mxu2  ;;  %v17233_v54 = vld [vmem:[#allocation76_spill] sm:$0xff] }
 0xb67   : > { %vm7572_vm15 = vweird.f32 %v16066_v58  ;;  %v7582_v1 = vmul.f32 %v16119_v38, %v16029_v33  ;;  %v7597_v52 = vmul.f32 %v16148_v27, %v16033_v25  ;;  %v7778_v22 = vpack.c.bf16 %v7742_v7, %v7738_v46  ;;  %v6353_v44 = vpop.f32.mrf.mxu3  ;;  %v17241_v46 = vld [vmem:[#allocation63_spill] sm:$0xff] }
 0xb68   : > { %vm7471_vm0 = vcmp.eq.f32.partialorder %v7470_v13, 8.507059e+37  ;;  %v7488_v26 = vor.u32 1.1754944e-38, %v7487_v49  ;;  %v7577_v16 = vand.u32 2147483648, %v15994_v21  ;;  %vm7486_vm4 = vcmp.eq.f32.partialorder %v7485_v61, 8.507059e+37  ;;  %v6258_v32 = vpop.f32.mrf.mxu1 }
 0xb69   : > { %8124 = vmatmul.bf16.gmra.mxu2 %v7775_v42  ;;  %v7474_v11 = vsel %vm7471_vm0, %v7473_v17, %v7469_v39  ;;  %vm7571_vm5 = vweird.f32 %v15994_v21  ;;  %v7575_v51 = vand.u32 2147483647, %v15994_v21  ;;  %v7519_v28 = vsel %vm16321_vm1, %v17228_v12, %v7514_v6 }
 0xb6a   : > { %v7745_v48 = vmul.f32 %v7681_v45, %v6402_v30  ;;  %v7489_v37 = vsel %vm7486_vm4, %v7488_v26, %v7484_v57  ;;  %vm16386_vm7 = vmor %vm7571_vm5, %vm7572_vm15  ;;  %v7614_v47 = vmul.f32 %v16079_v15, %v7613_v55  ;;  %v7559_v21 = vsel %vm16375_vm3, %v15963_v62, %v16276_v0  ;;  %8080 = vmatmul.bf16.gmra.mxu1 %v7778_v22  ;;  %v17234_v62 = vld [vmem:[#allocation81_spill] sm:$0xff] }
 0xb6b   : > { %v7574_v6 = vsel %vm16386_vm7, %v16066_v58, %v7570_v8  ;;  %v7583_v23 = vsub.f32 1.0, %v7582_v1  ;;  %v7598_v3 = vsub.f32 1.0, %v7597_v52  ;;  %vm7527_vm6 = vweird.f32 %v16021_v40  ;;  %v16407_v58 = vpop.f32.mrf.mxu0  ;;  %v17246_v52 = vld [vmem:[#allocation88_spill] sm:$0xff] }
 0xb6c   : > { %v7539_v34 = vmul.f32 %v17231_v18, %v7538_v9  ;;  %v7741_v19 = vmul.f32 %v17232_v56, %v16271_v35  ;;  %v7679_v60 = vmul.f32 %v7474_v11, %v17233_v54  ;;  %v7578_v50 = vor.u32 1.1754944e-38, %v7577_v16  ;;  %v17238_v35 = vld [vmem:[#allocation53_spill] sm:$0xff] }
 0xb6d   : > { %vm7542_vm8 = vweird.f32 %v17231_v18  ;;  %v7680_v0 = vmul.f32 %v7489_v37, %v17234_v62  ;;  %vm7576_vm9 = vcmp.eq.f32.partialorder %v7575_v51, 8.507059e+37  ;;  %v7620_v42 = vand.u32 2147483647, %v15996_v14  ;;  %v17266_v51 = vld [vmem:[#allocation36_spill] sm:$0xff] }
 0xb6e   : > { %v7622_v29 = vand.u32 2147483648, %v15996_v14  ;;  %v17235_v9 = vand.u32 2147483647, %v15861_v63  ;;  %vm7526_vm1 = vweird.f32 %v17238_v35  ;;  %v7781_v30 = vpack.c.bf16 %v7745_v48, %v7741_v19  ;;  %v16430_v57 = vpop.f32.mrf.mxu2 }
 0xb6f   : > { %v7579_v10 = vsel %vm7576_vm9, %v7578_v50, %v7574_v6  ;;  %v7615_v7 = vadd.f32 %v16079_v15, %v7614_v47  ;;  %vm7617_vm2 = vweird.f32 %v16079_v15  ;;  %v7743_v4 = vmul.f32 %v7679_v60, %v6304_v59  ;;  %v6356_v1 = vpop.f32.mrf.mxu3  ;;  %vm16477_vm9 = vmor %vm7526_vm1, %vm7527_vm6  ;;  %v17259_v50 = vld [vmem:[#allocation89_spill] sm:$0xff] }
 0xb70   : > { %vm16413_vm10 = vcmp.eq.f32.partialorder %v17235_v9, 8.507059e+37  ;;  %v7744_v13 = vmul.f32 %v7680_v0, %v6353_v44  ;;  %v7584_v49 = vmul.f32 %v16119_v38, %v7583_v23  ;;  %v7599_v41 = vmul.f32 %v16148_v27, %v7598_v3  ;;  %v17253_v3 = vld [vmem:[#allocation60_spill] sm:$0xff] }
 0xb71   : > { %v7682_v63 = vmul.f32 %v7519_v28, %v17239_v5  ;;  %v7525_v45 = vadd.f32 %v16021_v40, %v7524_v53  ;;  %v7540_v17 = vadd.f32 %v17231_v18, %v7539_v34  ;;  %vm7616_vm11 = vweird.f32 %v15996_v14  ;;  %v6260_v14 = vpop.f32.mrf.mxu1  ;;  %v17262_v5 = vld [vmem:[#allocation92_spill] sm:$0xff] }
 0xb72   : > { %v7739_v61 = vmul.f32 %v17240_v31, %v16313_v20  ;;  %v7740_v39 = vmul.f32 %v17241_v46, %v16315_v24  ;;  %vm16432_vm12 = vmor %vm7616_vm11, %vm7617_vm2  ;;  %vm16436_vm13 = vcmp.eq.f32.partialorder %v7620_v42, 8.507059e+37  ;;  %v7623_v53 = vor.u32 1.1754944e-38, %v7622_v29  ;;  %8227 = vmatmul.bf16.gmra.mxu0 %v7781_v30  ;;  %v17264_v31 = vld [vmem:[#allocation86_spill] sm:$0xff]  ;;  %v17265_v46 = vld [vmem:[#allocation87_spill] sm:$0xff] }
 0xb73   : > { %v7686_v22 = vmul.f32 %v7579_v10, %v17246_v52  ;;  %v7619_v20 = vsel %vm16432_vm12, %v16079_v15, %v7615_v7  ;;  %vm7587_vm14 = vweird.f32 %v16119_v38  ;;  %vm7602_vm15 = vweird.f32 %v16148_v27  ;;  %v6407_v56 = vpop.f32.mrf.mxu0 }
 0xb74   : > { %v7779_v24 = vpack.c.bf16 %v7743_v4, %v7739_v61  ;;  %v7780_v59 = vpack.c.bf16 %v7744_v13, %v7740_v39  ;;  %v7585_v44 = vadd.f32 %v16119_v38, %v7584_v49  ;;  %v7600_v26 = vadd.f32 %v16148_v27, %v7599_v41 }
 0xb75   : > { %v7750_v16 = vmul.f32 %v7686_v22, %v6260_v14  ;;  %vm7586_vm0 = vweird.f32 %v16029_v33  ;;  %v7592_v36 = vand.u32 2147483648, %v16029_v33  ;;  %v7607_v11 = vand.u32 2147483648, %v16033_v25 }
 0xb76   : > { %v7624_v15 = vsel %vm16436_vm13, %v7623_v53, %v7619_v20  ;;  %vm16453_vm3 = vmor %vm7586_vm0, %vm7587_vm14  ;;  %v7590_v12 = vand.u32 2147483647, %v16029_v33  ;;  %vm7601_vm4 = vweird.f32 %v16033_v25  ;;  %v7605_v28 = vand.u32 2147483647, %v16033_v25  ;;  %8178 = vmatmul.bf16.gmra.mxu3 %v7780_v59 }
 0xb77   : > { %v17249_v48 = vand.u32 2147483648, %v17238_v35  ;;  %vm7541_vm5 = vweird.f32 %v17250_v43  ;;  %v7545_v47 = vand.u32 2147483647, %v17250_v43  ;;  %v7746_v6 = vmul.f32 %v7682_v63, %v6258_v32  ;;  %vm16466_vm7 = vmor %vm7601_vm4, %vm7602_vm15  ;;  %v6358_v41 = vpop.f32.mrf.mxu3  ;;  %v17263_v63 = vld [vmem:[#allocation93_spill] sm:$0xff] }
 0xb78   : > { %v7564_v33 = vsel %vm16413_vm10, %v17253_v3, %v7559_v21  ;;  %v17256_v32 = vand.u32 2147483648, %v17250_v43  ;;  %v7589_v19 = vsel %vm16453_vm3, %v16119_v38, %v7585_v44  ;;  %v7604_v21 = vsel %vm16466_vm7, %v16148_v27, %v7600_v26  ;;  %vm16491_vm6 = vmor %vm7541_vm5, %vm7542_vm8  ;;  %v17260_v27 = vld [vmem:[#allocation83_spill] sm:$0xff] }
 0xb79   : > { %v7533_v37 = vor.u32 1.1754944e-38, %v17249_v48  ;;  %8129 = vmatmul.bf16.gmra.mxu2 %v7779_v24  ;;  %v7782_v60 = vpack.c.bf16 %v7750_v16, %v7746_v6  ;;  %v7689_v62 = vmul.f32 %v7624_v15, %v17259_v50  ;;  %v7593_v0 = vor.u32 1.1754944e-38, %v7592_v36  ;;  %v17267_v6 = vld [vmem:[#allocation77_spill] sm:$0xff] }
 0xb7a   : > { %v7548_v34 = vor.u32 1.1754944e-38, %v17256_v32  ;;  %v7608_v42 = vor.u32 1.1754944e-38, %v7607_v11  ;;  %v7529_v29 = vsel %vm16477_vm9, %v16021_v40, %v7525_v45  ;;  %v7544_v38 = vsel %vm16491_vm6, %v17231_v18, %v7540_v17  ;;  %v6309_v40 = vpop.f32.mrf.mxu2 }
 0xb7b   : > { %vm7591_vm10 = vcmp.eq.f32.partialorder %v7590_v12, 8.507059e+37  ;;  %vm7606_vm1 = vcmp.eq.f32.partialorder %v7605_v28, 8.507059e+37  ;;  %v7685_v9 = vmul.f32 %v7564_v33, %v17260_v27  ;;  %v7753_v2 = vmul.f32 %v7689_v62, %v6407_v56  ;;  %8085 = vmatmul.bf16.gmra.mxu1 %v7782_v60  ;;  %v17269_v27 = vld [vmem:[#allocation70_spill] sm:$0xff] }
 0xb7c   : > { %v7594_v30 = vsel %vm7591_vm10, %v7593_v0, %v7589_v19  ;;  %v7609_v10 = vsel %vm7606_vm1, %v7608_v42, %v7604_v21  ;;  %v17261_v7 = vand.u32 2147483647, %v17238_v35  ;;  %vm7546_vm2 = vcmp.eq.f32.partialorder %v7545_v47, 8.507059e+37  ;;  %v17268_v21 = vld [vmem:[#allocation34_spill] sm:$0xff] }
 0xb7d   : > { %v7549_v13 = vsel %vm7546_vm2, %v7548_v34, %v7544_v38  ;;  %v7749_v49 = vmul.f32 %v7685_v9, %v16407_v58  ;;  %v7687_v18 = vmul.f32 %v7594_v30, %v17262_v5  ;;  %v7688_v45 = vmul.f32 %v7609_v10, %v17263_v63 }
 0xb7e   : > { %vm7531_vm8 = vcmp.eq.f32.partialorder %v17261_v7, 8.507059e+37  ;;  %v7684_v39 = vmul.f32 %v7549_v13, %v17265_v46  ;;  %v17271_v46 = vld [vmem:[#allocation61_spill] sm:$0xff] }
 0xb7f   : > { %v7534_v4 = vsel %vm7531_vm8, %v7533_v37, %v7529_v29  ;;  %v7785_v17 = vpack.c.bf16 %v7753_v2, %v7749_v49  ;;  %v7751_v55 = vmul.f32 %v7687_v18, %v6309_v40  ;;  %v7752_v35 = vmul.f32 %v7688_v45, %v6358_v41  ;;  %v17270_v40 = vld [vmem:[#allocation56_spill] sm:$0xff] }
 0xb80   : > { %v7683_v61 = vmul.f32 %v7534_v4, %v17264_v31  ;;  %v7748_v53 = vmul.f32 %v7684_v39, %v6356_v1 }
 0xb82   : > { %v7747_v8 = vmul.f32 %v7683_v61, %v16430_v57  ;;  %8232 = vmatmul.bf16.gmra.mxu0 %v7785_v17  ;;  %v7784_v58 = vpack.c.bf16 %v7752_v35, %v7748_v53 }
 0xb84   : > { %v7783_v14 = vpack.c.bf16 %v7751_v55, %v7747_v8  ;;  %v8051_v52 = vpop.f32.mrf.mxu1 }
 0xb86   : > { %8183 = vmatmul.bf16.gmra.mxu3 %v7784_v58 }
 0xb89   : > { %8134 = vmatmul.bf16.gmra.mxu2 %v7783_v14 }
 0xb8c   : > { %v8053_v20 = vpop.f32.mrf.mxu1 }
 0xb8d   : > { %v8198_v22 = vpop.f32.mrf.mxu0 }
 0xb95   : > { %v8200_v24 = vpop.f32.mrf.mxu0 }
 0xb96   : > { %v8056_v59 = vpop.f32.mrf.mxu1 }
 0xb98   : > { %v8100_v44 = vpop.f32.mrf.mxu2  ;;  %v8149_v26 = vpop.f32.mrf.mxu3 }
 0xb99   : > { %v8101_v16 = vadd.f32 %v8100_v44, %v8051_v52 }
 0xb9b   : > { %v8150_v36 = vadd.f32 %v8149_v26, %v8101_v16 }
 0xb9d   : > { %v8199_v11 = vadd.f32 %v8198_v22, %v8150_v36  ;;  %v8203_v15 = vpop.f32.mrf.mxu0  ;;  %v17272_v22 = vld [vmem:[#allocation47_spill] sm:$0xff] }
 0xb9e   : > { %v8058_v57 = vpop.f32.mrf.mxu1 }
 0xb9f   : > { %v8238_v12 = vadd.f32 %v8199_v11, %v17266_v51  ;;  %v17273_v11 = vld [vmem:[#allocation74_spill] sm:$0xff] }
 0xba0   : > { %v8102_v1 = vpop.f32.mrf.mxu2  ;;  %v8151_v28 = vpop.f32.mrf.mxu3 }
 0xba1   : > { %8254 = vst [vmem:[#allocation11] sm:$0xff] %v8238_v12  ;;  %v8103_v48 = vadd.f32 %v8102_v1, %v8053_v20 }
 0xba3   : > { %v8152_v37 = vadd.f32 %v8151_v28, %v8103_v48 }
 0xba5   : > { %v8201_v43 = vadd.f32 %v8200_v24, %v8152_v37  ;;  %v8205_v47 = vpop.f32.mrf.mxu0 }
 0xba7   : > { %v8239_v23 = vadd.f32 %v8201_v43, %v17267_v6  ;;  %v8061_v3 = vpop.f32.mrf.mxu1  ;;  %v17274_v43 = vld [vmem:[#allocation25_spill] sm:$0xff] }
 0xba8   : > { %v8154_v25 = vpop.f32.mrf.mxu3 }
 0xba9   : > { %8255 = vst [vmem:[#allocation11 + $0x8] sm:$0xff] %v8239_v23 }
 0xbac   : > { %v8105_v33 = vpop.f32.mrf.mxu2 }
 0xbad   : > { %v8106_v32 = vadd.f32 %v8105_v33, %v8056_v59  ;;  %v8208_v19 = vpop.f32.mrf.mxu0 }
 0xbaf   : > { %v8155_v34 = vadd.f32 %v8154_v25, %v8106_v32  ;;  %v8063_v60 = vpop.f32.mrf.mxu1 }
 0xbb0   : > { %v8156_v62 = vpop.f32.mrf.mxu3 }
 0xbb1   : > { %v8204_v56 = vadd.f32 %v8203_v15, %v8155_v34  ;;  %v17275_v34 = vld [vmem:[#allocation31_spill] sm:$0xff] }
 0xbb3   : > { %v8240_v54 = vadd.f32 %v8204_v56, %v17268_v21 }
 0xbb4   : > { %v8107_v50 = vpop.f32.mrf.mxu2 }
 0xbb5   : > { %8256 = vst [vmem:[#allocation11 + $0x10] sm:$0xff] %v8240_v54  ;;  %v8108_v0 = vadd.f32 %v8107_v50, %v8058_v57  ;;  %v8210_v38 = vpop.f32.mrf.mxu0 }
 0xbb7   : > { %v8157_v42 = vadd.f32 %v8156_v62, %v8108_v0  ;;  %v8066_v2 = vpop.f32.mrf.mxu1 }
 0xbb8   : > { %v8159_v10 = vpop.f32.mrf.mxu3 }
 0xbb9   : > { %v8206_v29 = vadd.f32 %v8205_v47, %v8157_v42  ;;  %v17276_v42 = vld [vmem:[#allocation42_spill] sm:$0xff] }
 0xbbb   : > { %v8241_v9 = vadd.f32 %v8206_v29, %v17269_v27 }
 0xbbc   : > { %v8110_v30 = vpop.f32.mrf.mxu2 }
 0xbbd   : > { %8257 = vst [vmem:[#allocation11 + $0x18] sm:$0xff] %v8241_v9  ;;  %v8111_v7 = vadd.f32 %v8110_v30, %v8061_v3 }
 0xbbf   : > { %v8160_v4 = vadd.f32 %v8159_v10, %v8111_v7  ;;  %v8213_v49 = vpop.f32.mrf.mxu0  ;;  %v8068_v5 = vpop.f32.mrf.mxu1 }
 0xbc0   : > { %v8161_v63 = vpop.f32.mrf.mxu3 }
 0xbc1   : > { %v8209_v13 = vadd.f32 %v8208_v19, %v8160_v4  ;;  %v17277_v4 = vld [vmem:[#allocation49_spill] sm:$0xff] }
 0xbc3   : > { %v8242_v41 = vadd.f32 %v8209_v13, %v17270_v40 }
 0xbc4   : > { %v8112_v18 = vpop.f32.mrf.mxu2 }
 0xbc5   : > { %8258 = vst [vmem:[#allocation11 + $0x20] sm:$0xff] %v8242_v41  ;;  %v8113_v45 = vadd.f32 %v8112_v18, %v8063_v60 }
 0xbc7   : > { %v8162_v17 = vadd.f32 %v8161_v63, %v8113_v45  ;;  %v8215_v61 = vpop.f32.mrf.mxu0  ;;  %v8071_v53 = vpop.f32.mrf.mxu1 }
 0xbc8   : > { %v8164_v35 = vpop.f32.mrf.mxu3 }
 0xbc9   : > { %v8211_v31 = vadd.f32 %v8210_v38, %v8162_v17  ;;  %v17278_v17 = vld [vmem:[#allocation26_spill] sm:$0xff] }
 0xbcb   : > { %v8243_v39 = vadd.f32 %v8211_v31, %v17271_v46 }
 0xbcc   : > { %v8115_v55 = vpop.f32.mrf.mxu2 }
 0xbcd   : > { %8259 = vst [vmem:[#allocation11 + $0x28] sm:$0xff] %v8243_v39  ;;  %v8116_v8 = vadd.f32 %v8115_v55, %v8066_v2 }
 0xbcf   : > { %v8165_v14 = vadd.f32 %v8164_v35, %v8116_v8  ;;  %v8218_v52 = vpop.f32.mrf.mxu0  ;;  %v8073_v16 = vpop.f32.mrf.mxu1 }
 0xbd0   : > { %v8166_v59 = vpop.f32.mrf.mxu3 }
 0xbd1   : > { %v8214_v58 = vadd.f32 %v8213_v49, %v8165_v14 }
 0xbd3   : > { %v8244_v20 = vadd.f32 %v8214_v58, %v17272_v22 }
 0xbd4   : > { %v8117_v24 = vpop.f32.mrf.mxu2 }
 0xbd5   : > { %8260 = vst [vmem:[#allocation11 + $0x30] sm:$0xff] %v8244_v20  ;;  %v8118_v44 = vadd.f32 %v8117_v24, %v8068_v5 }
 0xbd7   : > { %v8167_v26 = vadd.f32 %v8166_v59, %v8118_v44  ;;  %v8220_v51 = vpop.f32.mrf.mxu0  ;;  %v8076_v37 = vpop.f32.mrf.mxu1  ;;  %v17280_v44 = vld [vmem:[#allocation39_spill] sm:$0xff] }
 0xbd8   : > { %v8169_v57 = vpop.f32.mrf.mxu3 }
 0xbd9   : > { %v8216_v36 = vadd.f32 %v8215_v61, %v8167_v26 }
 0xbdb   : > { %v8245_v15 = vadd.f32 %v8216_v36, %v17273_v11 }
 0xbdc   : > { %v8120_v12 = vpop.f32.mrf.mxu2 }
 0xbdd   : > { %8261 = vst [vmem:[#allocation11 + $0x38] sm:$0xff] %v8245_v15  ;;  %v8121_v1 = vadd.f32 %v8120_v12, %v8071_v53  ;;  %v17279_v53 = vld [vmem:[#allocation43_spill] sm:$0xff] }
 0xbdf   : > { %v8170_v28 = vadd.f32 %v8169_v57, %v8121_v1  ;;  %v8223_v3 = vpop.f32.mrf.mxu0  ;;  %v8078_v19 = vpop.f32.mrf.mxu1  ;;  %v17282_v1 = vld [vmem:[#allocation33_spill] sm:$0xff] }
 0xbe0   : > { %v8171_v23 = vpop.f32.mrf.mxu3 }
 0xbe1   : > { %v8219_v48 = vadd.f32 %v8218_v52, %v8170_v28 }
 0xbe3   : > { %v8246_v47 = vadd.f32 %v8219_v48, %v17274_v43 }
 0xbe4   : > { %v8122_v6 = vpop.f32.mrf.mxu2 }
 0xbe5   : > { %8262 = vst [vmem:[#allocation11 + $0x40] sm:$0xff] %v8246_v47  ;;  %v8123_v33 = vadd.f32 %v8122_v6, %v8073_v16 }
 0xbe7   : > { %v8172_v25 = vadd.f32 %v8171_v23, %v8123_v33  ;;  %v8225_v50 = vpop.f32.mrf.mxu0  ;;  %v8081_v2 = vpop.f32.mrf.mxu1 }
 0xbe8   : > { %v8174_v54 = vpop.f32.mrf.mxu3 }
 0xbe9   : > { %v8221_v32 = vadd.f32 %v8220_v51, %v8172_v25 }
 0xbeb   : > { %v8247_v56 = vadd.f32 %v8221_v32, %v17275_v34 }
 0xbec   : > { %v8125_v21 = vpop.f32.mrf.mxu2 }
 0xbed   : > { %8263 = vst [vmem:[#allocation11 + $0x48] sm:$0xff] %v8247_v56  ;;  %v8126_v60 = vadd.f32 %v8125_v21, %v8076_v37 }
 0xbef   : > { %v8175_v62 = vadd.f32 %v8174_v54, %v8126_v60  ;;  %v8228_v10 = vpop.f32.mrf.mxu0  ;;  %v8083_v18 = vpop.f32.mrf.mxu1 }
 0xbf0   : > { %v8176_v27 = vpop.f32.mrf.mxu3 }
 0xbf1   : > { %v8224_v0 = vadd.f32 %v8223_v3, %v8175_v62 }
 0xbf3   : > { %v8248_v29 = vadd.f32 %v8224_v0, %v17276_v42 }
 0xbf4   : > { %v8127_v38 = vpop.f32.mrf.mxu2 }
 0xbf5   : > { %8264 = vst [vmem:[#allocation11 + $0x50] sm:$0xff] %v8248_v29  ;;  %v8128_v9 = vadd.f32 %v8127_v38, %v8078_v19 }
 0xbf7   : > { %v8177_v30 = vadd.f32 %v8176_v27, %v8128_v9  ;;  %v8230_v45 = vpop.f32.mrf.mxu0 }
 0xbf8   : > { %v8086_v8 = vpop.f32.mrf.mxu1 }
 0xbf9   : > { %v8226_v7 = vadd.f32 %v8225_v50, %v8177_v30  ;;  %v8179_v40 = vpop.f32.mrf.mxu3 }
 0xbfb   : > { %v8249_v13 = vadd.f32 %v8226_v7, %v17277_v4 }
 0xbfc   : > { %v8130_v49 = vpop.f32.mrf.mxu2 }
 0xbfd   : > { %8265 = vst [vmem:[#allocation11 + $0x58] sm:$0xff] %v8249_v13  ;;  %v8131_v41 = vadd.f32 %v8130_v49, %v8081_v2 }
 0xbff   : > { %v8180_v5 = vadd.f32 %v8179_v40, %v8131_v41  ;;  %v8233_v20 = vpop.f32.mrf.mxu0 }
 0xc00   : > { %v8088_v16 = vpop.f32.mrf.mxu1 }
 0xc01   : > { %v8229_v63 = vadd.f32 %v8228_v10, %v8180_v5  ;;  %v8181_v46 = vpop.f32.mrf.mxu3 }
 0xc03   : > { %v8250_v31 = vadd.f32 %v8229_v63, %v17278_v17 }
 0xc04   : > { %v8132_v61 = vpop.f32.mrf.mxu2 }
 0xc05   : > { %8266 = vst [vmem:[#allocation11 + $0x60] sm:$0xff] %v8250_v31  ;;  %v8133_v39 = vadd.f32 %v8132_v61, %v8083_v18 }
 0xc07   : > { %v8182_v55 = vadd.f32 %v8181_v46, %v8133_v39  ;;  %v8235_v12 = vpop.f32.mrf.mxu0 }
 0xc09   : > { %v8231_v35 = vadd.f32 %v8230_v45, %v8182_v55  ;;  %v8184_v52 = vpop.f32.mrf.mxu3 }
 0xc0b   : > { %v8251_v14 = vadd.f32 %v8231_v35, %v17279_v53 }
 0xc0c   : > { %v8135_v58 = vpop.f32.mrf.mxu2 }
 0xc0d   : > { %8267 = vst [vmem:[#allocation11 + $0x68] sm:$0xff] %v8251_v14  ;;  %v8136_v22 = vadd.f32 %v8135_v58, %v8086_v8 }
 0xc0f   : > { %v8185_v24 = vadd.f32 %v8184_v52, %v8136_v22 }
 0xc11   : > { %v8234_v59 = vadd.f32 %v8233_v20, %v8185_v24  ;;  %v8186_v15 = vpop.f32.mrf.mxu3 }
 0xc13   : > { %v8252_v26 = vadd.f32 %v8234_v59, %v17280_v44 }
 0xc14   : > { %v8137_v36 = vpop.f32.mrf.mxu2 }
 0xc15   : > { %8268 = vst [vmem:[#allocation11 + $0x70] sm:$0xff] %v8252_v26  ;;  %v8138_v11 = vadd.f32 %v8137_v36, %v8088_v16 }
 0xc17   : > { %v8187_v51 = vadd.f32 %v8186_v15, %v8138_v11 }
 0xc19   : > { %v8236_v57 = vadd.f32 %v8235_v12, %v8187_v51 }
 0xc1b   : > { %v8253_v28 = vadd.f32 %v8236_v57, %v17282_v1 }
 0xc1d   : > { %8269 = vst [vmem:[#allocation11 + $0x78] sm:$0xff] %v8253_v28 }
 0xc1e   : > { %9381 = dma.vmem_to_hbm [thread:$0]  (%p9395_p10), %s8276_s16, 2048, %s8278_s11, [#allocation7], %s10269_s17, %s10269_s17, %s10270_s18  }
 0xc1f   : > { %10233 = dma.done.wait (%p9395_p10), [#allocation7], 2048  }
 0xc20   : > { %10235 = vsyncadd (%p9395_p10), [#allocation7], 4294965248 }
 0xc21 PF: > { %s17283_s28 = sld [smem:[#allocation16_spill]]  ;;  %s17286_s25 = smov %s10242_s26 }
 0xc22   : > { %s17284_s22 = sld [smem:[#allocation15_spill]] }
 0xc23   : > { %s17285_s27 = sld [smem:[#allocation17_spill]] }
 0xc27   : > { %p27_p5 = scmp.ge.s32.totalorder %s17283_s28, 6  }
 0xc28   : > { %s17287_s26 = smov %s17284_s22 }
 0xc29   :  { %29 = sbr.rel (!%p27_p5) target bundleno = 13 (0xd), region = 146 }
 0xc2e   :  { %8294 = vsyncpa [#allocation6], 1 }
 0xc2f   :  { %8296 = vsyncpa [#allocation6 + $0x1], 1 }
 0xc30   :  { %8297 = vsyncpa [#allocation9], 1 }
 0xc31   :  { %8299 = vsyncpa [#allocation9 + $0x1], 1 }
 0xc32   :  { %8300 = vsyncpa [#allocation7], 1 }
 0xc33   :  { %8302 = vsyncpa [#allocation7 + $0x1], 1 }

</bundles_post_ra>
